<compile_context>
chip_gen: v7x
topology: tpu7x:2x2x1
jax: 0.10.0
libtpu: 0.0.40
codegen_flags: <defaults>
</compile_context>

<pallas_src>
import functools

import jax
import jax.numpy as jnp
from jax.experimental import pallas as pl
from jax.experimental.pallas import tpu as pltpu

NUM_CLASSES = 31
PADDED_OUT = 128  # pad final feature dim 31 -> 128 for a lane-dense output slab
IN_FEATURES = 1024


def _round_up(n, m):
    return ((n + m - 1) // m) * m


def _mlp_kernel(x_ref,
                w1_ref, b1_ref,
                w2_ref, b2_ref,
                w3_ref, b3_ref,
                w4_ref, b4_ref,
                w5_ref, b5_ref,
                o_ref):
    # x arrives as f32 (single HBM read of the original input); cast to bf16 on the
    # VPU here -- this is hidden under the MXU work and halves x-side HBM traffic
    # vs. a wrapper-side astype.
    x = x_ref[...].astype(jnp.bfloat16)

    # fc1 -> relu -> (dropout: identity in eval)
    h = jnp.dot(x, w1_ref[...], preferred_element_type=jnp.float32)
    h = jnp.maximum(h + b1_ref[...], 0.0).astype(jnp.bfloat16)
    # fc2 -> relu
    h = jnp.dot(h, w2_ref[...], preferred_element_type=jnp.float32)
    h = jnp.maximum(h + b2_ref[...], 0.0).astype(jnp.bfloat16)
    # fc3 -> relu
    h = jnp.dot(h, w3_ref[...], preferred_element_type=jnp.float32)
    h = jnp.maximum(h + b3_ref[...], 0.0).astype(jnp.bfloat16)
    # fc4 -> relu
    h = jnp.dot(h, w4_ref[...], preferred_element_type=jnp.float32)
    h = jnp.maximum(h + b4_ref[...], 0.0).astype(jnp.bfloat16)
    # fc5 (no activation), f32 logits
    o = jnp.dot(h, w5_ref[...], preferred_element_type=jnp.float32) + b5_ref[...]
    o_ref[...] = o.astype(o_ref.dtype)


def _resident_spec(shape):
    # Whole-array block with a constant block index -> stays VMEM-resident across
    # the batch grid (the pipeline elides the re-fetch for constant indices).
    return pl.BlockSpec(shape, lambda i: (0,) * len(shape))


def _choose_tm(batch, block_m):
    """MXU-aligned batch tile: never below 128 rows; prefer a 256-row granule
    (v6e/v7x 256x256 MXU) once the batch exceeds one 128-row tile."""
    block_m = max(128, _round_up(block_m, 128))
    granule = 256 if (batch > 128 and block_m % 256 == 0) else 128
    return min(block_m, _round_up(batch, granule))


@functools.partial(jax.jit, static_argnames=("block_m",))
def custom_layers_forward(x, params, *, block_m=512):
    """x: (B, 1024) float32.  params: dict of transposed bf16 weights / f32 biases.

    block_m: upper bound on the batch tile (rounded to >=128 and a 128 multiple).
    Use block_m<=512 on v7x; 1024 is fine on v5e/v6e (128 MiB VMEM).
    """
    B, F = x.shape
    assert F == IN_FEATURES, F

    w1, b1 = params["w1"], params["b1"]
    w2, b2 = params["w2"], params["b2"]
    w3, b3 = params["w3"], params["b3"]
    w4, b4 = params["w4"], params["b4"]
    w5, b5 = params["w5"], params["b5"]  # already zero-padded to PADDED_OUT cols

    tm = _choose_tm(B, block_m)
    b_pad = _round_up(B, tm)
    if b_pad != B:
        # Row padding only (stays f32; no dtype round trip through HBM).  At small
        # batch the kernel is weight-DMA-bound, so the padded rows are free.
        x = jnp.pad(x, ((0, b_pad - B), (0, 0)))

    grid_n = b_pad // tm

    # Megacore split only pays off once there are enough batch tiles to amortize
    # each TensorCore's private copy of the ~3.4 MiB resident weights (v7x).
    dim_sem = ("parallel",) if grid_n >= 4 else ("arbitrary",)

    # 32 MiB fits every generation (v7x has 64 MiB/TC physical).  Only raise the
    # scoped limit for the large-tile v5e/v6e configuration.
    vmem_limit = (64 << 20) if tm > 512 else (32 << 20)

    out_padded = pl.pallas_call(
        _mlp_kernel,
        out_shape=jax.ShapeDtypeStruct((b_pad, PADDED_OUT), jnp.float32),
        grid=(grid_n,),
        in_specs=[
            pl.BlockSpec((tm, IN_FEATURES), lambda i: (i, 0)),
            _resident_spec(w1.shape), _resident_spec(b1.shape),
            _resident_spec(w2.shape), _resident_spec(b2.shape),
            _resident_spec(w3.shape), _resident_spec(b3.shape),
            _resident_spec(w4.shape), _resident_spec(b4.shape),
            _resident_spec(w5.shape), _resident_spec(b5.shape),
        ],
        out_specs=pl.BlockSpec((tm, PADDED_OUT), lambda i: (i, 0)),
        compiler_params=pltpu.CompilerParams(
            dimension_semantics=dim_sem,
            vmem_limit_bytes=vmem_limit,
        ),
    )(x, w1, b1, w2, b2, w3, b3, w4, b4, w5, b5)

    # Slice padded rows / padded logits back (glue, not hot path).
    return out_padded[:B, :NUM_CLASSES]


def init_params(key):
    """Deterministic init matching PyTorch nn.Linear default
    (uniform(-1/sqrt(fan_in), 1/sqrt(fan_in))).  Weights stored transposed
    (in, out) in bfloat16; biases (1, out) in float32."""
    dims = [(1024, 1024), (1024, 512), (512, 256), (256, 128), (128, NUM_CLASSES)]
    params = {}
    for idx, (fan_in, fan_out) in enumerate(dims, start=1):
        key, kw, kb = jax.random.split(key, 3)
        bound = 1.0 / jnp.sqrt(jnp.float32(fan_in))
        w = jax.random.uniform(kw, (fan_in, fan_out), jnp.float32, -bound, bound)
        b = jax.random.uniform(kb, (1, fan_out), jnp.float32, -bound, bound)
        if idx == 5:
            # zero-pad last layer to a lane-dense width; padded columns produce
            # zero logits that are sliced off in the wrapper.
            w = jnp.pad(w, ((0, 0), (0, PADDED_OUT - fan_out)))
            b = jnp.pad(b, ((0, 0), (0, PADDED_OUT - fan_out)))
        params[f"w{idx}"] = w.astype(jnp.bfloat16)
        params[f"b{idx}"] = b  # f32 bias, added after f32 accumulation
    return params


def _reference_forward(x, params):
    """Pure-JAX reference with the same dtype flow (bf16 operands, f32 accumulation).
    NOTE: bf16 weights mean results agree with the f32 PyTorch module only to ~1e-2."""
    h = x.astype(jnp.bfloat16)
    for i in range(1, 5):
        h = jnp.dot(h, params[f"w{i}"], preferred_element_type=jnp.float32)
        h = jnp.maximum(h + params[f"b{i}"], 0.0).astype(jnp.bfloat16)
    out = jnp.dot(h, params["w5"], preferred_element_type=jnp.float32) + params["b5"]
    return out[:, :NUM_CLASSES]


if __name__ == "__main__":
    key = jax.random.PRNGKey(0)
    key, kx = jax.random.split(key)

    B = 16  # small batch; wrapper pads to a single 128-row MXU tile (grid=1)
    x = jax.random.normal(kx, (B, IN_FEATURES), jnp.float32)

    params = init_params(key)

    out = custom_layers_forward(x, params)
    out = jax.block_until_ready(out)
    assert out.shape == (B, NUM_CLASSES), out.shape

    ref = _reference_forward(x, params)
    max_err = float(jnp.max(jnp.abs(out - ref)))
    assert jnp.allclose(out, ref, atol=1e-2, rtol=1e-2), max_err

    print("KERNEL_OK")
</pallas_src>

<mosaic_0001>
module attributes {stable_mosaic.version = 11 : i64} {
  func.func @_mlp_kernel(%arg0: i32, %arg1: memref<128x1024xf32, #tpu.memory_space<vmem>>, %arg2: memref<1024x1024xbf16, #tpu.memory_space<vmem>>, %arg3: memref<1x1024xf32, #tpu.memory_space<vmem>>, %arg4: memref<1024x512xbf16, #tpu.memory_space<vmem>>, %arg5: memref<1x512xf32, #tpu.memory_space<vmem>>, %arg6: memref<512x256xbf16, #tpu.memory_space<vmem>>, %arg7: memref<1x256xf32, #tpu.memory_space<vmem>>, %arg8: memref<256x128xbf16, #tpu.memory_space<vmem>>, %arg9: memref<1x128xf32, #tpu.memory_space<vmem>>, %arg10: memref<128x128xbf16, #tpu.memory_space<vmem>>, %arg11: memref<1x128xf32, #tpu.memory_space<vmem>>, %arg12: memref<128x128xf32, #tpu.memory_space<vmem>>) attributes {dimension_semantics = [#tpu.dimension_semantics<arbitrary>], iteration_bounds = array<i64: 1>, scalar_prefetch = 0 : i64, scratch_operands = 0 : i64, tpu.core_type = #tpu.core_type<tc>, window_params = [{transform_indices = @transform_0, window_bounds = array<i64: 128, 1024>}, {pipeline_mode = #tpu.pipeline_mode<synchronous>, transform_indices = @transform_1, window_bounds = array<i64: 1024, 1024>}, {pipeline_mode = #tpu.pipeline_mode<synchronous>, transform_indices = @transform_2, window_bounds = array<i64: 1, 1024>}, {pipeline_mode = #tpu.pipeline_mode<synchronous>, transform_indices = @transform_3, window_bounds = array<i64: 1024, 512>}, {pipeline_mode = #tpu.pipeline_mode<synchronous>, transform_indices = @transform_4, window_bounds = array<i64: 1, 512>}, {pipeline_mode = #tpu.pipeline_mode<synchronous>, transform_indices = @transform_5, window_bounds = array<i64: 512, 256>}, {pipeline_mode = #tpu.pipeline_mode<synchronous>, transform_indices = @transform_6, window_bounds = array<i64: 1, 256>}, {pipeline_mode = #tpu.pipeline_mode<synchronous>, transform_indices = @transform_7, window_bounds = array<i64: 256, 128>}, {pipeline_mode = #tpu.pipeline_mode<synchronous>, transform_indices = @transform_8, window_bounds = array<i64: 1, 128>}, {pipeline_mode = #tpu.pipeline_mode<synchronous>, transform_indices = @transform_9, window_bounds = array<i64: 128, 128>}, {pipeline_mode = #tpu.pipeline_mode<synchronous>, transform_indices = @transform_10, window_bounds = array<i64: 1, 128>}, {transform_indices = @transform_11, window_bounds = array<i64: 128, 128>}]} {
    %c0 = arith.constant 0 : index
    %c0_0 = arith.constant 0 : index
    %0 = vector.load %arg1[%c0, %c0_0] : memref<128x1024xf32, #tpu.memory_space<vmem>>, vector<128x1024xf32>
    %1 = arith.truncf %0 : vector<128x1024xf32> to vector<128x1024xbf16>
    %c0_1 = arith.constant 0 : index
    %c0_2 = arith.constant 0 : index
    %2 = vector.load %arg2[%c0_1, %c0_2] : memref<1024x1024xbf16, #tpu.memory_space<vmem>>, vector<1024x1024xbf16>
    %cst = arith.constant dense<0.000000e+00> : vector<128x1024xf32>
    %3 = tpu.matmul %1, %2, %cst {dimension_numbers = #tpu.dot_dimension_numbers<[1], [0], [0], [1], [0, 0, 1, 1], [], []>} : vector<128x1024xbf16>, vector<1024x1024xbf16>, vector<128x1024xf32> -> vector<128x1024xf32>
    %c0_3 = arith.constant 0 : index
    %c0_4 = arith.constant 0 : index
    %4 = vector.load %arg3[%c0_3, %c0_4] : memref<1x1024xf32, #tpu.memory_space<vmem>>, vector<1x1024xf32>
    %5 = vector.broadcast %4 : vector<1x1024xf32> to vector<128x1024xf32>
    %6 = arith.addf %3, %5 : vector<128x1024xf32>
    %cst_5 = arith.constant 0.000000e+00 : f32
    %7 = vector.broadcast %cst_5 : f32 to vector<128x1024xf32>
    %8 = arith.maximumf %6, %7 : vector<128x1024xf32>
    %9 = arith.truncf %8 : vector<128x1024xf32> to vector<128x1024xbf16>
    %c0_6 = arith.constant 0 : index
    %c0_7 = arith.constant 0 : index
    %10 = vector.load %arg4[%c0_6, %c0_7] : memref<1024x512xbf16, #tpu.memory_space<vmem>>, vector<1024x512xbf16>
    %cst_8 = arith.constant dense<0.000000e+00> : vector<128x512xf32>
    %11 = tpu.matmul %9, %10, %cst_8 {dimension_numbers = #tpu.dot_dimension_numbers<[1], [0], [0], [1], [0, 0, 1, 1], [], []>} : vector<128x1024xbf16>, vector<1024x512xbf16>, vector<128x512xf32> -> vector<128x512xf32>
    %c0_9 = arith.constant 0 : index
    %c0_10 = arith.constant 0 : index
    %12 = vector.load %arg5[%c0_9, %c0_10] : memref<1x512xf32, #tpu.memory_space<vmem>>, vector<1x512xf32>
    %13 = vector.broadcast %12 : vector<1x512xf32> to vector<128x512xf32>
    %14 = arith.addf %11, %13 : vector<128x512xf32>
    %cst_11 = arith.constant 0.000000e+00 : f32
    %15 = vector.broadcast %cst_11 : f32 to vector<128x512xf32>
    %16 = arith.maximumf %14, %15 : vector<128x512xf32>
    %17 = arith.truncf %16 : vector<128x512xf32> to vector<128x512xbf16>
    %c0_12 = arith.constant 0 : index
    %c0_13 = arith.constant 0 : index
    %18 = vector.load %arg6[%c0_12, %c0_13] : memref<512x256xbf16, #tpu.memory_space<vmem>>, vector<512x256xbf16>
    %cst_14 = arith.constant dense<0.000000e+00> : vector<128x256xf32>
    %19 = tpu.matmul %17, %18, %cst_14 {dimension_numbers = #tpu.dot_dimension_numbers<[1], [0], [0], [1], [0, 0, 1, 1], [], []>} : vector<128x512xbf16>, vector<512x256xbf16>, vector<128x256xf32> -> vector<128x256xf32>
    %c0_15 = arith.constant 0 : index
    %c0_16 = arith.constant 0 : index
    %20 = vector.load %arg7[%c0_15, %c0_16] : memref<1x256xf32, #tpu.memory_space<vmem>>, vector<1x256xf32>
    %21 = vector.broadcast %20 : vector<1x256xf32> to vector<128x256xf32>
    %22 = arith.addf %19, %21 : vector<128x256xf32>
    %cst_17 = arith.constant 0.000000e+00 : f32
    %23 = vector.broadcast %cst_17 : f32 to vector<128x256xf32>
    %24 = arith.maximumf %22, %23 : vector<128x256xf32>
    %25 = arith.truncf %24 : vector<128x256xf32> to vector<128x256xbf16>
    %c0_18 = arith.constant 0 : index
    %c0_19 = arith.constant 0 : index
    %26 = vector.load %arg8[%c0_18, %c0_19] : memref<256x128xbf16, #tpu.memory_space<vmem>>, vector<256x128xbf16>
    %cst_20 = arith.constant dense<0.000000e+00> : vector<128x128xf32>
    %27 = tpu.matmul %25, %26, %cst_20 {dimension_numbers = #tpu.dot_dimension_numbers<[1], [0], [0], [1], [0, 0, 1, 1], [], []>} : vector<128x256xbf16>, vector<256x128xbf16>, vector<128x128xf32> -> vector<128x128xf32>
    %c0_21 = arith.constant 0 : index
    %c0_22 = arith.constant 0 : index
    %28 = vector.load %arg9[%c0_21, %c0_22] : memref<1x128xf32, #tpu.memory_space<vmem>>, vector<1x128xf32>
    %29 = vector.broadcast %28 : vector<1x128xf32> to vector<128x128xf32>
    %30 = arith.addf %27, %29 : vector<128x128xf32>
    %cst_23 = arith.constant 0.000000e+00 : f32
    %31 = vector.broadcast %cst_23 : f32 to vector<128x128xf32>
    %32 = arith.maximumf %30, %31 : vector<128x128xf32>
    %33 = arith.truncf %32 : vector<128x128xf32> to vector<128x128xbf16>
    %c0_24 = arith.constant 0 : index
    %c0_25 = arith.constant 0 : index
    %34 = vector.load %arg10[%c0_24, %c0_25] : memref<128x128xbf16, #tpu.memory_space<vmem>>, vector<128x128xbf16>
    %cst_26 = arith.constant dense<0.000000e+00> : vector<128x128xf32>
    %35 = tpu.matmul %33, %34, %cst_26 {dimension_numbers = #tpu.dot_dimension_numbers<[1], [0], [0], [1], [0, 0, 1, 1], [], []>} : vector<128x128xbf16>, vector<128x128xbf16>, vector<128x128xf32> -> vector<128x128xf32>
    %c0_27 = arith.constant 0 : index
    %c0_28 = arith.constant 0 : index
    %36 = vector.load %arg11[%c0_27, %c0_28] : memref<1x128xf32, #tpu.memory_space<vmem>>, vector<1x128xf32>
    %37 = vector.broadcast %36 : vector<1x128xf32> to vector<128x128xf32>
    %38 = arith.addf %35, %37 : vector<128x128xf32>
    %c0_29 = arith.constant 0 : index
    %c0_30 = arith.constant 0 : index
    %39 = vector.load %arg12[%c0_29, %c0_30] : memref<128x128xf32, #tpu.memory_space<vmem>>, vector<128x128xf32>
    tpu.vector_store %arg12[%c0_29, %c0_30], %38 {strides = array<i32>} : memref<128x128xf32, #tpu.memory_space<vmem>>, vector<128x128xf32>,
    return
  }
  func.func @transform_0(%arg0: i32) -> (i32, i32) {
    %c0_i32 = arith.constant 0 : i32
    %c0_i32_0 = arith.constant 0 : i32
    return %arg0, %c0_i32 : i32, i32
  }
  func.func @transform_1(%arg0: i32) -> (i32, i32) {
    %c0_i32 = arith.constant 0 : i32
    %c0_i32_0 = arith.constant 0 : i32
    %c0_i32_1 = arith.constant 0 : i32
    return %c0_i32, %c0_i32_0 : i32, i32
  }
  func.func @transform_2(%arg0: i32) -> (i32, i32) {
    %c0_i32 = arith.constant 0 : i32
    %c0_i32_0 = arith.constant 0 : i32
    %c0_i32_1 = arith.constant 0 : i32
    return %c0_i32, %c0_i32_0 : i32, i32
  }
  func.func @transform_3(%arg0: i32) -> (i32, i32) {
    %c0_i32 = arith.constant 0 : i32
    %c0_i32_0 = arith.constant 0 : i32
    %c0_i32_1 = arith.constant 0 : i32
    return %c0_i32, %c0_i32_0 : i32, i32
  }
  func.func @transform_4(%arg0: i32) -> (i32, i32) {
    %c0_i32 = arith.constant 0 : i32
    %c0_i32_0 = arith.constant 0 : i32
    %c0_i32_1 = arith.constant 0 : i32
    return %c0_i32, %c0_i32_0 : i32, i32
  }
  func.func @transform_5(%arg0: i32) -> (i32, i32) {
    %c0_i32 = arith.constant 0 : i32
    %c0_i32_0 = arith.constant 0 : i32
    %c0_i32_1 = arith.constant 0 : i32
    return %c0_i32, %c0_i32_0 : i32, i32
  }
  func.func @transform_6(%arg0: i32) -> (i32, i32) {
    %c0_i32 = arith.constant 0 : i32
    %c0_i32_0 = arith.constant 0 : i32
    %c0_i32_1 = arith.constant 0 : i32
    return %c0_i32, %c0_i32_0 : i32, i32
  }
  func.func @transform_7(%arg0: i32) -> (i32, i32) {
    %c0_i32 = arith.constant 0 : i32
    %c0_i32_0 = arith.constant 0 : i32
    %c0_i32_1 = arith.constant 0 : i32
    return %c0_i32, %c0_i32_0 : i32, i32
  }
  func.func @transform_8(%arg0: i32) -> (i32, i32) {
    %c0_i32 = arith.constant 0 : i32
    %c0_i32_0 = arith.constant 0 : i32
    %c0_i32_1 = arith.constant 0 : i32
    return %c0_i32, %c0_i32_0 : i32, i32
  }
  func.func @transform_9(%arg0: i32) -> (i32, i32) {
    %c0_i32 = arith.constant 0 : i32
    %c0_i32_0 = arith.constant 0 : i32
    %c0_i32_1 = arith.constant 0 : i32
    return %c0_i32, %c0_i32_0 : i32, i32
  }
  func.func @transform_10(%arg0: i32) -> (i32, i32) {
    %c0_i32 = arith.constant 0 : i32
    %c0_i32_0 = arith.constant 0 : i32
    %c0_i32_1 = arith.constant 0 : i32
    return %c0_i32, %c0_i32_0 : i32, i32
  }
  func.func @transform_11(%arg0: i32) -> (i32, i32) {
    %c0_i32 = arith.constant 0 : i32
    %c0_i32_0 = arith.constant 0 : i32
    return %arg0, %c0_i32 : i32, i32
  }
}

</mosaic_0001>

<bundles_post_ra>
// kernel: custom_layers_forward.1
= control target key start
LH: loop header
LB: loop body
LE: loop exit
PB: predicated region body
PF: predicated region fallthrough
CT: control target
= control target key end

     0   :  { %16 = vsyncpa [#allocation3], 0  ;;  %s13369_s0 = inlined_call_operand.vmem [shape: f32[128,1024], index: 0, kind: input, shape index: {}]   ;;  %s13370_s1 = inlined_call_operand.hbm [shape: bf16[1024,1024], index: 1, kind: input, shape index: {}]   ;;  %s13371_s2 = inlined_call_operand.hbm [shape: f32[1,1024], index: 2, kind: input, shape index: {}]   ;;  %s13372_s3 = inlined_call_operand.hbm [shape: bf16[1024,512], index: 3, kind: input, shape index: {}]   ;;  %s13373_s4 = inlined_call_operand.hbm [shape: f32[1,512], index: 4, kind: input, shape index: {}]   ;;  %s13374_s5 = inlined_call_operand.hbm [shape: bf16[512,256], index: 5, kind: input, shape index: {}]   ;;  %s13375_s6 = inlined_call_operand.hbm [shape: f32[1,256], index: 6, kind: input, shape index: {}]   ;;  %s13376_s7 = inlined_call_operand.hbm [shape: bf16[256,128], index: 7, kind: input, shape index: {}]   ;;  %s13377_s8 = inlined_call_operand.hbm [shape: f32[1,128], index: 8, kind: input, shape index: {}]   ;;  %s13378_s9 = inlined_call_operand.hbm [shape: bf16[128,128], index: 9, kind: input, shape index: {}]   ;;  %s13379_s10 = inlined_call_operand.hbm [shape: f32[1,128], index: 10, kind: input, shape index: {}]   ;;  %s13380_s11 = inlined_call_operand.vmem [shape: f32[128,128], index: 11, kind: output, shape index: {}]  }
   0x1   :  { %17 = vsyncpa [#allocation5], 0 }
   0x2   :  { %18 = vsyncpa [#allocation8], 0 }
   0x3   :  { %19 = vsyncpa [#allocation11], 0 }
   0x4   :  { %20 = vsyncpa [#allocation14], 0 }
   0x5   :  { %21 = vsyncpa [#allocation17], 0  ;;  %s11706_s17 = smov [#allocation4]   ;;  %s11707_s19 = smov [#allocation7]  }
   0x6   :  { %s42_s18 = sshll.u32 %s11706_s17, 4  ;;  %s64_s20 = sshll.u32 %s11707_s19, 4  ;;  %s43_s18 = int_to_ptr.vmem [resolvable:$true] %s42_s18  ;;  %s65_s20 = int_to_ptr.vmem [resolvable:$true] %s64_s20 }
   0x7   :  { %s11474_s23 = scalar_lea.hbm %s13371_s2, 128 }
   0x8   :  { %p11475_p0 = scmp.ne.s32.totalorder %s13371_s2, %s11474_s23  ;;  %p11478_p1 = scmp.lt.u32.totalorder %s11474_s23, %s13371_s2 }
   0xa   :  { %p11480_p2 = pnand %p11478_p1, %p11475_p0 }
   0xc   :  { %11483 = shalt.err (!%p11480_p2)
}
   0xd   :  { %s11484_s28 = scalar_lea.vmem %s43_s18, 128  ;;  %p11489_p4 = scmp.lt.s32.totalorder %s43_s18, %s43_s18 }
   0xe   :  { %p11485_p3 = scmp.ne.s32.totalorder %s43_s18, %s11484_s28  ;;  %p11490_p5 = scmp.lt.s32.totalorder %s11484_s28, %s11484_s28 }
  0x10   :  { %p11491_p6 = por %p11490_p5, %p11489_p4 }
  0x12   :  { %p11492_p7 = pnand %p11491_p6, %p11485_p3 }
  0x14   :  { %11495 = shalt.err (!%p11492_p7)
}
  0x15   :  { %45 = dma.hbm_to_vmem [thread:$0]  %s13371_s2, 128, %s43_s18, [#allocation5]  }
  0x16   :  { %s11496_s14 = scalar_lea.hbm %s13373_s4, 64 }
  0x17   :  { %p11497_p8 = scmp.ne.s32.totalorder %s13373_s4, %s11496_s14  ;;  %p11500_p9 = scmp.lt.u32.totalorder %s11496_s14, %s13373_s4 }
  0x19   :  { %p11502_p10 = pnand %p11500_p9, %p11497_p8 }
  0x1b   :  { %11505 = shalt.err (!%p11502_p10)
}
  0x1c   :  { %s11506_s21 = scalar_lea.vmem %s65_s20, 64  ;;  %p11511_p12 = scmp.lt.s32.totalorder %s65_s20, %s65_s20 }
  0x1d   :  { %p11507_p11 = scmp.ne.s32.totalorder %s65_s20, %s11506_s21  ;;  %p11512_p13 = scmp.lt.s32.totalorder %s11506_s21, %s11506_s21 }
  0x1f   :  { %p11513_p0 = por %p11512_p13, %p11511_p12 }
  0x21   :  { %p11514_p1 = pnand %p11513_p0, %p11507_p11 }
  0x23   :  { %11517 = shalt.err (!%p11514_p1)
}
  0x24   :  { %67 = dma.hbm_to_vmem [thread:$0]  %s13373_s4, 64, %s65_s20, [#allocation8]  }
  0x25   :  { %s11708_s22 = smov [#allocation10]   ;;  %s11709_s24 = smov [#allocation13]  }
  0x26   :  { %s86_s23 = sshll.u32 %s11708_s22, 4  ;;  %s108_s25 = sshll.u32 %s11709_s24, 4  ;;  %s87_s23 = int_to_ptr.vmem [resolvable:$true] %s86_s23  ;;  %s109_s25 = int_to_ptr.vmem [resolvable:$true] %s108_s25 }
  0x27   :  { %s11518_s28 = scalar_lea.hbm %s13375_s6, 32 }
  0x28   :  { %p11519_p2 = scmp.ne.s32.totalorder %s13375_s6, %s11518_s28  ;;  %p11522_p3 = scmp.lt.u32.totalorder %s11518_s28, %s13375_s6 }
  0x2a   :  { %p11524_p4 = pnand %p11522_p3, %p11519_p2 }
  0x2c   :  { %11527 = shalt.err (!%p11524_p4)
}
  0x2d   :  { %s11528_s4 = scalar_lea.vmem %s87_s23, 32  ;;  %p11533_p6 = scmp.lt.s32.totalorder %s87_s23, %s87_s23 }
  0x2e   :  { %p11529_p5 = scmp.ne.s32.totalorder %s87_s23, %s11528_s4  ;;  %p11534_p7 = scmp.lt.s32.totalorder %s11528_s4, %s11528_s4 }
  0x30   :  { %p11535_p8 = por %p11534_p7, %p11533_p6 }
  0x32   :  { %p11536_p9 = pnand %p11535_p8, %p11529_p5 }
  0x34   :  { %11539 = shalt.err (!%p11536_p9)
}
  0x35   :  { %89 = dma.hbm_to_vmem [thread:$0]  %s13375_s6, 32, %s87_s23, [#allocation11]  }
  0x36   :  { %s11540_s17 = scalar_lea.hbm %s13377_s8, 16 }
  0x37   :  { %p11541_p10 = scmp.ne.s32.totalorder %s13377_s8, %s11540_s17  ;;  %p11544_p11 = scmp.lt.u32.totalorder %s11540_s17, %s13377_s8 }
  0x39   :  { %p11546_p12 = pnand %p11544_p11, %p11541_p10 }
  0x3b   :  { %11549 = shalt.err (!%p11546_p12)
}
  0x3c   :  { %s11550_s22 = scalar_lea.vmem %s109_s25, 16  ;;  %s11554_s24 = scalar_lea.vmem %s109_s25, 32 }
  0x3d   :  { %p11551_p13 = scmp.ne.s32.totalorder %s109_s25, %s11550_s22  ;;  %p11555_p0 = scmp.lt.s32.totalorder %s109_s25, %s109_s25 }
  0x3e   :  { %p11556_p1 = scmp.lt.s32.totalorder %s11554_s24, %s11550_s22 }
  0x40   :  { %p11557_p2 = por %p11556_p1, %p11555_p0 }
  0x42   :  { %p11558_p3 = pnand %p11557_p2, %p11551_p13 }
  0x44   :  { %11561 = shalt.err (!%p11558_p3)
}
  0x45   :  { %111 = dma.hbm_to_vmem [thread:$0]  %s13377_s8, 16, %s109_s25, [#allocation14]  }
  0x46   :  { %s11710_s26 = smov [#allocation2]   ;;  %s11562_s30 = scalar_lea.hbm %s13370_s1, 65536 }
  0x47   :  { %s29_s27 = sshll.u32 %s11710_s26, 4  ;;  %p11563_p4 = scmp.ne.s32.totalorder %s13370_s1, %s11562_s30  ;;  %s30_s27 = int_to_ptr.vmem [resolvable:$true] %s29_s27 }
  0x48   :  { %p11566_p5 = scmp.lt.u32.totalorder %s11562_s30, %s13370_s1 }
  0x4a   :  { %p11568_p6 = pnand %p11566_p5, %p11563_p4 }
  0x4c   :  { %11571 = shalt.err (!%p11568_p6)
}
  0x4d   :  { %s11572_s14 = scalar_lea.vmem %s30_s27, 65536  ;;  %p11577_p8 = scmp.lt.s32.totalorder %s30_s27, %s30_s27 }
  0x4e   :  { %p11573_p7 = scmp.ne.s32.totalorder %s30_s27, %s11572_s14  ;;  %p11578_p9 = scmp.lt.s32.totalorder %s11572_s14, %s11572_s14 }
  0x50   :  { %p11579_p10 = por %p11578_p9, %p11577_p8 }
  0x52   :  { %p11580_p11 = pnand %p11579_p10, %p11573_p7 }
  0x54   :  { %11583 = shalt.err (!%p11580_p11)
}
  0x55   :  { %s11711_s8 = smov 512   ;;  %s11712_s25 = smov 32  }
  0x56   :  { %35 = dma.hbm_to_vmem [thread:$0]  %s13370_s1, 65536, %s30_s27, [#allocation3], %s11711_s8, %s11711_s8, %s11712_s25  }
  0x57   :  { %s11713_s17 = smov [#allocation6]   ;;  %s11584_s18 = scalar_lea.hbm %s13372_s3, 32768 }
  0x58   :  { %s51_s19 = sshll.u32 %s11713_s17, 4  ;;  %p11585_p12 = scmp.ne.s32.totalorder %s13372_s3, %s11584_s18  ;;  %s52_s19 = int_to_ptr.vmem [resolvable:$true] %s51_s19 }
  0x59   :  { %p11588_p13 = scmp.lt.u32.totalorder %s11584_s18, %s13372_s3 }
  0x5b   :  { %p11590_p0 = pnand %p11588_p13, %p11585_p12 }
  0x5d   :  { %11593 = shalt.err (!%p11590_p0)
}
  0x5e   :  { %s11594_s26 = scalar_lea.vmem %s52_s19, 32768  ;;  %p11599_p2 = scmp.lt.s32.totalorder %s52_s19, %s52_s19 }
  0x5f   :  { %p11595_p1 = scmp.ne.s32.totalorder %s52_s19, %s11594_s26  ;;  %p11600_p3 = scmp.lt.s32.totalorder %s11594_s26, %s11594_s26 }
  0x61   :  { %p11601_p4 = por %p11600_p3, %p11599_p2 }
  0x63   :  { %p11602_p5 = pnand %p11601_p4, %p11595_p1 }
  0x65   :  { %11605 = shalt.err (!%p11602_p5)
}
  0x66   :  { %s11714_s1 = smov 256   ;;  %s11715_s27 = smov 16  }
  0x67   :  { %57 = dma.hbm_to_vmem [thread:$0]  %s13372_s3, 32768, %s52_s19, [#allocation5], %s11714_s1, %s11714_s1, %s11715_s27  }
  0x68   :  { %s11716_s30 = smov [#allocation9]   ;;  %s11606_s20 = scalar_lea.hbm %s13374_s5, 8192 }
  0x69   :  { %s73_s12 = sshll.u32 %s11716_s30, 4  ;;  %p11607_p6 = scmp.ne.s32.totalorder %s13374_s5, %s11606_s20  ;;  %s74_s12 = int_to_ptr.vmem [resolvable:$true] %s73_s12 }
  0x6a   :  { %p11610_p7 = scmp.lt.u32.totalorder %s11606_s20, %s13374_s5 }
  0x6c   :  { %p11612_p8 = pnand %p11610_p7, %p11607_p6 }
  0x6e   :  { %11615 = shalt.err (!%p11612_p8)
}
  0x6f   :  { %s11616_s16 = scalar_lea.vmem %s74_s12, 8192  ;;  %p11621_p10 = scmp.lt.s32.totalorder %s74_s12, %s74_s12 }
  0x70   :  { %p11617_p9 = scmp.ne.s32.totalorder %s74_s12, %s11616_s16  ;;  %p11622_p11 = scmp.lt.s32.totalorder %s11616_s16, %s11616_s16 }
  0x72   :  { %p11623_p12 = por %p11622_p11, %p11621_p10 }
  0x74   :  { %p11624_p13 = pnand %p11623_p12, %p11617_p9 }
  0x76   :  { %11627 = shalt.err (!%p11624_p13)
}
  0x77   :  { %s11717_s3 = smov 128   ;;  %s11718_s17 = smov 8  }
  0x78   :  { %79 = dma.hbm_to_vmem [thread:$0]  %s13374_s5, 8192, %s74_s12, [#allocation8], %s11717_s3, %s11717_s3, %s11718_s17  }
  0x79   :  { %s11719_s2 = smov [#allocation12]   ;;  %s11628_s6 = scalar_lea.hbm %s13376_s7, 2048 }
  0x7a   :  { %s95_s18 = sshll.u32 %s11719_s2, 4  ;;  %p11629_p0 = scmp.ne.s32.totalorder %s13376_s7, %s11628_s6  ;;  %s96_s18 = int_to_ptr.vmem [resolvable:$true] %s95_s18 }
  0x7b   :  { %p11632_p1 = scmp.lt.u32.totalorder %s11628_s6, %s13376_s7 }
  0x7d   :  { %p11634_p2 = pnand %p11632_p1, %p11629_p0 }
  0x7f   :  { %11637 = shalt.err (!%p11634_p2)
}
  0x80   :  { %s11638_s28 = scalar_lea.vmem %s96_s18, 2048  ;;  %p11643_p4 = scmp.lt.s32.totalorder %s96_s18, %s96_s18 }
  0x81   :  { %p11639_p3 = scmp.ne.s32.totalorder %s96_s18, %s11638_s28  ;;  %p11644_p5 = scmp.lt.s32.totalorder %s11638_s28, %s11638_s28 }
  0x83   :  { %p11645_p6 = por %p11644_p5, %p11643_p4 }
  0x85   :  { %p11646_p7 = pnand %p11645_p6, %p11639_p3 }
  0x87   :  { %11649 = shalt.err (!%p11646_p7)
}
  0x88   :  { %s11720_s5 = smov 64   ;;  %s11721_s29 = smov 4  }
  0x89   :  { %101 = dma.hbm_to_vmem [thread:$0]  %s13376_s7, 2048, %s96_s18, [#allocation11], %s11720_s5, %s11720_s5, %s11721_s29  }
  0x8a   :  { %s11722_s13 = smov [#allocation15]   ;;  %s11723_s20 = smov [#allocation16]  }
  0x8b   :  { %s117_s4 = sshll.u32 %s11722_s13, 4  ;;  %s130_s14 = sshll.u32 %s11723_s20, 4  ;;  %s118_s4 = int_to_ptr.vmem [resolvable:$true] %s117_s4  ;;  %s131_s14 = int_to_ptr.vmem [resolvable:$true] %s130_s14 }
  0x8c   :  { %s11650_s15 = scalar_lea.hbm %s13378_s9, 1024 }
  0x8d   :  { %p11651_p8 = scmp.ne.s32.totalorder %s13378_s9, %s11650_s15  ;;  %p11654_p9 = scmp.lt.u32.totalorder %s11650_s15, %s13378_s9 }
  0x8f   :  { %p11656_p10 = pnand %p11654_p9, %p11651_p8 }
  0x91   :  { %11659 = shalt.err (!%p11656_p10)
}
  0x92   :  { %s11660_s7 = scalar_lea.vmem %s118_s4, 1024  ;;  %p11665_p12 = scmp.lt.s32.totalorder %s118_s4, %s118_s4 }
  0x93   :  { %p11661_p11 = scmp.ne.s32.totalorder %s118_s4, %s11660_s7  ;;  %p11666_p13 = scmp.lt.s32.totalorder %s11660_s7, %s11660_s7 }
  0x95   :  { %p11667_p0 = por %p11666_p13, %p11665_p12 }
  0x97   :  { %p11668_p1 = pnand %p11667_p0, %p11661_p11 }
  0x99   :  { %11671 = shalt.err (!%p11668_p1)
}
  0x9a   :  { %123 = dma.hbm_to_vmem [thread:$0]  %s13378_s9, 1024, %s118_s4, [#allocation14], %s11720_s5, %s11720_s5, %s11721_s29  }
  0x9b   :  { %s11672_s24 = scalar_lea.hbm %s13379_s10, 16 }
  0x9c   :  { %p11673_p2 = scmp.ne.s32.totalorder %s13379_s10, %s11672_s24  ;;  %p11676_p3 = scmp.lt.u32.totalorder %s11672_s24, %s13379_s10 }
  0x9e   :  { %p11678_p4 = pnand %p11676_p3, %p11673_p2 }
  0xa0   :  { %11681 = shalt.err (!%p11678_p4)
}
  0xa1   :  { %s11682_s27 = scalar_lea.vmem %s131_s14, 16  ;;  %s11686_s28 = scalar_lea.vmem %s131_s14, 32 }
  0xa2   :  { %p11683_p5 = scmp.ne.s32.totalorder %s131_s14, %s11682_s27  ;;  %p11687_p6 = scmp.lt.s32.totalorder %s131_s14, %s131_s14 }
  0xa3   :  { %p11688_p7 = scmp.lt.s32.totalorder %s11686_s28, %s11682_s27 }
  0xa5   :  { %p11689_p8 = por %p11688_p7, %p11687_p6 }
  0xa7   :  { %p11690_p9 = pnand %p11689_p8, %p11683_p5 }
  0xa9   :  { %11693 = shalt.err (!%p11690_p9)
}
  0xaa   :  { %133 = dma.hbm_to_vmem [thread:$0]  %s13379_s10, 16, %s131_s14, [#allocation17]  }
  0xab   :  { %11694 = dma.done.wait [#allocation3], 65536  }
  0xac   :  { %11695 = vsyncadd [#allocation3], 4294901760 }
  0xad   :  { %11696 = dma.done.wait [#allocation5], 32896  }
  0xae   :  { %11697 = vsyncadd [#allocation5], 4294934400 }
  0xaf   :  { %11698 = dma.done.wait [#allocation8], 8256  }
  0xb0   :  { %11699 = vsyncadd [#allocation8], 4294959040 }
  0xb1   :  { %11700 = dma.done.wait [#allocation11], 2080  }
  0xb2   :  { %11701 = vsyncadd [#allocation11], 4294965216 }
  0xb3   :  { %11702 = dma.done.wait [#allocation14], 1040  }
  0xb4   :  { %11703 = vsyncadd [#allocation14], 4294966256 }
  0xb5   :  { %11704 = dma.done.wait [#allocation17], 16  }
  0xb6   :  { %11705 = vsyncadd [#allocation17], 4294967280  ;;  %v357_v0 = vld [vmem:[#allocation2] sm:$0xff]  ;;  %v358_v2 = vld [vmem:[#allocation2 + $0x8] sm:$0xff] }
  0xb7   :  { %v361_v1 = vld [vmem:[#allocation2 + $0x20] sm:$0xff]  ;;  %v362_v4 = vld [vmem:[#allocation2 + $0x28] sm:$0xff] }
  0xb8   :  { %v9150_v3 = vcombine.high %v357_v0, %v361_v1  ;;  %v9149_v5 = vcombine.low %v357_v0, %v361_v1  ;;  %v365_v6 = vld [vmem:[#allocation2 + $0x40] sm:$0xff]  ;;  %v9152_v8 = vcombine.high %v358_v2, %v362_v4  ;;  %v9151_v9 = vcombine.low %v358_v2, %v362_v4  ;;  %v366_v11 = vld [vmem:[#allocation2 + $0x48] sm:$0xff] }
  0xb9   :  { %v369_v7 = vld [vmem:[#allocation2 + $0x60] sm:$0xff]  ;;  %v370_v12 = vld [vmem:[#allocation2 + $0x68] sm:$0xff] }
  0xba   :  { %v9158_v10 = vcombine.high %v365_v6, %v369_v7  ;;  %v373_v13 = vld [vmem:[#allocation2 + $0x80] sm:$0xff]  ;;  %3471 = vmatprep.subr.bf16.mxu0 %v9150_v3  ;;  %v9160_v14 = vcombine.high %v366_v11, %v370_v12  ;;  %v374_v16 = vld [vmem:[#allocation2 + $0x88] sm:$0xff]  ;;  %3923 = vmatprep.subr.bf16.mxu1 %v9152_v8  ;;  %v9157_v18 = vcombine.low %v365_v6, %v369_v7 }
  0xbb   :  { %v377_v15 = vld [vmem:[#allocation2 + $0xa0] sm:$0xff]  ;;  %v378_v17 = vld [vmem:[#allocation2 + $0xa8] sm:$0xff]  ;;  %3472 = vmatpush1.bf16.msra.mxu0 %v9149_v5  ;;  %3924 = vmatpush1.bf16.msra.mxu1 %v9151_v9  ;;  %v9159_v19 = vcombine.low %v366_v11, %v370_v12 }
  0xbc   :  { %3473 = vmatprep.subr.bf16.mxu0 %v9158_v10  ;;  %v9166_v20 = vcombine.high %v373_v13, %v377_v15  ;;  %3925 = vmatprep.subr.bf16.mxu1 %v9160_v14  ;;  %v9168_v21 = vcombine.high %v374_v16, %v378_v17  ;;  %v381_v22 = vld [vmem:[#allocation2 + $0xc0] sm:$0xff]  ;;  %v382_v24 = vld [vmem:[#allocation2 + $0xc8] sm:$0xff]  ;;  %v9165_v26 = vcombine.low %v373_v13, %v377_v15 }
  0xbd   :  { %v385_v23 = vld [vmem:[#allocation2 + $0xe0] sm:$0xff]  ;;  %v386_v25 = vld [vmem:[#allocation2 + $0xe8] sm:$0xff]  ;;  %v9167_v27 = vcombine.low %v374_v16, %v378_v17 }
  0xbe   :  { %v9174_v28 = vcombine.high %v381_v22, %v385_v23  ;;  %v9176_v29 = vcombine.high %v382_v24, %v386_v25  ;;  %v389_v30 = vld [vmem:[#allocation2 + $0x100] sm:$0xff]  ;;  %v390_v32 = vld [vmem:[#allocation2 + $0x108] sm:$0xff]  ;;  %v9173_v34 = vcombine.low %v381_v22, %v385_v23  ;;  %v9175_v35 = vcombine.low %v382_v24, %v386_v25 }
  0xbf   :  { %3474 = vmatpush1.bf16.msra.mxu0 %v9157_v18  ;;  %3926 = vmatpush1.bf16.msra.mxu1 %v9159_v19  ;;  %v393_v31 = vld [vmem:[#allocation2 + $0x120] sm:$0xff]  ;;  %v394_v33 = vld [vmem:[#allocation2 + $0x128] sm:$0xff] }
  0xc0   :  { %3475 = vmatprep.subr.bf16.mxu0 %v9166_v20  ;;  %3927 = vmatprep.subr.bf16.mxu1 %v9168_v21  ;;  %v9182_v36 = vcombine.high %v389_v30, %v393_v31  ;;  %v9184_v37 = vcombine.high %v390_v32, %v394_v33  ;;  %v397_v38 = vld [vmem:[#allocation2 + $0x140] sm:$0xff]  ;;  %v398_v40 = vld [vmem:[#allocation2 + $0x148] sm:$0xff]  ;;  %v9181_v42 = vcombine.low %v389_v30, %v393_v31 }
  0xc1   :  { %v401_v39 = vld [vmem:[#allocation2 + $0x160] sm:$0xff]  ;;  %v402_v41 = vld [vmem:[#allocation2 + $0x168] sm:$0xff]  ;;  %v9183_v43 = vcombine.low %v390_v32, %v394_v33 }
  0xc2   :  { %v9190_v44 = vcombine.high %v397_v38, %v401_v39  ;;  %v9192_v45 = vcombine.high %v398_v40, %v402_v41  ;;  %v405_v46 = vld [vmem:[#allocation2 + $0x180] sm:$0xff]  ;;  %v406_v48 = vld [vmem:[#allocation2 + $0x188] sm:$0xff]  ;;  %v9189_v50 = vcombine.low %v397_v38, %v401_v39  ;;  %v9191_v51 = vcombine.low %v398_v40, %v402_v41 }
  0xc3   :  { %3476 = vmatpush1.bf16.msra.mxu0 %v9165_v26  ;;  %3928 = vmatpush1.bf16.msra.mxu1 %v9167_v27  ;;  %v409_v47 = vld [vmem:[#allocation2 + $0x1a0] sm:$0xff]  ;;  %v410_v49 = vld [vmem:[#allocation2 + $0x1a8] sm:$0xff] }
  0xc4   :  { %3477 = vmatprep.subr.bf16.mxu0 %v9174_v28  ;;  %3929 = vmatprep.subr.bf16.mxu1 %v9176_v29  ;;  %v9198_v52 = vcombine.high %v405_v46, %v409_v47  ;;  %v166_v53 = vld [vmem:[%s13369_s0 + $0x8] sm:$0xff]  ;;  %v9200_v55 = vcombine.high %v406_v48, %v410_v49  ;;  %v413_v56 = vld [vmem:[#allocation2 + $0x1c0] sm:$0xff]  ;;  %v9197_v61 = vcombine.low %v405_v46, %v409_v47 }
  0xc5   :  { %v174_v54 = vld [vmem:[%s13369_s0 + $0x48] sm:$0xff]  ;;  %v417_v57 = vld [vmem:[#allocation2 + $0x1e0] sm:$0xff]  ;;  %v9199_v62 = vcombine.low %v406_v48, %v410_v49 }
  0xc6   :  { %v11910_v58 = vpack.c.bf16 %v174_v54, %v166_v53  ;;  %v414_v59 = vld [vmem:[#allocation2 + $0x1c8] sm:$0xff]  ;;  %v9206_v63 = vcombine.high %v413_v56, %v417_v57  ;;  %v421_v1 = vld [vmem:[#allocation2 + $0x200] sm:$0xff]  ;;  %v9205_v5 = vcombine.low %v413_v56, %v417_v57 }
  0xc7   :  { %3478 = vmatpush1.bf16.msra.mxu0 %v9173_v34  ;;  %3930 = vmatpush1.bf16.msra.mxu1 %v9175_v35  ;;  %v418_v60 = vld [vmem:[#allocation2 + $0x1e8] sm:$0xff]  ;;  %v425_v2 = vld [vmem:[#allocation2 + $0x220] sm:$0xff] }
  0xc8   :  { %3479 = vmatprep.subr.bf16.mxu0 %v9182_v36  ;;  %3931 = vmatprep.subr.bf16.mxu1 %v9184_v37  ;;  %v9208_v0 = vcombine.high %v414_v59, %v418_v60  ;;  %v422_v3 = vld [vmem:[#allocation2 + $0x208] sm:$0xff]  ;;  %v9207_v6 = vcombine.low %v414_v59, %v418_v60  ;;  %v9214_v7 = vcombine.high %v421_v1, %v425_v2  ;;  %v429_v9 = vld [vmem:[#allocation2 + $0x240] sm:$0xff] }
  0xc9   :  { %3503 = vmatprep.mubr.bf16.mxu0 %v11910_v58  ;;  %3955 = vmatprep.mubr.bf16.mxu1 %v11910_v58  ;;  %v426_v4 = vld [vmem:[#allocation2 + $0x228] sm:$0xff]  ;;  %v433_v10 = vld [vmem:[#allocation2 + $0x260] sm:$0xff]  ;;  %v9213_v13 = vcombine.low %v421_v1, %v425_v2 }
  0xca   :  { %v9216_v8 = vcombine.high %v422_v3, %v426_v4  ;;  %v430_v11 = vld [vmem:[#allocation2 + $0x248] sm:$0xff]  ;;  %v9215_v14 = vcombine.low %v422_v3, %v426_v4  ;;  %v9222_v15 = vcombine.high %v429_v9, %v433_v10  ;;  %v437_v17 = vld [vmem:[#allocation2 + $0x280] sm:$0xff]  ;;  %v9221_v21 = vcombine.low %v429_v9, %v433_v10 }
  0xcb   :  { %3480 = vmatpush1.bf16.msra.mxu0 %v9181_v42  ;;  %3932 = vmatpush1.bf16.msra.mxu1 %v9183_v43  ;;  %v434_v12 = vld [vmem:[#allocation2 + $0x268] sm:$0xff]  ;;  %v441_v18 = vld [vmem:[#allocation2 + $0x2a0] sm:$0xff] }
  0xcc   :  { %3481 = vmatprep.subr.bf16.mxu0 %v9190_v44  ;;  %3933 = vmatprep.subr.bf16.mxu1 %v9192_v45  ;;  %v9224_v16 = vcombine.high %v430_v11, %v434_v12  ;;  %v438_v19 = vld [vmem:[#allocation2 + $0x288] sm:$0xff]  ;;  %v9223_v22 = vcombine.low %v430_v11, %v434_v12  ;;  %v9230_v23 = vcombine.high %v437_v17, %v441_v18  ;;  %v445_v25 = vld [vmem:[#allocation2 + $0x2c0] sm:$0xff] }
  0xcd   :  { %v442_v20 = vld [vmem:[#allocation2 + $0x2a8] sm:$0xff]  ;;  %v449_v26 = vld [vmem:[#allocation2 + $0x2e0] sm:$0xff]  ;;  %v9229_v29 = vcombine.low %v437_v17, %v441_v18 }
  0xce   :  { %v9232_v24 = vcombine.high %v438_v19, %v442_v20  ;;  %v446_v27 = vld [vmem:[#allocation2 + $0x2c8] sm:$0xff]  ;;  %v9231_v30 = vcombine.low %v438_v19, %v442_v20  ;;  %v9238_v31 = vcombine.high %v445_v25, %v449_v26  ;;  %v453_v33 = vld [vmem:[#allocation2 + $0x300] sm:$0xff]  ;;  %v9237_v37 = vcombine.low %v445_v25, %v449_v26 }
  0xcf   :  { %3482 = vmatpush1.bf16.msra.mxu0 %v9189_v50  ;;  %3934 = vmatpush1.bf16.msra.mxu1 %v9191_v51  ;;  %v450_v28 = vld [vmem:[#allocation2 + $0x2e8] sm:$0xff]  ;;  %v457_v34 = vld [vmem:[#allocation2 + $0x320] sm:$0xff] }
  0xd0   :  { %3483 = vmatprep.subr.bf16.mxu0 %v9198_v52  ;;  %3935 = vmatprep.subr.bf16.mxu1 %v9200_v55  ;;  %v9240_v32 = vcombine.high %v446_v27, %v450_v28  ;;  %v454_v35 = vld [vmem:[#allocation2 + $0x308] sm:$0xff]  ;;  %v9239_v38 = vcombine.low %v446_v27, %v450_v28  ;;  %v9246_v39 = vcombine.high %v453_v33, %v457_v34  ;;  %v461_v41 = vld [vmem:[#allocation2 + $0x340] sm:$0xff] }
  0xd1   :  { %v458_v36 = vld [vmem:[#allocation2 + $0x328] sm:$0xff]  ;;  %v465_v42 = vld [vmem:[#allocation2 + $0x360] sm:$0xff]  ;;  %v9245_v45 = vcombine.low %v453_v33, %v457_v34 }
  0xd2   :  { %v9248_v40 = vcombine.high %v454_v35, %v458_v36  ;;  %v462_v43 = vld [vmem:[#allocation2 + $0x348] sm:$0xff]  ;;  %v9247_v46 = vcombine.low %v454_v35, %v458_v36  ;;  %v9254_v47 = vcombine.high %v461_v41, %v465_v42  ;;  %v469_v49 = vld [vmem:[#allocation2 + $0x380] sm:$0xff]  ;;  %v9253_v53 = vcombine.low %v461_v41, %v465_v42 }
  0xd3   :  { %3484 = vmatpush1.bf16.msra.mxu0 %v9197_v61  ;;  %3936 = vmatpush1.bf16.msra.mxu1 %v9199_v62  ;;  %v466_v44 = vld [vmem:[#allocation2 + $0x368] sm:$0xff]  ;;  %v473_v50 = vld [vmem:[#allocation2 + $0x3a0] sm:$0xff] }
  0xd4   :  { %3485 = vmatprep.subr.bf16.mxu0 %v9206_v63  ;;  %3937 = vmatprep.subr.bf16.mxu1 %v9208_v0  ;;  %v9256_v48 = vcombine.high %v462_v43, %v466_v44  ;;  %v470_v51 = vld [vmem:[#allocation2 + $0x388] sm:$0xff]  ;;  %v9255_v54 = vcombine.low %v462_v43, %v466_v44  ;;  %v9262_v55 = vcombine.high %v469_v49, %v473_v50  ;;  %v477_v57 = vld [vmem:[#allocation2 + $0x3c0] sm:$0xff] }
  0xd5   :  { %v474_v52 = vld [vmem:[#allocation2 + $0x3a8] sm:$0xff]  ;;  %v481_v59 = vld [vmem:[#allocation2 + $0x3e0] sm:$0xff]  ;;  %v9261_v62 = vcombine.low %v469_v49, %v473_v50 }
  0xd6   :  { %v9264_v56 = vcombine.high %v470_v51, %v474_v52  ;;  %v478_v60 = vld [vmem:[#allocation2 + $0x3c8] sm:$0xff]  ;;  %v9263_v63 = vcombine.low %v470_v51, %v474_v52  ;;  %v9270_v0 = vcombine.high %v477_v57, %v481_v59  ;;  %v485_v2 = vld [vmem:[#allocation2 + $0x400] sm:$0xff] }
  0xd7   :  { %3486 = vmatpush1.bf16.msra.mxu0 %v9205_v5  ;;  %3938 = vmatpush1.bf16.msra.mxu1 %v9207_v6  ;;  %v482_v61 = vld [vmem:[#allocation2 + $0x3e8] sm:$0xff]  ;;  %v489_v3 = vld [vmem:[#allocation2 + $0x420] sm:$0xff]  ;;  %v9269_v6 = vcombine.low %v477_v57, %v481_v59 }
  0xd8   :  { %3487 = vmatprep.subr.bf16.mxu0 %v9214_v7  ;;  %3939 = vmatprep.subr.bf16.mxu1 %v9216_v8  ;;  %v9272_v1 = vcombine.high %v478_v60, %v482_v61  ;;  %v486_v4 = vld [vmem:[#allocation2 + $0x408] sm:$0xff]  ;;  %v165_v7 = vld [vmem:[%s13369_s0] sm:$0xff]  ;;  %v9271_v9 = vcombine.low %v478_v60, %v482_v61  ;;  %v9278_v10 = vcombine.high %v485_v2, %v489_v3 }
  0xd9   :  { %v490_v5 = vld [vmem:[#allocation2 + $0x428] sm:$0xff]  ;;  %v173_v8 = vld [vmem:[%s13369_s0 + $0x40] sm:$0xff]  ;;  %v9277_v19 = vcombine.low %v485_v2, %v489_v3 }
  0xda   :  { %v9280_v11 = vcombine.high %v486_v4, %v490_v5  ;;  %v493_v12 = vld [vmem:[#allocation2 + $0x440] sm:$0xff]  ;;  %v182_v17 = vld [vmem:[%s13369_s0 + $0x88] sm:$0xff]  ;;  %v9279_v20 = vcombine.low %v486_v4, %v490_v5 }
  0xdb   :  { %3488 = vmatpush1.bf16.msra.mxu0 %v9213_v13  ;;  %3940 = vmatpush1.bf16.msra.mxu1 %v9215_v14  ;;  %v497_v13 = vld [vmem:[#allocation2 + $0x460] sm:$0xff]  ;;  %v494_v14 = vld [vmem:[#allocation2 + $0x448] sm:$0xff] }
  0xdc   :  { %3489 = vmatprep.subr.bf16.mxu0 %v9222_v15  ;;  %3941 = vmatprep.subr.bf16.mxu1 %v9224_v16  ;;  %v11920_v15 = vpack.c.bf16 %v173_v8, %v165_v7  ;;  %v498_v16 = vld [vmem:[#allocation2 + $0x468] sm:$0xff]  ;;  %v505_v25 = vld [vmem:[#allocation2 + $0x4a0] sm:$0xff]  ;;  %v9285_v28 = vcombine.low %v493_v12, %v497_v13 }
  0xdd   :  { %v190_v18 = vld [vmem:[%s13369_s0 + $0xc8] sm:$0xff]  ;;  %v509_v34 = vld [vmem:[#allocation2 + $0x4c0] sm:$0xff] }
  0xde   :  { %v502_v26 = vld [vmem:[#allocation2 + $0x488] sm:$0xff]  ;;  %v513_v35 = vld [vmem:[#allocation2 + $0x4e0] sm:$0xff] }
  0xdf   :  { %3490 = vmatpush1.bf16.msra.mxu0 %v9221_v21  ;;  %3942 = vmatpush1.bf16.msra.mxu1 %v9223_v22  ;;  %v9286_v21 = vcombine.high %v493_v12, %v497_v13  ;;  %v9288_v22 = vcombine.high %v494_v14, %v498_v16  ;;  %v506_v27 = vld [vmem:[#allocation2 + $0x4a8] sm:$0xff]  ;;  %v9302_v43 = vcombine.high %v509_v34, %v513_v35  ;;  %v197_v51 = vld [vmem:[%s13369_s0 + $0x100] sm:$0xff] }
  0xe0   :  { %3491 = vmatprep.subr.bf16.mxu0 %v9230_v23  ;;  %3943 = vmatprep.subr.bf16.mxu1 %v9232_v24  ;;  %v11928_v23 = vpack.c.bf16 %v190_v18, %v182_v17  ;;  %v501_v24 = vld [vmem:[#allocation2 + $0x480] sm:$0xff]  ;;  %v9296_v33 = vcombine.high %v502_v26, %v506_v27  ;;  %v510_v36 = vld [vmem:[#allocation2 + $0x4c8] sm:$0xff]  ;;  %v9295_v42 = vcombine.low %v502_v26, %v506_v27 }
  0xe1   :  { %v9293_v41 = vcombine.low %v501_v24, %v505_v25  ;;  %v522_v49 = vld [vmem:[#allocation2 + $0x528] sm:$0xff]  ;;  %v9301_v50 = vcombine.low %v509_v34, %v513_v35  ;;  %v205_v52 = vld [vmem:[%s13369_s0 + $0x140] sm:$0xff] }
  0xe2   :  { %v529_v57 = vld [vmem:[#allocation2 + $0x560] sm:$0xff]  ;;  %v526_v59 = vld [vmem:[#allocation2 + $0x548] sm:$0xff]  ;;  %v11960_v60 = vpack.c.bf16 %v205_v52, %v197_v51 }
  0xe3   :  { %3492 = vmatpush1.bf16.msra.mxu0 %v9229_v29  ;;  %3944 = vmatpush1.bf16.msra.mxu1 %v9231_v30  ;;  %v181_v29 = vld [vmem:[%s13369_s0 + $0x80] sm:$0xff]  ;;  %v530_v61 = vld [vmem:[#allocation2 + $0x568] sm:$0xff] }
  0xe4   :  { %3493 = vmatprep.subr.bf16.mxu0 %v9238_v31  ;;  %3945 = vmatprep.subr.bf16.mxu1 %v9240_v32  ;;  %v189_v30 = vld [vmem:[%s13369_s0 + $0xc0] sm:$0xff]  ;;  %v9287_v31 = vcombine.low %v494_v14, %v498_v16  ;;  %v9294_v32 = vcombine.high %v501_v24, %v505_v25  ;;  %v9320_v3 = vcombine.high %v526_v59, %v530_v61  ;;  %v534_v7 = vld [vmem:[#allocation2 + $0x588] sm:$0xff] }
  0xe5   :  { %v533_v5 = vld [vmem:[#allocation2 + $0x580] sm:$0xff]  ;;  %v538_v8 = vld [vmem:[#allocation2 + $0x5a8] sm:$0xff]  ;;  %v9319_v12 = vcombine.low %v526_v59, %v530_v61 }
  0xe6   :  { %v9328_v14 = vcombine.high %v534_v7, %v538_v8  ;;  %v541_v16 = vld [vmem:[#allocation2 + $0x5c0] sm:$0xff]  ;;  %v542_v18 = vld [vmem:[#allocation2 + $0x5c8] sm:$0xff]  ;;  %v9327_v25 = vcombine.low %v534_v7, %v538_v8 }
  0xe7   :  { %3494 = vmatpush1.bf16.msra.mxu0 %v9237_v37  ;;  %3946 = vmatpush1.bf16.msra.mxu1 %v9239_v38  ;;  %v11940_v37 = vpack.c.bf16 %v189_v30, %v181_v29  ;;  %v514_v38 = vld [vmem:[#allocation2 + $0x4e8] sm:$0xff]  ;;  %v545_v17 = vld [vmem:[#allocation2 + $0x5e0] sm:$0xff] }
  0xe8   :  { %3495 = vmatprep.subr.bf16.mxu0 %v9246_v39  ;;  %3947 = vmatprep.subr.bf16.mxu1 %v9248_v40  ;;  %v198_v39 = vld [vmem:[%s13369_s0 + $0x108] sm:$0xff]  ;;  %v9304_v44 = vcombine.high %v510_v36, %v514_v38  ;;  %v9334_v26 = vcombine.high %v541_v16, %v545_v17  ;;  %v549_v29 = vld [vmem:[#allocation2 + $0x600] sm:$0xff] }
  0xe9   :  { %v206_v40 = vld [vmem:[%s13369_s0 + $0x148] sm:$0xff]  ;;  %v553_v30 = vld [vmem:[#allocation2 + $0x620] sm:$0xff] }
  0xea   :  { %v229_v34 = vld [vmem:[%s13369_s0 + $0x200] sm:$0xff]  ;;  %v262_v7 = vld [vmem:[%s13369_s0 + $0x308] sm:$0xff] }
  0xeb   :  { %3496 = vmatpush1.bf16.msra.mxu0 %v9245_v45  ;;  %3948 = vmatpush1.bf16.msra.mxu1 %v9247_v46  ;;  %v11948_v45 = vpack.c.bf16 %v206_v40, %v198_v39  ;;  %v517_v46 = vld [vmem:[#allocation2 + $0x500] sm:$0xff]  ;;  %v270_v8 = vld [vmem:[%s13369_s0 + $0x348] sm:$0xff] }
  0xec   :  { %3497 = vmatprep.subr.bf16.mxu0 %v9254_v47  ;;  %3949 = vmatprep.subr.bf16.mxu1 %v9256_v48  ;;  %v521_v47 = vld [vmem:[#allocation2 + $0x520] sm:$0xff]  ;;  %v518_v48 = vld [vmem:[#allocation2 + $0x508] sm:$0xff] }
  0xed   :  { %v237_v35 = vld [vmem:[%s13369_s0 + $0x240] sm:$0xff] }
  0xee   :  { %v557_v40 = vld [vmem:[#allocation2 + $0x640] sm:$0xff] }
  0xef   :  { %3498 = vmatpush1.bf16.msra.mxu0 %v9253_v53  ;;  %3950 = vmatpush1.bf16.msra.mxu1 %v9255_v54  ;;  %v9303_v53 = vcombine.low %v510_v36, %v514_v38  ;;  %v9310_v54 = vcombine.high %v517_v46, %v521_v47  ;;  %v9342_v38 = vcombine.high %v549_v29, %v553_v30  ;;  %v245_v59 = vld [vmem:[%s13369_s0 + $0x280] sm:$0xff] }
  0xf0   :  { %3499 = vmatprep.subr.bf16.mxu0 %v9262_v55  ;;  %3951 = vmatprep.subr.bf16.mxu1 %v9264_v56  ;;  %v9312_v55 = vcombine.high %v518_v48, %v522_v49  ;;  %v525_v56 = vld [vmem:[#allocation2 + $0x540] sm:$0xff] }
  0xf1   :  { %v9318_v2 = vcombine.high %v525_v56, %v529_v57  ;;  %v253_v61 = vld [vmem:[%s13369_s0 + $0x2c0] sm:$0xff] }
  0xf3   :  { %3500 = vmatpush1.bf16.msra.mxu0 %v9261_v62  ;;  %3952 = vmatpush1.bf16.msra.mxu1 %v9263_v63  ;;  %v214_v62 = vld [vmem:[%s13369_s0 + $0x188] sm:$0xff] }
  0xf4   :  { %3501 = vmatprep.subr.bf16.mxu0 %v9270_v0  ;;  %3953 = vmatprep.subr.bf16.mxu1 %v9272_v1  ;;  %v222_v63 = vld [vmem:[%s13369_s0 + $0x1c8] sm:$0xff]  ;;  %v9309_v0 = vcombine.low %v517_v46, %v521_v47  ;;  %v9311_v1 = vcombine.low %v518_v48, %v522_v49  ;;  %v9341_v48 = vcombine.low %v549_v29, %v553_v30 }
  0xf5   :  { %v11968_v4 = vpack.c.bf16 %v222_v63, %v214_v62  ;;  %v246_v46 = vld [vmem:[%s13369_s0 + $0x288] sm:$0xff] }
  0xf6   :  { %v254_v47 = vld [vmem:[%s13369_s0 + $0x2c8] sm:$0xff] }
  0xf7   :  { %3502 = vmatpush1.bf16.msra.mxu0 %v9269_v6  ;;  %3954 = vmatpush1.bf16.msra.mxu1 %v9271_v9  ;;  %v537_v6 = vld [vmem:[#allocation2 + $0x5a0] sm:$0xff]  ;;  %v9317_v9 = vcombine.low %v525_v56, %v529_v57  ;;  %v12008_v52 = vpack.c.bf16 %v254_v47, %v246_v46  ;;  %v570_v56 = vld [vmem:[#allocation2 + $0x6a8] sm:$0xff] }
  0xf8   :  { %3584 = vmatprep.subr.bf16.mxu0 %v9278_v10  ;;  %4036 = vmatprep.subr.bf16.mxu1 %v9280_v11  ;;  %v213_v10 = vld [vmem:[%s13369_s0 + $0x180] sm:$0xff]  ;;  %v9326_v13 = vcombine.high %v533_v5, %v537_v6  ;;  %v9325_v24 = vcombine.low %v533_v5, %v537_v6  ;;  %v12020_v5 = vpack.c.bf16 %v253_v61, %v245_v59  ;;  %v578_v6 = vld [vmem:[#allocation2 + $0x6e8] sm:$0xff]  ;;  %v176_v61 = vld [vmem:[%s13369_s0 + $0x58] sm:$0xff] }
  0xf9   :  { %v221_v11 = vld [vmem:[%s13369_s0 + $0x1c0] sm:$0xff]  ;;  %v590_v29 = vld [vmem:[#allocation2 + $0x748] sm:$0xff] }
  0xfa   :  { %3504 = vmatmul.mubr.bf16.vlgmr.msra.gmra.mrb[0].mxu0 %v11920_v15  ;;  %3956 = vmatmul.mubr.bf16.vlgmr.msra.gmra.mrb[0].mxu1 %v11920_v15  ;;  %v594_v30 = vld [vmem:[#allocation2 + $0x768] sm:$0xff]  ;;  %v601_v46 = vld [vmem:[#allocation2 + $0x7a0] sm:$0xff] }
  0xfb   :  { %3585 = vmatpush1.bf16.msra.mxu0 %v9277_v19  ;;  %4037 = vmatpush1.bf16.msra.mxu1 %v9279_v20  ;;  %v11980_v19 = vpack.c.bf16 %v221_v11, %v213_v10  ;;  %v546_v20 = vld [vmem:[#allocation2 + $0x5e8] sm:$0xff] }
  0xfc   :  { %3586 = vmatprep.subr.bf16.mxu0 %v9286_v21  ;;  %4038 = vmatprep.subr.bf16.mxu1 %v9288_v22  ;;  %v230_v21 = vld [vmem:[%s13369_s0 + $0x208] sm:$0xff]  ;;  %v9336_v27 = vcombine.high %v542_v18, %v546_v20  ;;  %v9335_v36 = vcombine.low %v542_v18, %v546_v20  ;;  %v269_v18 = vld [vmem:[%s13369_s0 + $0x340] sm:$0xff] }
  0xfd   :  { %3513 = vmatprep.mubr.bf16.mxu0 %v11928_v23  ;;  %3965 = vmatprep.mubr.bf16.mxu1 %v11928_v23  ;;  %v238_v22 = vld [vmem:[%s13369_s0 + $0x248] sm:$0xff] }
  0xfe   :  { %v582_v20 = vld [vmem:[#allocation2 + $0x708] sm:$0xff] }
  0xff   :  { %3587 = vmatpush1.bf16.msra.mxu0 %v9285_v28  ;;  %4039 = vmatpush1.bf16.msra.mxu1 %v9287_v31  ;;  %v11988_v28 = vpack.c.bf16 %v238_v22, %v230_v21  ;;  %v550_v31 = vld [vmem:[#allocation2 + $0x608] sm:$0xff] }
 0x100   :  { %3588 = vmatprep.subr.bf16.mxu0 %v9294_v32  ;;  %4040 = vmatprep.subr.bf16.mxu1 %v9296_v33  ;;  %v554_v32 = vld [vmem:[#allocation2 + $0x628] sm:$0xff]  ;;  %v9333_v33 = vcombine.low %v541_v16, %v545_v17  ;;  %v581_v16 = vld [vmem:[#allocation2 + $0x700] sm:$0xff] }
 0x101   :  { %v9344_v39 = vcombine.high %v550_v31, %v554_v32  ;;  %v9343_v49 = vcombine.low %v550_v31, %v554_v32  ;;  %v585_v17 = vld [vmem:[#allocation2 + $0x720] sm:$0xff]  ;;  %v586_v21 = vld [vmem:[#allocation2 + $0x728] sm:$0xff] }
 0x102   :  { %3514 = vmatmul.mubr.bf16.gmra.mrb[4].mxu0 %v11940_v37  ;;  %3966 = vmatmul.mubr.bf16.gmra.mrb[4].mxu1 %v11940_v37  ;;  %v278_v31 = vld [vmem:[%s13369_s0 + $0x388] sm:$0xff]  ;;  %v9376_v32 = vcombine.high %v582_v20, %v586_v21 }
 0x103   :  { %3589 = vmatpush1.bf16.msra.mxu0 %v9293_v41  ;;  %4041 = vmatpush1.bf16.msra.mxu1 %v9295_v42  ;;  %v561_v41 = vld [vmem:[#allocation2 + $0x660] sm:$0xff]  ;;  %v558_v42 = vld [vmem:[#allocation2 + $0x648] sm:$0xff] }
 0x104   :  { %3590 = vmatprep.subr.bf16.mxu0 %v9302_v43  ;;  %4042 = vmatprep.subr.bf16.mxu1 %v9304_v44  ;;  %v12000_v43 = vpack.c.bf16 %v237_v35, %v229_v34  ;;  %v562_v44 = vld [vmem:[#allocation2 + $0x668] sm:$0xff]  ;;  %v9349_v57 = vcombine.low %v557_v40, %v561_v41  ;;  %v9373_v35 = vcombine.low %v581_v16, %v585_v17 }
 0x105   :  { %3523 = vmatprep.mubr.bf16.mxu0 %v11948_v45  ;;  %3975 = vmatprep.mubr.bf16.mxu1 %v11948_v45  ;;  %v9352_v51 = vcombine.high %v558_v42, %v562_v44  ;;  %v9351_v62 = vcombine.low %v558_v42, %v562_v44  ;;  %v277_v42 = vld [vmem:[%s13369_s0 + $0x380] sm:$0xff]  ;;  %v598_v47 = vld [vmem:[#allocation2 + $0x788] sm:$0xff] }
 0x106   :  { %v285_v44 = vld [vmem:[%s13369_s0 + $0x3c0] sm:$0xff] }
 0x107   :  { %3591 = vmatpush1.bf16.msra.mxu0 %v9301_v50  ;;  %4043 = vmatpush1.bf16.msra.mxu1 %v9303_v53  ;;  %v9350_v50 = vcombine.high %v557_v40, %v561_v41  ;;  %v565_v53 = vld [vmem:[#allocation2 + $0x680] sm:$0xff]  ;;  %v9384_v40 = vcombine.high %v590_v29, %v594_v30 }
 0x108   :  { %3592 = vmatprep.subr.bf16.mxu0 %v9310_v54  ;;  %4044 = vmatprep.subr.bf16.mxu1 %v9312_v55  ;;  %v569_v54 = vld [vmem:[#allocation2 + $0x6a0] sm:$0xff]  ;;  %v566_v55 = vld [vmem:[#allocation2 + $0x688] sm:$0xff] }
 0x109   :  { %v9358_v63 = vcombine.high %v565_v53, %v569_v54  ;;  %v9359_v10 = vcombine.low %v566_v55, %v570_v56 }
 0x10a   :  { %3524 = vmatmul.mubr.bf16.gmra.mrb[8].mxu0 %v11960_v60  ;;  %3976 = vmatmul.mubr.bf16.gmra.mrb[8].mxu1 %v11960_v60 }
 0x10b   :  { %3593 = vmatpush1.bf16.msra.mxu0 %v9309_v0  ;;  %4045 = vmatpush1.bf16.msra.mxu1 %v9311_v1  ;;  %v9360_v0 = vcombine.high %v566_v55, %v570_v56  ;;  %v573_v1 = vld [vmem:[#allocation2 + $0x6c0] sm:$0xff]  ;;  %v606_v55 = vld [vmem:[#allocation2 + $0x7c8] sm:$0xff] }
 0x10c   :  { %3594 = vmatprep.subr.bf16.mxu0 %v9318_v2  ;;  %4046 = vmatprep.subr.bf16.mxu1 %v9320_v3  ;;  %v577_v2 = vld [vmem:[#allocation2 + $0x6e0] sm:$0xff]  ;;  %v574_v3 = vld [vmem:[#allocation2 + $0x6c8] sm:$0xff] }
 0x10d   :  { %3533 = vmatprep.mubr.bf16.mxu0 %v11968_v4  ;;  %3985 = vmatprep.mubr.bf16.mxu1 %v11968_v4  ;;  %v9366_v11 = vcombine.high %v573_v1, %v577_v2  ;;  %v9365_v22 = vcombine.low %v573_v1, %v577_v2  ;;  %v610_v56 = vld [vmem:[#allocation2 + $0x7e8] sm:$0xff]  ;;  %v613_v2 = vld [vmem:[#allocation2 + $0x800] sm:$0xff] }
 0x10f   :  { %3595 = vmatpush1.bf16.msra.mxu0 %v9317_v9  ;;  %4047 = vmatpush1.bf16.msra.mxu1 %v9319_v12  ;;  %v9357_v9 = vcombine.low %v565_v53, %v569_v54  ;;  %v9368_v12 = vcombine.high %v574_v3, %v578_v6  ;;  %v9383_v53 = vcombine.low %v590_v29, %v594_v30 }
 0x110   :  { %3596 = vmatprep.subr.bf16.mxu0 %v9326_v13  ;;  %4048 = vmatprep.subr.bf16.mxu1 %v9328_v14  ;;  %v12028_v13 = vpack.c.bf16 %v270_v8, %v262_v7  ;;  %v261_v14 = vld [vmem:[%s13369_s0 + $0x300] sm:$0xff]  ;;  %v167_v7 = vld [vmem:[%s13369_s0 + $0x10] sm:$0xff] }
 0x111   :  { %v12046_v34 = vpack.c.bf16 %v269_v18, %v261_v14  ;;  %v175_v8 = vld [vmem:[%s13369_s0 + $0x50] sm:$0xff]  ;;  %v621_v14 = vld [vmem:[#allocation2 + $0x840] sm:$0xff] }
 0x112   :  { %3534 = vmatmul.mubr.bf16.gmra.mrb[12].mxu0 %v11980_v19  ;;  %3986 = vmatmul.mubr.bf16.gmra.mrb[12].mxu1 %v11980_v19 }
 0x113   :  { %3597 = vmatpush1.bf16.msra.mxu0 %v9325_v24  ;;  %4049 = vmatpush1.bf16.msra.mxu1 %v9327_v25  ;;  %v589_v24 = vld [vmem:[#allocation2 + $0x740] sm:$0xff] }
 0x114   :  { %3598 = vmatprep.subr.bf16.mxu0 %v9334_v26  ;;  %4050 = vmatprep.subr.bf16.mxu1 %v9336_v27  ;;  %v593_v25 = vld [vmem:[#allocation2 + $0x760] sm:$0xff]  ;;  %v9367_v26 = vcombine.low %v574_v3, %v578_v6  ;;  %v9374_v27 = vcombine.high %v581_v16, %v585_v17  ;;  %v9400_v3 = vcombine.high %v606_v55, %v610_v56 }
 0x115   :  { %3543 = vmatprep.mubr.bf16.mxu0 %v11988_v28  ;;  %3995 = vmatprep.mubr.bf16.mxu1 %v11988_v28  ;;  %v625_v16 = vld [vmem:[#allocation2 + $0x860] sm:$0xff]  ;;  %v9399_v17 = vcombine.low %v606_v55, %v610_v56 }
 0x116   :  { %v9414_v30 = vcombine.high %v621_v14, %v625_v16 }
 0x117   :  { %3599 = vmatpush1.bf16.msra.mxu0 %v9333_v33  ;;  %4051 = vmatpush1.bf16.msra.mxu1 %v9335_v36  ;;  %v286_v33 = vld [vmem:[%s13369_s0 + $0x3c8] sm:$0xff]  ;;  %v9375_v36 = vcombine.low %v582_v20, %v586_v21 }
 0x118   :  { %3600 = vmatprep.subr.bf16.mxu0 %v9342_v38  ;;  %4052 = vmatprep.subr.bf16.mxu1 %v9344_v39  ;;  %v9382_v38 = vcombine.high %v589_v24, %v593_v25  ;;  %v597_v39 = vld [vmem:[#allocation2 + $0x780] sm:$0xff]  ;;  %v12048_v41 = vpack.c.bf16 %v286_v33, %v278_v31  ;;  %v622_v20 = vld [vmem:[#allocation2 + $0x848] sm:$0xff] }
 0x119   :  { %v9390_v54 = vcombine.high %v597_v39, %v601_v46  ;;  %v626_v21 = vld [vmem:[#allocation2 + $0x868] sm:$0xff]  ;;  %v629_v31 = vld [vmem:[#allocation2 + $0x880] sm:$0xff] }
 0x11a   :  { %3544 = vmatmul.mubr.bf16.gmra.mrb[16].mxu0 %v12000_v43  ;;  %3996 = vmatmul.mubr.bf16.gmra.mrb[16].mxu1 %v12000_v43 }
 0x11b   :  { %3601 = vmatpush1.bf16.msra.mxu0 %v9341_v48  ;;  %4053 = vmatpush1.bf16.msra.mxu1 %v9343_v49  ;;  %v602_v48 = vld [vmem:[#allocation2 + $0x7a8] sm:$0xff]  ;;  %v9381_v49 = vcombine.low %v589_v24, %v593_v25  ;;  %v192_v25 = vld [vmem:[%s13369_s0 + $0xd8] sm:$0xff] }
 0x11c   :  { %3602 = vmatprep.subr.bf16.mxu0 %v9350_v50  ;;  %4054 = vmatprep.subr.bf16.mxu1 %v9352_v51  ;;  %v605_v50 = vld [vmem:[#allocation2 + $0x7c0] sm:$0xff]  ;;  %v9392_v59 = vcombine.high %v598_v47, %v602_v48 }
 0x11d   :  { %3553 = vmatprep.mubr.bf16.mxu0 %v12008_v52  ;;  %4005 = vmatprep.mubr.bf16.mxu1 %v12008_v52  ;;  %v609_v51 = vld [vmem:[#allocation2 + $0x7e0] sm:$0xff] }
 0x11e   :  { %v9398_v1 = vcombine.high %v605_v50, %v609_v51 }
 0x11f   :  { %3603 = vmatpush1.bf16.msra.mxu0 %v9349_v57  ;;  %4055 = vmatpush1.bf16.msra.mxu1 %v9351_v62  ;;  %v168_v57 = vld [vmem:[%s13369_s0 + $0x18] sm:$0xff]  ;;  %v12066_v62 = vpack.c.bf16 %v285_v44, %v277_v42  ;;  %v9413_v42 = vcombine.low %v621_v14, %v625_v16  ;;  %v637_v44 = vld [vmem:[#allocation2 + $0x8c0] sm:$0xff]  ;;  %v654_v16 = vld [vmem:[#allocation2 + $0x948] sm:$0xff] }
 0x120   :  { %3604 = vmatprep.subr.bf16.mxu0 %v9358_v63  ;;  %4056 = vmatprep.subr.bf16.mxu1 %v9360_v0  ;;  %v9389_v63 = vcombine.low %v597_v39, %v601_v46  ;;  %v9391_v0 = vcombine.low %v598_v47, %v602_v48  ;;  %v12068_v6 = vpack.c.bf16 %v176_v61, %v168_v57  ;;  %v630_v39 = vld [vmem:[#allocation2 + $0x888] sm:$0xff]  ;;  %v641_v46 = vld [vmem:[#allocation2 + $0x8e0] sm:$0xff] }
 0x121   :  { %v9415_v47 = vcombine.low %v622_v20, %v626_v21  ;;  %v645_v61 = vld [vmem:[#allocation2 + $0x900] sm:$0xff] }
 0x122   :  { %3554 = vmatmul.mubr.bf16.gmra.mrb[20].mxu0 %v12020_v5  ;;  %4006 = vmatmul.mubr.bf16.gmra.mrb[20].mxu1 %v12020_v5 }
 0x123   :  { %3605 = vmatpush1.bf16.msra.mxu0 %v9357_v9  ;;  %4057 = vmatpush1.bf16.msra.mxu1 %v9359_v10  ;;  %v617_v9 = vld [vmem:[#allocation2 + $0x820] sm:$0xff]  ;;  %v614_v10 = vld [vmem:[#allocation2 + $0x808] sm:$0xff] }
 0x124   :  { %3606 = vmatprep.subr.bf16.mxu0 %v9366_v11  ;;  %4058 = vmatprep.subr.bf16.mxu1 %v9368_v12  ;;  %v618_v11 = vld [vmem:[#allocation2 + $0x828] sm:$0xff]  ;;  %v9397_v12 = vcombine.low %v605_v50, %v609_v51  ;;  %v9406_v18 = vcombine.high %v613_v2, %v617_v9  ;;  %v200_v51 = vld [vmem:[%s13369_s0 + $0x118] sm:$0xff] }
 0x125   :  { %3563 = vmatprep.mubr.bf16.mxu0 %v12028_v13  ;;  %4015 = vmatprep.mubr.bf16.mxu1 %v12028_v13  ;;  %v9408_v24 = vcombine.high %v614_v10, %v618_v11  ;;  %v9407_v29 = vcombine.low %v614_v10, %v618_v11  ;;  %v642_v50 = vld [vmem:[#allocation2 + $0x8e8] sm:$0xff]  ;;  %v653_v10 = vld [vmem:[#allocation2 + $0x940] sm:$0xff] }
 0x126   :  { %v657_v11 = vld [vmem:[#allocation2 + $0x960] sm:$0xff] }
 0x127   :  { %3607 = vmatpush1.bf16.msra.mxu0 %v9365_v22  ;;  %4059 = vmatpush1.bf16.msra.mxu1 %v9367_v26  ;;  %v184_v22 = vld [vmem:[%s13369_s0 + $0x98] sm:$0xff]  ;;  %v12086_v26 = vpack.c.bf16 %v175_v8, %v167_v7  ;;  %v646_v7 = vld [vmem:[#allocation2 + $0x908] sm:$0xff] }
 0x128   :  { %3608 = vmatprep.subr.bf16.mxu0 %v9374_v27  ;;  %4060 = vmatprep.subr.bf16.mxu1 %v9376_v32  ;;  %v9405_v27 = vcombine.low %v613_v2, %v617_v9  ;;  %v9416_v32 = vcombine.high %v622_v20, %v626_v21  ;;  %v12088_v33 = vpack.c.bf16 %v192_v25, %v184_v22  ;;  %v207_v2 = vld [vmem:[%s13369_s0 + $0x150] sm:$0xff]  ;;  %v650_v8 = vld [vmem:[#allocation2 + $0x928] sm:$0xff]  ;;  %v224_v21 = vld [vmem:[%s13369_s0 + $0x1d8] sm:$0xff] }
 0x129   :  { %v9429_v9 = vcombine.low %v637_v44, %v641_v46  ;;  %v9440_v20 = vcombine.high %v646_v7, %v650_v8  ;;  %v9439_v25 = vcombine.low %v646_v7, %v650_v8  ;;  %v681_v7 = vld [vmem:[#allocation2 + $0xa20] sm:$0xff]  ;;  %v678_v8 = vld [vmem:[#allocation2 + $0xa08] sm:$0xff] }
 0x12a   :  { %3564 = vmatmul.mubr.bf16.gmra.mrb[24].mxu0 %v12046_v34  ;;  %4016 = vmatmul.mubr.bf16.gmra.mrb[24].mxu1 %v12046_v34 }
 0x12b   :  { %3609 = vmatpush1.bf16.msra.mxu0 %v9373_v35  ;;  %4061 = vmatpush1.bf16.msra.mxu1 %v9375_v36  ;;  %v183_v35 = vld [vmem:[%s13369_s0 + $0x90] sm:$0xff] }
 0x12c   :  { %3610 = vmatprep.subr.bf16.mxu0 %v9382_v38  ;;  %4062 = vmatprep.subr.bf16.mxu1 %v9384_v40  ;;  %v191_v36 = vld [vmem:[%s13369_s0 + $0xd0] sm:$0xff]  ;;  %v633_v38 = vld [vmem:[#allocation2 + $0x8a0] sm:$0xff]  ;;  %v634_v40 = vld [vmem:[#allocation2 + $0x8a8] sm:$0xff] }
 0x12d   :  { %3573 = vmatprep.mubr.bf16.mxu0 %v12048_v41  ;;  %4025 = vmatprep.mubr.bf16.mxu1 %v12048_v41  ;;  %v9422_v48 = vcombine.high %v629_v31, %v633_v38  ;;  %v12106_v55 = vpack.c.bf16 %v191_v36, %v183_v35  ;;  %v9421_v56 = vcombine.low %v629_v31, %v633_v38  ;;  %v223_v35 = vld [vmem:[%s13369_s0 + $0x1d0] sm:$0xff]  ;;  %v665_v36 = vld [vmem:[#allocation2 + $0x9a0] sm:$0xff]  ;;  %v662_v38 = vld [vmem:[#allocation2 + $0x988] sm:$0xff] }
 0x12e   :  { %v9423_v57 = vcombine.low %v630_v39, %v634_v40 }
 0x12f   :  { %3611 = vmatpush1.bf16.msra.mxu0 %v9381_v49  ;;  %4063 = vmatpush1.bf16.msra.mxu1 %v9383_v53  ;;  %v638_v49 = vld [vmem:[#allocation2 + $0x8c8] sm:$0xff]  ;;  %v9424_v53 = vcombine.high %v630_v39, %v634_v40  ;;  %v9445_v40 = vcombine.low %v653_v10, %v657_v11 }
 0x130   :  { %3612 = vmatprep.subr.bf16.mxu0 %v9390_v54  ;;  %4064 = vmatprep.subr.bf16.mxu1 %v9392_v59  ;;  %v208_v54 = vld [vmem:[%s13369_s0 + $0x158] sm:$0xff]  ;;  %v9430_v59 = vcombine.high %v637_v44, %v641_v46  ;;  %v666_v39 = vld [vmem:[#allocation2 + $0x9a8] sm:$0xff]  ;;  %v673_v44 = vld [vmem:[#allocation2 + $0x9e0] sm:$0xff] }
 0x132   :  { %3574 = vmatmul.mubr.bf16.gmra.mrb[28].mxu0 %v12066_v62  ;;  %4026 = vmatmul.mubr.bf16.gmra.mrb[28].mxu1 %v12066_v62 }
 0x133   :  { %3613 = vmatpush1.bf16.msra.mxu0 %v9389_v63  ;;  %4065 = vmatpush1.bf16.msra.mxu1 %v9391_v0  ;;  %v9432_v63 = vcombine.high %v638_v49, %v642_v50  ;;  %v12108_v0 = vpack.c.bf16 %v208_v54, %v200_v51  ;;  %v9456_v51 = vcombine.high %v662_v38, %v666_v39 }
 0x134   :  { %3614 = vmatprep.subr.bf16.mxu0 %v9398_v1  ;;  %4066 = vmatprep.subr.bf16.mxu1 %v9400_v3  ;;  %v199_v1 = vld [vmem:[%s13369_s0 + $0x110] sm:$0xff]  ;;  %v649_v3 = vld [vmem:[#allocation2 + $0x920] sm:$0xff] }
 0x135   :  { %3616 = vmatprep.mubr.bf16.mxu0 %v12068_v6  ;;  %4068 = vmatprep.mubr.bf16.mxu1 %v12068_v6  ;;  %v9438_v14 = vcombine.high %v645_v61, %v649_v3  ;;  %v12126_v22 = vpack.c.bf16 %v207_v2, %v199_v1  ;;  %v231_v2 = vld [vmem:[%s13369_s0 + $0x210] sm:$0xff] }
 0x137   :  { %3615 = vmatpush1.bf16.msra.mxu0 %v9397_v12  ;;  %4067 = vmatpush1.bf16.msra.mxu1 %v9399_v17  ;;  %v9431_v12 = vcombine.low %v638_v49, %v642_v50  ;;  %v658_v17 = vld [vmem:[#allocation2 + $0x968] sm:$0xff]  ;;  %v232_v50 = vld [vmem:[%s13369_s0 + $0x218] sm:$0xff] }
 0x138   :  { %3697 = vmatprep.subr.bf16.mxu0 %v9406_v18  ;;  %4149 = vmatprep.subr.bf16.mxu1 %v9408_v24  ;;  %v216_v18 = vld [vmem:[%s13369_s0 + $0x198] sm:$0xff]  ;;  %v9437_v24 = vcombine.low %v645_v61, %v649_v3  ;;  %v9447_v46 = vcombine.low %v654_v16, %v658_v17  ;;  %v674_v49 = vld [vmem:[#allocation2 + $0x9e8] sm:$0xff]  ;;  %v677_v61 = vld [vmem:[#allocation2 + $0xa00] sm:$0xff] }
 0x139   :  { %v12128_v31 = vpack.c.bf16 %v224_v21, %v216_v18  ;;  %v239_v3 = vld [vmem:[%s13369_s0 + $0x250] sm:$0xff]  ;;  %v690_v18 = vld [vmem:[#allocation2 + $0xa68] sm:$0xff] }
 0x13a   :  { %3617 = vmatmul.mubr.bf16.vlgmr.msra.gmra.mrb[0].mxu0 %v12086_v26  ;;  %4069 = vmatmul.mubr.bf16.vlgmr.msra.gmra.mrb[0].mxu1 %v12086_v26 }
 0x13b   :  { %3698 = vmatpush1.bf16.msra.mxu0 %v9405_v27  ;;  %4150 = vmatpush1.bf16.msra.mxu1 %v9407_v29  ;;  %v9446_v27 = vcombine.high %v653_v10, %v657_v11  ;;  %v661_v29 = vld [vmem:[#allocation2 + $0x980] sm:$0xff] }
 0x13c   :  { %3699 = vmatprep.subr.bf16.mxu0 %v9414_v30  ;;  %4151 = vmatprep.subr.bf16.mxu1 %v9416_v32  ;;  %v9448_v30 = vcombine.high %v654_v16, %v658_v17  ;;  %v215_v32 = vld [vmem:[%s13369_s0 + $0x190] sm:$0xff]  ;;  %v685_v11 = vld [vmem:[#allocation2 + $0xa40] sm:$0xff]  ;;  %v9470_v16 = vcombine.high %v677_v61, %v681_v7  ;;  %v686_v17 = vld [vmem:[#allocation2 + $0xa48] sm:$0xff] }
 0x13d   :  { %3626 = vmatprep.mubr.bf16.mxu0 %v12088_v33  ;;  %4078 = vmatprep.mubr.bf16.mxu1 %v12088_v33  ;;  %v12146_v54 = vpack.c.bf16 %v223_v35, %v215_v32  ;;  %v693_v32 = vld [vmem:[#allocation2 + $0xa80] sm:$0xff]  ;;  %v9480_v35 = vcombine.high %v686_v17, %v690_v18 }
 0x13f   :  { %3700 = vmatpush1.bf16.msra.mxu0 %v9413_v42  ;;  %4152 = vmatpush1.bf16.msra.mxu1 %v9415_v47  ;;  %v669_v42 = vld [vmem:[#allocation2 + $0x9c0] sm:$0xff]  ;;  %v9454_v47 = vcombine.high %v661_v29, %v665_v36 }
 0x140   :  { %3701 = vmatprep.subr.bf16.mxu0 %v9422_v48  ;;  %4153 = vmatprep.subr.bf16.mxu1 %v9424_v53  ;;  %v670_v48 = vld [vmem:[#allocation2 + $0x9c8] sm:$0xff]  ;;  %v240_v53 = vld [vmem:[%s13369_s0 + $0x258] sm:$0xff]  ;;  %v9461_v10 = vcombine.low %v669_v42, %v673_v44 }
 0x141   :  { %v12148_v1 = vpack.c.bf16 %v240_v53, %v232_v50  ;;  %v706_v53 = vld [vmem:[#allocation2 + $0xae8] sm:$0xff] }
 0x142   :  { %3627 = vmatmul.mubr.bf16.gmra.mrb[4].mxu0 %v12106_v55  ;;  %4079 = vmatmul.mubr.bf16.gmra.mrb[4].mxu1 %v12106_v55 }
 0x143   :  { %3702 = vmatpush1.bf16.msra.mxu0 %v9421_v56  ;;  %4154 = vmatpush1.bf16.msra.mxu1 %v9423_v57  ;;  %v9453_v56 = vcombine.low %v661_v29, %v665_v36  ;;  %v9455_v57 = vcombine.low %v662_v38, %v666_v39  ;;  %v247_v38 = vld [vmem:[%s13369_s0 + $0x290] sm:$0xff] }
 0x144   :  { %3703 = vmatprep.subr.bf16.mxu0 %v9430_v59  ;;  %4155 = vmatprep.subr.bf16.mxu1 %v9432_v63  ;;  %v9462_v59 = vcombine.high %v669_v42, %v673_v44  ;;  %v9464_v63 = vcombine.high %v670_v48, %v674_v49  ;;  %v255_v39 = vld [vmem:[%s13369_s0 + $0x2d0] sm:$0xff]  ;;  %v694_v42 = vld [vmem:[#allocation2 + $0xa88] sm:$0xff] }
 0x145   :  { %3636 = vmatprep.mubr.bf16.mxu0 %v12108_v0  ;;  %4088 = vmatprep.mubr.bf16.mxu1 %v12108_v0  ;;  %v698_v44 = vld [vmem:[#allocation2 + $0xaa8] sm:$0xff] }
 0x147   :  { %3704 = vmatpush1.bf16.msra.mxu0 %v9429_v9  ;;  %4156 = vmatpush1.bf16.msra.mxu1 %v9431_v12  ;;  %v682_v9 = vld [vmem:[#allocation2 + $0xa28] sm:$0xff]  ;;  %v689_v12 = vld [vmem:[#allocation2 + $0xa60] sm:$0xff] }
 0x148   :  { %3705 = vmatprep.subr.bf16.mxu0 %v9438_v14  ;;  %4157 = vmatprep.subr.bf16.mxu1 %v9440_v20  ;;  %v9463_v14 = vcombine.low %v670_v48, %v674_v49  ;;  %v248_v20 = vld [vmem:[%s13369_s0 + $0x298] sm:$0xff]  ;;  %v9472_v21 = vcombine.high %v678_v8, %v682_v9  ;;  %v9471_v29 = vcombine.low %v678_v8, %v682_v9  ;;  %v705_v48 = vld [vmem:[#allocation2 + $0xae0] sm:$0xff] }
 0x149   :  { %v9479_v49 = vcombine.low %v686_v17, %v690_v18  ;;  %v717_v18 = vld [vmem:[#allocation2 + $0xb40] sm:$0xff] }
 0x14a   :  { %3637 = vmatmul.mubr.bf16.gmra.mrb[8].mxu0 %v12126_v22  ;;  %4089 = vmatmul.mubr.bf16.gmra.mrb[8].mxu1 %v12126_v22 }
 0x14b   :  { %3706 = vmatpush1.bf16.msra.mxu0 %v9437_v24  ;;  %4158 = vmatpush1.bf16.msra.mxu1 %v9439_v25  ;;  %v256_v24 = vld [vmem:[%s13369_s0 + $0x2d8] sm:$0xff]  ;;  %v12166_v25 = vpack.c.bf16 %v239_v3, %v231_v2  ;;  %v9487_v2 = vcombine.low %v694_v42, %v698_v44 }
 0x14c   :  { %3707 = vmatprep.subr.bf16.mxu0 %v9446_v27  ;;  %4159 = vmatprep.subr.bf16.mxu1 %v9448_v30  ;;  %v9469_v27 = vcombine.low %v677_v61, %v681_v7  ;;  %v9478_v30 = vcombine.high %v685_v11, %v689_v12  ;;  %v12168_v36 = vpack.c.bf16 %v256_v24, %v248_v20  ;;  %v709_v7 = vld [vmem:[#allocation2 + $0xb00] sm:$0xff] }
 0x14d   :  { %3646 = vmatprep.mubr.bf16.mxu0 %v12128_v31  ;;  %4098 = vmatprep.mubr.bf16.mxu1 %v12128_v31  ;;  %v12186_v61 = vpack.c.bf16 %v255_v39, %v247_v38  ;;  %v721_v20 = vld [vmem:[#allocation2 + $0xb60] sm:$0xff] }
 0x14f   :  { %3708 = vmatpush1.bf16.msra.mxu0 %v9445_v40  ;;  %4160 = vmatpush1.bf16.msra.mxu1 %v9447_v46  ;;  %v697_v40 = vld [vmem:[#allocation2 + $0xaa0] sm:$0xff]  ;;  %v9477_v46 = vcombine.low %v685_v11, %v689_v12  ;;  %v271_v11 = vld [vmem:[%s13369_s0 + $0x350] sm:$0xff] }
 0x150   :  { %3709 = vmatprep.subr.bf16.mxu0 %v9454_v47  ;;  %4161 = vmatprep.subr.bf16.mxu1 %v9456_v51  ;;  %v701_v47 = vld [vmem:[#allocation2 + $0xac0] sm:$0xff]  ;;  %v9486_v50 = vcombine.high %v693_v32, %v697_v40  ;;  %v702_v51 = vld [vmem:[#allocation2 + $0xac8] sm:$0xff] }
 0x151   :  { %v9494_v3 = vcombine.high %v701_v47, %v705_v48  ;;  %v9496_v8 = vcombine.high %v702_v51, %v706_v53  ;;  %v713_v12 = vld [vmem:[#allocation2 + $0xb20] sm:$0xff]  ;;  %v9493_v17 = vcombine.low %v701_v47, %v705_v48  ;;  %v279_v48 = vld [vmem:[%s13369_s0 + $0x390] sm:$0xff] }
 0x152   :  { %3647 = vmatmul.mubr.bf16.gmra.mrb[12].mxu0 %v12146_v54  ;;  %4099 = vmatmul.mubr.bf16.gmra.mrb[12].mxu1 %v12146_v54  ;;  %v9502_v24 = vcombine.high %v709_v7, %v713_v12  ;;  %v9501_v39 = vcombine.low %v709_v7, %v713_v12  ;;  %v738_v7 = vld [vmem:[#allocation2 + $0xbe8] sm:$0xff] }
 0x153   :  { %3710 = vmatpush1.bf16.msra.mxu0 %v9453_v56  ;;  %4162 = vmatpush1.bf16.msra.mxu1 %v9455_v57  ;;  %v264_v56 = vld [vmem:[%s13369_s0 + $0x318] sm:$0xff]  ;;  %v9488_v57 = vcombine.high %v694_v42, %v698_v44  ;;  %v9510_v42 = vcombine.high %v717_v18, %v721_v20  ;;  %v725_v44 = vld [vmem:[#allocation2 + $0xb80] sm:$0xff] }
 0x154   :  { %3711 = vmatprep.subr.bf16.mxu0 %v9462_v59  ;;  %4163 = vmatprep.subr.bf16.mxu1 %v9464_v63  ;;  %v272_v59 = vld [vmem:[%s13369_s0 + $0x358] sm:$0xff]  ;;  %v9485_v63 = vcombine.low %v693_v32, %v697_v40 }
 0x155   :  { %3656 = vmatprep.mubr.bf16.mxu0 %v12148_v1  ;;  %4108 = vmatprep.mubr.bf16.mxu1 %v12148_v1  ;;  %v12188_v9 = vpack.c.bf16 %v272_v59, %v264_v56  ;;  %v9509_v56 = vcombine.low %v717_v18, %v721_v20  ;;  %v737_v59 = vld [vmem:[#allocation2 + $0xbe0] sm:$0xff] }
 0x156   :  { %v741_v18 = vld [vmem:[#allocation2 + $0xc00] sm:$0xff] }
 0x157   :  { %3712 = vmatpush1.bf16.msra.mxu0 %v9461_v10  ;;  %4164 = vmatpush1.bf16.msra.mxu1 %v9463_v14  ;;  %v263_v10 = vld [vmem:[%s13369_s0 + $0x310] sm:$0xff]  ;;  %v710_v14 = vld [vmem:[#allocation2 + $0xb08] sm:$0xff] }
 0x158   :  { %3713 = vmatprep.subr.bf16.mxu0 %v9470_v16  ;;  %4165 = vmatprep.subr.bf16.mxu1 %v9472_v21  ;;  %v714_v16 = vld [vmem:[#allocation2 + $0xb28] sm:$0xff]  ;;  %v9495_v21 = vcombine.low %v702_v51, %v706_v53  ;;  %v12206_v38 = vpack.c.bf16 %v271_v11, %v263_v10 }
 0x159   :  { %v9504_v32 = vcombine.high %v710_v14, %v714_v16  ;;  %v9503_v40 = vcombine.low %v710_v14, %v714_v16  ;;  %v726_v51 = vld [vmem:[#allocation2 + $0xb88] sm:$0xff] }
 0x15a   :  { %3657 = vmatmul.mubr.bf16.gmra.mrb[16].mxu0 %v12166_v25  ;;  %4109 = vmatmul.mubr.bf16.gmra.mrb[16].mxu1 %v12166_v25  ;;  %v730_v53 = vld [vmem:[#allocation2 + $0xba8] sm:$0xff] }
 0x15b   :  { %3714 = vmatpush1.bf16.msra.mxu0 %v9469_v27  ;;  %4166 = vmatpush1.bf16.msra.mxu1 %v9471_v29  ;;  %v718_v27 = vld [vmem:[#allocation2 + $0xb48] sm:$0xff]  ;;  %v9520_v10 = vcombine.high %v726_v51, %v730_v53  ;;  %v9519_v16 = vcombine.low %v726_v51, %v730_v53 }
 0x15c   :  { %3715 = vmatprep.subr.bf16.mxu0 %v9478_v30  ;;  %4167 = vmatprep.subr.bf16.mxu1 %v9480_v35  ;;  %v722_v29 = vld [vmem:[#allocation2 + $0xb68] sm:$0xff]  ;;  %v280_v30 = vld [vmem:[%s13369_s0 + $0x398] sm:$0xff] }
 0x15d   :  { %3666 = vmatprep.mubr.bf16.mxu0 %v12168_v36  ;;  %4118 = vmatprep.mubr.bf16.mxu1 %v12168_v36  ;;  %v288_v35 = vld [vmem:[%s13369_s0 + $0x3d8] sm:$0xff]  ;;  %v178_v11 = vld [vmem:[%s13369_s0 + $0x68] sm:$0xff] }
 0x15e   :  { %v12208_v47 = vpack.c.bf16 %v288_v35, %v280_v30  ;;  %v742_v30 = vld [vmem:[#allocation2 + $0xc08] sm:$0xff] }
 0x15f   :  { %3716 = vmatpush1.bf16.msra.mxu0 %v9477_v46  ;;  %4168 = vmatpush1.bf16.msra.mxu1 %v9479_v49  ;;  %v9512_v46 = vcombine.high %v718_v27, %v722_v29  ;;  %v287_v49 = vld [vmem:[%s13369_s0 + $0x3d0] sm:$0xff]  ;;  %v194_v51 = vld [vmem:[%s13369_s0 + $0xe8] sm:$0xff] }
 0x160   :  { %3717 = vmatprep.subr.bf16.mxu0 %v9486_v50  ;;  %4169 = vmatprep.subr.bf16.mxu1 %v9488_v57  ;;  %v729_v50 = vld [vmem:[#allocation2 + $0xba0] sm:$0xff]  ;;  %v12226_v12 = vpack.c.bf16 %v287_v49, %v279_v48  ;;  %v754_v48 = vld [vmem:[#allocation2 + $0xc68] sm:$0xff] }
 0x161   :  { %v733_v57 = vld [vmem:[#allocation2 + $0xbc0] sm:$0xff]  ;;  %v9517_v14 = vcombine.low %v725_v44, %v729_v50  ;;  %v186_v49 = vld [vmem:[%s13369_s0 + $0xa8] sm:$0xff] }
 0x162   :  { %3667 = vmatmul.mubr.bf16.gmra.mrb[20].mxu0 %v12186_v61  ;;  %4119 = vmatmul.mubr.bf16.gmra.mrb[20].mxu1 %v12186_v61  ;;  %v9525_v35 = vcombine.low %v733_v57, %v737_v59 }
 0x163   :  { %3718 = vmatpush1.bf16.msra.mxu0 %v9485_v63  ;;  %4170 = vmatpush1.bf16.msra.mxu1 %v9487_v2  ;;  %v9511_v63 = vcombine.low %v718_v27, %v722_v29  ;;  %v9518_v2 = vcombine.high %v725_v44, %v729_v50  ;;  %v177_v27 = vld [vmem:[%s13369_s0 + $0x60] sm:$0xff] }
 0x164   :  { %3719 = vmatprep.subr.bf16.mxu0 %v9494_v3  ;;  %4171 = vmatprep.subr.bf16.mxu1 %v9496_v8  ;;  %v734_v3 = vld [vmem:[#allocation2 + $0xbc8] sm:$0xff]  ;;  %v745_v29 = vld [vmem:[#allocation2 + $0xc20] sm:$0xff] }
 0x165   :  { %3676 = vmatprep.mubr.bf16.mxu0 %v12188_v9  ;;  %4128 = vmatprep.mubr.bf16.mxu1 %v12188_v9  ;;  %v170_v8 = vld [vmem:[%s13369_s0 + $0x28] sm:$0xff]  ;;  %v9528_v20 = vcombine.high %v734_v3, %v738_v7  ;;  %v9534_v44 = vcombine.high %v741_v18, %v745_v29 }
 0x167   :  { %3720 = vmatpush1.bf16.msra.mxu0 %v9493_v17  ;;  %4172 = vmatpush1.bf16.msra.mxu1 %v9495_v21  ;;  %v9526_v17 = vcombine.high %v733_v57, %v737_v59  ;;  %v12228_v21 = vpack.c.bf16 %v178_v11, %v170_v8  ;;  %v12248_v8 = vpack.c.bf16 %v194_v51, %v186_v49  ;;  %v193_v11 = vld [vmem:[%s13369_s0 + $0xe0] sm:$0xff]  ;;  %v774_v49 = vld [vmem:[#allocation2 + $0xd08] sm:$0xff] }
 0x168   :  { %3721 = vmatprep.subr.bf16.mxu0 %v9502_v24  ;;  %4173 = vmatprep.subr.bf16.mxu1 %v9504_v32  ;;  %v169_v24 = vld [vmem:[%s13369_s0 + $0x20] sm:$0xff]  ;;  %v746_v32 = vld [vmem:[#allocation2 + $0xc28] sm:$0xff] }
 0x169   :  { %v9536_v50 = vcombine.high %v742_v30, %v746_v32  ;;  %v12246_v53 = vpack.c.bf16 %v177_v27, %v169_v24  ;;  %v9535_v57 = vcombine.low %v742_v30, %v746_v32  ;;  %v766_v27 = vld [vmem:[#allocation2 + $0xcc8] sm:$0xff] }
 0x16a   :  { %3677 = vmatmul.mubr.bf16.gmra.mrb[24].mxu0 %v12206_v38  ;;  %4129 = vmatmul.mubr.bf16.gmra.mrb[24].mxu1 %v12206_v38  ;;  %v202_v30 = vld [vmem:[%s13369_s0 + $0x128] sm:$0xff] }
 0x16b   :  { %3722 = vmatpush1.bf16.msra.mxu0 %v9501_v39  ;;  %4174 = vmatpush1.bf16.msra.mxu1 %v9503_v40  ;;  %v749_v39 = vld [vmem:[#allocation2 + $0xc40] sm:$0xff] }
 0x16c   :  { %3723 = vmatprep.subr.bf16.mxu0 %v9510_v42  ;;  %4175 = vmatprep.subr.bf16.mxu1 %v9512_v46  ;;  %v753_v40 = vld [vmem:[#allocation2 + $0xc60] sm:$0xff]  ;;  %v9527_v42 = vcombine.low %v734_v3, %v738_v7  ;;  %v750_v46 = vld [vmem:[#allocation2 + $0xc48] sm:$0xff] }
 0x16d   :  { %3686 = vmatprep.mubr.bf16.mxu0 %v12208_v47  ;;  %4138 = vmatprep.mubr.bf16.mxu1 %v12208_v47  ;;  %v9542_v59 = vcombine.high %v749_v39, %v753_v40  ;;  %v758_v3 = vld [vmem:[#allocation2 + $0xc88] sm:$0xff]  ;;  %v9544_v7 = vcombine.high %v750_v46, %v754_v48 }
 0x16f   :  { %3724 = vmatpush1.bf16.msra.mxu0 %v9509_v56  ;;  %4176 = vmatpush1.bf16.msra.mxu1 %v9511_v63  ;;  %v9533_v56 = vcombine.low %v741_v18, %v745_v29  ;;  %v757_v63 = vld [vmem:[#allocation2 + $0xc80] sm:$0xff]  ;;  %v770_v29 = vld [vmem:[#allocation2 + $0xce8] sm:$0xff] }
 0x170   :  { %3725 = vmatprep.subr.bf16.mxu0 %v9518_v2  ;;  %4177 = vmatprep.subr.bf16.mxu1 %v9520_v10  ;;  %v761_v2 = vld [vmem:[#allocation2 + $0xca0] sm:$0xff] }
 0x171   :  { %v185_v10 = vld [vmem:[%s13369_s0 + $0xa0] sm:$0xff]  ;;  %v9550_v24 = vcombine.high %v757_v63, %v761_v2 }
 0x172   :  { %3687 = vmatmul.mubr.bf16.gmra.mrb[28].mxu0 %v12226_v12  ;;  %4139 = vmatmul.mubr.bf16.gmra.mrb[28].mxu1 %v12226_v12  ;;  %v769_v18 = vld [vmem:[#allocation2 + $0xce0] sm:$0xff] }
 0x173   :  { %3726 = vmatpush1.bf16.msra.mxu0 %v9517_v14  ;;  %4178 = vmatpush1.bf16.msra.mxu1 %v9519_v16  ;;  %v762_v14 = vld [vmem:[#allocation2 + $0xca8] sm:$0xff]  ;;  %v9541_v16 = vcombine.low %v749_v39, %v753_v40  ;;  %v12266_v39 = vpack.c.bf16 %v193_v11, %v185_v10  ;;  %v9549_v40 = vcombine.low %v757_v63, %v761_v2  ;;  %v781_v2 = vld [vmem:[#allocation2 + $0xd40] sm:$0xff] }
 0x174   :  { %3727 = vmatprep.subr.bf16.mxu0 %v9526_v17  ;;  %4179 = vmatprep.subr.bf16.mxu1 %v9528_v20  ;;  %v765_v17 = vld [vmem:[#allocation2 + $0xcc0] sm:$0xff]  ;;  %v9543_v20 = vcombine.low %v750_v46, %v754_v48  ;;  %v9552_v32 = vcombine.high %v758_v3, %v762_v14  ;;  %v782_v11 = vld [vmem:[#allocation2 + $0xd48] sm:$0xff] }
 0x175   :  { %3729 = vmatprep.mubr.bf16.mxu0 %v12228_v21  ;;  %4181 = vmatprep.mubr.bf16.mxu1 %v12228_v21  ;;  %v773_v46 = vld [vmem:[#allocation2 + $0xd00] sm:$0xff]  ;;  %v9557_v63 = vcombine.low %v765_v17, %v769_v18 }
 0x176   :  { %v777_v48 = vld [vmem:[#allocation2 + $0xd20] sm:$0xff] }
 0x177   :  { %3728 = vmatpush1.bf16.msra.mxu0 %v9525_v35  ;;  %4180 = vmatpush1.bf16.msra.mxu1 %v9527_v42  ;;  %v210_v35 = vld [vmem:[%s13369_s0 + $0x168] sm:$0xff]  ;;  %v9551_v42 = vcombine.low %v758_v3, %v762_v14  ;;  %v785_v3 = vld [vmem:[#allocation2 + $0xd60] sm:$0xff]  ;;  %v9566_v10 = vcombine.high %v773_v46, %v777_v48 }
 0x178   :  { %3810 = vmatprep.subr.bf16.mxu0 %v9534_v44  ;;  %4262 = vmatprep.subr.bf16.mxu1 %v9536_v50  ;;  %v9558_v44 = vcombine.high %v765_v17, %v769_v18  ;;  %v9560_v50 = vcombine.high %v766_v27, %v770_v29  ;;  %v12268_v51 = vpack.c.bf16 %v210_v35, %v202_v30  ;;  %v786_v14 = vld [vmem:[#allocation2 + $0xd68] sm:$0xff]  ;;  %v789_v30 = vld [vmem:[#allocation2 + $0xd80] sm:$0xff] }
 0x179   :  { %v226_v17 = vld [vmem:[%s13369_s0 + $0x1e8] sm:$0xff] }
 0x17a   :  { %3730 = vmatmul.mubr.bf16.vlgmr.msra.gmra.mrb[0].mxu0 %v12246_v53  ;;  %4182 = vmatmul.mubr.bf16.vlgmr.msra.gmra.mrb[0].mxu1 %v12246_v53  ;;  %v790_v35 = vld [vmem:[#allocation2 + $0xd88] sm:$0xff] }
 0x17b   :  { %3811 = vmatpush1.bf16.msra.mxu0 %v9533_v56  ;;  %4263 = vmatpush1.bf16.msra.mxu1 %v9535_v57  ;;  %v201_v56 = vld [vmem:[%s13369_s0 + $0x120] sm:$0xff] }
 0x17c   :  { %3812 = vmatprep.subr.bf16.mxu0 %v9542_v59  ;;  %4264 = vmatprep.subr.bf16.mxu1 %v9544_v7  ;;  %v209_v57 = vld [vmem:[%s13369_s0 + $0x160] sm:$0xff]  ;;  %v778_v59 = vld [vmem:[#allocation2 + $0xd28] sm:$0xff]  ;;  %v9559_v7 = vcombine.low %v766_v27, %v770_v29  ;;  %v9574_v29 = vcombine.high %v781_v2, %v785_v3 }
 0x17d   :  { %3739 = vmatprep.mubr.bf16.mxu0 %v12248_v8  ;;  %4191 = vmatprep.mubr.bf16.mxu1 %v12248_v8  ;;  %v12286_v18 = vpack.c.bf16 %v209_v57, %v201_v56  ;;  %v9567_v27 = vcombine.low %v774_v49, %v778_v59  ;;  %v801_v56 = vld [vmem:[#allocation2 + $0xde0] sm:$0xff]  ;;  %v9575_v57 = vcombine.low %v782_v11, %v786_v14 }
 0x17f   :  { %3813 = vmatpush1.bf16.msra.mxu0 %v9541_v16  ;;  %4265 = vmatpush1.bf16.msra.mxu1 %v9543_v20  ;;  %v218_v16 = vld [vmem:[%s13369_s0 + $0x1a8] sm:$0xff]  ;;  %v9568_v20 = vcombine.high %v774_v49, %v778_v59  ;;  %13427 = vst [vmem:[#allocation24_spill] sm:$0xff] %v12286_v18  ;;  %v797_v49 = vld [vmem:[#allocation2 + $0xdc0] sm:$0xff] }
 0x180   :  { %3814 = vmatprep.subr.bf16.mxu0 %v9550_v24  ;;  %4266 = vmatprep.subr.bf16.mxu1 %v9552_v32  ;;  %v9565_v24 = vcombine.low %v773_v46, %v777_v48  ;;  %v793_v32 = vld [vmem:[#allocation2 + $0xda0] sm:$0xff]  ;;  %v794_v46 = vld [vmem:[#allocation2 + $0xda8] sm:$0xff]  ;;  %v9573_v48 = vcombine.low %v781_v2, %v785_v3 }
 0x181   :  { %v9582_v59 = vcombine.high %v789_v30, %v793_v32  ;;  %v242_v2 = vld [vmem:[%s13369_s0 + $0x268] sm:$0xff] }
 0x182   :  { %3740 = vmatmul.mubr.bf16.gmra.mrb[4].mxu0 %v12266_v39  ;;  %4192 = vmatmul.mubr.bf16.gmra.mrb[4].mxu1 %v12266_v39 }
 0x183   :  { %3815 = vmatpush1.bf16.msra.mxu0 %v9549_v40  ;;  %4267 = vmatpush1.bf16.msra.mxu1 %v9551_v42  ;;  %v9576_v40 = vcombine.high %v782_v11, %v786_v14  ;;  %v12288_v42 = vpack.c.bf16 %v226_v17, %v218_v16  ;;  %v9584_v16 = vcombine.high %v790_v35, %v794_v46  ;;  %v805_v17 = vld [vmem:[#allocation2 + $0xe00] sm:$0xff] }
 0x184   :  { %3816 = vmatprep.subr.bf16.mxu0 %v9558_v44  ;;  %4268 = vmatprep.subr.bf16.mxu1 %v9560_v50  ;;  %v217_v44 = vld [vmem:[%s13369_s0 + $0x1a0] sm:$0xff]  ;;  %v9581_v11 = vcombine.low %v789_v30, %v793_v32  ;;  %v9583_v14 = vcombine.low %v790_v35, %v794_v46  ;;  %v810_v30 = vld [vmem:[#allocation2 + $0xe28] sm:$0xff]  ;;  %v9589_v32 = vcombine.low %v797_v49, %v801_v56 }
 0x185   :  { %3749 = vmatprep.mubr.bf16.mxu0 %v12268_v51  ;;  %4201 = vmatprep.mubr.bf16.mxu1 %v12268_v51  ;;  %13428 = vst [vmem:[#allocation25_spill] sm:$0xff] %v12288_v42  ;;  %v225_v50 = vld [vmem:[%s13369_s0 + $0x1e0] sm:$0xff] }
 0x186   :  { %v12306_v3 = vpack.c.bf16 %v225_v50, %v217_v44  ;;  %v241_v44 = vld [vmem:[%s13369_s0 + $0x260] sm:$0xff] }
 0x187   :  { %3817 = vmatpush1.bf16.msra.mxu0 %v9557_v63  ;;  %4269 = vmatpush1.bf16.msra.mxu1 %v9559_v7  ;;  %v798_v63 = vld [vmem:[#allocation2 + $0xdc8] sm:$0xff]  ;;  %v813_v35 = vld [vmem:[#allocation2 + $0xe40] sm:$0xff] }
 0x188   :  { %3818 = vmatprep.subr.bf16.mxu0 %v9566_v10  ;;  %4270 = vmatprep.subr.bf16.mxu1 %v9568_v20  ;;  %v802_v7 = vld [vmem:[#allocation2 + $0xde8] sm:$0xff]  ;;  %13429 = vst [vmem:[#allocation26_spill] sm:$0xff] %v12306_v3  ;;  %v9590_v20 = vcombine.high %v797_v49, %v801_v56  ;;  %v817_v50 = vld [vmem:[#allocation2 + $0xe60] sm:$0xff] }
 0x189   :  { %v234_v10 = vld [vmem:[%s13369_s0 + $0x228] sm:$0xff]  ;;  %v9591_v46 = vcombine.low %v798_v63, %v802_v7 }
 0x18a   :  { %3750 = vmatmul.mubr.bf16.gmra.mrb[8].mxu0 %v12286_v18  ;;  %4202 = vmatmul.mubr.bf16.gmra.mrb[8].mxu1 %v12286_v18  ;;  %v233_v18 = vld [vmem:[%s13369_s0 + $0x220] sm:$0xff]  ;;  %v258_v49 = vld [vmem:[%s13369_s0 + $0x2e8] sm:$0xff] }
 0x18b   :  { %3819 = vmatpush1.bf16.msra.mxu0 %v9565_v24  ;;  %4271 = vmatpush1.bf16.msra.mxu1 %v9567_v27  ;;  %v809_v24 = vld [vmem:[#allocation2 + $0xe20] sm:$0xff]  ;;  %v806_v27 = vld [vmem:[#allocation2 + $0xe08] sm:$0xff]  ;;  %v12326_v56 = vpack.c.bf16 %v241_v44, %v233_v18 }
 0x18c   :  { %3820 = vmatprep.subr.bf16.mxu0 %v9574_v29  ;;  %4272 = vmatprep.subr.bf16.mxu1 %v9576_v40  ;;  %v9592_v29 = vcombine.high %v798_v63, %v802_v7  ;;  %v12308_v40 = vpack.c.bf16 %v242_v2, %v234_v10  ;;  %v250_v10 = vld [vmem:[%s13369_s0 + $0x2a8] sm:$0xff]  ;;  %v9597_v63 = vcombine.low %v805_v17, %v809_v24  ;;  %v257_v18 = vld [vmem:[%s13369_s0 + $0x2e0] sm:$0xff] }
 0x18d   :  { %3759 = vmatprep.mubr.bf16.mxu0 %v12288_v42  ;;  %4211 = vmatprep.mubr.bf16.mxu1 %v12288_v42  ;;  %13431 = vst [vmem:[#allocation28_spill] sm:$0xff] %v12326_v56  ;;  %v9599_v7 = vcombine.low %v806_v27, %v810_v30  ;;  %v9606_v2 = vcombine.high %v813_v35, %v817_v50  ;;  %v249_v42 = vld [vmem:[%s13369_s0 + $0x2a0] sm:$0xff] }
 0x18e   :  { %13430 = vst [vmem:[#allocation27_spill] sm:$0xff] %v12308_v40  ;;  %v833_v44 = vld [vmem:[#allocation2 + $0xee0] sm:$0xff] }
 0x18f   :  { %3821 = vmatpush1.bf16.msra.mxu0 %v9573_v48  ;;  %4273 = vmatpush1.bf16.msra.mxu1 %v9575_v57  ;;  %v9598_v48 = vcombine.high %v805_v17, %v809_v24  ;;  %v814_v57 = vld [vmem:[#allocation2 + $0xe48] sm:$0xff]  ;;  %v9605_v24 = vcombine.low %v813_v35, %v817_v50  ;;  %v12346_v50 = vpack.c.bf16 %v257_v18, %v249_v42  ;;  %v273_v42 = vld [vmem:[%s13369_s0 + $0x360] sm:$0xff] }
 0x190   :  { %3822 = vmatprep.subr.bf16.mxu0 %v9582_v59  ;;  %4274 = vmatprep.subr.bf16.mxu1 %v9584_v16  ;;  %v818_v59 = vld [vmem:[#allocation2 + $0xe68] sm:$0xff]  ;;  %v9600_v16 = vcombine.high %v806_v27, %v810_v30  ;;  %v829_v27 = vld [vmem:[#allocation2 + $0xec0] sm:$0xff] }
 0x191   :  { %v826_v17 = vld [vmem:[#allocation2 + $0xea8] sm:$0xff]  ;;  %v9607_v30 = vcombine.low %v814_v57, %v818_v59  ;;  %13433 = vst [vmem:[#allocation30_spill] sm:$0xff] %v12346_v50  ;;  %v849_v18 = vld [vmem:[#allocation2 + $0xf60] sm:$0xff] }
 0x192   :  { %3760 = vmatmul.mubr.bf16.gmra.mrb[12].mxu0 %v12306_v3  ;;  %4212 = vmatmul.mubr.bf16.gmra.mrb[12].mxu1 %v12306_v3  ;;  %v12328_v3 = vpack.c.bf16 %v258_v49, %v250_v10  ;;  %v266_v10 = vld [vmem:[%s13369_s0 + $0x328] sm:$0xff]  ;;  %v9622_v49 = vcombine.high %v829_v27, %v833_v44 }
 0x193   :  { %3823 = vmatpush1.bf16.msra.mxu0 %v9581_v11  ;;  %4275 = vmatpush1.bf16.msra.mxu1 %v9583_v14  ;;  %v821_v11 = vld [vmem:[#allocation2 + $0xe80] sm:$0xff]  ;;  %v274_v35 = vld [vmem:[%s13369_s0 + $0x368] sm:$0xff] }
 0x194   :  { %3824 = vmatprep.subr.bf16.mxu0 %v9590_v20  ;;  %4276 = vmatprep.subr.bf16.mxu1 %v9592_v29  ;;  %v825_v14 = vld [vmem:[#allocation2 + $0xea0] sm:$0xff]  ;;  %v822_v20 = vld [vmem:[#allocation2 + $0xe88] sm:$0xff]  ;;  %v9608_v29 = vcombine.high %v814_v57, %v818_v59  ;;  %13432 = vst [vmem:[#allocation29_spill] sm:$0xff] %v12328_v3 }
 0x195   :  { %3769 = vmatprep.mubr.bf16.mxu0 %v12308_v40  ;;  %4221 = vmatprep.mubr.bf16.mxu1 %v12308_v40  ;;  %v9613_v57 = vcombine.low %v821_v11, %v825_v14  ;;  %v9615_v59 = vcombine.low %v822_v20, %v826_v17  ;;  %v265_v40 = vld [vmem:[%s13369_s0 + $0x320] sm:$0xff] }
 0x197   :  { %3825 = vmatpush1.bf16.msra.mxu0 %v9589_v32  ;;  %4277 = vmatpush1.bf16.msra.mxu1 %v9591_v46  ;;  %v9614_v32 = vcombine.high %v821_v11, %v825_v14  ;;  %v830_v46 = vld [vmem:[#allocation2 + $0xec8] sm:$0xff]  ;;  %v9621_v14 = vcombine.low %v829_v27, %v833_v44  ;;  %v12366_v44 = vpack.c.bf16 %v273_v42, %v265_v40  ;;  %v289_v40 = vld [vmem:[%s13369_s0 + $0x3e0] sm:$0xff] }
 0x198   :  { %3826 = vmatprep.subr.bf16.mxu0 %v9598_v48  ;;  %4278 = vmatprep.subr.bf16.mxu1 %v9600_v16  ;;  %v834_v48 = vld [vmem:[#allocation2 + $0xee8] sm:$0xff]  ;;  %v9616_v16 = vcombine.high %v822_v20, %v826_v17  ;;  %v845_v20 = vld [vmem:[#allocation2 + $0xf40] sm:$0xff] }
 0x199   :  { %v842_v11 = vld [vmem:[#allocation2 + $0xf28] sm:$0xff]  ;;  %v9623_v17 = vcombine.low %v830_v46, %v834_v48  ;;  %13435 = vst [vmem:[#allocation32_spill] sm:$0xff] %v12366_v44  ;;  %v865_v42 = vld [vmem:[#allocation2 + $0xfe0] sm:$0xff] }
 0x19a   :  { %3770 = vmatmul.mubr.bf16.gmra.mrb[16].mxu0 %v12326_v56  ;;  %4222 = vmatmul.mubr.bf16.gmra.mrb[16].mxu1 %v12326_v56  ;;  %v12348_v56 = vpack.c.bf16 %v274_v35, %v266_v10  ;;  %v282_v10 = vld [vmem:[%s13369_s0 + $0x3a8] sm:$0xff]  ;;  %v9638_v35 = vcombine.high %v845_v20, %v849_v18 }
 0x19b   :  { %3827 = vmatpush1.bf16.msra.mxu0 %v9597_v63  ;;  %4279 = vmatpush1.bf16.msra.mxu1 %v9599_v7  ;;  %v837_v63 = vld [vmem:[#allocation2 + $0xf00] sm:$0xff]  ;;  %v290_v27 = vld [vmem:[%s13369_s0 + $0x3e8] sm:$0xff] }
 0x19c   :  { %3828 = vmatprep.subr.bf16.mxu0 %v9606_v2  ;;  %4280 = vmatprep.subr.bf16.mxu1 %v9608_v29  ;;  %v841_v7 = vld [vmem:[#allocation2 + $0xf20] sm:$0xff]  ;;  %v838_v2 = vld [vmem:[#allocation2 + $0xf08] sm:$0xff]  ;;  %v9624_v29 = vcombine.high %v830_v46, %v834_v48  ;;  %13434 = vst [vmem:[#allocation31_spill] sm:$0xff] %v12348_v56 }
 0x19d   :  { %3779 = vmatprep.mubr.bf16.mxu0 %v12328_v3  ;;  %4231 = vmatprep.mubr.bf16.mxu1 %v12328_v3  ;;  %v9629_v46 = vcombine.low %v837_v63, %v841_v7  ;;  %v9631_v48 = vcombine.low %v838_v2, %v842_v11  ;;  %v281_v3 = vld [vmem:[%s13369_s0 + $0x3a0] sm:$0xff] }
 0x19f   :  { %3829 = vmatpush1.bf16.msra.mxu0 %v9605_v24  ;;  %4281 = vmatpush1.bf16.msra.mxu1 %v9607_v30  ;;  %v9630_v24 = vcombine.high %v837_v63, %v841_v7  ;;  %v846_v30 = vld [vmem:[#allocation2 + $0xf48] sm:$0xff]  ;;  %v9637_v7 = vcombine.low %v845_v20, %v849_v18  ;;  %v180_v20 = vld [vmem:[%s13369_s0 + $0x78] sm:$0xff]  ;;  %v12386_v18 = vpack.c.bf16 %v289_v40, %v281_v3  ;;  %v179_v3 = vld [vmem:[%s13369_s0 + $0x70] sm:$0xff] }
 0x1a0   :  { %3830 = vmatprep.subr.bf16.mxu0 %v9614_v32  ;;  %4282 = vmatprep.subr.bf16.mxu1 %v9616_v16  ;;  %v850_v32 = vld [vmem:[#allocation2 + $0xf68] sm:$0xff]  ;;  %v9632_v16 = vcombine.high %v838_v2, %v842_v11  ;;  %v861_v2 = vld [vmem:[#allocation2 + $0xfc0] sm:$0xff]  ;;  %v371_v40 = vld [vmem:[#allocation2 + $0x70] sm:$0xff] }
 0x1a1   :  { %v858_v63 = vld [vmem:[#allocation2 + $0xfa8] sm:$0xff]  ;;  %v9639_v11 = vcombine.low %v846_v30, %v850_v32  ;;  %13437 = vst [vmem:[#allocation34_spill] sm:$0xff] %v12386_v18 }
 0x1a2   :  { %3780 = vmatmul.mubr.bf16.gmra.mrb[20].mxu0 %v12346_v50  ;;  %4232 = vmatmul.mubr.bf16.gmra.mrb[20].mxu1 %v12346_v50  ;;  %v12368_v50 = vpack.c.bf16 %v290_v27, %v282_v10  ;;  %v172_v10 = vld [vmem:[%s13369_s0 + $0x38] sm:$0xff]  ;;  %v9654_v27 = vcombine.high %v861_v2, %v865_v42 }
 0x1a3   :  { %3831 = vmatpush1.bf16.msra.mxu0 %v9613_v57  ;;  %4283 = vmatpush1.bf16.msra.mxu1 %v9615_v59  ;;  %v853_v57 = vld [vmem:[#allocation2 + $0xf80] sm:$0xff] }
 0x1a4   :  { %3832 = vmatprep.subr.bf16.mxu0 %v9622_v49  ;;  %4284 = vmatprep.subr.bf16.mxu1 %v9624_v29  ;;  %v857_v59 = vld [vmem:[#allocation2 + $0xfa0] sm:$0xff]  ;;  %v854_v49 = vld [vmem:[#allocation2 + $0xf88] sm:$0xff]  ;;  %v9640_v29 = vcombine.high %v846_v30, %v850_v32  ;;  %13436 = vst [vmem:[#allocation33_spill] sm:$0xff] %v12368_v50 }
 0x1a5   :  { %3789 = vmatprep.mubr.bf16.mxu0 %v12348_v56  ;;  %4241 = vmatprep.mubr.bf16.mxu1 %v12348_v56  ;;  %v9645_v30 = vcombine.low %v853_v57, %v857_v59  ;;  %v9647_v32 = vcombine.low %v854_v49, %v858_v63  ;;  %v171_v56 = vld [vmem:[%s13369_s0 + $0x30] sm:$0xff] }
 0x1a7   :  { %3833 = vmatpush1.bf16.msra.mxu0 %v9621_v14  ;;  %4285 = vmatpush1.bf16.msra.mxu1 %v9623_v17  ;;  %v9646_v14 = vcombine.high %v853_v57, %v857_v59  ;;  %v862_v17 = vld [vmem:[#allocation2 + $0xfc8] sm:$0xff]  ;;  %v364_v57 = vld [vmem:[#allocation2 + $0x38] sm:$0xff]  ;;  %v9653_v59 = vcombine.low %v861_v2, %v865_v42  ;;  %v12406_v42 = vpack.c.bf16 %v179_v3, %v171_v56  ;;  %v195_v56 = vld [vmem:[%s13369_s0 + $0xf0] sm:$0xff] }
 0x1a8   :  { %3834 = vmatprep.subr.bf16.mxu0 %v9630_v24  ;;  %4286 = vmatprep.subr.bf16.mxu1 %v9632_v16  ;;  %v866_v24 = vld [vmem:[#allocation2 + $0xfe8] sm:$0xff]  ;;  %v9648_v16 = vcombine.high %v854_v49, %v858_v63  ;;  %v367_v49 = vld [vmem:[#allocation2 + $0x50] sm:$0xff]  ;;  %v196_v2 = vld [vmem:[%s13369_s0 + $0xf8] sm:$0xff] }
 0x1a9   :  { %v9655_v63 = vcombine.low %v862_v17, %v866_v24  ;;  %13439 = vst [vmem:[#allocation36_spill] sm:$0xff] %v12406_v42  ;;  %v387_v3 = vld [vmem:[#allocation2 + $0xf0] sm:$0xff] }
 0x1aa   :  { %3790 = vmatmul.mubr.bf16.gmra.mrb[24].mxu0 %v12366_v44  ;;  %4242 = vmatmul.mubr.bf16.gmra.mrb[24].mxu1 %v12366_v44  ;;  %v12388_v44 = vpack.c.bf16 %v180_v20, %v172_v10  ;;  %v188_v10 = vld [vmem:[%s13369_s0 + $0xb8] sm:$0xff]  ;;  %v9162_v20 = vcombine.high %v367_v49, %v371_v40 }
 0x1ab   :  { %3835 = vmatpush1.bf16.msra.mxu0 %v9629_v46  ;;  %4287 = vmatpush1.bf16.msra.mxu1 %v9631_v48  ;;  %v359_v46 = vld [vmem:[#allocation2 + $0x10] sm:$0xff] }
 0x1ac   :  { %3836 = vmatprep.subr.bf16.mxu0 %v9638_v35  ;;  %4288 = vmatprep.subr.bf16.mxu1 %v9640_v29  ;;  %v363_v48 = vld [vmem:[#allocation2 + $0x30] sm:$0xff]  ;;  %v360_v35 = vld [vmem:[#allocation2 + $0x18] sm:$0xff]  ;;  %v9656_v29 = vcombine.high %v862_v17, %v866_v24  ;;  %13438 = vst [vmem:[#allocation35_spill] sm:$0xff] %v12388_v44 }
 0x1ad   :  { %3799 = vmatprep.mubr.bf16.mxu0 %v12368_v50  ;;  %4251 = vmatprep.mubr.bf16.mxu1 %v12368_v50  ;;  %v9153_v17 = vcombine.low %v359_v46, %v363_v48  ;;  %v9155_v24 = vcombine.low %v360_v35, %v364_v57  ;;  %v187_v50 = vld [vmem:[%s13369_s0 + $0xb0] sm:$0xff] }
 0x1af   :  { %3837 = vmatpush1.bf16.msra.mxu0 %v9637_v7  ;;  %4289 = vmatpush1.bf16.msra.mxu1 %v9639_v11  ;;  %v9154_v7 = vcombine.high %v359_v46, %v363_v48  ;;  %v368_v11 = vld [vmem:[#allocation2 + $0x58] sm:$0xff]  ;;  %v9161_v48 = vcombine.low %v367_v49, %v371_v40  ;;  %v12426_v40 = vpack.c.bf16 %v195_v56, %v187_v50  ;;  %v211_v50 = vld [vmem:[%s13369_s0 + $0x170] sm:$0xff] }
 0x1b0   :  { %3838 = vmatprep.subr.bf16.mxu0 %v9646_v14  ;;  %4290 = vmatprep.subr.bf16.mxu1 %v9648_v16  ;;  %v372_v14 = vld [vmem:[#allocation2 + $0x78] sm:$0xff]  ;;  %v9156_v16 = vcombine.high %v360_v35, %v364_v57  ;;  %v383_v35 = vld [vmem:[#allocation2 + $0xd0] sm:$0xff] }
 0x1b1   :  { %v380_v46 = vld [vmem:[#allocation2 + $0xb8] sm:$0xff]  ;;  %v9163_v57 = vcombine.low %v368_v11, %v372_v14  ;;  %13441 = vst [vmem:[#allocation38_spill] sm:$0xff] %v12426_v40  ;;  %v403_v56 = vld [vmem:[#allocation2 + $0x170] sm:$0xff] }
 0x1b2   :  { %3800 = vmatmul.mubr.bf16.gmra.mrb[28].mxu0 %v12386_v18  ;;  %4252 = vmatmul.mubr.bf16.gmra.mrb[28].mxu1 %v12386_v18  ;;  %v12408_v18 = vpack.c.bf16 %v196_v2, %v188_v10  ;;  %v204_v10 = vld [vmem:[%s13369_s0 + $0x138] sm:$0xff]  ;;  %v9178_v2 = vcombine.high %v383_v35, %v387_v3 }
 0x1b3   :  { %3839 = vmatpush1.bf16.msra.mxu0 %v9645_v30  ;;  %4291 = vmatpush1.bf16.msra.mxu1 %v9647_v32  ;;  %v375_v30 = vld [vmem:[#allocation2 + $0x90] sm:$0xff]  ;;  %v212_v49 = vld [vmem:[%s13369_s0 + $0x178] sm:$0xff] }
 0x1b4   :  { %3840 = vmatprep.subr.bf16.mxu0 %v9654_v27  ;;  %4292 = vmatprep.subr.bf16.mxu1 %v9656_v29  ;;  %v379_v32 = vld [vmem:[#allocation2 + $0xb0] sm:$0xff]  ;;  %v376_v27 = vld [vmem:[#allocation2 + $0x98] sm:$0xff]  ;;  %v9164_v29 = vcombine.high %v368_v11, %v372_v14  ;;  %13440 = vst [vmem:[#allocation37_spill] sm:$0xff] %v12408_v18 }
 0x1b5   :  { %3842 = vmatprep.mubr.bf16.mxu0 %v12388_v44  ;;  %4294 = vmatprep.mubr.bf16.mxu1 %v12388_v44  ;;  %v9169_v11 = vcombine.low %v375_v30, %v379_v32  ;;  %v9171_v14 = vcombine.low %v376_v27, %v380_v46  ;;  %v203_v44 = vld [vmem:[%s13369_s0 + $0x130] sm:$0xff] }
 0x1b7   :  { %3841 = vmatpush1.bf16.msra.mxu0 %v9653_v59  ;;  %4293 = vmatpush1.bf16.msra.mxu1 %v9655_v63  ;;  %v9170_v59 = vcombine.high %v375_v30, %v379_v32  ;;  %v384_v63 = vld [vmem:[#allocation2 + $0xd8] sm:$0xff]  ;;  %v9177_v32 = vcombine.low %v383_v35, %v387_v3  ;;  %v12446_v3 = vpack.c.bf16 %v211_v50, %v203_v44  ;;  %v227_v44 = vld [vmem:[%s13369_s0 + $0x1f0] sm:$0xff] }
 0x1b8   :  { %4375 = vmatprep.subr.bf16.mxu0 %v9154_v7  ;;  %4827 = vmatprep.subr.bf16.mxu1 %v9156_v16  ;;  %v388_v7 = vld [vmem:[#allocation2 + $0xf8] sm:$0xff]  ;;  %v9172_v16 = vcombine.high %v376_v27, %v380_v46  ;;  %v399_v27 = vld [vmem:[#allocation2 + $0x150] sm:$0xff] }
 0x1b9   :  { %v396_v30 = vld [vmem:[#allocation2 + $0x138] sm:$0xff]  ;;  %v9179_v46 = vcombine.low %v384_v63, %v388_v7  ;;  %13443 = vst [vmem:[#allocation40_spill] sm:$0xff] %v12446_v3  ;;  %v419_v50 = vld [vmem:[#allocation2 + $0x1f0] sm:$0xff] }
 0x1ba   :  { %3843 = vmatmul.mubr.bf16.vlgmr.msra.gmra.mrb[0].mxu0 %v12406_v42  ;;  %4295 = vmatmul.mubr.bf16.vlgmr.msra.gmra.mrb[0].mxu1 %v12406_v42  ;;  %v12428_v42 = vpack.c.bf16 %v212_v49, %v204_v10  ;;  %v220_v10 = vld [vmem:[%s13369_s0 + $0x1b8] sm:$0xff]  ;;  %v9194_v49 = vcombine.high %v399_v27, %v403_v56 }
 0x1bb   :  { %4376 = vmatpush1.bf16.msra.mxu0 %v9153_v17  ;;  %4828 = vmatpush1.bf16.msra.mxu1 %v9155_v24  ;;  %v391_v17 = vld [vmem:[#allocation2 + $0x110] sm:$0xff]  ;;  %v228_v35 = vld [vmem:[%s13369_s0 + $0x1f8] sm:$0xff] }
 0x1bc   :  { %4377 = vmatprep.subr.bf16.mxu0 %v9162_v20  ;;  %4829 = vmatprep.subr.bf16.mxu1 %v9164_v29  ;;  %v395_v24 = vld [vmem:[#allocation2 + $0x130] sm:$0xff]  ;;  %v392_v20 = vld [vmem:[#allocation2 + $0x118] sm:$0xff]  ;;  %v9180_v29 = vcombine.high %v384_v63, %v388_v7  ;;  %13442 = vst [vmem:[#allocation39_spill] sm:$0xff] %v12428_v42 }
 0x1bd   :  { %3852 = vmatprep.mubr.bf16.mxu0 %v12408_v18  ;;  %4304 = vmatprep.mubr.bf16.mxu1 %v12408_v18  ;;  %v9185_v63 = vcombine.low %v391_v17, %v395_v24  ;;  %v9187_v7 = vcombine.low %v392_v20, %v396_v30  ;;  %v219_v18 = vld [vmem:[%s13369_s0 + $0x1b0] sm:$0xff] }
 0x1bf   :  { %4378 = vmatpush1.bf16.msra.mxu0 %v9161_v48  ;;  %4830 = vmatpush1.bf16.msra.mxu1 %v9163_v57  ;;  %v9186_v48 = vcombine.high %v391_v17, %v395_v24  ;;  %v400_v57 = vld [vmem:[#allocation2 + $0x158] sm:$0xff]  ;;  %v9193_v24 = vcombine.low %v399_v27, %v403_v56  ;;  %v12466_v56 = vpack.c.bf16 %v227_v44, %v219_v18  ;;  %v243_v18 = vld [vmem:[%s13369_s0 + $0x270] sm:$0xff] }
 0x1c0   :  { %4379 = vmatprep.subr.bf16.mxu0 %v9170_v59  ;;  %4831 = vmatprep.subr.bf16.mxu1 %v9172_v16  ;;  %v404_v59 = vld [vmem:[#allocation2 + $0x178] sm:$0xff]  ;;  %v9188_v16 = vcombine.high %v392_v20, %v396_v30  ;;  %v415_v20 = vld [vmem:[#allocation2 + $0x1d0] sm:$0xff] }
 0x1c1   :  { %v412_v17 = vld [vmem:[#allocation2 + $0x1b8] sm:$0xff]  ;;  %v9195_v30 = vcombine.low %v400_v57, %v404_v59  ;;  %13445 = vst [vmem:[#allocation42_spill] sm:$0xff] %v12466_v56  ;;  %v435_v44 = vld [vmem:[#allocation2 + $0x270] sm:$0xff] }
 0x1c2   :  { %3853 = vmatmul.mubr.bf16.gmra.mrb[4].mxu0 %v12426_v40  ;;  %4305 = vmatmul.mubr.bf16.gmra.mrb[4].mxu1 %v12426_v40  ;;  %v12448_v40 = vpack.c.bf16 %v228_v35, %v220_v10  ;;  %v236_v10 = vld [vmem:[%s13369_s0 + $0x238] sm:$0xff]  ;;  %v9210_v35 = vcombine.high %v415_v20, %v419_v50 }
 0x1c3   :  { %4380 = vmatpush1.bf16.msra.mxu0 %v9169_v11  ;;  %4832 = vmatpush1.bf16.msra.mxu1 %v9171_v14  ;;  %v407_v11 = vld [vmem:[#allocation2 + $0x190] sm:$0xff]  ;;  %v244_v27 = vld [vmem:[%s13369_s0 + $0x278] sm:$0xff] }
 0x1c4   :  { %4381 = vmatprep.subr.bf16.mxu0 %v9178_v2  ;;  %4833 = vmatprep.subr.bf16.mxu1 %v9180_v29  ;;  %v411_v14 = vld [vmem:[#allocation2 + $0x1b0] sm:$0xff]  ;;  %v408_v2 = vld [vmem:[#allocation2 + $0x198] sm:$0xff]  ;;  %v9196_v29 = vcombine.high %v400_v57, %v404_v59  ;;  %13444 = vst [vmem:[#allocation41_spill] sm:$0xff] %v12448_v40 }
 0x1c5   :  { %3862 = vmatprep.mubr.bf16.mxu0 %v12428_v42  ;;  %4314 = vmatprep.mubr.bf16.mxu1 %v12428_v42  ;;  %v9201_v57 = vcombine.low %v407_v11, %v411_v14  ;;  %v9203_v59 = vcombine.low %v408_v2, %v412_v17  ;;  %v235_v42 = vld [vmem:[%s13369_s0 + $0x230] sm:$0xff] }
 0x1c7   :  { %4382 = vmatpush1.bf16.msra.mxu0 %v9177_v32  ;;  %4834 = vmatpush1.bf16.msra.mxu1 %v9179_v46  ;;  %v9202_v32 = vcombine.high %v407_v11, %v411_v14  ;;  %v416_v46 = vld [vmem:[#allocation2 + $0x1d8] sm:$0xff]  ;;  %v9209_v14 = vcombine.low %v415_v20, %v419_v50  ;;  %v12486_v50 = vpack.c.bf16 %v243_v18, %v235_v42  ;;  %v259_v42 = vld [vmem:[%s13369_s0 + $0x2f0] sm:$0xff] }
 0x1c8   :  { %4383 = vmatprep.subr.bf16.mxu0 %v9186_v48  ;;  %4835 = vmatprep.subr.bf16.mxu1 %v9188_v16  ;;  %v420_v48 = vld [vmem:[#allocation2 + $0x1f8] sm:$0xff]  ;;  %v9204_v16 = vcombine.high %v408_v2, %v412_v17  ;;  %v431_v2 = vld [vmem:[#allocation2 + $0x250] sm:$0xff] }
 0x1c9   :  { %v428_v11 = vld [vmem:[#allocation2 + $0x238] sm:$0xff]  ;;  %v9211_v17 = vcombine.low %v416_v46, %v420_v48  ;;  %13447 = vst [vmem:[#allocation44_spill] sm:$0xff] %v12486_v50  ;;  %v451_v18 = vld [vmem:[#allocation2 + $0x2f0] sm:$0xff] }
 0x1ca   :  { %3863 = vmatmul.mubr.bf16.gmra.mrb[8].mxu0 %v12446_v3  ;;  %4315 = vmatmul.mubr.bf16.gmra.mrb[8].mxu1 %v12446_v3  ;;  %v12468_v3 = vpack.c.bf16 %v244_v27, %v236_v10  ;;  %v252_v10 = vld [vmem:[%s13369_s0 + $0x2b8] sm:$0xff]  ;;  %v9226_v27 = vcombine.high %v431_v2, %v435_v44 }
 0x1cb   :  { %4384 = vmatpush1.bf16.msra.mxu0 %v9185_v63  ;;  %4836 = vmatpush1.bf16.msra.mxu1 %v9187_v7  ;;  %v423_v63 = vld [vmem:[#allocation2 + $0x210] sm:$0xff]  ;;  %v260_v20 = vld [vmem:[%s13369_s0 + $0x2f8] sm:$0xff] }
 0x1cc   :  { %4385 = vmatprep.subr.bf16.mxu0 %v9194_v49  ;;  %4837 = vmatprep.subr.bf16.mxu1 %v9196_v29  ;;  %v427_v7 = vld [vmem:[#allocation2 + $0x230] sm:$0xff]  ;;  %v424_v49 = vld [vmem:[#allocation2 + $0x218] sm:$0xff]  ;;  %v9212_v29 = vcombine.high %v416_v46, %v420_v48  ;;  %13446 = vst [vmem:[#allocation43_spill] sm:$0xff] %v12468_v3 }
 0x1cd   :  { %3872 = vmatprep.mubr.bf16.mxu0 %v12448_v40  ;;  %4324 = vmatprep.mubr.bf16.mxu1 %v12448_v40  ;;  %v9217_v46 = vcombine.low %v423_v63, %v427_v7  ;;  %v9219_v48 = vcombine.low %v424_v49, %v428_v11  ;;  %v251_v40 = vld [vmem:[%s13369_s0 + $0x2b0] sm:$0xff] }
 0x1cf   :  { %4386 = vmatpush1.bf16.msra.mxu0 %v9193_v24  ;;  %4838 = vmatpush1.bf16.msra.mxu1 %v9195_v30  ;;  %v9218_v24 = vcombine.high %v423_v63, %v427_v7  ;;  %v432_v30 = vld [vmem:[#allocation2 + $0x258] sm:$0xff]  ;;  %v9225_v7 = vcombine.low %v431_v2, %v435_v44  ;;  %v12506_v44 = vpack.c.bf16 %v259_v42, %v251_v40  ;;  %v275_v40 = vld [vmem:[%s13369_s0 + $0x370] sm:$0xff] }
 0x1d0   :  { %4387 = vmatprep.subr.bf16.mxu0 %v9202_v32  ;;  %4839 = vmatprep.subr.bf16.mxu1 %v9204_v16  ;;  %v436_v32 = vld [vmem:[#allocation2 + $0x278] sm:$0xff]  ;;  %v9220_v16 = vcombine.high %v424_v49, %v428_v11  ;;  %v447_v49 = vld [vmem:[#allocation2 + $0x2d0] sm:$0xff] }
 0x1d1   :  { %v444_v63 = vld [vmem:[#allocation2 + $0x2b8] sm:$0xff]  ;;  %v9227_v11 = vcombine.low %v432_v30, %v436_v32  ;;  %13449 = vst [vmem:[#allocation46_spill] sm:$0xff] %v12506_v44  ;;  %v467_v42 = vld [vmem:[#allocation2 + $0x370] sm:$0xff] }
 0x1d2   :  { %3873 = vmatmul.mubr.bf16.gmra.mrb[12].mxu0 %v12466_v56  ;;  %4325 = vmatmul.mubr.bf16.gmra.mrb[12].mxu1 %v12466_v56  ;;  %v12488_v56 = vpack.c.bf16 %v260_v20, %v252_v10  ;;  %v268_v10 = vld [vmem:[%s13369_s0 + $0x338] sm:$0xff]  ;;  %v9242_v20 = vcombine.high %v447_v49, %v451_v18 }
 0x1d3   :  { %4388 = vmatpush1.bf16.msra.mxu0 %v9201_v57  ;;  %4840 = vmatpush1.bf16.msra.mxu1 %v9203_v59  ;;  %v439_v57 = vld [vmem:[#allocation2 + $0x290] sm:$0xff]  ;;  %v276_v2 = vld [vmem:[%s13369_s0 + $0x378] sm:$0xff] }
 0x1d4   :  { %4389 = vmatprep.subr.bf16.mxu0 %v9210_v35  ;;  %4841 = vmatprep.subr.bf16.mxu1 %v9212_v29  ;;  %v443_v59 = vld [vmem:[#allocation2 + $0x2b0] sm:$0xff]  ;;  %v440_v35 = vld [vmem:[#allocation2 + $0x298] sm:$0xff]  ;;  %v9228_v29 = vcombine.high %v432_v30, %v436_v32  ;;  %13448 = vst [vmem:[#allocation45_spill] sm:$0xff] %v12488_v56 }
 0x1d5   :  { %3882 = vmatprep.mubr.bf16.mxu0 %v12468_v3  ;;  %4334 = vmatprep.mubr.bf16.mxu1 %v12468_v3  ;;  %v9233_v30 = vcombine.low %v439_v57, %v443_v59  ;;  %v9235_v32 = vcombine.low %v440_v35, %v444_v63  ;;  %v267_v3 = vld [vmem:[%s13369_s0 + $0x330] sm:$0xff] }
 0x1d7   :  { %4390 = vmatpush1.bf16.msra.mxu0 %v9209_v14  ;;  %4842 = vmatpush1.bf16.msra.mxu1 %v9211_v17  ;;  %v9234_v14 = vcombine.high %v439_v57, %v443_v59  ;;  %v448_v17 = vld [vmem:[#allocation2 + $0x2d8] sm:$0xff]  ;;  %v9241_v59 = vcombine.low %v447_v49, %v451_v18  ;;  %v12526_v18 = vpack.c.bf16 %v275_v40, %v267_v3  ;;  %v291_v3 = vld [vmem:[%s13369_s0 + $0x3f0] sm:$0xff] }
 0x1d8   :  { %4391 = vmatprep.subr.bf16.mxu0 %v9218_v24  ;;  %4843 = vmatprep.subr.bf16.mxu1 %v9220_v16  ;;  %v452_v24 = vld [vmem:[#allocation2 + $0x2f8] sm:$0xff]  ;;  %v9236_v16 = vcombine.high %v440_v35, %v444_v63  ;;  %v463_v35 = vld [vmem:[#allocation2 + $0x350] sm:$0xff] }
 0x1d9   :  { %v460_v57 = vld [vmem:[#allocation2 + $0x338] sm:$0xff]  ;;  %v9243_v63 = vcombine.low %v448_v17, %v452_v24 }
 0x1da   :  { %3883 = vmatmul.mubr.bf16.gmra.mrb[16].mxu0 %v12486_v50  ;;  %4335 = vmatmul.mubr.bf16.gmra.mrb[16].mxu1 %v12486_v50  ;;  %v12508_v50 = vpack.c.bf16 %v276_v2, %v268_v10  ;;  %v284_v10 = vld [vmem:[%s13369_s0 + $0x3b8] sm:$0xff]  ;;  %v9258_v2 = vcombine.high %v463_v35, %v467_v42 }
 0x1db   :  { %4392 = vmatpush1.bf16.msra.mxu0 %v9217_v46  ;;  %4844 = vmatpush1.bf16.msra.mxu1 %v9219_v48  ;;  %v455_v46 = vld [vmem:[#allocation2 + $0x310] sm:$0xff]  ;;  %v292_v49 = vld [vmem:[%s13369_s0 + $0x3f8] sm:$0xff] }
 0x1dc   :  { %4393 = vmatprep.subr.bf16.mxu0 %v9226_v27  ;;  %4845 = vmatprep.subr.bf16.mxu1 %v9228_v29  ;;  %v459_v48 = vld [vmem:[#allocation2 + $0x330] sm:$0xff]  ;;  %v456_v27 = vld [vmem:[#allocation2 + $0x318] sm:$0xff]  ;;  %v9244_v29 = vcombine.high %v448_v17, %v452_v24 }
 0x1dd   :  { %3892 = vmatprep.mubr.bf16.mxu0 %v12488_v56  ;;  %4344 = vmatprep.mubr.bf16.mxu1 %v12488_v56  ;;  %v9249_v17 = vcombine.low %v455_v46, %v459_v48  ;;  %v9251_v24 = vcombine.low %v456_v27, %v460_v57  ;;  %v283_v56 = vld [vmem:[%s13369_s0 + $0x3b0] sm:$0xff] }
 0x1df   :  { %4394 = vmatpush1.bf16.msra.mxu0 %v9225_v7  ;;  %4846 = vmatpush1.bf16.msra.mxu1 %v9227_v11  ;;  %v9250_v7 = vcombine.high %v455_v46, %v459_v48  ;;  %v464_v11 = vld [vmem:[#allocation2 + $0x358] sm:$0xff]  ;;  %v9257_v48 = vcombine.low %v463_v35, %v467_v42 }
 0x1e0   :  { %4395 = vmatprep.subr.bf16.mxu0 %v9234_v14  ;;  %4847 = vmatprep.subr.bf16.mxu1 %v9236_v16  ;;  %v468_v14 = vld [vmem:[#allocation2 + $0x378] sm:$0xff]  ;;  %v9252_v16 = vcombine.high %v456_v27, %v460_v57  ;;  %v479_v57 = vld [vmem:[#allocation2 + $0x3d0] sm:$0xff] }
 0x1e1   :  { %v476_v46 = vld [vmem:[#allocation2 + $0x3b8] sm:$0xff]  ;;  %v9259_v27 = vcombine.low %v464_v11, %v468_v14 }
 0x1e2   :  { %3893 = vmatmul.mubr.bf16.gmra.mrb[20].mxu0 %v12506_v44  ;;  %4345 = vmatmul.mubr.bf16.gmra.mrb[20].mxu1 %v12506_v44  ;;  %v12528_v44 = vpack.c.bf16 %v292_v49, %v284_v10  ;;  %v484_v10 = vld [vmem:[#allocation2 + $0x3f8] sm:$0xff] }
 0x1e3   :  { %4396 = vmatpush1.bf16.msra.mxu0 %v9233_v30  ;;  %4848 = vmatpush1.bf16.msra.mxu1 %v9235_v32  ;;  %v471_v30 = vld [vmem:[#allocation2 + $0x390] sm:$0xff] }
 0x1e4   :  { %4397 = vmatprep.subr.bf16.mxu0 %v9242_v20  ;;  %4849 = vmatprep.subr.bf16.mxu1 %v9244_v29  ;;  %v475_v32 = vld [vmem:[#allocation2 + $0x3b0] sm:$0xff]  ;;  %v472_v20 = vld [vmem:[#allocation2 + $0x398] sm:$0xff]  ;;  %v9260_v29 = vcombine.high %v464_v11, %v468_v14 }
 0x1e5   :  { %3902 = vmatprep.mubr.bf16.mxu0 %v12508_v50  ;;  %4354 = vmatprep.mubr.bf16.mxu1 %v12508_v50  ;;  %v9266_v40 = vcombine.high %v471_v30, %v475_v32  ;;  %v9265_v49 = vcombine.low %v471_v30, %v475_v32  ;;  %v9267_v35 = vcombine.low %v472_v20, %v476_v46  ;;  %v487_v14 = vld [vmem:[#allocation2 + $0x410] sm:$0xff] }
 0x1e7   :  { %4398 = vmatpush1.bf16.msra.mxu0 %v9241_v59  ;;  %4850 = vmatpush1.bf16.msra.mxu1 %v9243_v63  ;;  %v483_v59 = vld [vmem:[#allocation2 + $0x3f0] sm:$0xff]  ;;  %v480_v63 = vld [vmem:[#allocation2 + $0x3d8] sm:$0xff] }
 0x1e8   :  { %4399 = vmatprep.subr.bf16.mxu0 %v9250_v7  ;;  %4851 = vmatprep.subr.bf16.mxu1 %v9252_v16  ;;  %v9268_v7 = vcombine.high %v472_v20, %v476_v46  ;;  %v12540_v16 = vpack.c.bf16 %v291_v3, %v283_v56  ;;  %v9274_v42 = vcombine.high %v479_v57, %v483_v59  ;;  %v495_v20 = vld [vmem:[#allocation2 + $0x450] sm:$0xff]  ;;  %v496_v46 = vld [vmem:[#allocation2 + $0x458] sm:$0xff] }
 0x1e9   :  { %v9276_v11 = vcombine.high %v480_v63, %v484_v10  ;;  %v9275_v56 = vcombine.low %v480_v63, %v484_v10  ;;  %v499_v3 = vld [vmem:[#allocation2 + $0x470] sm:$0xff]  ;;  %v504_v10 = vld [vmem:[#allocation2 + $0x498] sm:$0xff] }
 0x1ea   :  { %3903 = vmatmul.mubr.bf16.gmra.mrb[24].mxu0 %v12526_v18  ;;  %4355 = vmatmul.mubr.bf16.gmra.mrb[24].mxu1 %v12526_v18  ;;  %v503_v63 = vld [vmem:[#allocation2 + $0x490] sm:$0xff] }
 0x1eb   :  { %4400 = vmatpush1.bf16.msra.mxu0 %v9249_v17  ;;  %4852 = vmatpush1.bf16.msra.mxu1 %v9251_v24  ;;  %v491_v17 = vld [vmem:[#allocation2 + $0x430] sm:$0xff]  ;;  %v488_v24 = vld [vmem:[#allocation2 + $0x418] sm:$0xff] }
 0x1ec   :  { %4401 = vmatprep.subr.bf16.mxu0 %v9258_v2  ;;  %4853 = vmatprep.subr.bf16.mxu1 %v9260_v29  ;;  %v492_v2 = vld [vmem:[#allocation2 + $0x438] sm:$0xff]  ;;  %v9273_v29 = vcombine.low %v479_v57, %v483_v59  ;;  %v9282_v30 = vcombine.high %v487_v14, %v491_v17  ;;  %v9290_v57 = vcombine.high %v495_v20, %v499_v3 }
 0x1ed   :  { %3912 = vmatprep.mubr.bf16.mxu0 %v12528_v44  ;;  %4364 = vmatprep.mubr.bf16.mxu1 %v12528_v44  ;;  %v9284_v32 = vcombine.high %v488_v24, %v492_v2 }
 0x1ef   :  { %4402 = vmatpush1.bf16.msra.mxu0 %v9257_v48  ;;  %4854 = vmatpush1.bf16.msra.mxu1 %v9259_v27  ;;  %v500_v48 = vld [vmem:[#allocation2 + $0x478] sm:$0xff]  ;;  %v9281_v27 = vcombine.low %v487_v14, %v491_v17  ;;  %v511_v14 = vld [vmem:[#allocation2 + $0x4d0] sm:$0xff] }
 0x1f0   :  { %4403 = vmatprep.subr.bf16.mxu0 %v9266_v40  ;;  %4855 = vmatprep.subr.bf16.mxu1 %v9268_v7  ;;  %v9283_v40 = vcombine.low %v488_v24, %v492_v2  ;;  %v9292_v59 = vcombine.high %v496_v46, %v500_v48  ;;  %v507_v7 = vld [vmem:[#allocation2 + $0x4b0] sm:$0xff]  ;;  %v512_v24 = vld [vmem:[#allocation2 + $0x4d8] sm:$0xff] }
 0x1f1   :  { %v515_v17 = vld [vmem:[#allocation2 + $0x4f0] sm:$0xff]  ;;  %v516_v2 = vld [vmem:[#allocation2 + $0x4f8] sm:$0xff] }
 0x1f2   :  { %3913 = vmatmul.mubr.bf16.gmra.mrb[28].mxu0 %v12540_v16  ;;  %4365 = vmatmul.mubr.bf16.gmra.mrb[28].mxu1 %v12540_v16 }
 0x1f3   :  { %4404 = vmatpush1.bf16.msra.mxu0 %v9265_v49  ;;  %4856 = vmatpush1.bf16.msra.mxu1 %v9267_v35  ;;  %v508_v49 = vld [vmem:[#allocation2 + $0x4b8] sm:$0xff]  ;;  %v9291_v35 = vcombine.low %v496_v46, %v500_v48  ;;  %v9307_v48 = vcombine.low %v512_v24, %v516_v2 }
 0x1f4   :  { %4405 = vmatprep.subr.bf16.mxu0 %v9274_v42  ;;  %4857 = vmatprep.subr.bf16.mxu1 %v9276_v11  ;;  %v9298_v42 = vcombine.high %v503_v63, %v507_v7  ;;  %v9300_v11 = vcombine.high %v504_v10, %v508_v49  ;;  %v524_v46 = vld [vmem:[#allocation2 + $0x538] sm:$0xff] }
 0x1f5   :  { %4407 = vmatprep.mubr.bf16.mxu0 %v11910_v58  ;;  %4859 = vmatprep.mubr.bf16.mxu1 %v11910_v58  ;;  %v9289_v58 = vcombine.low %v495_v20, %v499_v3  ;;  %v523_v20 = vld [vmem:[#allocation2 + $0x530] sm:$0xff]  ;;  %v520_v3 = vld [vmem:[#allocation2 + $0x518] sm:$0xff] }
 0x1f7   :  { %4406 = vmatpush1.bf16.msra.mxu0 %v9273_v29  ;;  %4858 = vmatpush1.bf16.msra.mxu1 %v9275_v56  ;;  %v9297_v29 = vcombine.low %v503_v63, %v507_v7  ;;  %v9306_v56 = vcombine.high %v511_v14, %v515_v17  ;;  %v528_v63 = vld [vmem:[#allocation2 + $0x558] sm:$0xff] }
 0x1f8   :  { %4488 = vmatprep.subr.bf16.mxu0 %v9282_v30  ;;  %4940 = vmatprep.subr.bf16.mxu1 %v9284_v32  ;;  %v9308_v30 = vcombine.high %v512_v24, %v516_v2  ;;  %v519_v32 = vld [vmem:[#allocation2 + $0x510] sm:$0xff]  ;;  %v532_v7 = vld [vmem:[#allocation2 + $0x578] sm:$0xff] }
 0x1fa   :  { %4408 = vmatmul.mubr.bf16.vlgmr.msra.gmra.mrb[32].mxu0 %v11920_v15  ;;  %4860 = vmatmul.mubr.bf16.vlgmr.msra.gmra.mrb[32].mxu1 %v11920_v15  ;;  %v9299_v15 = vcombine.low %v504_v10, %v508_v49  ;;  %v9313_v10 = vcombine.low %v519_v32, %v523_v20 }
 0x1fb   :  { %4489 = vmatpush1.bf16.msra.mxu0 %v9281_v27  ;;  %4941 = vmatpush1.bf16.msra.mxu1 %v9283_v40  ;;  %v9314_v27 = vcombine.high %v519_v32, %v523_v20  ;;  %v9316_v40 = vcombine.high %v520_v3, %v524_v46 }
 0x1fc   :  { %4490 = vmatprep.subr.bf16.mxu0 %v9290_v57  ;;  %4942 = vmatprep.subr.bf16.mxu1 %v9292_v59  ;;  %v527_v57 = vld [vmem:[#allocation2 + $0x550] sm:$0xff] }
 0x1fd   :  { %4417 = vmatprep.mubr.bf16.mxu0 %v11928_v23  ;;  %4869 = vmatprep.mubr.bf16.mxu1 %v11928_v23  ;;  %v9305_v23 = vcombine.low %v511_v14, %v515_v17  ;;  %v531_v59 = vld [vmem:[#allocation2 + $0x570] sm:$0xff]  ;;  %v540_v14 = vld [vmem:[#allocation2 + $0x5b8] sm:$0xff]  ;;  %v9323_v17 = vcombine.low %v528_v63, %v532_v7 }
 0x1fe   :  { %v9322_v49 = vcombine.high %v527_v57, %v531_v59 }
 0x1ff   :  { %4491 = vmatpush1.bf16.msra.mxu0 %v9289_v58  ;;  %4943 = vmatpush1.bf16.msra.mxu1 %v9291_v35  ;;  %v9324_v58 = vcombine.high %v528_v63, %v532_v7  ;;  %v535_v35 = vld [vmem:[#allocation2 + $0x590] sm:$0xff] }
 0x200   :  { %4492 = vmatprep.subr.bf16.mxu0 %v9298_v42  ;;  %4944 = vmatprep.subr.bf16.mxu1 %v9300_v11  ;;  %v539_v42 = vld [vmem:[#allocation2 + $0x5b0] sm:$0xff]  ;;  %v536_v11 = vld [vmem:[#allocation2 + $0x598] sm:$0xff] }
 0x201   :  { %v9330_v24 = vcombine.high %v535_v35, %v539_v42  ;;  %v9332_v2 = vcombine.high %v536_v11, %v540_v14  ;;  %v9329_v32 = vcombine.low %v535_v35, %v539_v42  ;;  %v559_v63 = vld [vmem:[#allocation2 + $0x650] sm:$0xff] }
 0x202   :  { %4418 = vmatmul.mubr.bf16.gmra.mrb[36].mxu0 %v11940_v37  ;;  %4870 = vmatmul.mubr.bf16.gmra.mrb[36].mxu1 %v11940_v37  ;;  %v9315_v37 = vcombine.low %v520_v3, %v524_v46  ;;  %v551_v46 = vld [vmem:[#allocation2 + $0x610] sm:$0xff] }
 0x203   :  { %4493 = vmatpush1.bf16.msra.mxu0 %v9297_v29  ;;  %4945 = vmatpush1.bf16.msra.mxu1 %v9299_v15  ;;  %v543_v29 = vld [vmem:[#allocation2 + $0x5d0] sm:$0xff] }
 0x204   :  { %4494 = vmatprep.subr.bf16.mxu0 %v9306_v56  ;;  %4946 = vmatprep.subr.bf16.mxu1 %v9308_v30  ;;  %v547_v15 = vld [vmem:[#allocation2 + $0x5f0] sm:$0xff]  ;;  %v544_v56 = vld [vmem:[#allocation2 + $0x5d8] sm:$0xff] }
 0x205   :  { %4427 = vmatprep.mubr.bf16.mxu0 %v11948_v45  ;;  %4879 = vmatprep.mubr.bf16.mxu1 %v11948_v45  ;;  %v9321_v45 = vcombine.low %v527_v57, %v531_v59  ;;  %v548_v30 = vld [vmem:[#allocation2 + $0x5f8] sm:$0xff]  ;;  %v9338_v20 = vcombine.high %v543_v29, %v547_v15  ;;  %v563_v7 = vld [vmem:[#allocation2 + $0x670] sm:$0xff] }
 0x206   :  { %v9340_v3 = vcombine.high %v544_v56, %v548_v30  ;;  %v567_v42 = vld [vmem:[#allocation2 + $0x690] sm:$0xff] }
 0x207   :  { %4495 = vmatpush1.bf16.msra.mxu0 %v9305_v23  ;;  %4947 = vmatpush1.bf16.msra.mxu1 %v9307_v48  ;;  %v555_v23 = vld [vmem:[#allocation2 + $0x630] sm:$0xff]  ;;  %v552_v48 = vld [vmem:[#allocation2 + $0x618] sm:$0xff] }
 0x208   :  { %4496 = vmatprep.subr.bf16.mxu0 %v9314_v27  ;;  %4948 = vmatprep.subr.bf16.mxu1 %v9316_v40  ;;  %v556_v27 = vld [vmem:[#allocation2 + $0x638] sm:$0xff]  ;;  %v9339_v40 = vcombine.low %v544_v56, %v548_v30  ;;  %v9346_v57 = vcombine.high %v551_v46, %v555_v23 }
 0x209   :  { %v9348_v59 = vcombine.high %v552_v48, %v556_v27  ;;  %v576_v56 = vld [vmem:[#allocation2 + $0x6d8] sm:$0xff] }
 0x20a   :  { %4428 = vmatmul.mubr.bf16.gmra.mrb[40].mxu0 %v11960_v60  ;;  %4880 = vmatmul.mubr.bf16.gmra.mrb[40].mxu1 %v11960_v60  ;;  %v9331_v60 = vcombine.low %v536_v11, %v540_v14  ;;  %v571_v11 = vld [vmem:[#allocation2 + $0x6b0] sm:$0xff]  ;;  %v568_v14 = vld [vmem:[#allocation2 + $0x698] sm:$0xff] }
 0x20b   :  { %4497 = vmatpush1.bf16.msra.mxu0 %v9313_v10  ;;  %4949 = vmatpush1.bf16.msra.mxu1 %v9315_v37  ;;  %v560_v10 = vld [vmem:[#allocation2 + $0x658] sm:$0xff] }
 0x20c   :  { %4498 = vmatprep.subr.bf16.mxu0 %v9322_v49  ;;  %4950 = vmatprep.subr.bf16.mxu1 %v9324_v58  ;;  %v564_v37 = vld [vmem:[#allocation2 + $0x678] sm:$0xff]  ;;  %v9345_v49 = vcombine.low %v551_v46, %v555_v23  ;;  %v9354_v58 = vcombine.high %v559_v63, %v563_v7  ;;  %v587_v46 = vld [vmem:[#allocation2 + $0x730] sm:$0xff] }
 0x20d   :  { %4437 = vmatprep.mubr.bf16.mxu0 %v11968_v4  ;;  %4889 = vmatprep.mubr.bf16.mxu1 %v11968_v4  ;;  %v9337_v4 = vcombine.low %v543_v29, %v547_v15  ;;  %v9356_v35 = vcombine.high %v560_v10, %v564_v37  ;;  %v575_v29 = vld [vmem:[#allocation2 + $0x6d0] sm:$0xff]  ;;  %v580_v30 = vld [vmem:[#allocation2 + $0x6f8] sm:$0xff] }
 0x20e   :  { %v579_v15 = vld [vmem:[#allocation2 + $0x6f0] sm:$0xff]  ;;  %v584_v23 = vld [vmem:[#allocation2 + $0x718] sm:$0xff] }
 0x20f   :  { %4499 = vmatpush1.bf16.msra.mxu0 %v9321_v45  ;;  %4951 = vmatpush1.bf16.msra.mxu1 %v9323_v17  ;;  %v572_v45 = vld [vmem:[#allocation2 + $0x6b8] sm:$0xff]  ;;  %v9355_v17 = vcombine.low %v560_v10, %v564_v37 }
 0x210   :  { %4500 = vmatprep.subr.bf16.mxu0 %v9330_v24  ;;  %4952 = vmatprep.subr.bf16.mxu1 %v9332_v2  ;;  %v9362_v24 = vcombine.high %v567_v42, %v571_v11  ;;  %v9364_v2 = vcombine.high %v568_v14, %v572_v45 }
 0x212   :  { %4438 = vmatmul.mubr.bf16.gmra.mrb[44].mxu0 %v11980_v19  ;;  %4890 = vmatmul.mubr.bf16.gmra.mrb[44].mxu1 %v11980_v19  ;;  %v9347_v19 = vcombine.low %v552_v48, %v556_v27  ;;  %v588_v48 = vld [vmem:[#allocation2 + $0x738] sm:$0xff]  ;;  %v9371_v27 = vcombine.low %v576_v56, %v580_v30 }
 0x213   :  { %4501 = vmatpush1.bf16.msra.mxu0 %v9329_v32  ;;  %4953 = vmatpush1.bf16.msra.mxu1 %v9331_v60  ;;  %v9361_v32 = vcombine.low %v567_v42, %v571_v11  ;;  %v9370_v60 = vcombine.high %v575_v29, %v579_v15  ;;  %v604_v42 = vld [vmem:[#allocation2 + $0x7b8] sm:$0xff] }
 0x214   :  { %4502 = vmatprep.subr.bf16.mxu0 %v9338_v20  ;;  %4954 = vmatprep.subr.bf16.mxu1 %v9340_v3  ;;  %v9372_v20 = vcombine.high %v576_v56, %v580_v30  ;;  %v583_v3 = vld [vmem:[#allocation2 + $0x710] sm:$0xff] }
 0x215   :  { %4447 = vmatprep.mubr.bf16.mxu0 %v11988_v28  ;;  %4899 = vmatprep.mubr.bf16.mxu1 %v11988_v28  ;;  %v9353_v28 = vcombine.low %v559_v63, %v563_v7  ;;  %v592_v63 = vld [vmem:[#allocation2 + $0x758] sm:$0xff]  ;;  %v9377_v10 = vcombine.low %v583_v3, %v587_v46  ;;  %v615_v30 = vld [vmem:[#allocation2 + $0x810] sm:$0xff] }
 0x216   :  { %v596_v7 = vld [vmem:[#allocation2 + $0x778] sm:$0xff] }
 0x217   :  { %4503 = vmatpush1.bf16.msra.mxu0 %v9337_v4  ;;  %4955 = vmatpush1.bf16.msra.mxu1 %v9339_v40  ;;  %v9378_v4 = vcombine.high %v583_v3, %v587_v46  ;;  %v9380_v40 = vcombine.high %v584_v23, %v588_v48  ;;  %v9387_v11 = vcombine.low %v592_v63, %v596_v7 }
 0x218   :  { %4504 = vmatprep.subr.bf16.mxu0 %v9346_v57  ;;  %4956 = vmatprep.subr.bf16.mxu1 %v9348_v59  ;;  %v591_v57 = vld [vmem:[#allocation2 + $0x750] sm:$0xff] }
 0x219   :  { %v595_v59 = vld [vmem:[#allocation2 + $0x770] sm:$0xff] }
 0x21a   :  { %4448 = vmatmul.mubr.bf16.gmra.mrb[48].mxu0 %v12000_v43  ;;  %4900 = vmatmul.mubr.bf16.gmra.mrb[48].mxu1 %v12000_v43  ;;  %v9363_v43 = vcombine.low %v568_v14, %v572_v45  ;;  %v9386_v37 = vcombine.high %v591_v57, %v595_v59 }
 0x21b   :  { %4505 = vmatpush1.bf16.msra.mxu0 %v9345_v49  ;;  %4957 = vmatpush1.bf16.msra.mxu1 %v9347_v19  ;;  %v9388_v49 = vcombine.high %v592_v63, %v596_v7  ;;  %v599_v19 = vld [vmem:[#allocation2 + $0x790] sm:$0xff]  ;;  %v632_v7 = vld [vmem:[#allocation2 + $0x898] sm:$0xff] }
 0x21c   :  { %4506 = vmatprep.subr.bf16.mxu0 %v9354_v58  ;;  %4958 = vmatprep.subr.bf16.mxu1 %v9356_v35  ;;  %v603_v58 = vld [vmem:[#allocation2 + $0x7b0] sm:$0xff]  ;;  %v600_v35 = vld [vmem:[#allocation2 + $0x798] sm:$0xff] }
 0x21d   :  { %4457 = vmatprep.mubr.bf16.mxu0 %v12008_v52  ;;  %4909 = vmatprep.mubr.bf16.mxu1 %v12008_v52  ;;  %v9369_v52 = vcombine.low %v575_v29, %v579_v15  ;;  %v9394_v14 = vcombine.high %v599_v19, %v603_v58  ;;  %v9396_v45 = vcombine.high %v600_v35, %v604_v42  ;;  %v635_v63 = vld [vmem:[#allocation2 + $0x8b0] sm:$0xff] }
 0x21e   :  { %v9393_v29 = vcombine.low %v599_v19, %v603_v58  ;;  %v639_v19 = vld [vmem:[#allocation2 + $0x8d0] sm:$0xff] }
 0x21f   :  { %4507 = vmatpush1.bf16.msra.mxu0 %v9353_v28  ;;  %4959 = vmatpush1.bf16.msra.mxu1 %v9355_v17  ;;  %v607_v28 = vld [vmem:[#allocation2 + $0x7d0] sm:$0xff] }
 0x220   :  { %4508 = vmatprep.subr.bf16.mxu0 %v9362_v24  ;;  %4960 = vmatprep.subr.bf16.mxu1 %v9364_v2  ;;  %v611_v17 = vld [vmem:[#allocation2 + $0x7f0] sm:$0xff]  ;;  %v608_v24 = vld [vmem:[#allocation2 + $0x7d8] sm:$0xff] }
 0x221   :  { %v612_v2 = vld [vmem:[#allocation2 + $0x7f8] sm:$0xff]  ;;  %v9402_v15 = vcombine.high %v607_v28, %v611_v17  ;;  %v643_v58 = vld [vmem:[#allocation2 + $0x8f0] sm:$0xff] }
 0x222   :  { %4458 = vmatmul.mubr.bf16.gmra.mrb[52].mxu0 %v12020_v5  ;;  %4910 = vmatmul.mubr.bf16.gmra.mrb[52].mxu1 %v12020_v5  ;;  %v9379_v5 = vcombine.low %v584_v23, %v588_v48  ;;  %v9404_v56 = vcombine.high %v608_v24, %v612_v2  ;;  %v623_v23 = vld [vmem:[#allocation2 + $0x850] sm:$0xff] }
 0x223   :  { %4509 = vmatpush1.bf16.msra.mxu0 %v9361_v32  ;;  %4961 = vmatpush1.bf16.msra.mxu1 %v9363_v43  ;;  %v619_v32 = vld [vmem:[#allocation2 + $0x830] sm:$0xff]  ;;  %v616_v43 = vld [vmem:[#allocation2 + $0x818] sm:$0xff] }
 0x224   :  { %4510 = vmatprep.subr.bf16.mxu0 %v9370_v60  ;;  %4962 = vmatprep.subr.bf16.mxu1 %v9372_v20  ;;  %v620_v60 = vld [vmem:[#allocation2 + $0x838] sm:$0xff]  ;;  %v9403_v20 = vcombine.low %v608_v24, %v612_v2  ;;  %v9410_v3 = vcombine.high %v615_v30, %v619_v32  ;;  %v627_v48 = vld [vmem:[#allocation2 + $0x870] sm:$0xff] }
 0x225   :  { %4467 = vmatprep.mubr.bf16.mxu0 %v12028_v13  ;;  %4919 = vmatprep.mubr.bf16.mxu1 %v12028_v13  ;;  %v9385_v13 = vcombine.low %v591_v57, %v595_v59  ;;  %v9412_v46 = vcombine.high %v616_v43, %v620_v60  ;;  %v631_v59 = vld [vmem:[#allocation2 + $0x890] sm:$0xff]  ;;  %v652_v24 = vld [vmem:[#allocation2 + $0x938] sm:$0xff] }
 0x227   :  { %4511 = vmatpush1.bf16.msra.mxu0 %v9369_v52  ;;  %4963 = vmatpush1.bf16.msra.mxu1 %v9371_v27  ;;  %v624_v52 = vld [vmem:[#allocation2 + $0x858] sm:$0xff] }
 0x228   :  { %4512 = vmatprep.subr.bf16.mxu0 %v9378_v4  ;;  %4964 = vmatprep.subr.bf16.mxu1 %v9380_v40  ;;  %v628_v27 = vld [vmem:[#allocation2 + $0x878] sm:$0xff]  ;;  %v9409_v4 = vcombine.low %v615_v30, %v619_v32  ;;  %v9418_v40 = vcombine.high %v623_v23, %v627_v48 }
 0x229   :  { %v9420_v57 = vcombine.high %v624_v52, %v628_v27  ;;  %v656_v30 = vld [vmem:[#allocation2 + $0x958] sm:$0xff] }
 0x22a   :  { %4468 = vmatmul.mubr.bf16.gmra.mrb[56].mxu0 %v12046_v34  ;;  %4920 = vmatmul.mubr.bf16.gmra.mrb[56].mxu1 %v12046_v34  ;;  %v9395_v34 = vcombine.low %v600_v35, %v604_v42  ;;  %v640_v35 = vld [vmem:[#allocation2 + $0x8d8] sm:$0xff] }
 0x22b   :  { %4513 = vmatpush1.bf16.msra.mxu0 %v9377_v10  ;;  %4965 = vmatpush1.bf16.msra.mxu1 %v9379_v5  ;;  %v636_v10 = vld [vmem:[#allocation2 + $0x8b8] sm:$0xff]  ;;  %v9419_v5 = vcombine.low %v624_v52, %v628_v27 }
 0x22c   :  { %4514 = vmatprep.subr.bf16.mxu0 %v9386_v37  ;;  %4966 = vmatprep.subr.bf16.mxu1 %v9388_v49  ;;  %v9426_v37 = vcombine.high %v631_v59, %v635_v63  ;;  %v9428_v49 = vcombine.high %v632_v7, %v636_v10  ;;  %v644_v42 = vld [vmem:[#allocation2 + $0x8f8] sm:$0xff] }
 0x22d   :  { %4477 = vmatprep.mubr.bf16.mxu0 %v12048_v41  ;;  %4929 = vmatprep.mubr.bf16.mxu1 %v12048_v41  ;;  %v9401_v41 = vcombine.low %v607_v28, %v611_v17  ;;  %v651_v28 = vld [vmem:[#allocation2 + $0x930] sm:$0xff]  ;;  %v648_v17 = vld [vmem:[#allocation2 + $0x918] sm:$0xff]  ;;  %v9435_v2 = vcombine.low %v640_v35, %v644_v42 }
 0x22e   :  { %v660_v32 = vld [vmem:[#allocation2 + $0x978] sm:$0xff] }
 0x22f   :  { %4515 = vmatpush1.bf16.msra.mxu0 %v9385_v13  ;;  %4967 = vmatpush1.bf16.msra.mxu1 %v9387_v11  ;;  %v9425_v13 = vcombine.low %v631_v59, %v635_v63  ;;  %v9434_v11 = vcombine.high %v639_v19, %v643_v58 }
 0x230   :  { %4516 = vmatprep.subr.bf16.mxu0 %v9394_v14  ;;  %4968 = vmatprep.subr.bf16.mxu1 %v9396_v45  ;;  %v9436_v14 = vcombine.high %v640_v35, %v644_v42  ;;  %v647_v45 = vld [vmem:[#allocation2 + $0x910] sm:$0xff] }
 0x231   :  { %v687_v35 = vld [vmem:[#allocation2 + $0xa50] sm:$0xff] }
 0x232   :  { %4478 = vmatmul.mubr.bf16.gmra.mrb[60].mxu0 %v12066_v62  ;;  %4930 = vmatmul.mubr.bf16.gmra.mrb[60].mxu1 %v12066_v62  ;;  %v9411_v62 = vcombine.low %v616_v43, %v620_v60  ;;  %v9441_v43 = vcombine.low %v647_v45, %v651_v28  ;;  %v691_v42 = vld [vmem:[#allocation2 + $0xa70] sm:$0xff] }
 0x233   :  { %4517 = vmatpush1.bf16.msra.mxu0 %v9393_v29  ;;  %4969 = vmatpush1.bf16.msra.mxu1 %v9395_v34  ;;  %v9442_v29 = vcombine.high %v647_v45, %v651_v28  ;;  %v9444_v34 = vcombine.high %v648_v17, %v652_v24  ;;  %v695_v28 = vld [vmem:[#allocation2 + $0xa90] sm:$0xff] }
 0x234   :  { %4518 = vmatprep.subr.bf16.mxu0 %v9402_v15  ;;  %4970 = vmatprep.subr.bf16.mxu1 %v9404_v56  ;;  %v655_v15 = vld [vmem:[#allocation2 + $0x950] sm:$0xff] }
 0x235   :  { %4520 = vmatprep.mubr.bf16.mxu0 %v12068_v6  ;;  %4972 = vmatprep.mubr.bf16.mxu1 %v12068_v6  ;;  %v9417_v6 = vcombine.low %v623_v23, %v627_v48  ;;  %v659_v56 = vld [vmem:[#allocation2 + $0x970] sm:$0xff]  ;;  %v668_v23 = vld [vmem:[#allocation2 + $0x9b8] sm:$0xff]  ;;  %v9451_v48 = vcombine.low %v656_v30, %v660_v32 }
 0x236   :  { %v9450_v60 = vcombine.high %v655_v15, %v659_v56 }
 0x237   :  { %4519 = vmatpush1.bf16.msra.mxu0 %v9401_v41  ;;  %4971 = vmatpush1.bf16.msra.mxu1 %v9403_v20  ;;  %v9452_v41 = vcombine.high %v656_v30, %v660_v32  ;;  %v663_v20 = vld [vmem:[#allocation2 + $0x990] sm:$0xff]  ;;  %v704_v30 = vld [vmem:[#allocation2 + $0xad8] sm:$0xff] }
 0x238   :  { %4601 = vmatprep.subr.bf16.mxu0 %v9410_v3  ;;  %5053 = vmatprep.subr.bf16.mxu1 %v9412_v46  ;;  %v667_v3 = vld [vmem:[#allocation2 + $0x9b0] sm:$0xff]  ;;  %v664_v46 = vld [vmem:[#allocation2 + $0x998] sm:$0xff] }
 0x239   :  { %v9458_v52 = vcombine.high %v663_v20, %v667_v3  ;;  %v9460_v27 = vcombine.high %v664_v46, %v668_v23  ;;  %v9457_v59 = vcombine.low %v663_v20, %v667_v3  ;;  %v708_v32 = vld [vmem:[#allocation2 + $0xaf8] sm:$0xff]  ;;  %v715_v20 = vld [vmem:[#allocation2 + $0xb30] sm:$0xff] }
 0x23a   :  { %4521 = vmatmul.mubr.bf16.vlgmr.msra.gmra.mrb[32].mxu0 %v12086_v26  ;;  %4973 = vmatmul.mubr.bf16.vlgmr.msra.gmra.mrb[32].mxu1 %v12086_v26  ;;  %v9427_v26 = vcombine.low %v632_v7, %v636_v10  ;;  %v679_v10 = vld [vmem:[#allocation2 + $0xa10] sm:$0xff]  ;;  %v712_v3 = vld [vmem:[#allocation2 + $0xb18] sm:$0xff] }
 0x23b   :  { %4602 = vmatpush1.bf16.msra.mxu0 %v9409_v4  ;;  %5054 = vmatpush1.bf16.msra.mxu1 %v9411_v62  ;;  %v671_v4 = vld [vmem:[#allocation2 + $0x9d0] sm:$0xff] }
 0x23c   :  { %4603 = vmatprep.subr.bf16.mxu0 %v9418_v40  ;;  %5055 = vmatprep.subr.bf16.mxu1 %v9420_v57  ;;  %v675_v62 = vld [vmem:[#allocation2 + $0x9f0] sm:$0xff]  ;;  %v672_v40 = vld [vmem:[#allocation2 + $0x9d8] sm:$0xff] }
 0x23d   :  { %4530 = vmatprep.mubr.bf16.mxu0 %v12088_v33  ;;  %4982 = vmatprep.mubr.bf16.mxu1 %v12088_v33  ;;  %v9433_v33 = vcombine.low %v639_v19, %v643_v58  ;;  %v676_v57 = vld [vmem:[#allocation2 + $0x9f8] sm:$0xff]  ;;  %v9466_v63 = vcombine.high %v671_v4, %v675_v62 }
 0x23e   :  { %v9468_v7 = vcombine.high %v672_v40, %v676_v57 }
 0x23f   :  { %4604 = vmatpush1.bf16.msra.mxu0 %v9417_v6  ;;  %5056 = vmatpush1.bf16.msra.mxu1 %v9419_v5  ;;  %v683_v6 = vld [vmem:[#allocation2 + $0xa30] sm:$0xff]  ;;  %v680_v5 = vld [vmem:[#allocation2 + $0xa18] sm:$0xff] }
 0x240   :  { %4605 = vmatprep.subr.bf16.mxu0 %v9426_v37  ;;  %5057 = vmatprep.subr.bf16.mxu1 %v9428_v49  ;;  %v684_v37 = vld [vmem:[#allocation2 + $0xa38] sm:$0xff]  ;;  %v9467_v49 = vcombine.low %v672_v40, %v676_v57  ;;  %v9474_v19 = vcombine.high %v679_v10, %v683_v6 }
 0x241   :  { %v9476_v58 = vcombine.high %v680_v5, %v684_v37 }
 0x242   :  { %4531 = vmatmul.mubr.bf16.gmra.mrb[36].mxu0 %v12106_v55  ;;  %4983 = vmatmul.mubr.bf16.gmra.mrb[36].mxu1 %v12106_v55  ;;  %v9443_v55 = vcombine.low %v648_v17, %v652_v24  ;;  %v699_v17 = vld [vmem:[#allocation2 + $0xab0] sm:$0xff]  ;;  %v696_v24 = vld [vmem:[#allocation2 + $0xa98] sm:$0xff] }
 0x243   :  { %4606 = vmatpush1.bf16.msra.mxu0 %v9425_v13  ;;  %5058 = vmatpush1.bf16.msra.mxu1 %v9427_v26  ;;  %v688_v13 = vld [vmem:[#allocation2 + $0xa58] sm:$0xff] }
 0x244   :  { %4607 = vmatprep.subr.bf16.mxu0 %v9434_v11  ;;  %5059 = vmatprep.subr.bf16.mxu1 %v9436_v14  ;;  %v692_v26 = vld [vmem:[#allocation2 + $0xa78] sm:$0xff]  ;;  %v9473_v11 = vcombine.low %v679_v10, %v683_v6  ;;  %v9482_v14 = vcombine.high %v687_v35, %v691_v42 }
 0x245   :  { %4540 = vmatprep.mubr.bf16.mxu0 %v12108_v0  ;;  %4992 = vmatprep.mubr.bf16.mxu1 %v12108_v0  ;;  %v9449_v0 = vcombine.low %v655_v15, %v659_v56  ;;  %v9484_v45 = vcombine.high %v688_v13, %v692_v26  ;;  %v703_v15 = vld [vmem:[#allocation2 + $0xad0] sm:$0xff]  ;;  %v732_v10 = vld [vmem:[#allocation2 + $0xbb8] sm:$0xff] }
 0x246   :  { %v707_v56 = vld [vmem:[#allocation2 + $0xaf0] sm:$0xff] }
 0x247   :  { %4608 = vmatpush1.bf16.msra.mxu0 %v9433_v33  ;;  %5060 = vmatpush1.bf16.msra.mxu1 %v9435_v2  ;;  %v700_v33 = vld [vmem:[#allocation2 + $0xab8] sm:$0xff]  ;;  %v9483_v2 = vcombine.low %v688_v13, %v692_v26  ;;  %v743_v26 = vld [vmem:[#allocation2 + $0xc10] sm:$0xff] }
 0x248   :  { %4609 = vmatprep.subr.bf16.mxu0 %v9442_v29  ;;  %5061 = vmatprep.subr.bf16.mxu1 %v9444_v34  ;;  %v9490_v29 = vcombine.high %v695_v28, %v699_v17  ;;  %v9492_v34 = vcombine.high %v696_v24, %v700_v33 }
 0x24a   :  { %4541 = vmatmul.mubr.bf16.gmra.mrb[40].mxu0 %v12126_v22  ;;  %4993 = vmatmul.mubr.bf16.gmra.mrb[40].mxu1 %v12126_v22  ;;  %v9459_v22 = vcombine.low %v664_v46, %v668_v23  ;;  %v716_v46 = vld [vmem:[#allocation2 + $0xb38] sm:$0xff]  ;;  %v9499_v23 = vcombine.low %v704_v30, %v708_v32 }
 0x24b   :  { %4610 = vmatpush1.bf16.msra.mxu0 %v9441_v43  ;;  %5062 = vmatpush1.bf16.msra.mxu1 %v9443_v55  ;;  %v9489_v43 = vcombine.low %v695_v28, %v699_v17  ;;  %v9498_v55 = vcombine.high %v703_v15, %v707_v56 }
 0x24c   :  { %4611 = vmatprep.subr.bf16.mxu0 %v9450_v60  ;;  %5063 = vmatprep.subr.bf16.mxu1 %v9452_v41  ;;  %v9500_v60 = vcombine.high %v704_v30, %v708_v32  ;;  %v711_v41 = vld [vmem:[#allocation2 + $0xb10] sm:$0xff]  ;;  %v760_v32 = vld [vmem:[#allocation2 + $0xc98] sm:$0xff] }
 0x24d   :  { %4550 = vmatprep.mubr.bf16.mxu0 %v12128_v31  ;;  %5002 = vmatprep.mubr.bf16.mxu1 %v12128_v31  ;;  %v9465_v31 = vcombine.low %v671_v4, %v675_v62  ;;  %v720_v4 = vld [vmem:[#allocation2 + $0xb58] sm:$0xff]  ;;  %v9505_v40 = vcombine.low %v711_v41, %v715_v20  ;;  %v763_v30 = vld [vmem:[#allocation2 + $0xcb0] sm:$0xff] }
 0x24e   :  { %v724_v62 = vld [vmem:[#allocation2 + $0xb78] sm:$0xff] }
 0x24f   :  { %4612 = vmatpush1.bf16.msra.mxu0 %v9449_v0  ;;  %5064 = vmatpush1.bf16.msra.mxu1 %v9451_v48  ;;  %v9506_v0 = vcombine.high %v711_v41, %v715_v20  ;;  %v9508_v48 = vcombine.high %v712_v3, %v716_v46  ;;  %v9515_v6 = vcombine.low %v720_v4, %v724_v62  ;;  %v767_v41 = vld [vmem:[#allocation2 + $0xcd0] sm:$0xff] }
 0x250   :  { %4613 = vmatprep.subr.bf16.mxu0 %v9458_v52  ;;  %5065 = vmatprep.subr.bf16.mxu1 %v9460_v27  ;;  %v719_v52 = vld [vmem:[#allocation2 + $0xb50] sm:$0xff] }
 0x251   :  { %v723_v27 = vld [vmem:[#allocation2 + $0xb70] sm:$0xff] }
 0x252   :  { %4551 = vmatmul.mubr.bf16.gmra.mrb[44].mxu0 %v12146_v54  ;;  %5003 = vmatmul.mubr.bf16.gmra.mrb[44].mxu1 %v12146_v54  ;;  %v9475_v54 = vcombine.low %v680_v5, %v684_v37  ;;  %v9514_v57 = vcombine.high %v719_v52, %v723_v27  ;;  %v771_v20 = vld [vmem:[#allocation2 + $0xcf0] sm:$0xff] }
 0x253   :  { %4614 = vmatpush1.bf16.msra.mxu0 %v9457_v59  ;;  %5066 = vmatpush1.bf16.msra.mxu1 %v9459_v22  ;;  %v9516_v59 = vcombine.high %v720_v4, %v724_v62  ;;  %v727_v22 = vld [vmem:[#allocation2 + $0xb90] sm:$0xff]  ;;  %v776_v4 = vld [vmem:[#allocation2 + $0xd18] sm:$0xff] }
 0x254   :  { %4615 = vmatprep.subr.bf16.mxu0 %v9466_v63  ;;  %5067 = vmatprep.subr.bf16.mxu1 %v9468_v7  ;;  %v731_v63 = vld [vmem:[#allocation2 + $0xbb0] sm:$0xff]  ;;  %v728_v7 = vld [vmem:[#allocation2 + $0xb98] sm:$0xff] }
 0x255   :  { %4560 = vmatprep.mubr.bf16.mxu0 %v12148_v1  ;;  %5012 = vmatprep.mubr.bf16.mxu1 %v12148_v1  ;;  %v9481_v1 = vcombine.low %v687_v35, %v691_v42  ;;  %v9522_v5 = vcombine.high %v727_v22, %v731_v63  ;;  %v9524_v37 = vcombine.high %v728_v7, %v732_v10  ;;  %v780_v62 = vld [vmem:[#allocation2 + $0xd38] sm:$0xff] }
 0x256   :  { %v9521_v35 = vcombine.low %v727_v22, %v731_v63  ;;  %v783_v22 = vld [vmem:[#allocation2 + $0xd50] sm:$0xff] }
 0x257   :  { %4616 = vmatpush1.bf16.msra.mxu0 %v9465_v31  ;;  %5068 = vmatpush1.bf16.msra.mxu1 %v9467_v49  ;;  %v735_v31 = vld [vmem:[#allocation2 + $0xbd0] sm:$0xff] }
 0x258   :  { %4617 = vmatprep.subr.bf16.mxu0 %v9474_v19  ;;  %5069 = vmatprep.subr.bf16.mxu1 %v9476_v58  ;;  %v739_v49 = vld [vmem:[#allocation2 + $0xbf0] sm:$0xff]  ;;  %v736_v19 = vld [vmem:[#allocation2 + $0xbd8] sm:$0xff] }
 0x259   :  { %v740_v58 = vld [vmem:[#allocation2 + $0xbf8] sm:$0xff]  ;;  %v9530_v42 = vcombine.high %v735_v31, %v739_v49  ;;  %v787_v63 = vld [vmem:[#allocation2 + $0xd70] sm:$0xff] }
 0x25a   :  { %4561 = vmatmul.mubr.bf16.gmra.mrb[48].mxu0 %v12166_v25  ;;  %5013 = vmatmul.mubr.bf16.gmra.mrb[48].mxu1 %v12166_v25  ;;  %v9491_v25 = vcombine.low %v696_v24, %v700_v33  ;;  %v9532_v13 = vcombine.high %v736_v19, %v740_v58  ;;  %v751_v24 = vld [vmem:[#allocation2 + $0xc50] sm:$0xff] }
 0x25b   :  { %4618 = vmatpush1.bf16.msra.mxu0 %v9473_v11  ;;  %5070 = vmatpush1.bf16.msra.mxu1 %v9475_v54  ;;  %v747_v11 = vld [vmem:[#allocation2 + $0xc30] sm:$0xff]  ;;  %v744_v54 = vld [vmem:[#allocation2 + $0xc18] sm:$0xff] }
 0x25c   :  { %4619 = vmatprep.subr.bf16.mxu0 %v9482_v14  ;;  %5071 = vmatprep.subr.bf16.mxu1 %v9484_v45  ;;  %v748_v14 = vld [vmem:[#allocation2 + $0xc38] sm:$0xff]  ;;  %v9531_v45 = vcombine.low %v736_v19, %v740_v58  ;;  %v9538_v28 = vcombine.high %v743_v26, %v747_v11  ;;  %v755_v33 = vld [vmem:[#allocation2 + $0xc70] sm:$0xff]  ;;  %v9578_v19 = vcombine.high %v783_v22, %v787_v63 }
 0x25d   :  { %4570 = vmatprep.mubr.bf16.mxu0 %v12168_v36  ;;  %5022 = vmatprep.mubr.bf16.mxu1 %v12168_v36  ;;  %v9497_v36 = vcombine.low %v703_v15, %v707_v56  ;;  %v9540_v17 = vcombine.high %v744_v54, %v748_v14  ;;  %v759_v56 = vld [vmem:[#allocation2 + $0xc90] sm:$0xff] }
 0x25e   :  { %v791_v58 = vld [vmem:[#allocation2 + $0xd90] sm:$0xff] }
 0x25f   :  { %4620 = vmatpush1.bf16.msra.mxu0 %v9481_v1  ;;  %5072 = vmatpush1.bf16.msra.mxu1 %v9483_v2  ;;  %v752_v1 = vld [vmem:[#allocation2 + $0xc58] sm:$0xff] }
 0x260   :  { %4621 = vmatprep.subr.bf16.mxu0 %v9490_v29  ;;  %5073 = vmatprep.subr.bf16.mxu1 %v9492_v34  ;;  %v756_v2 = vld [vmem:[#allocation2 + $0xc78] sm:$0xff]  ;;  %v9537_v29 = vcombine.low %v743_v26, %v747_v11  ;;  %v9546_v34 = vcombine.high %v751_v24, %v755_v33 }
 0x261   :  { %v9548_v15 = vcombine.high %v752_v1, %v756_v2  ;;  %v796_v26 = vld [vmem:[#allocation2 + $0xdb8] sm:$0xff] }
 0x262   :  { %4571 = vmatmul.mubr.bf16.gmra.mrb[52].mxu0 %v12186_v61  ;;  %5023 = vmatmul.mubr.bf16.gmra.mrb[52].mxu1 %v12186_v61  ;;  %v9507_v61 = vcombine.low %v712_v3, %v716_v46  ;;  %v768_v3 = vld [vmem:[#allocation2 + $0xcd8] sm:$0xff] }
 0x263   :  { %4622 = vmatpush1.bf16.msra.mxu0 %v9489_v43  ;;  %5074 = vmatpush1.bf16.msra.mxu1 %v9491_v25  ;;  %v764_v43 = vld [vmem:[#allocation2 + $0xcb8] sm:$0xff]  ;;  %v9547_v25 = vcombine.low %v752_v1, %v756_v2  ;;  %v12645_v1 = vld [vmem:[#allocation2 + $0xdd0] sm:$0xff] }
 0x264   :  { %4623 = vmatprep.subr.bf16.mxu0 %v9498_v55  ;;  %5075 = vmatprep.subr.bf16.mxu1 %v9500_v60  ;;  %v9554_v55 = vcombine.high %v759_v56, %v763_v30  ;;  %v9556_v60 = vcombine.high %v760_v32, %v764_v43  ;;  %v772_v46 = vld [vmem:[#allocation2 + $0xcf8] sm:$0xff]  ;;  %v12647_v2 = vld [vmem:[#allocation2 + $0xdf0] sm:$0xff] }
 0x265   :  { %4580 = vmatprep.mubr.bf16.mxu0 %v12188_v9  ;;  %5032 = vmatprep.mubr.bf16.mxu1 %v12188_v9  ;;  %v9513_v9 = vcombine.low %v719_v52, %v723_v27  ;;  %v775_v52 = vld [vmem:[#allocation2 + $0xd10] sm:$0xff] }
 0x266   :  { %v779_v27 = vld [vmem:[#allocation2 + $0xd30] sm:$0xff] }
 0x267   :  { %4624 = vmatpush1.bf16.msra.mxu0 %v9497_v36  ;;  %5076 = vmatpush1.bf16.msra.mxu1 %v9499_v23  ;;  %v871_v36 = vlaneseq  ;;  %v9553_v23 = vcombine.low %v759_v56, %v763_v30  ;;  %v12653_v56 = vld [vmem:[#allocation2 + $0xdf8] sm:$0xff] }
 0x268   :  { %4625 = vmatprep.subr.bf16.mxu0 %v9506_v0  ;;  %5077 = vmatprep.subr.bf16.mxu1 %v9508_v48  ;;  %v9562_v0 = vcombine.high %v767_v41, %v771_v20  ;;  %v9564_v48 = vcombine.high %v768_v3, %v772_v46 }
 0x26a   :  { %4581 = vmatmul.mubr.bf16.gmra.mrb[56].mxu0 %v12206_v38  ;;  %5033 = vmatmul.mubr.bf16.gmra.mrb[56].mxu1 %v12206_v38  ;;  %v9523_v38 = vcombine.low %v728_v7, %v732_v10  ;;  %v784_v10 = vld [vmem:[#allocation2 + $0xd58] sm:$0xff] }
 0x26b   :  { %4626 = vmatpush1.bf16.msra.mxu0 %v9505_v40  ;;  %5078 = vmatpush1.bf16.msra.mxu1 %v9507_v61  ;;  %v12615_v40 = vshrl.u32 %v871_v36, 7  ;;  %v9563_v61 = vcombine.low %v768_v3, %v772_v46  ;;  %v9594_v46 = vcombine.high %v12645_v1, %v12647_v2 }
 0x26c   :  { %4627 = vmatprep.subr.bf16.mxu0 %v9514_v57  ;;  %5079 = vmatprep.subr.bf16.mxu1 %v9516_v59  ;;  %v9570_v57 = vcombine.high %v775_v52, %v779_v27  ;;  %v9572_v59 = vcombine.high %v776_v4, %v780_v62 }
 0x26d   :  { %4590 = vmatprep.mubr.bf16.mxu0 %v12208_v47  ;;  %5042 = vmatprep.mubr.bf16.mxu1 %v12208_v47  ;;  %v9529_v47 = vcombine.low %v735_v31, %v739_v49  ;;  %v12621_v7 = vsub.s32 0, %v12615_v40  ;;  %v9571_v31 = vcombine.low %v776_v4, %v780_v62  ;;  %v885_v49 = vsub.s32 3, %v12615_v40 }
 0x26f   :  { %4628 = vmatpush1.bf16.msra.mxu0 %v9513_v9  ;;  %5080 = vmatpush1.bf16.msra.mxu1 %v9515_v6  ;;  %v788_v9 = vld [vmem:[#allocation2 + $0xd78] sm:$0xff]  ;;  %v869_v6 = vld [vmem:[#allocation4] sm:$0xff] }
 0x270   :  { %4629 = vmatprep.subr.bf16.mxu0 %v9522_v5  ;;  %5081 = vmatprep.subr.bf16.mxu1 %v9524_v37  ;;  %v881_v5 = vsub.s32 2, %v12615_v40  ;;  %v12625_v37 = vsub.s32 1, %v12615_v40 }
 0x272   :  { %4591 = vmatmul.mubr.bf16.gmra.mrb[60].mxu0 %v12226_v12  ;;  %5043 = vmatmul.mubr.bf16.gmra.mrb[60].mxu1 %v12226_v12  ;;  %v9539_v12 = vcombine.low %v744_v54, %v748_v14  ;;  %v12635_v11 = vrot.slane %v869_v6, %v881_v5  ;;  %v12638_v54 = vrot.slane %v869_v6, %v12625_v37 }
 0x273   :  { %4630 = vmatpush1.bf16.msra.mxu0 %v9521_v35  ;;  %5082 = vmatpush1.bf16.msra.mxu1 %v9523_v38  ;;  %v795_v35 = vld [vmem:[#allocation2 + $0xdb0] sm:$0xff]  ;;  %v9577_v14 = vcombine.low %v783_v22, %v787_v63  ;;  %v12677_v22 = vld [vmem:[#allocation2 + $0xe38] sm:$0xff] }
 0x274   :  { %4631 = vmatprep.subr.bf16.mxu0 %v9530_v42  ;;  %5083 = vmatprep.subr.bf16.mxu1 %v9532_v13  ;;  %v13450_v38 = vld [vmem:[#allocation24_spill] sm:$0xff]  ;;  %v12630_v42 = vrot.slane %v869_v6, %v12621_v7 }
 0x275   :  { %4633 = vmatprep.mubr.bf16.mxu0 %v12228_v21  ;;  %5085 = vmatprep.mubr.bf16.mxu1 %v12228_v21  ;;  %v9545_v21 = vcombine.low %v751_v24, %v755_v33  ;;  %v792_v13 = vld [vmem:[#allocation2 + $0xd98] sm:$0xff] }
 0x276   :  { %v13451_v24 = vld [vmem:[#allocation25_spill] sm:$0xff]  ;;  %v9588_v33 = vcombine.high %v792_v13, %v796_v26 }
 0x277   :  { %4632 = vmatpush1.bf16.msra.mxu0 %v9529_v47  ;;  %5084 = vmatpush1.bf16.msra.mxu1 %v9531_v45  ;;  %v12642_v47 = vrot.slane %v869_v6, %v885_v49  ;;  %v9579_v45 = vcombine.low %v784_v10, %v788_v9 }
 0x278   :  { %4714 = vmatprep.subr.bf16.mxu0 %v9538_v28  ;;  %5166 = vmatprep.subr.bf16.mxu1 %v9540_v17  ;;  %v9586_v28 = vcombine.high %v791_v58, %v795_v35 }
 0x27a   :  { %4634 = vmatmul.mubr.bf16.vlgmr.msra.gmra.mrb[32].mxu0 %v12246_v53  ;;  %5086 = vmatmul.mubr.bf16.vlgmr.msra.gmra.mrb[32].mxu1 %v12246_v53  ;;  %v9555_v53 = vcombine.low %v760_v32, %v764_v43 }
 0x27b   :  { %4715 = vmatpush1.bf16.msra.mxu0 %v9537_v29  ;;  %5167 = vmatpush1.bf16.msra.mxu1 %v9539_v12 }
 0x27c   :  { %4716 = vmatprep.subr.bf16.mxu0 %v9546_v34  ;;  %5168 = vmatprep.subr.bf16.mxu1 %v9548_v15  ;;  %v12651_v15 = vld [vmem:[#allocation2 + $0xdd8] sm:$0xff] }
 0x27d   :  { %4643 = vmatprep.mubr.bf16.mxu0 %v12248_v8  ;;  %5095 = vmatprep.mubr.bf16.mxu1 %v12248_v8  ;;  %v9561_v8 = vcombine.low %v767_v41, %v771_v20 }
 0x27f   :  { %4717 = vmatpush1.bf16.msra.mxu0 %v9545_v21  ;;  %5169 = vmatpush1.bf16.msra.mxu1 %v9547_v25  ;;  %v9585_v25 = vcombine.low %v791_v58, %v795_v35 }
 0x280   :  { %4718 = vmatprep.subr.bf16.mxu0 %v9554_v55  ;;  %5170 = vmatprep.subr.bf16.mxu1 %v9556_v60  ;;  %v9587_v55 = vcombine.low %v792_v13, %v796_v26  ;;  %v13453_v13 = vld [vmem:[#allocation27_spill] sm:$0xff] }
 0x282   :  { %4644 = vmatmul.mubr.bf16.gmra.mrb[36].mxu0 %v12266_v39  ;;  %5096 = vmatmul.mubr.bf16.gmra.mrb[36].mxu1 %v12266_v39  ;;  %v9569_v39 = vcombine.low %v775_v52, %v779_v27  ;;  %v12667_v52 = vld [vmem:[#allocation2 + $0xe10] sm:$0xff] }
 0x283   :  { %4719 = vmatpush1.bf16.msra.mxu0 %v9553_v23  ;;  %5171 = vmatpush1.bf16.msra.mxu1 %v9555_v53  ;;  %v12669_v27 = vld [vmem:[#allocation2 + $0xe30] sm:$0xff] }
 0x284   :  { %4720 = vmatprep.subr.bf16.mxu0 %v9562_v0  ;;  %5172 = vmatprep.subr.bf16.mxu1 %v9564_v48  ;;  %v9593_v0 = vcombine.low %v12645_v1, %v12647_v2  ;;  %v9596_v48 = vcombine.high %v12651_v15, %v12653_v56  ;;  %v12699_v1 = vld [vmem:[#allocation2 + $0xe58] sm:$0xff] }
 0x285   :  { %4653 = vmatprep.mubr.bf16.mxu0 %v12268_v51  ;;  %5105 = vmatprep.mubr.bf16.mxu1 %v12268_v51  ;;  %v9580_v51 = vcombine.high %v784_v10, %v788_v9  ;;  %v12701_v2 = vld [vmem:[#allocation2 + $0xe78] sm:$0xff] }
 0x287   :  { %4721 = vmatpush1.bf16.msra.mxu0 %v9561_v8  ;;  %5173 = vmatpush1.bf16.msra.mxu1 %v9563_v61  ;;  %v13452_v61 = vld [vmem:[#allocation26_spill] sm:$0xff] }
 0x288   :  { %4722 = vmatprep.subr.bf16.mxu0 %v9570_v57  ;;  %5174 = vmatprep.subr.bf16.mxu1 %v9572_v59  ;;  %v9595_v57 = vcombine.low %v12651_v15, %v12653_v56  ;;  %v12675_v59 = vld [vmem:[#allocation2 + $0xe18] sm:$0xff]  ;;  %v9601_v56 = vcombine.low %v12667_v52, %v12669_v27 }
 0x289   :  { %v9604_v26 = vcombine.high %v12675_v59, %v12677_v22 }
 0x28a   :  { %4654 = vmatmul.mubr.bf16.gmra.mrb[40].mxu0 %v13450_v38  ;;  %5106 = vmatmul.mubr.bf16.gmra.mrb[40].mxu1 %v13450_v38 }
 0x28b   :  { %4723 = vmatpush1.bf16.msra.mxu0 %v9569_v39  ;;  %5175 = vmatpush1.bf16.msra.mxu1 %v9571_v31 }
 0x28c   :  { %4724 = vmatprep.subr.bf16.mxu0 %v9578_v19  ;;  %5176 = vmatprep.subr.bf16.mxu1 %v9580_v51  ;;  %v9602_v51 = vcombine.high %v12667_v52, %v12669_v27  ;;  %v13454_v52 = vld [vmem:[#allocation28_spill] sm:$0xff]  ;;  %v9611_v27 = vcombine.low %v12699_v1, %v12701_v2 }
 0x28d   :  { %v3844_v17 = vpop.f32.mrb[0].mxu0  ;;  %4663 = vmatprep.mubr.bf16.mxu0 %v13451_v24  ;;  %v4296_v12 = vpop.f32.mrb[0].mxu1  ;;  %5115 = vmatprep.mubr.bf16.mxu1 %v13451_v24 }
 0x28e   :  { %v10119_v29 = vadd.f32 %v3844_v17, %v12630_v42  ;;  %v3846_v34 = vpop.f32.mrb[1].mxu0  ;;  %v10151_v30 = vadd.f32 %v4296_v12, %v12635_v11  ;;  %v4298_v43 = vpop.f32.mrb[1].mxu1 }
 0x28f   :  { %v10120_v32 = vadd.f32 %v3846_v34, %v12638_v54  ;;  %v3848_v21 = vpop.f32.mrb[2].mxu0  ;;  %4725 = vmatpush1.bf16.msra.mxu0 %v9577_v14  ;;  %v10152_v60 = vadd.f32 %v4298_v43, %v12642_v47  ;;  %v4300_v20 = vpop.f32.mrb[2].mxu1  ;;  %5177 = vmatpush1.bf16.msra.mxu1 %v9579_v45  ;;  %v12691_v14 = vld [vmem:[#allocation2 + $0xe50] sm:$0xff] }
 0x290   :  { %v10121_v41 = vadd.f32 %v3848_v21, %v12630_v42  ;;  %v3850_v3 = vpop.f32.mrb[3].mxu0  ;;  %4726 = vmatprep.subr.bf16.mxu0 %v9586_v28  ;;  %v10153_v36 = vadd.f32 %v4300_v20, %v12635_v11  ;;  %v4302_v53 = vpop.f32.mrb[3].mxu1  ;;  %5178 = vmatprep.subr.bf16.mxu1 %v9588_v33  ;;  %v5279_v4 = vmax.f32 %v10119_v29, 0.0  ;;  %v5281_v63 = vmax.f32 %v10151_v30, 0.0  ;;  %v12693_v45 = vld [vmem:[#allocation2 + $0xe70] sm:$0xff] }
 0x291   :  { %v10122_v23 = vadd.f32 %v3850_v3, %v12638_v54  ;;  %v10154_v8 = vadd.f32 %v4302_v53, %v12642_v47  ;;  %v5280_v10 = vmax.f32 %v10120_v32, 0.0  ;;  %v5282_v6 = vmax.f32 %v10152_v60, 0.0 }
 0x292   :  { %v5287_v62 = vmax.f32 %v10121_v41, 0.0  ;;  %4664 = vmatmul.mubr.bf16.gmra.mrb[44].mxu0 %v13452_v61  ;;  %v5289_v9 = vmax.f32 %v10153_v36, 0.0  ;;  %5116 = vmatmul.mubr.bf16.gmra.mrb[44].mxu1 %v13452_v61  ;;  %v9603_v30 = vcombine.low %v12675_v59, %v12677_v22  ;;  %v9609_v3 = vcombine.low %v12691_v14, %v12693_v45  ;;  %v12719_v36 = vld [vmem:[#allocation2 + $0xe90] sm:$0xff] }
 0x293   :  { %v5288_v39 = vmax.f32 %v10122_v23, 0.0  ;;  %4727 = vmatpush1.bf16.msra.mxu0 %v9585_v25  ;;  %v5290_v19 = vmax.f32 %v10154_v8, 0.0  ;;  %5179 = vmatpush1.bf16.msra.mxu1 %v9587_v55  ;;  %v9610_v55 = vcombine.high %v12691_v14, %v12693_v45  ;;  %v12721_v23 = vld [vmem:[#allocation2 + $0xeb0] sm:$0xff] }
 0x294   :  { %v12680_v31 = vpack.c.bf16 %v5287_v62, %v5279_v4  ;;  %4728 = vmatprep.subr.bf16.mxu0 %v9594_v46  ;;  %v12684_v58 = vpack.c.bf16 %v5289_v9, %v5281_v63  ;;  %5180 = vmatprep.subr.bf16.mxu1 %v9596_v48  ;;  %v9612_v46 = vcombine.high %v12699_v1, %v12701_v2  ;;  %v12727_v4 = vld [vmem:[#allocation2 + $0xe98] sm:$0xff] }
 0x295   :  { %v12686_v35 = vpack.c.bf16 %v5288_v39, %v5280_v10  ;;  %v3854_v38 = vpop.f32.mrb[4].mxu0  ;;  %4673 = vmatprep.mubr.bf16.mxu0 %v13453_v13  ;;  %v12695_v28 = vpack.c.bf16 %v5290_v19, %v5282_v6  ;;  %v4306_v24 = vpop.f32.mrb[4].mxu1  ;;  %5125 = vmatprep.mubr.bf16.mxu1 %v13453_v13  ;;  %v12729_v62 = vld [vmem:[#allocation2 + $0xeb8] sm:$0xff]  ;;  %v9618_v9 = vcombine.high %v12719_v36, %v12721_v23  ;;  %v12743_v13 = vld [vmem:[#allocation2 + $0xed0] sm:$0xff] }
 0x296   :  { %v10123_v17 = vadd.f32 %v3854_v38, %v12630_v42  ;;  %v3856_v33 = vpop.f32.mrb[5].mxu0  ;;  %v10155_v29 = vadd.f32 %v4306_v24, %v12635_v11  ;;  %v4308_v34 = vpop.f32.mrb[5].mxu1  ;;  %v9620_v38 = vcombine.high %v12727_v4, %v12729_v62  ;;  %v12753_v1 = vld [vmem:[#allocation2 + $0xef8] sm:$0xff] }
 0x297   :  { %v10124_v12 = vadd.f32 %v3856_v33, %v12638_v54  ;;  %v3858_v15 = vpop.f32.mrb[6].mxu0  ;;  %4729 = vmatpush1.bf16.msra.mxu0 %v9593_v0  ;;  %v10156_v32 = vadd.f32 %v4308_v34, %v12642_v47  ;;  %v4310_v21 = vpop.f32.mrb[6].mxu1  ;;  %5181 = vmatpush1.bf16.msra.mxu1 %v9595_v57  ;;  %v12751_v33 = vld [vmem:[#allocation2 + $0xed8] sm:$0xff] }
 0x298   :  { %v10125_v43 = vadd.f32 %v3858_v15, %v12630_v42  ;;  %v3860_v25 = vpop.f32.mrb[7].mxu0  ;;  %4730 = vmatprep.subr.bf16.mxu0 %v9602_v51  ;;  %v10157_v60 = vadd.f32 %v4310_v21, %v12635_v11  ;;  %v4312_v20 = vpop.f32.mrb[7].mxu1  ;;  %5182 = vmatprep.subr.bf16.mxu1 %v9604_v26  ;;  %v5295_v53 = vmax.f32 %v10123_v17, 0.0  ;;  %v5297_v8 = vmax.f32 %v10155_v29, 0.0  ;;  %v13455_v51 = vld [vmem:[#allocation29_spill] sm:$0xff]  ;;  %v12745_v26 = vld [vmem:[#allocation2 + $0xef0] sm:$0xff] }
 0x299   :  { %v10126_v41 = vadd.f32 %v3860_v25, %v12638_v54  ;;  %v10158_v48 = vadd.f32 %v4312_v20, %v12642_v47  ;;  %v5296_v61 = vmax.f32 %v10124_v12, 0.0  ;;  %v5298_v22 = vmax.f32 %v10156_v32, 0.0 }
 0x29a   :  { %v5303_v0 = vmax.f32 %v10125_v43, 0.0  ;;  %4674 = vmatmul.mubr.bf16.gmra.mrb[48].mxu0 %v13454_v52  ;;  %v5305_v57 = vmax.f32 %v10157_v60, 0.0  ;;  %5126 = vmatmul.mubr.bf16.gmra.mrb[48].mxu1 %v13454_v52  ;;  %v9617_v15 = vcombine.low %v12719_v36, %v12721_v23  ;;  %v9626_v25 = vcombine.high %v12743_v13, %v12745_v26  ;;  %v12773_v36 = vld [vmem:[#allocation2 + $0xf30] sm:$0xff] }
 0x29b   :  { %v5304_v59 = vmax.f32 %v10126_v41, 0.0  ;;  %4731 = vmatpush1.bf16.msra.mxu0 %v9601_v56  ;;  %v5306_v10 = vmax.f32 %v10158_v48, 0.0  ;;  %5183 = vmatpush1.bf16.msra.mxu1 %v9603_v30  ;;  %v9619_v56 = vcombine.low %v12727_v4, %v12729_v62  ;;  %v9625_v20 = vcombine.low %v12743_v13, %v12745_v26  ;;  %v13456_v48 = vld [vmem:[#allocation30_spill] sm:$0xff]  ;;  %v12781_v4 = vld [vmem:[#allocation2 + $0xf38] sm:$0xff]  ;;  %v13457_v13 = vld [vmem:[#allocation31_spill] sm:$0xff] }
 0x29c   :  { %v12732_v63 = vpack.c.bf16 %v5303_v0, %v5295_v53  ;;  %4732 = vmatprep.subr.bf16.mxu0 %v9610_v55  ;;  %v12736_v39 = vpack.c.bf16 %v5305_v57, %v5297_v8  ;;  %5184 = vmatprep.subr.bf16.mxu1 %v9612_v46  ;;  %v12771_v46 = vld [vmem:[#allocation2 + $0xf10] sm:$0xff]  ;;  %v9627_v52 = vcombine.low %v12751_v33, %v12753_v1 }
 0x29d   :  { %v12738_v6 = vpack.c.bf16 %v5304_v59, %v5296_v61  ;;  %v3864_v19 = vpop.f32.mrb[8].mxu0  ;;  %4683 = vmatprep.mubr.bf16.mxu0 %v13455_v51  ;;  %v12747_v14 = vpack.c.bf16 %v5306_v10, %v5298_v22  ;;  %v4316_v17 = vpop.f32.mrb[8].mxu1  ;;  %5135 = vmatprep.mubr.bf16.mxu1 %v13455_v51 }
 0x29e   :  { %v10127_v45 = vadd.f32 %v3864_v19, %v12630_v42  ;;  %v3866_v24 = vpop.f32.mrb[9].mxu0  ;;  %v10159_v2 = vadd.f32 %v4316_v17, %v12635_v11  ;;  %v4318_v12 = vpop.f32.mrb[9].mxu1  ;;  %v12797_v17 = vld [vmem:[#allocation2 + $0xf70] sm:$0xff] }
 0x29f   :  { %v10128_v29 = vadd.f32 %v3866_v24, %v12638_v54  ;;  %v3868_v34 = vpop.f32.mrb[10].mxu0  ;;  %4733 = vmatpush1.bf16.msra.mxu0 %v9609_v3  ;;  %v10160_v30 = vadd.f32 %v4318_v12, %v12642_v47  ;;  %v4320_v43 = vpop.f32.mrb[10].mxu1  ;;  %5185 = vmatpush1.bf16.msra.mxu1 %v9611_v27  ;;  %v9628_v3 = vcombine.high %v12751_v33, %v12753_v1  ;;  %v12779_v27 = vld [vmem:[#allocation2 + $0xf18] sm:$0xff] }
 0x2a0   :  { %v10129_v32 = vadd.f32 %v3868_v34, %v12630_v42  ;;  %v3870_v21 = vpop.f32.mrb[11].mxu0  ;;  %4734 = vmatprep.subr.bf16.mxu0 %v9618_v9  ;;  %v10161_v55 = vadd.f32 %v4320_v43, %v12635_v11  ;;  %v4322_v41 = vpop.f32.mrb[11].mxu1  ;;  %5186 = vmatprep.subr.bf16.mxu1 %v9620_v38  ;;  %v5311_v23 = vmax.f32 %v10127_v45, 0.0  ;;  %v5313_v62 = vmax.f32 %v10159_v2, 0.0  ;;  %v12795_v45 = vld [vmem:[#allocation2 + $0xf50] sm:$0xff]  ;;  %v12805_v12 = vld [vmem:[#allocation2 + $0xf78] sm:$0xff] }
 0x2a1   :  { %v10130_v60 = vadd.f32 %v3870_v21, %v12638_v54  ;;  %v10162_v0 = vadd.f32 %v4322_v41, %v12642_v47  ;;  %v5312_v8 = vmax.f32 %v10128_v29, 0.0  ;;  %v5314_v59 = vmax.f32 %v10160_v30, 0.0  ;;  %v12803_v29 = vld [vmem:[#allocation2 + $0xf58] sm:$0xff] }
 0x2a2   :  { %v5319_v53 = vmax.f32 %v10129_v32, 0.0  ;;  %4684 = vmatmul.mubr.bf16.gmra.mrb[52].mxu0 %v13456_v48  ;;  %v5321_v61 = vmax.f32 %v10161_v55, 0.0  ;;  %5136 = vmatmul.mubr.bf16.gmra.mrb[52].mxu1 %v13456_v48  ;;  %v9634_v9 = vcombine.high %v12771_v46, %v12773_v36  ;;  %v9636_v26 = vcombine.high %v12779_v27, %v12781_v4 }
 0x2a3   :  { %v5320_v57 = vmax.f32 %v10130_v60, 0.0  ;;  %4735 = vmatpush1.bf16.msra.mxu0 %v9617_v15  ;;  %v5322_v10 = vmax.f32 %v10162_v0, 0.0  ;;  %5187 = vmatpush1.bf16.msra.mxu1 %v9619_v56  ;;  %v9633_v32 = vcombine.low %v12771_v46, %v12773_v36  ;;  %v9635_v43 = vcombine.low %v12779_v27, %v12781_v4  ;;  %v12825_v0 = vld [vmem:[#allocation2 + $0xfb0] sm:$0xff] }
 0x2a4   :  { %v12784_v22 = vpack.c.bf16 %v5319_v53, %v5311_v23  ;;  %4736 = vmatprep.subr.bf16.mxu0 %v9626_v25  ;;  %v12788_v19 = vpack.c.bf16 %v5321_v61, %v5313_v62  ;;  %5188 = vmatprep.subr.bf16.mxu1 %v9628_v3  ;;  %v9642_v41 = vcombine.high %v12795_v45, %v12797_v17  ;;  %v12823_v53 = vld [vmem:[#allocation2 + $0xf90] sm:$0xff]  ;;  %v860_v61 = vld [vmem:[#allocation2 + $0xfb8] sm:$0xff] }
 0x2a5   :  { %v12790_v51 = vpack.c.bf16 %v5320_v57, %v5312_v8  ;;  %v3874_v38 = vpop.f32.mrb[12].mxu0  ;;  %4693 = vmatprep.mubr.bf16.mxu0 %v13457_v13  ;;  %v12799_v24 = vpack.c.bf16 %v5322_v10, %v5314_v59  ;;  %v4326_v1 = vpop.f32.mrb[12].mxu1  ;;  %5145 = vmatprep.mubr.bf16.mxu1 %v13457_v13  ;;  %v9641_v46 = vcombine.low %v12795_v45, %v12797_v17  ;;  %v13458_v4 = vld [vmem:[#allocation32_spill] sm:$0xff] }
 0x2a6   :  { %v10131_v33 = vadd.f32 %v3874_v38, %v12630_v42  ;;  %v3876_v2 = vpop.f32.mrb[13].mxu0  ;;  %v10163_v34 = vadd.f32 %v4326_v1, %v12635_v11  ;;  %v4328_v56 = vpop.f32.mrb[13].mxu1  ;;  %v9644_v36 = vcombine.high %v12803_v29, %v12805_v12  ;;  %v9643_v62 = vcombine.low %v12803_v29, %v12805_v12  ;;  %v856_v8 = vld [vmem:[#allocation2 + $0xf98] sm:$0xff]  ;;  %v863_v12 = vld [vmem:[#allocation2 + $0xfd0] sm:$0xff] }
 0x2a7   :  { %v10132_v15 = vadd.f32 %v3876_v2, %v12638_v54  ;;  %v3878_v30 = vpop.f32.mrb[14].mxu0  ;;  %4737 = vmatpush1.bf16.msra.mxu0 %v9625_v20  ;;  %v10164_v21 = vadd.f32 %v4328_v56, %v12642_v47  ;;  %v4330_v55 = vpop.f32.mrb[14].mxu1  ;;  %5189 = vmatpush1.bf16.msra.mxu1 %v9627_v52  ;;  %v9650_v45 = vcombine.high %v12823_v53, %v12825_v0  ;;  %v13459_v2 = vld [vmem:[#allocation33_spill] sm:$0xff] }
 0x2a8   :  { %v10133_v25 = vadd.f32 %v3878_v30, %v12630_v42  ;;  %v3880_v60 = vpop.f32.mrb[15].mxu0  ;;  %4738 = vmatprep.subr.bf16.mxu0 %v9634_v9  ;;  %v10165_v3 = vadd.f32 %v4330_v55, %v12635_v11  ;;  %v4332_v23 = vpop.f32.mrb[15].mxu1  ;;  %5190 = vmatprep.subr.bf16.mxu1 %v9636_v26  ;;  %v5327_v48 = vmax.f32 %v10131_v33, 0.0  ;;  %v5329_v57 = vmax.f32 %v10163_v34, 0.0  ;;  %v867_v34 = vld [vmem:[#allocation2 + $0xff0] sm:$0xff] }
 0x2a9   :  { %v10134_v20 = vadd.f32 %v3880_v60, %v12638_v54  ;;  %v10166_v27 = vadd.f32 %v4332_v23, %v12642_v47  ;;  %v5328_v59 = vmax.f32 %v10132_v15, 0.0  ;;  %v5330_v38 = vmax.f32 %v10164_v21, 0.0  ;;  %v868_v21 = vld [vmem:[#allocation2 + $0xff8] sm:$0xff] }
 0x2aa   :  { %v5335_v52 = vmax.f32 %v10133_v25, 0.0  ;;  %4694 = vmatmul.mubr.bf16.gmra.mrb[56].mxu0 %v13458_v4  ;;  %v5337_v10 = vmax.f32 %v10165_v3, 0.0  ;;  %5146 = vmatmul.mubr.bf16.gmra.mrb[56].mxu1 %v13458_v4  ;;  %v9652_v29 = vcombine.high %v856_v8, %v860_v61  ;;  %v9649_v3 = vcombine.low %v12823_v53, %v12825_v0  ;;  %v13460_v0 = vld [vmem:[#allocation34_spill] sm:$0xff] }
 0x2ab   :  { %v5336_v9 = vmax.f32 %v10134_v20, 0.0  ;;  %4739 = vmatpush1.bf16.msra.mxu0 %v9633_v32  ;;  %v5338_v26 = vmax.f32 %v10166_v27, 0.0  ;;  %5191 = vmatpush1.bf16.msra.mxu1 %v9635_v43  ;;  %v864_v43 = vld [vmem:[#allocation2 + $0xfd8] sm:$0xff]  ;;  %v9651_v20 = vcombine.low %v856_v8, %v860_v61  ;;  %v9658_v27 = vcombine.high %v863_v12, %v867_v34 }
 0x2ac   :  { %v12832_v13 = vpack.c.bf16 %v5335_v52, %v5327_v48  ;;  %4740 = vmatprep.subr.bf16.mxu0 %v9642_v41  ;;  %v12836_v17 = vpack.c.bf16 %v5337_v10, %v5329_v57  ;;  %5192 = vmatprep.subr.bf16.mxu1 %v9644_v36  ;;  %v9657_v8 = vcombine.low %v863_v12, %v867_v34  ;;  %v13461_v34 = vld [vmem:[#allocation35_spill] sm:$0xff] }
 0x2ad   :  { %v12838_v33 = vpack.c.bf16 %v5336_v9, %v5328_v59  ;;  %v3884_v1 = vpop.f32.mrb[16].mxu0  ;;  %4703 = vmatprep.mubr.bf16.mxu0 %v13459_v2  ;;  %v12841_v15 = vpack.c.bf16 %v5338_v26, %v5330_v38  ;;  %v4336_v30 = vpop.f32.mrb[16].mxu1  ;;  %5155 = vmatprep.mubr.bf16.mxu1 %v13459_v2 }
 0x2ae   :  { %v10135_v56 = vadd.f32 %v3884_v1, %v12630_v42  ;;  %v3886_v32 = vpop.f32.mrb[17].mxu0  ;;  %v10167_v25 = vadd.f32 %v4336_v30, %v12635_v11  ;;  %v4338_v60 = vpop.f32.mrb[17].mxu1 }
 0x2af   :  { %v10136_v55 = vadd.f32 %v3886_v32, %v12638_v54  ;;  %v3888_v41 = vpop.f32.mrb[18].mxu0  ;;  %4741 = vmatpush1.bf16.msra.mxu0 %v9641_v46  ;;  %v10168_v23 = vadd.f32 %v4338_v60, %v12642_v47  ;;  %v4340_v48 = vpop.f32.mrb[18].mxu1  ;;  %5193 = vmatpush1.bf16.msra.mxu1 %v9643_v62  ;;  %v9660_v46 = vcombine.high %v864_v43, %v868_v21 }
 0x2b0   :  { %v10137_v36 = vadd.f32 %v3888_v41, %v12630_v42  ;;  %v3890_v52 = vpop.f32.mrb[19].mxu0  ;;  %4742 = vmatprep.subr.bf16.mxu0 %v9650_v45  ;;  %v10169_v4 = vadd.f32 %v4340_v48, %v12635_v11  ;;  %v4342_v59 = vpop.f32.mrb[19].mxu1  ;;  %5194 = vmatprep.subr.bf16.mxu1 %v9652_v29  ;;  %v5343_v10 = vmax.f32 %v10135_v56, 0.0  ;;  %v5345_v61 = vmax.f32 %v10167_v25, 0.0  ;;  %v10971_v56 = vld [vmem:[#allocation6 + $0x4] ss:$16 sps:$4 sm:$0xff]  }
 0x2b1   :  { %v10138_v57 = vadd.f32 %v3890_v52, %v12638_v54  ;;  %v10170_v53 = vadd.f32 %v4342_v59, %v12642_v47  ;;  %v5344_v38 = vmax.f32 %v10136_v55, 0.0  ;;  %v5346_v45 = vmax.f32 %v10168_v23, 0.0  ;;  %v10974_v25 = vld [vmem:[#allocation6 + $0xc] ss:$16 sps:$4 sm:$0xff]   ;;  %v10977_v59 = vld [vmem:[#allocation6 + $0x24] ss:$16 sps:$4 sm:$0xff]  }
 0x2b2   :  { %v5351_v9 = vmax.f32 %v10137_v36, 0.0  ;;  %4704 = vmatmul.mubr.bf16.gmra.mrb[60].mxu0 %v13460_v0  ;;  %v5353_v62 = vmax.f32 %v10169_v4, 0.0  ;;  %5156 = vmatmul.mubr.bf16.gmra.mrb[60].mxu1 %v13460_v0  ;;  %v9659_v29 = vcombine.low %v864_v43, %v868_v21  ;;  %v10969_v36 = vld [vmem:[#allocation6] ss:$16 sps:$4 sm:$0xff]  }
 0x2b3   :  { %v5352_v26 = vmax.f32 %v10138_v57, 0.0  ;;  %4743 = vmatpush1.bf16.msra.mxu0 %v9649_v3  ;;  %v5354_v2 = vmax.f32 %v10170_v53, 0.0  ;;  %5195 = vmatpush1.bf16.msra.mxu1 %v9651_v20  ;;  %v10972_v57 = vld [vmem:[#allocation6 + $0x8] ss:$16 sps:$4 sm:$0xff]   ;;  %v10980_v53 = vld [vmem:[#allocation6 + $0x2c] ss:$16 sps:$4 sm:$0xff]  }
 0x2b4   :  { %v12856_v1 = vpack.c.bf16 %v5351_v9, %v5343_v10  ;;  %4744 = vmatprep.subr.bf16.mxu0 %v9658_v27  ;;  %v12858_v30 = vpack.c.bf16 %v5353_v62, %v5345_v61  ;;  %5196 = vmatprep.subr.bf16.mxu1 %v9660_v46 }
 0x2b5   :  { %v12860_v32 = vpack.c.bf16 %v5352_v26, %v5344_v38  ;;  %v3894_v12 = vpop.f32.mrb[20].mxu0  ;;  %4746 = vmatprep.mubr.bf16.mxu0 %v13461_v34  ;;  %v12863_v55 = vpack.c.bf16 %v5354_v2, %v5346_v45  ;;  %v4346_v41 = vpop.f32.mrb[20].mxu1  ;;  %5198 = vmatprep.mubr.bf16.mxu1 %v13461_v34  ;;  %v13462_v38 = vld [vmem:[#allocation36_spill] sm:$0xff] }
 0x2b6   :  { %v10139_v60 = vadd.f32 %v3894_v12, %v12630_v42  ;;  %v3896_v3 = vpop.f32.mrb[21].mxu0  ;;  %v10171_v43 = vadd.f32 %v4346_v41, %v12635_v11  ;;  %v4348_v20 = vpop.f32.mrb[21].mxu1 }
 0x2b7   :  { %v10140_v21 = vadd.f32 %v3896_v3, %v12638_v54  ;;  %v3898_v23 = vpop.f32.mrb[22].mxu0  ;;  %4745 = vmatpush1.bf16.msra.mxu0 %v9657_v8  ;;  %v10172_v48 = vadd.f32 %v4348_v20, %v12642_v47  ;;  %v4350_v27 = vpop.f32.mrb[22].mxu1  ;;  %5197 = vmatpush1.bf16.msra.mxu1 %v9659_v29  ;;  %v10975_v29 = vld [vmem:[#allocation6 + $0x20] ss:$16 sps:$4 sm:$0xff]   ;;  %v10986_v20 = vld [vmem:[#allocation6 + $0x4c] ss:$16 sps:$4 sm:$0xff]  }
 0x2b8   :  { %v10141_v52 = vadd.f32 %v3898_v23, %v12630_v42  ;;  %v3900_v4 = vpop.f32.mrb[23].mxu0  ;;  %7029 = vmatprep.subr.bf16.mxu0 %v10971_v56  ;;  %v10173_v46 = vadd.f32 %v4350_v27, %v12635_v11  ;;  %v4352_v9 = vpop.f32.mrb[23].mxu1  ;;  %7481 = vmatprep.subr.bf16.mxu1 %v10974_v25  ;;  %v5359_v0 = vmax.f32 %v10139_v60, 0.0  ;;  %v5361_v62 = vmax.f32 %v10171_v43, 0.0  ;;  %v10978_v25 = vld [vmem:[#allocation6 + $0x28] ss:$16 sps:$4 sm:$0xff]  }
 0x2b9   :  { %v10142_v10 = vadd.f32 %v3900_v4, %v12638_v54  ;;  %v10174_v61 = vadd.f32 %v4352_v9, %v12642_v47  ;;  %v5360_v26 = vmax.f32 %v10140_v21, 0.0  ;;  %v5362_v56 = vmax.f32 %v10172_v48, 0.0  ;;  %v10983_v60 = vld [vmem:[#allocation6 + $0x44] ss:$16 sps:$4 sm:$0xff]  }
 0x2ba   :  { %v5367_v8 = vmax.f32 %v10141_v52, 0.0  ;;  %4747 = vmatmul.mubr.bf16.vlgmr.msra.gmra.mrb[32].mxu0 %v13462_v38  ;;  %v5369_v45 = vmax.f32 %v10173_v46, 0.0  ;;  %5199 = vmatmul.mubr.bf16.vlgmr.msra.gmra.mrb[32].mxu1 %v13462_v38  ;;  %v13463_v21 = vld [vmem:[#allocation37_spill] sm:$0xff] }
 0x2bb   :  { %v5368_v2 = vmax.f32 %v10142_v10, 0.0  ;;  %7030 = vmatpush1.bf16.msra.mxu0 %v10969_v36  ;;  %v5370_v34 = vmax.f32 %v10174_v61, 0.0  ;;  %7482 = vmatpush1.bf16.msra.mxu1 %v10972_v57  ;;  %v10981_v46 = vld [vmem:[#allocation6 + $0x40] ss:$16 sps:$4 sm:$0xff]   ;;  %v10989_v61 = vld [vmem:[#allocation6 + $0x64] ss:$16 sps:$4 sm:$0xff]  }
 0x2bc   :  { %v12876_v12 = vpack.c.bf16 %v5367_v8, %v5359_v0  ;;  %7031 = vmatprep.subr.bf16.mxu0 %v10977_v59  ;;  %v12878_v41 = vpack.c.bf16 %v5369_v45, %v5361_v62  ;;  %7483 = vmatprep.subr.bf16.mxu1 %v10980_v53  ;;  %v10984_v8 = vld [vmem:[#allocation6 + $0x48] ss:$16 sps:$4 sm:$0xff]   ;;  %v10992_v45 = vld [vmem:[#allocation6 + $0x6c] ss:$16 sps:$4 sm:$0xff]  }
 0x2bd   :  { %v12880_v3 = vpack.c.bf16 %v5368_v2, %v5360_v26  ;;  %v3904_v43 = vpop.f32.mrb[24].mxu0  ;;  %4756 = vmatprep.mubr.bf16.mxu0 %v13463_v21  ;;  %v12883_v23 = vpack.c.bf16 %v5370_v34, %v5362_v56  ;;  %v4356_v48 = vpop.f32.mrb[24].mxu1  ;;  %5208 = vmatprep.mubr.bf16.mxu1 %v13463_v21  ;;  %v13464_v34 = vld [vmem:[#allocation38_spill] sm:$0xff] }
 0x2be   :  { %v10143_v36 = vadd.f32 %v3904_v43, %v12630_v42  ;;  %v3906_v52 = vpop.f32.mrb[25].mxu0  ;;  %v10175_v27 = vadd.f32 %v4356_v48, %v12635_v11  ;;  %v4358_v57 = vpop.f32.mrb[25].mxu1 }
 0x2bf   :  { %v10144_v4 = vadd.f32 %v3906_v52, %v12638_v54  ;;  %v3908_v59 = vpop.f32.mrb[26].mxu0  ;;  %7032 = vmatpush1.bf16.msra.mxu0 %v10975_v29  ;;  %v10176_v10 = vadd.f32 %v4358_v57, %v12642_v47  ;;  %v4360_v53 = vpop.f32.mrb[26].mxu1  ;;  %7484 = vmatpush1.bf16.msra.mxu1 %v10978_v25 }
 0x2c0   :  { %v10145_v9 = vadd.f32 %v3908_v59, %v12630_v42  ;;  %v3910_v0 = vpop.f32.mrb[27].mxu0  ;;  %7033 = vmatprep.subr.bf16.mxu0 %v10983_v60  ;;  %v10177_v38 = vadd.f32 %v4360_v53, %v12635_v11  ;;  %v4362_v26 = vpop.f32.mrb[27].mxu1  ;;  %7485 = vmatprep.subr.bf16.mxu1 %v10986_v20  ;;  %v5375_v2 = vmax.f32 %v10143_v36, 0.0  ;;  %v5377_v43 = vmax.f32 %v10175_v27, 0.0  ;;  %v10987_v60 = vld [vmem:[#allocation6 + $0x60] ss:$16 sps:$4 sm:$0xff]  }
 0x2c1   :  { %v10146_v62 = vadd.f32 %v3910_v0, %v12638_v54  ;;  %v10178_v56 = vadd.f32 %v4362_v26, %v12642_v47  ;;  %v5376_v21 = vmax.f32 %v10144_v4, 0.0  ;;  %v5378_v52 = vmax.f32 %v10176_v10, 0.0  ;;  %v10990_v20 = vld [vmem:[#allocation6 + $0x68] ss:$16 sps:$4 sm:$0xff]   ;;  %v10995_v36 = vld [vmem:[#allocation6 + $0x84] ss:$16 sps:$4 sm:$0xff]  }
 0x2c2   :  { %v5383_v29 = vmax.f32 %v10145_v9, 0.0  ;;  %4757 = vmatmul.mubr.bf16.gmra.mrb[36].mxu0 %v13464_v34  ;;  %v5385_v25 = vmax.f32 %v10177_v38, 0.0  ;;  %5209 = vmatmul.mubr.bf16.gmra.mrb[36].mxu1 %v13464_v34  ;;  %v13465_v4 = vld [vmem:[#allocation39_spill] sm:$0xff]  ;;  %v10998_v0 = vld [vmem:[#allocation6 + $0x8c] ss:$16 sps:$4 sm:$0xff]  }
 0x2c3   :  { %v5384_v48 = vmax.f32 %v10146_v62, 0.0  ;;  %7034 = vmatpush1.bf16.msra.mxu0 %v10981_v46  ;;  %v5386_v59 = vmax.f32 %v10178_v56, 0.0  ;;  %7486 = vmatpush1.bf16.msra.mxu1 %v10984_v8 }
 0x2c4   :  { %v12896_v57 = vpack.c.bf16 %v5383_v29, %v5375_v2  ;;  %7035 = vmatprep.subr.bf16.mxu0 %v10989_v61  ;;  %v12898_v9 = vpack.c.bf16 %v5385_v25, %v5377_v43  ;;  %7487 = vmatprep.subr.bf16.mxu1 %v10992_v45  ;;  %v10993_v29 = vld [vmem:[#allocation6 + $0x80] ss:$16 sps:$4 sm:$0xff]   ;;  %v11001_v25 = vld [vmem:[#allocation6 + $0xa4] ss:$16 sps:$4 sm:$0xff]  }
 0x2c5   :  { %v12900_v53 = vpack.c.bf16 %v5384_v48, %v5376_v21  ;;  %v3914_v27 = vpop.f32.mrb[28].mxu0  ;;  %4766 = vmatprep.mubr.bf16.mxu0 %v13465_v4  ;;  %v12903_v38 = vpack.c.bf16 %v5386_v59, %v5378_v52  ;;  %v4366_v10 = vpop.f32.mrb[28].mxu1  ;;  %5218 = vmatprep.mubr.bf16.mxu1 %v13465_v4  ;;  %v10996_v21 = vld [vmem:[#allocation6 + $0x88] ss:$16 sps:$4 sm:$0xff]  }
 0x2c6   :  { %v10147_v46 = vadd.f32 %v3914_v27, %v12630_v42  ;;  %v3916_v62 = vpop.f32.mrb[29].mxu0  ;;  %v10179_v8 = vadd.f32 %v4366_v10, %v12635_v11  ;;  %v4368_v26 = vpop.f32.mrb[29].mxu1  ;;  %v11004_v27 = vld [vmem:[#allocation6 + $0xac] ss:$16 sps:$4 sm:$0xff]  }
 0x2c7   :  { %v10148_v61 = vadd.f32 %v3916_v62, %v12638_v54  ;;  %v3918_v2 = vpop.f32.mrb[30].mxu0  ;;  %7036 = vmatpush1.bf16.msra.mxu0 %v10987_v60  ;;  %v10180_v45 = vadd.f32 %v4368_v26, %v12642_v47  ;;  %v4370_v34 = vpop.f32.mrb[30].mxu1  ;;  %7488 = vmatpush1.bf16.msra.mxu1 %v10990_v20  ;;  %v13466_v62 = vld [vmem:[#allocation40_spill] sm:$0xff] }
 0x2c8   :  { %v10149_v56 = vadd.f32 %v3918_v2, %v12630_v42  ;;  %v3920_v43 = vpop.f32.mrb[31].mxu0  ;;  %7037 = vmatprep.subr.bf16.mxu0 %v10995_v36  ;;  %v10181_v48 = vadd.f32 %v4370_v34, %v12635_v11  ;;  %v4372_v59 = vpop.f32.mrb[31].mxu1  ;;  %7489 = vmatprep.subr.bf16.mxu1 %v10998_v0  ;;  %v5391_v4 = vmax.f32 %v10147_v46, 0.0  ;;  %v5393_v42 = vmax.f32 %v10179_v8, 0.0  ;;  %v10999_v36 = vld [vmem:[#allocation6 + $0xa0] ss:$16 sps:$4 sm:$0xff]  }
 0x2c9   :  { %v10150_v52 = vadd.f32 %v3920_v43, %v12638_v54  ;;  %v10182_v10 = vadd.f32 %v4372_v59, %v12642_v47  ;;  %v5392_v26 = vmax.f32 %v10148_v61, 0.0  ;;  %v5394_v11 = vmax.f32 %v10180_v45, 0.0  ;;  %v11002_v0 = vld [vmem:[#allocation6 + $0xa8] ss:$16 sps:$4 sm:$0xff]   ;;  %v11007_v46 = vld [vmem:[#allocation6 + $0xc4] ss:$16 sps:$4 sm:$0xff]  }
 0x2ca   :  { %v5399_v60 = vmax.f32 %v10149_v56, 0.0  ;;  %4767 = vmatmul.mubr.bf16.gmra.mrb[40].mxu0 %v13466_v62  ;;  %v5401_v20 = vmax.f32 %v10181_v48, 0.0  ;;  %5219 = vmatmul.mubr.bf16.gmra.mrb[40].mxu1 %v13466_v62  ;;  %v13467_v8 = vld [vmem:[#allocation41_spill] sm:$0xff]  ;;  %v11010_v61 = vld [vmem:[#allocation6 + $0xcc] ss:$16 sps:$4 sm:$0xff]  }
 0x2cb   :  { %v5400_v2 = vmax.f32 %v10150_v52, 0.0  ;;  %7038 = vmatpush1.bf16.msra.mxu0 %v10993_v29  ;;  %v5402_v54 = vmax.f32 %v10182_v10, 0.0  ;;  %7490 = vmatpush1.bf16.msra.mxu1 %v10996_v21  ;;  %v11005_v29 = vld [vmem:[#allocation6 + $0xc0] ss:$16 sps:$4 sm:$0xff]   ;;  %v11008_v45 = vld [vmem:[#allocation6 + $0xc8] ss:$16 sps:$4 sm:$0xff]  }
 0x2cc   :  { %v12916_v34 = vpack.c.bf16 %v5399_v60, %v5391_v4  ;;  %7039 = vmatprep.subr.bf16.mxu0 %v11001_v25  ;;  %v12918_v56 = vpack.c.bf16 %v5401_v20, %v5393_v42  ;;  %7491 = vmatprep.subr.bf16.mxu1 %v11004_v27  ;;  %v11013_v21 = vld [vmem:[#allocation6 + $0xe4] ss:$16 sps:$4 sm:$0xff]   ;;  %v11016_v25 = vld [vmem:[#allocation6 + $0xec] ss:$16 sps:$4 sm:$0xff]   ;;  %v11011_v52 = vld [vmem:[#allocation6 + $0xe0] ss:$16 sps:$4 sm:$0xff]  }
 0x2cd   :  { %v12920_v47 = vpack.c.bf16 %v5400_v2, %v5392_v26  ;;  %4776 = vmatprep.mubr.bf16.mxu0 %v13467_v8  ;;  %v12923_v43 = vpack.c.bf16 %v5402_v54, %v5394_v11  ;;  %5228 = vmatprep.mubr.bf16.mxu1 %v13467_v8  ;;  %v13468_v48 = vld [vmem:[#allocation42_spill] sm:$0xff]  ;;  %v11019_v27 = vld [vmem:[#allocation6 + $0x104] ss:$16 sps:$4 sm:$0xff]   ;;  %v13470_v20 = vld [vmem:[#allocation44_spill] sm:$0xff] }
 0x2ce   :  { %v11014_v59 = vld [vmem:[#allocation6 + $0xe8] ss:$16 sps:$4 sm:$0xff]   ;;  %v11022_v60 = vld [vmem:[#allocation6 + $0x10c] ss:$16 sps:$4 sm:$0xff]   ;;  %v11017_v10 = vld [vmem:[#allocation6 + $0x100] ss:$16 sps:$4 sm:$0xff]  }
 0x2cf   :  { %7040 = vmatpush1.bf16.msra.mxu0 %v10999_v36  ;;  %7492 = vmatpush1.bf16.msra.mxu1 %v11002_v0  ;;  %v13469_v4 = vld [vmem:[#allocation43_spill] sm:$0xff]  ;;  %v11028_v26 = vld [vmem:[#allocation6 + $0x12c] ss:$16 sps:$4 sm:$0xff]   ;;  %v13471_v54 = vld [vmem:[#allocation45_spill] sm:$0xff] }
 0x2d0   :  { %7041 = vmatprep.subr.bf16.mxu0 %v11007_v46  ;;  %7493 = vmatprep.subr.bf16.mxu1 %v11010_v61  ;;  %v11020_v62 = vld [vmem:[#allocation6 + $0x108] ss:$16 sps:$4 sm:$0xff]   ;;  %v11025_v42 = vld [vmem:[#allocation6 + $0x124] ss:$16 sps:$4 sm:$0xff]   ;;  %v11023_v2 = vld [vmem:[#allocation6 + $0x120] ss:$16 sps:$4 sm:$0xff]  }
 0x2d1   :  { %v11026_v36 = vld [vmem:[#allocation6 + $0x128] ss:$16 sps:$4 sm:$0xff]   ;;  %v11031_v11 = vld [vmem:[#allocation6 + $0x144] ss:$16 sps:$4 sm:$0xff]   ;;  %v11034_v0 = vld [vmem:[#allocation6 + $0x14c] ss:$16 sps:$4 sm:$0xff]  }
 0x2d2   :  { %4777 = vmatmul.mubr.bf16.gmra.mrb[44].mxu0 %v13468_v48  ;;  %5229 = vmatmul.mubr.bf16.gmra.mrb[44].mxu1 %v13468_v48  ;;  %v11029_v46 = vld [vmem:[#allocation6 + $0x140] ss:$16 sps:$4 sm:$0xff]   ;;  %v11032_v8 = vld [vmem:[#allocation6 + $0x148] ss:$16 sps:$4 sm:$0xff]   ;;  %v11037_v61 = vld [vmem:[#allocation6 + $0x164] ss:$16 sps:$4 sm:$0xff]  }
 0x2d3   :  { %7042 = vmatpush1.bf16.msra.mxu0 %v11005_v29  ;;  %7494 = vmatpush1.bf16.msra.mxu1 %v11008_v45  ;;  %v11040_v29 = vld [vmem:[#allocation6 + $0x16c] ss:$16 sps:$4 sm:$0xff]   ;;  %v11043_v48 = vld [vmem:[#allocation6 + $0x184] ss:$16 sps:$4 sm:$0xff]  }
 0x2d4   :  { %7043 = vmatprep.subr.bf16.mxu0 %v11013_v21  ;;  %7495 = vmatprep.subr.bf16.mxu1 %v11016_v25  ;;  %v13472_v45 = vld [vmem:[#allocation46_spill] sm:$0xff] }
 0x2d5   :  { %4786 = vmatprep.mubr.bf16.mxu0 %v13469_v4  ;;  %5238 = vmatprep.mubr.bf16.mxu1 %v13469_v4  ;;  %v11035_v21 = vld [vmem:[#allocation6 + $0x160] ss:$16 sps:$4 sm:$0xff]   ;;  %v11038_v25 = vld [vmem:[#allocation6 + $0x168] ss:$16 sps:$4 sm:$0xff]   ;;  %v11049_v4 = vld [vmem:[#allocation6 + $0x1a4] ss:$16 sps:$4 sm:$0xff]  }
 0x2d7   :  { %7044 = vmatpush1.bf16.msra.mxu0 %v11011_v52  ;;  %7496 = vmatpush1.bf16.msra.mxu1 %v11014_v59  ;;  %v11046_v52 = vld [vmem:[#allocation6 + $0x18c] ss:$16 sps:$4 sm:$0xff]   ;;  %v11041_v59 = vld [vmem:[#allocation6 + $0x180] ss:$16 sps:$4 sm:$0xff]  }
 0x2d8   :  { %7045 = vmatprep.subr.bf16.mxu0 %v11019_v27  ;;  %7497 = vmatprep.subr.bf16.mxu1 %v11022_v60  ;;  %v11044_v27 = vld [vmem:[#allocation6 + $0x188] ss:$16 sps:$4 sm:$0xff]   ;;  %v11052_v60 = vld [vmem:[#allocation6 + $0x1ac] ss:$16 sps:$4 sm:$0xff]  }
 0x2da   :  { %4787 = vmatmul.mubr.bf16.gmra.mrb[48].mxu0 %v13470_v20  ;;  %5239 = vmatmul.mubr.bf16.gmra.mrb[48].mxu1 %v13470_v20  ;;  %v11056_v20 = vld [vmem:[#allocation6 + $0x1c8] ss:$16 sps:$4 sm:$0xff]  }
 0x2db   :  { %7046 = vmatpush1.bf16.msra.mxu0 %v11017_v10  ;;  %7498 = vmatpush1.bf16.msra.mxu1 %v11020_v62  ;;  %v11047_v10 = vld [vmem:[#allocation6 + $0x1a0] ss:$16 sps:$4 sm:$0xff]   ;;  %v11050_v62 = vld [vmem:[#allocation6 + $0x1a8] ss:$16 sps:$4 sm:$0xff]  }
 0x2dc   :  { %7047 = vmatprep.subr.bf16.mxu0 %v11025_v42  ;;  %7499 = vmatprep.subr.bf16.mxu1 %v11028_v26  ;;  %v11055_v42 = vld [vmem:[#allocation6 + $0x1c4] ss:$16 sps:$4 sm:$0xff]   ;;  %v11053_v26 = vld [vmem:[#allocation6 + $0x1c0] ss:$16 sps:$4 sm:$0xff]  }
 0x2dd   :  { %4796 = vmatprep.mubr.bf16.mxu0 %v13471_v54  ;;  %5248 = vmatprep.mubr.bf16.mxu1 %v13471_v54  ;;  %v11067_v54 = vld [vmem:[#allocation6 + $0x204] ss:$16 sps:$4 sm:$0xff]  }
 0x2df   :  { %7048 = vmatpush1.bf16.msra.mxu0 %v11023_v2  ;;  %7500 = vmatpush1.bf16.msra.mxu1 %v11026_v36  ;;  %v11061_v2 = vld [vmem:[#allocation6 + $0x1e4] ss:$16 sps:$4 sm:$0xff]   ;;  %v11059_v36 = vld [vmem:[#allocation6 + $0x1e0] ss:$16 sps:$4 sm:$0xff]  }
 0x2e0   :  { %7049 = vmatprep.subr.bf16.mxu0 %v11031_v11  ;;  %7501 = vmatprep.subr.bf16.mxu1 %v11034_v0  ;;  %v11062_v11 = vld [vmem:[#allocation6 + $0x1e8] ss:$16 sps:$4 sm:$0xff]   ;;  %v11065_v0 = vld [vmem:[#allocation6 + $0x200] ss:$16 sps:$4 sm:$0xff]  }
 0x2e2   :  { %4797 = vmatmul.mubr.bf16.gmra.mrb[52].mxu0 %v13472_v45  ;;  %5249 = vmatmul.mubr.bf16.gmra.mrb[52].mxu1 %v13472_v45  ;;  %v11082_v45 = vld [vmem:[#allocation6 + $0x24c] ss:$16 sps:$4 sm:$0xff]  }
 0x2e3   :  { %7050 = vmatpush1.bf16.msra.mxu0 %v11029_v46  ;;  %7502 = vmatpush1.bf16.msra.mxu1 %v11032_v8  ;;  %v11068_v46 = vld [vmem:[#allocation6 + $0x208] ss:$16 sps:$4 sm:$0xff]   ;;  %v11073_v8 = vld [vmem:[#allocation6 + $0x224] ss:$16 sps:$4 sm:$0xff]  }
 0x2e4   :  { %7051 = vmatprep.subr.bf16.mxu0 %v11037_v61  ;;  %7503 = vmatprep.subr.bf16.mxu1 %v11040_v29  ;;  %v11074_v61 = vld [vmem:[#allocation6 + $0x228] ss:$16 sps:$4 sm:$0xff]   ;;  %v11079_v29 = vld [vmem:[#allocation6 + $0x244] ss:$16 sps:$4 sm:$0xff]  }
 0x2e5   :  { %4806 = vmatprep.mubr.bf16.mxu0 %v12508_v50  ;;  %5258 = vmatprep.mubr.bf16.mxu1 %v12508_v50  ;;  %v11058_v50 = vld [vmem:[#allocation6 + $0x1cc] ss:$16 sps:$4 sm:$0xff]  }
 0x2e7   :  { %7052 = vmatpush1.bf16.msra.mxu0 %v11035_v21  ;;  %7504 = vmatpush1.bf16.msra.mxu1 %v11038_v25  ;;  %v11077_v21 = vld [vmem:[#allocation6 + $0x240] ss:$16 sps:$4 sm:$0xff]   ;;  %v11080_v25 = vld [vmem:[#allocation6 + $0x248] ss:$16 sps:$4 sm:$0xff]  }
 0x2e8   :  { %7053 = vmatprep.subr.bf16.mxu0 %v11043_v48  ;;  %7505 = vmatprep.subr.bf16.mxu1 %v11046_v52  ;;  %v11085_v48 = vld [vmem:[#allocation6 + $0x264] ss:$16 sps:$4 sm:$0xff]   ;;  %v11086_v52 = vld [vmem:[#allocation6 + $0x268] ss:$16 sps:$4 sm:$0xff]  }
 0x2ea   :  { %4807 = vmatmul.mubr.bf16.gmra.mrb[56].mxu0 %v12526_v18  ;;  %5259 = vmatmul.mubr.bf16.gmra.mrb[56].mxu1 %v12526_v18  ;;  %v11064_v18 = vld [vmem:[#allocation6 + $0x1ec] ss:$16 sps:$4 sm:$0xff]  }
 0x2eb   :  { %7054 = vmatpush1.bf16.msra.mxu0 %v11041_v59  ;;  %7506 = vmatpush1.bf16.msra.mxu1 %v11044_v27  ;;  %v11091_v59 = vld [vmem:[#allocation6 + $0x284] ss:$16 sps:$4 sm:$0xff]   ;;  %v11094_v27 = vld [vmem:[#allocation6 + $0x28c] ss:$16 sps:$4 sm:$0xff]  }
 0x2ec   :  { %7055 = vmatprep.subr.bf16.mxu0 %v11049_v4  ;;  %7507 = vmatprep.subr.bf16.mxu1 %v11052_v60  ;;  %v11089_v4 = vld [vmem:[#allocation6 + $0x280] ss:$16 sps:$4 sm:$0xff]   ;;  %v11092_v60 = vld [vmem:[#allocation6 + $0x288] ss:$16 sps:$4 sm:$0xff]  }
 0x2ed   :  { %4816 = vmatprep.mubr.bf16.mxu0 %v12528_v44  ;;  %5268 = vmatprep.mubr.bf16.mxu1 %v12528_v44  ;;  %v11070_v44 = vld [vmem:[#allocation6 + $0x20c] ss:$16 sps:$4 sm:$0xff]  }
 0x2ef   :  { %7056 = vmatpush1.bf16.msra.mxu0 %v11047_v10  ;;  %7508 = vmatpush1.bf16.msra.mxu1 %v11050_v62  ;;  %v11097_v10 = vld [vmem:[#allocation6 + $0x2a4] ss:$16 sps:$4 sm:$0xff]   ;;  %v11098_v62 = vld [vmem:[#allocation6 + $0x2a8] ss:$16 sps:$4 sm:$0xff]  }
 0x2f0   :  { %7057 = vmatprep.subr.bf16.mxu0 %v11055_v42  ;;  %7509 = vmatprep.subr.bf16.mxu1 %v11058_v50  ;;  %v11103_v42 = vld [vmem:[#allocation6 + $0x2c4] ss:$16 sps:$4 sm:$0xff]   ;;  %v11106_v50 = vld [vmem:[#allocation6 + $0x2cc] ss:$16 sps:$4 sm:$0xff]  }
 0x2f2   :  { %4817 = vmatmul.mubr.bf16.gmra.mrb[60].mxu0 %v12540_v16  ;;  %5269 = vmatmul.mubr.bf16.gmra.mrb[60].mxu1 %v12540_v16  ;;  %v11076_v16 = vld [vmem:[#allocation6 + $0x22c] ss:$16 sps:$4 sm:$0xff]  }
 0x2f3   :  { %7058 = vmatpush1.bf16.msra.mxu0 %v11053_v26  ;;  %7061 = vmatprep.mubr.bf16.mxu0 %v12686_v35  ;;  %v11101_v26 = vld [vmem:[#allocation6 + $0x2c0] ss:$16 sps:$4 sm:$0xff]  }
 0x2f4   :  { %7510 = vmatpush1.bf16.msra.mxu1 %v11056_v20  ;;  %7513 = vmatprep.mubr.bf16.mxu1 %v12686_v35  ;;  %v11071_v35 = vld [vmem:[#allocation6 + $0x220] ss:$16 sps:$4 sm:$0xff]   ;;  %v11104_v20 = vld [vmem:[#allocation6 + $0x2c8] ss:$16 sps:$4 sm:$0xff]  }
 0x2f5   :  { %7059 = vmatprep.subr.bf16.mxu0 %v11061_v2  ;;  %7511 = vmatprep.subr.bf16.mxu1 %v11064_v18  ;;  %v11109_v2 = vld [vmem:[#allocation6 + $0x2e4] ss:$16 sps:$4 sm:$0xff]   ;;  %v11110_v18 = vld [vmem:[#allocation6 + $0x2e8] ss:$16 sps:$4 sm:$0xff]  }
 0x2f7   :  { %7060 = vmatpush1.bf16.msra.mxu0 %v11059_v36  ;;  %v11115_v36 = vld [vmem:[#allocation6 + $0x304] ss:$16 sps:$4 sm:$0xff]  }
 0x2f8   :  { %7512 = vmatpush1.bf16.msra.mxu1 %v11062_v11  ;;  %7142 = vmatprep.subr.bf16.mxu0 %v11067_v54  ;;  %v11118_v11 = vld [vmem:[#allocation6 + $0x30c] ss:$16 sps:$4 sm:$0xff]   ;;  %v11113_v54 = vld [vmem:[#allocation6 + $0x300] ss:$16 sps:$4 sm:$0xff]  }
 0x2f9   :  { %7594 = vmatprep.subr.bf16.mxu1 %v11070_v44  ;;  %v11116_v44 = vld [vmem:[#allocation6 + $0x308] ss:$16 sps:$4 sm:$0xff]  }
 0x2fa   :  { %7062 = vmatmul.mubr.bf16.vlgmr.msra.gmra.mrb[64].mxu0 %v12680_v31 }
 0x2fb   :  { %7514 = vmatmul.mubr.bf16.vlgmr.msra.gmra.mrb[64].mxu1 %v12680_v31  ;;  %7071 = vmatprep.mubr.bf16.mxu0 %v12738_v6  ;;  %v11088_v31 = vld [vmem:[#allocation6 + $0x26c] ss:$16 sps:$4 sm:$0xff]  }
 0x2fc   :  { %7143 = vmatpush1.bf16.msra.mxu0 %v11065_v0  ;;  %7523 = vmatprep.mubr.bf16.mxu1 %v12738_v6  ;;  %v11083_v6 = vld [vmem:[#allocation6 + $0x260] ss:$16 sps:$4 sm:$0xff]   ;;  %v11121_v0 = vld [vmem:[#allocation6 + $0x324] ss:$16 sps:$4 sm:$0xff]  }
 0x2fd   :  { %7595 = vmatpush1.bf16.msra.mxu1 %v11068_v46  ;;  %7144 = vmatprep.subr.bf16.mxu0 %v11073_v8  ;;  %v11122_v46 = vld [vmem:[#allocation6 + $0x328] ss:$16 sps:$4 sm:$0xff]   ;;  %v11127_v8 = vld [vmem:[#allocation6 + $0x344] ss:$16 sps:$4 sm:$0xff]  }
 0x2fe   :  { %7596 = vmatprep.subr.bf16.mxu1 %v11076_v16  ;;  %v11130_v16 = vld [vmem:[#allocation6 + $0x34c] ss:$16 sps:$4 sm:$0xff]  }
 0x300   :  { %7145 = vmatpush1.bf16.msra.mxu0 %v11071_v35  ;;  %v11125_v35 = vld [vmem:[#allocation6 + $0x340] ss:$16 sps:$4 sm:$0xff]  }
 0x301   :  { %7597 = vmatpush1.bf16.msra.mxu1 %v11074_v61  ;;  %7146 = vmatprep.subr.bf16.mxu0 %v11079_v29  ;;  %v11128_v61 = vld [vmem:[#allocation6 + $0x348] ss:$16 sps:$4 sm:$0xff]   ;;  %v11133_v29 = vld [vmem:[#allocation6 + $0x364] ss:$16 sps:$4 sm:$0xff]  }
 0x302   :  { %7072 = vmatmul.mubr.bf16.gmra.mrb[68].mxu0 %v12732_v63  ;;  %7598 = vmatprep.subr.bf16.mxu1 %v11082_v45  ;;  %v11134_v45 = vld [vmem:[#allocation6 + $0x368] ss:$16 sps:$4 sm:$0xff]  }
 0x303   :  { %7524 = vmatmul.mubr.bf16.gmra.mrb[68].mxu1 %v12732_v63  ;;  %7081 = vmatprep.mubr.bf16.mxu0 %v12790_v51  ;;  %v11100_v63 = vld [vmem:[#allocation6 + $0x2ac] ss:$16 sps:$4 sm:$0xff]  }
 0x304   :  { %7147 = vmatpush1.bf16.msra.mxu0 %v11077_v21  ;;  %7533 = vmatprep.mubr.bf16.mxu1 %v12790_v51  ;;  %v11095_v51 = vld [vmem:[#allocation6 + $0x2a0] ss:$16 sps:$4 sm:$0xff]   ;;  %v11139_v21 = vld [vmem:[#allocation6 + $0x384] ss:$16 sps:$4 sm:$0xff]  }
 0x305   :  { %7599 = vmatpush1.bf16.msra.mxu1 %v11080_v25  ;;  %7148 = vmatprep.subr.bf16.mxu0 %v11085_v48  ;;  %v11142_v25 = vld [vmem:[#allocation6 + $0x38c] ss:$16 sps:$4 sm:$0xff]   ;;  %v11137_v48 = vld [vmem:[#allocation6 + $0x380] ss:$16 sps:$4 sm:$0xff]  }
 0x306   :  { %7600 = vmatprep.subr.bf16.mxu1 %v11088_v31  ;;  %v11140_v31 = vld [vmem:[#allocation6 + $0x388] ss:$16 sps:$4 sm:$0xff]  }
 0x308   :  { %7149 = vmatpush1.bf16.msra.mxu0 %v11083_v6  ;;  %v11145_v6 = vld [vmem:[#allocation6 + $0x3a4] ss:$16 sps:$4 sm:$0xff]  }
 0x309   :  { %7601 = vmatpush1.bf16.msra.mxu1 %v11086_v52  ;;  %7150 = vmatprep.subr.bf16.mxu0 %v11091_v59  ;;  %v11146_v52 = vld [vmem:[#allocation6 + $0x3a8] ss:$16 sps:$4 sm:$0xff]   ;;  %v11151_v59 = vld [vmem:[#allocation6 + $0x3c4] ss:$16 sps:$4 sm:$0xff]  }
 0x30a   :  { %7082 = vmatmul.mubr.bf16.gmra.mrb[72].mxu0 %v12784_v22  ;;  %7602 = vmatprep.subr.bf16.mxu1 %v11094_v27  ;;  %v11154_v27 = vld [vmem:[#allocation6 + $0x3cc] ss:$16 sps:$4 sm:$0xff]  }
 0x30b   :  { %7534 = vmatmul.mubr.bf16.gmra.mrb[72].mxu1 %v12784_v22  ;;  %7091 = vmatprep.mubr.bf16.mxu0 %v12838_v33  ;;  %v11112_v22 = vld [vmem:[#allocation6 + $0x2ec] ss:$16 sps:$4 sm:$0xff]  }
 0x30c   :  { %7151 = vmatpush1.bf16.msra.mxu0 %v11089_v4  ;;  %7543 = vmatprep.mubr.bf16.mxu1 %v12838_v33  ;;  %v11107_v33 = vld [vmem:[#allocation6 + $0x2e0] ss:$16 sps:$4 sm:$0xff]  }
 0x30d   :  { %7603 = vmatpush1.bf16.msra.mxu1 %v11092_v60  ;;  %7152 = vmatprep.subr.bf16.mxu0 %v11097_v10  ;;  %v11149_v4 = vld [vmem:[#allocation6 + $0x3c0] ss:$16 sps:$4 sm:$0xff]   ;;  %v11152_v60 = vld [vmem:[#allocation6 + $0x3c8] ss:$16 sps:$4 sm:$0xff]   ;;  %v11157_v10 = vld [vmem:[#allocation6 + $0x3e4] ss:$16 sps:$4 sm:$0xff]  }
 0x30e   :  { %7604 = vmatprep.subr.bf16.mxu1 %v11100_v63  ;;  %v11158_v63 = vld [vmem:[#allocation6 + $0x3e8] ss:$16 sps:$4 sm:$0xff]  }
 0x310   :  { %7153 = vmatpush1.bf16.msra.mxu0 %v11095_v51  ;;  %v11163_v51 = vld [vmem:[#allocation6 + $0x404] ss:$16 sps:$4 sm:$0xff]  }
 0x311   :  { %7605 = vmatpush1.bf16.msra.mxu1 %v11098_v62  ;;  %7154 = vmatprep.subr.bf16.mxu0 %v11103_v42  ;;  %v11166_v62 = vld [vmem:[#allocation6 + $0x40c] ss:$16 sps:$4 sm:$0xff]   ;;  %v11161_v42 = vld [vmem:[#allocation6 + $0x400] ss:$16 sps:$4 sm:$0xff]  }
 0x312   :  { %7092 = vmatmul.mubr.bf16.gmra.mrb[76].mxu0 %v12832_v13  ;;  %7606 = vmatprep.subr.bf16.mxu1 %v11106_v50  ;;  %v11164_v50 = vld [vmem:[#allocation6 + $0x408] ss:$16 sps:$4 sm:$0xff]  }
 0x313   :  { %7544 = vmatmul.mubr.bf16.gmra.mrb[76].mxu1 %v12832_v13  ;;  %7101 = vmatprep.mubr.bf16.mxu0 %v12860_v32  ;;  %v11124_v13 = vld [vmem:[#allocation6 + $0x32c] ss:$16 sps:$4 sm:$0xff]  }
 0x314   :  { %7155 = vmatpush1.bf16.msra.mxu0 %v11101_v26  ;;  %7553 = vmatprep.mubr.bf16.mxu1 %v12860_v32  ;;  %v11119_v32 = vld [vmem:[#allocation6 + $0x320] ss:$16 sps:$4 sm:$0xff]   ;;  %v11169_v26 = vld [vmem:[#allocation6 + $0x424] ss:$16 sps:$4 sm:$0xff]  }
 0x315   :  { %7607 = vmatpush1.bf16.msra.mxu1 %v11104_v20  ;;  %7156 = vmatprep.subr.bf16.mxu0 %v11109_v2  ;;  %v11170_v20 = vld [vmem:[#allocation6 + $0x428] ss:$16 sps:$4 sm:$0xff]   ;;  %v11175_v2 = vld [vmem:[#allocation6 + $0x444] ss:$16 sps:$4 sm:$0xff]  }
 0x316   :  { %7608 = vmatprep.subr.bf16.mxu1 %v11112_v22  ;;  %v11178_v22 = vld [vmem:[#allocation6 + $0x44c] ss:$16 sps:$4 sm:$0xff]  }
 0x318   :  { %7157 = vmatpush1.bf16.msra.mxu0 %v11107_v33  ;;  %v11173_v33 = vld [vmem:[#allocation6 + $0x440] ss:$16 sps:$4 sm:$0xff]  }
 0x319   :  { %7609 = vmatpush1.bf16.msra.mxu1 %v11110_v18  ;;  %7158 = vmatprep.subr.bf16.mxu0 %v11115_v36  ;;  %v11176_v18 = vld [vmem:[#allocation6 + $0x448] ss:$16 sps:$4 sm:$0xff]   ;;  %v11181_v36 = vld [vmem:[#allocation6 + $0x464] ss:$16 sps:$4 sm:$0xff]  }
 0x31a   :  { %7102 = vmatmul.mubr.bf16.gmra.mrb[80].mxu0 %v12856_v1  ;;  %7610 = vmatprep.subr.bf16.mxu1 %v11118_v11  ;;  %v11182_v11 = vld [vmem:[#allocation6 + $0x468] ss:$16 sps:$4 sm:$0xff]  }
 0x31b   :  { %7554 = vmatmul.mubr.bf16.gmra.mrb[80].mxu1 %v12856_v1  ;;  %7111 = vmatprep.mubr.bf16.mxu0 %v12880_v3  ;;  %v11136_v1 = vld [vmem:[#allocation6 + $0x36c] ss:$16 sps:$4 sm:$0xff]  }
 0x31c   :  { %7159 = vmatpush1.bf16.msra.mxu0 %v11113_v54  ;;  %7563 = vmatprep.mubr.bf16.mxu1 %v12880_v3  ;;  %v11131_v3 = vld [vmem:[#allocation6 + $0x360] ss:$16 sps:$4 sm:$0xff]   ;;  %v11187_v54 = vld [vmem:[#allocation6 + $0x484] ss:$16 sps:$4 sm:$0xff]  }
 0x31d   :  { %7611 = vmatpush1.bf16.msra.mxu1 %v11116_v44  ;;  %7160 = vmatprep.subr.bf16.mxu0 %v11121_v0  ;;  %v11190_v44 = vld [vmem:[#allocation6 + $0x48c] ss:$16 sps:$4 sm:$0xff]   ;;  %v11185_v0 = vld [vmem:[#allocation6 + $0x480] ss:$16 sps:$4 sm:$0xff]  }
 0x31e   :  { %7612 = vmatprep.subr.bf16.mxu1 %v11124_v13  ;;  %v11188_v13 = vld [vmem:[#allocation6 + $0x488] ss:$16 sps:$4 sm:$0xff]  }
 0x320   :  { %7161 = vmatpush1.bf16.msra.mxu0 %v11119_v32  ;;  %v11193_v32 = vld [vmem:[#allocation6 + $0x4a4] ss:$16 sps:$4 sm:$0xff]  }
 0x321   :  { %7613 = vmatpush1.bf16.msra.mxu1 %v11122_v46  ;;  %7162 = vmatprep.subr.bf16.mxu0 %v11127_v8  ;;  %v11194_v46 = vld [vmem:[#allocation6 + $0x4a8] ss:$16 sps:$4 sm:$0xff]   ;;  %v11199_v8 = vld [vmem:[#allocation6 + $0x4c4] ss:$16 sps:$4 sm:$0xff]  }
 0x322   :  { %7112 = vmatmul.mubr.bf16.gmra.mrb[84].mxu0 %v12876_v12  ;;  %7614 = vmatprep.subr.bf16.mxu1 %v11130_v16  ;;  %v11202_v16 = vld [vmem:[#allocation6 + $0x4cc] ss:$16 sps:$4 sm:$0xff]  }
 0x323   :  { %7564 = vmatmul.mubr.bf16.gmra.mrb[84].mxu1 %v12876_v12  ;;  %7121 = vmatprep.mubr.bf16.mxu0 %v12900_v53  ;;  %v11148_v12 = vld [vmem:[#allocation6 + $0x3ac] ss:$16 sps:$4 sm:$0xff]  }
 0x324   :  { %7163 = vmatpush1.bf16.msra.mxu0 %v11125_v35  ;;  %7573 = vmatprep.mubr.bf16.mxu1 %v12900_v53  ;;  %v11143_v53 = vld [vmem:[#allocation6 + $0x3a0] ss:$16 sps:$4 sm:$0xff]  }
 0x325   :  { %7615 = vmatpush1.bf16.msra.mxu1 %v11128_v61  ;;  %7164 = vmatprep.subr.bf16.mxu0 %v11133_v29  ;;  %v11197_v35 = vld [vmem:[#allocation6 + $0x4c0] ss:$16 sps:$4 sm:$0xff]   ;;  %v11200_v61 = vld [vmem:[#allocation6 + $0x4c8] ss:$16 sps:$4 sm:$0xff]   ;;  %v11205_v29 = vld [vmem:[#allocation6 + $0x4e4] ss:$16 sps:$4 sm:$0xff]  }
 0x326   :  { %7616 = vmatprep.subr.bf16.mxu1 %v11136_v1  ;;  %v11206_v1 = vld [vmem:[#allocation6 + $0x4e8] ss:$16 sps:$4 sm:$0xff]  }
 0x328   :  { %7165 = vmatpush1.bf16.msra.mxu0 %v11131_v3  ;;  %v11211_v3 = vld [vmem:[#allocation6 + $0x504] ss:$16 sps:$4 sm:$0xff]  }
 0x329   :  { %7617 = vmatpush1.bf16.msra.mxu1 %v11134_v45  ;;  %7166 = vmatprep.subr.bf16.mxu0 %v11139_v21  ;;  %v11214_v45 = vld [vmem:[#allocation6 + $0x50c] ss:$16 sps:$4 sm:$0xff]   ;;  %v11209_v21 = vld [vmem:[#allocation6 + $0x500] ss:$16 sps:$4 sm:$0xff]  }
 0x32a   :  { %7122 = vmatmul.mubr.bf16.gmra.mrb[88].mxu0 %v12896_v57  ;;  %7618 = vmatprep.subr.bf16.mxu1 %v11142_v25  ;;  %v11212_v25 = vld [vmem:[#allocation6 + $0x508] ss:$16 sps:$4 sm:$0xff]  }
 0x32b   :  { %7574 = vmatmul.mubr.bf16.gmra.mrb[88].mxu1 %v12896_v57  ;;  %7131 = vmatprep.mubr.bf16.mxu0 %v12920_v47  ;;  %v11160_v57 = vld [vmem:[#allocation6 + $0x3ec] ss:$16 sps:$4 sm:$0xff]  }
 0x32c   :  { %7167 = vmatpush1.bf16.msra.mxu0 %v11137_v48  ;;  %7583 = vmatprep.mubr.bf16.mxu1 %v12920_v47  ;;  %v11155_v47 = vld [vmem:[#allocation6 + $0x3e0] ss:$16 sps:$4 sm:$0xff]   ;;  %v11217_v48 = vld [vmem:[#allocation6 + $0x524] ss:$16 sps:$4 sm:$0xff]  }
 0x32d   :  { %7619 = vmatpush1.bf16.msra.mxu1 %v11140_v31  ;;  %7168 = vmatprep.subr.bf16.mxu0 %v11145_v6  ;;  %v11218_v31 = vld [vmem:[#allocation6 + $0x528] ss:$16 sps:$4 sm:$0xff]   ;;  %v11223_v6 = vld [vmem:[#allocation6 + $0x544] ss:$16 sps:$4 sm:$0xff]  }
 0x32e   :  { %7620 = vmatprep.subr.bf16.mxu1 %v11148_v12  ;;  %v11226_v12 = vld [vmem:[#allocation6 + $0x54c] ss:$16 sps:$4 sm:$0xff]  }
 0x330   :  { %7169 = vmatpush1.bf16.msra.mxu0 %v11143_v53  ;;  %v11221_v53 = vld [vmem:[#allocation6 + $0x540] ss:$16 sps:$4 sm:$0xff]  }
 0x331   :  { %7621 = vmatpush1.bf16.msra.mxu1 %v11146_v52  ;;  %7170 = vmatprep.subr.bf16.mxu0 %v11151_v59  ;;  %v11224_v52 = vld [vmem:[#allocation6 + $0x548] ss:$16 sps:$4 sm:$0xff]   ;;  %v11229_v59 = vld [vmem:[#allocation6 + $0x564] ss:$16 sps:$4 sm:$0xff]  }
 0x332   :  { %7132 = vmatmul.mubr.bf16.gmra.mrb[92].mxu0 %v12916_v34  ;;  %7622 = vmatprep.subr.bf16.mxu1 %v11154_v27  ;;  %v11230_v27 = vld [vmem:[#allocation6 + $0x568] ss:$16 sps:$4 sm:$0xff]  }
 0x333   :  { %7584 = vmatmul.mubr.bf16.gmra.mrb[92].mxu1 %v12916_v34  ;;  %7174 = vmatprep.mubr.bf16.mxu0 %v12695_v28  ;;  %v11172_v34 = vld [vmem:[#allocation6 + $0x42c] ss:$16 sps:$4 sm:$0xff]  }
 0x334   :  { %7171 = vmatpush1.bf16.msra.mxu0 %v11149_v4  ;;  %7626 = vmatprep.mubr.bf16.mxu1 %v12695_v28  ;;  %v11167_v28 = vld [vmem:[#allocation6 + $0x420] ss:$16 sps:$4 sm:$0xff]   ;;  %v11235_v4 = vld [vmem:[#allocation6 + $0x584] ss:$16 sps:$4 sm:$0xff]  }
 0x335   :  { %7623 = vmatpush1.bf16.msra.mxu1 %v11152_v60  ;;  %7172 = vmatprep.subr.bf16.mxu0 %v11157_v10  ;;  %v11238_v60 = vld [vmem:[#allocation6 + $0x58c] ss:$16 sps:$4 sm:$0xff]   ;;  %v11233_v10 = vld [vmem:[#allocation6 + $0x580] ss:$16 sps:$4 sm:$0xff]  }
 0x336   :  { %7624 = vmatprep.subr.bf16.mxu1 %v11160_v57  ;;  %v11236_v57 = vld [vmem:[#allocation6 + $0x588] ss:$16 sps:$4 sm:$0xff]  }
 0x338   :  { %7173 = vmatpush1.bf16.msra.mxu0 %v11155_v47  ;;  %v11241_v47 = vld [vmem:[#allocation6 + $0x5a4] ss:$16 sps:$4 sm:$0xff]  }
 0x339   :  { %7625 = vmatpush1.bf16.msra.mxu1 %v11158_v63  ;;  %7255 = vmatprep.subr.bf16.mxu0 %v11163_v51  ;;  %v11242_v63 = vld [vmem:[#allocation6 + $0x5a8] ss:$16 sps:$4 sm:$0xff]   ;;  %v11247_v51 = vld [vmem:[#allocation6 + $0x5c4] ss:$16 sps:$4 sm:$0xff]  }
 0x33a   :  { %7707 = vmatprep.subr.bf16.mxu1 %v11166_v62  ;;  %v11250_v62 = vld [vmem:[#allocation6 + $0x5cc] ss:$16 sps:$4 sm:$0xff]  }
 0x33b   :  { %7175 = vmatmul.mubr.bf16.vlgmr.msra.gmra.mrb[64].mxu0 %v12684_v58 }
 0x33c   :  { %7627 = vmatmul.mubr.bf16.vlgmr.msra.gmra.mrb[64].mxu1 %v12684_v58  ;;  %7184 = vmatprep.mubr.bf16.mxu0 %v12747_v14  ;;  %v11184_v58 = vld [vmem:[#allocation6 + $0x46c] ss:$16 sps:$4 sm:$0xff]  }
 0x33d   :  { %7636 = vmatprep.mubr.bf16.mxu1 %v12747_v14  ;;  %7256 = vmatpush1.bf16.msra.mxu0 %v11161_v42  ;;  %v11179_v14 = vld [vmem:[#allocation6 + $0x460] ss:$16 sps:$4 sm:$0xff]  }
 0x33e   :  { %7708 = vmatpush1.bf16.msra.mxu1 %v11164_v50  ;;  %7257 = vmatprep.subr.bf16.mxu0 %v11169_v26  ;;  %v11245_v42 = vld [vmem:[#allocation6 + $0x5c0] ss:$16 sps:$4 sm:$0xff]   ;;  %v11248_v50 = vld [vmem:[#allocation6 + $0x5c8] ss:$16 sps:$4 sm:$0xff]   ;;  %v11253_v26 = vld [vmem:[#allocation6 + $0x5e4] ss:$16 sps:$4 sm:$0xff]  }
 0x33f   :  { %7709 = vmatprep.subr.bf16.mxu1 %v11172_v34  ;;  %v11254_v34 = vld [vmem:[#allocation6 + $0x5e8] ss:$16 sps:$4 sm:$0xff]  }
 0x341   :  { %7258 = vmatpush1.bf16.msra.mxu0 %v11167_v28  ;;  %v11259_v28 = vld [vmem:[#allocation6 + $0x604] ss:$16 sps:$4 sm:$0xff]  }
 0x342   :  { %7710 = vmatpush1.bf16.msra.mxu1 %v11170_v20  ;;  %7259 = vmatprep.subr.bf16.mxu0 %v11175_v2  ;;  %v11262_v20 = vld [vmem:[#allocation6 + $0x60c] ss:$16 sps:$4 sm:$0xff]   ;;  %v889_v2 = vsub.s32 4, %v12615_v40 }
 0x343   :  { %7185 = vmatmul.mubr.bf16.gmra.mrb[68].mxu0 %v12736_v39  ;;  %7711 = vmatprep.subr.bf16.mxu1 %v11178_v22  ;;  %v897_v22 = vsub.s32 6, %v12615_v40 }
 0x344   :  { %7637 = vmatmul.mubr.bf16.gmra.mrb[68].mxu1 %v12736_v39  ;;  %7194 = vmatprep.mubr.bf16.mxu0 %v12799_v24  ;;  %v11196_v39 = vld [vmem:[#allocation6 + $0x4ac] ss:$16 sps:$4 sm:$0xff]  }
 0x345   :  { %7646 = vmatprep.mubr.bf16.mxu1 %v12799_v24  ;;  %7260 = vmatpush1.bf16.msra.mxu0 %v11173_v33  ;;  %v11191_v24 = vld [vmem:[#allocation6 + $0x4a0] ss:$16 sps:$4 sm:$0xff]   ;;  %v893_v33 = vsub.s32 5, %v12615_v40 }
 0x346   :  { %7712 = vmatpush1.bf16.msra.mxu1 %v11176_v18  ;;  %7261 = vmatprep.subr.bf16.mxu0 %v11181_v36  ;;  %v11473_v18 = vld [vmem:[#allocation4] sm:$0xff] }
 0x347   :  { %7713 = vmatprep.subr.bf16.mxu1 %v11184_v58  ;;  %v13012_v36 = vrot.slane %v11473_v18, %v889_v2  ;;  %v13014_v58 = vrot.slane %v11473_v18, %v897_v22 }
 0x349   :  { %7262 = vmatpush1.bf16.msra.mxu0 %v11179_v14  ;;  %v13016_v14 = vrot.slane %v11473_v18, %v893_v33  ;;  %v11271_v33 = vld [vmem:[#allocation6 + $0x644] ss:$16 sps:$4 sm:$0xff]  }
 0x34a   :  { %7714 = vmatpush1.bf16.msra.mxu1 %v11182_v11  ;;  %7263 = vmatprep.subr.bf16.mxu0 %v11187_v54 }
 0x34b   :  { %7195 = vmatmul.mubr.bf16.gmra.mrb[72].mxu0 %v12788_v19  ;;  %7715 = vmatprep.subr.bf16.mxu1 %v11190_v44 }
 0x34c   :  { %7647 = vmatmul.mubr.bf16.gmra.mrb[72].mxu1 %v12788_v19  ;;  %7204 = vmatprep.mubr.bf16.mxu0 %v12841_v15  ;;  %v11208_v19 = vld [vmem:[#allocation6 + $0x4ec] ss:$16 sps:$4 sm:$0xff]  }
 0x34d   :  { %7656 = vmatprep.mubr.bf16.mxu1 %v12841_v15  ;;  %7264 = vmatpush1.bf16.msra.mxu0 %v11185_v0  ;;  %v11203_v15 = vld [vmem:[#allocation6 + $0x4e0] ss:$16 sps:$4 sm:$0xff]  }
 0x34e   :  { %7716 = vmatpush1.bf16.msra.mxu1 %v11188_v13  ;;  %7265 = vmatprep.subr.bf16.mxu0 %v11193_v32 }
 0x34f   :  { %7717 = vmatprep.subr.bf16.mxu1 %v11196_v39 }
 0x351   :  { %7266 = vmatpush1.bf16.msra.mxu0 %v11191_v24 }
 0x352   :  { %7718 = vmatpush1.bf16.msra.mxu1 %v11194_v46  ;;  %7267 = vmatprep.subr.bf16.mxu0 %v11199_v8 }
 0x353   :  { %7205 = vmatmul.mubr.bf16.gmra.mrb[76].mxu0 %v12836_v17  ;;  %7719 = vmatprep.subr.bf16.mxu1 %v11202_v16 }
 0x354   :  { %7657 = vmatmul.mubr.bf16.gmra.mrb[76].mxu1 %v12836_v17  ;;  %7214 = vmatprep.mubr.bf16.mxu0 %v12863_v55  ;;  %v11220_v17 = vld [vmem:[#allocation6 + $0x52c] ss:$16 sps:$4 sm:$0xff]  }
 0x355   :  { %7666 = vmatprep.mubr.bf16.mxu1 %v12863_v55  ;;  %7268 = vmatpush1.bf16.msra.mxu0 %v11197_v35  ;;  %v11215_v55 = vld [vmem:[#allocation6 + $0x520] ss:$16 sps:$4 sm:$0xff]  }
 0x356   :  { %7720 = vmatpush1.bf16.msra.mxu1 %v11200_v61  ;;  %7269 = vmatprep.subr.bf16.mxu0 %v11205_v29 }
 0x357   :  { %7721 = vmatprep.subr.bf16.mxu1 %v11208_v19 }
 0x359   :  { %7270 = vmatpush1.bf16.msra.mxu0 %v11203_v15 }
 0x35a   :  { %7722 = vmatpush1.bf16.msra.mxu1 %v11206_v1  ;;  %7271 = vmatprep.subr.bf16.mxu0 %v11211_v3 }
 0x35b   :  { %7215 = vmatmul.mubr.bf16.gmra.mrb[80].mxu0 %v12858_v30  ;;  %7723 = vmatprep.subr.bf16.mxu1 %v11214_v45 }
 0x35c   :  { %7667 = vmatmul.mubr.bf16.gmra.mrb[80].mxu1 %v12858_v30  ;;  %7224 = vmatprep.mubr.bf16.mxu0 %v12883_v23  ;;  %v11232_v30 = vld [vmem:[#allocation6 + $0x56c] ss:$16 sps:$4 sm:$0xff]  }
 0x35d   :  { %7676 = vmatprep.mubr.bf16.mxu1 %v12883_v23  ;;  %7272 = vmatpush1.bf16.msra.mxu0 %v11209_v21  ;;  %v11227_v23 = vld [vmem:[#allocation6 + $0x560] ss:$16 sps:$4 sm:$0xff]  }
 0x35e   :  { %7724 = vmatpush1.bf16.msra.mxu1 %v11212_v25  ;;  %7273 = vmatprep.subr.bf16.mxu0 %v11217_v48 }
 0x35f   :  { %7725 = vmatprep.subr.bf16.mxu1 %v11220_v17 }
 0x361   :  { %7274 = vmatpush1.bf16.msra.mxu0 %v11215_v55 }
 0x362   :  { %7726 = vmatpush1.bf16.msra.mxu1 %v11218_v31  ;;  %7275 = vmatprep.subr.bf16.mxu0 %v11223_v6 }
 0x363   :  { %7225 = vmatmul.mubr.bf16.gmra.mrb[84].mxu0 %v12878_v41  ;;  %7727 = vmatprep.subr.bf16.mxu1 %v11226_v12 }
 0x364   :  { %7677 = vmatmul.mubr.bf16.gmra.mrb[84].mxu1 %v12878_v41  ;;  %7234 = vmatprep.mubr.bf16.mxu0 %v12903_v38  ;;  %v11244_v41 = vld [vmem:[#allocation6 + $0x5ac] ss:$16 sps:$4 sm:$0xff]  }
 0x365   :  { %7686 = vmatprep.mubr.bf16.mxu1 %v12903_v38  ;;  %7276 = vmatpush1.bf16.msra.mxu0 %v11221_v53  ;;  %v11239_v38 = vld [vmem:[#allocation6 + $0x5a0] ss:$16 sps:$4 sm:$0xff]  }
 0x366   :  { %7728 = vmatpush1.bf16.msra.mxu1 %v11224_v52  ;;  %7277 = vmatprep.subr.bf16.mxu0 %v11229_v59  ;;  %v11257_v59 = vld [vmem:[#allocation6 + $0x600] ss:$16 sps:$4 sm:$0xff]  }
 0x367   :  { %7729 = vmatprep.subr.bf16.mxu1 %v11232_v30  ;;  %v11260_v30 = vld [vmem:[#allocation6 + $0x608] ss:$16 sps:$4 sm:$0xff]  }
 0x369   :  { %7278 = vmatpush1.bf16.msra.mxu0 %v11227_v23 }
 0x36a   :  { %7730 = vmatpush1.bf16.msra.mxu1 %v11230_v27  ;;  %7279 = vmatprep.subr.bf16.mxu0 %v11235_v4 }
 0x36b   :  { %7235 = vmatmul.mubr.bf16.gmra.mrb[88].mxu0 %v12898_v9  ;;  %7731 = vmatprep.subr.bf16.mxu1 %v11238_v60 }
 0x36c   :  { %7687 = vmatmul.mubr.bf16.gmra.mrb[88].mxu1 %v12898_v9  ;;  %7244 = vmatprep.mubr.bf16.mxu0 %v12923_v43  ;;  %v11256_v9 = vld [vmem:[#allocation6 + $0x5ec] ss:$16 sps:$4 sm:$0xff]  }
 0x36d   :  { %7696 = vmatprep.mubr.bf16.mxu1 %v12923_v43  ;;  %7280 = vmatpush1.bf16.msra.mxu0 %v11233_v10  ;;  %v11251_v43 = vld [vmem:[#allocation6 + $0x5e0] ss:$16 sps:$4 sm:$0xff]   ;;  %v11265_v10 = vld [vmem:[#allocation6 + $0x624] ss:$16 sps:$4 sm:$0xff]  }
 0x36e   :  { %7732 = vmatpush1.bf16.msra.mxu1 %v11236_v57  ;;  %7281 = vmatprep.subr.bf16.mxu0 %v11241_v47  ;;  %v11268_v57 = vld [vmem:[#allocation6 + $0x62c] ss:$16 sps:$4 sm:$0xff]  }
 0x36f   :  { %7733 = vmatprep.subr.bf16.mxu1 %v11244_v41 }
 0x371   :  { %7282 = vmatpush1.bf16.msra.mxu0 %v11239_v38 }
 0x372   :  { %7734 = vmatpush1.bf16.msra.mxu1 %v11242_v63  ;;  %7283 = vmatprep.subr.bf16.mxu0 %v11247_v51 }
 0x373   :  { %7245 = vmatmul.mubr.bf16.gmra.mrb[92].mxu0 %v12918_v56  ;;  %7735 = vmatprep.subr.bf16.mxu1 %v11250_v62 }
 0x374   :  { %7697 = vmatmul.mubr.bf16.gmra.mrb[92].mxu1 %v12918_v56  ;;  %v901_v56 = vsub.s32 7, %v12615_v40  ;;  %v11449_v40 = vld [vmem:[#allocation12 + $0x40] sm:$0xff]  }
 0x375   :  { %7284 = vmatpush1.bf16.msra.mxu0 %v11245_v42 }
 0x376   :  { %7736 = vmatpush1.bf16.msra.mxu1 %v11248_v50  ;;  %7285 = vmatprep.subr.bf16.mxu0 %v11253_v26  ;;  %v13018_v11 = vrot.slane %v11473_v18, %v901_v56  ;;  %v11274_v56 = vld [vmem:[#allocation6 + $0x64c] ss:$16 sps:$4 sm:$0xff]  }
 0x377   :  { %7737 = vmatprep.subr.bf16.mxu1 %v11256_v9 }
 0x379   :  { %7286 = vmatpush1.bf16.msra.mxu0 %v11251_v43 }
 0x37a   :  { %7738 = vmatpush1.bf16.msra.mxu1 %v11254_v34  ;;  %7368 = vmatprep.subr.bf16.mxu0 %v11259_v28  ;;  %v11263_v34 = vld [vmem:[#allocation6 + $0x620] ss:$16 sps:$4 sm:$0xff]   ;;  %v11266_v28 = vld [vmem:[#allocation6 + $0x628] ss:$16 sps:$4 sm:$0xff]  }
 0x37b   :  { %7820 = vmatprep.subr.bf16.mxu1 %v11262_v20 }
 0x38d   :  { %v4748_v54 = vpop.f32.mrb[32].mxu0  ;;  %v5200_v0 = vpop.f32.mrb[32].mxu1 }
 0x38e   :  { %v10183_v44 = vadd.f32 %v4748_v54, %v13012_v36  ;;  %v4750_v13 = vpop.f32.mrb[33].mxu0  ;;  %v10215_v32 = vadd.f32 %v5200_v0, %v13014_v58  ;;  %v5202_v24 = vpop.f32.mrb[33].mxu1 }
 0x38f   :  { %v10184_v39 = vadd.f32 %v4750_v13, %v13016_v14  ;;  %v4752_v46 = vpop.f32.mrb[34].mxu0  ;;  %v10216_v8 = vadd.f32 %v5202_v24, %v13018_v11  ;;  %v5204_v35 = vpop.f32.mrb[34].mxu1 }
 0x390   :  { %v10185_v16 = vadd.f32 %v4752_v46, %v13012_v36  ;;  %v4754_v61 = vpop.f32.mrb[35].mxu0  ;;  %v10217_v29 = vadd.f32 %v5204_v35, %v13014_v58  ;;  %v5206_v15 = vpop.f32.mrb[35].mxu1  ;;  %v5283_v1 = vmax.f32 %v10183_v44, 0.0  ;;  %v5285_v21 = vmax.f32 %v10215_v32, 0.0  ;;  %v11272_v35 = vld [vmem:[#allocation6 + $0x648] ss:$16 sps:$4 sm:$0xff]  }
 0x391   :  { %v10186_v19 = vadd.f32 %v4754_v61, %v13016_v14  ;;  %v10218_v45 = vadd.f32 %v5206_v15, %v13018_v11  ;;  %v5284_v25 = vmax.f32 %v10184_v39, 0.0  ;;  %v5286_v55 = vmax.f32 %v10216_v8, 0.0 }
 0x392   :  { %v5291_v3 = vmax.f32 %v10185_v16, 0.0  ;;  %v5293_v48 = vmax.f32 %v10217_v29, 0.0  ;;  %v11269_v16 = vld [vmem:[#allocation6 + $0x640] ss:$16 sps:$4 sm:$0xff]  }
 0x393   :  { %v5292_v17 = vmax.f32 %v10186_v19, 0.0  ;;  %v5294_v6 = vmax.f32 %v10218_v45, 0.0 }
 0x394   :  { %v5411_v31 = vpack.c.bf16 %v5291_v3, %v5283_v1  ;;  %v13028_v12 = vpack.c.bf16 %v5293_v48, %v5285_v21  ;;  %v11277_v1 = vld [vmem:[#allocation6 + $0x664] ss:$16 sps:$4 sm:$0xff]   ;;  %v11280_v3 = vld [vmem:[#allocation6 + $0x66c] ss:$16 sps:$4 sm:$0xff]  }
 0x395   :  { %v5412_v53 = vpack.c.bf16 %v5292_v17, %v5284_v25  ;;  %v4758_v52 = vpop.f32.mrb[36].mxu0  ;;  %v13030_v23 = vpack.c.bf16 %v5294_v6, %v5286_v55  ;;  %v5210_v4 = vpop.f32.mrb[36].mxu1 }
 0x396   :  { %v10187_v27 = vadd.f32 %v4758_v52, %v13012_v36  ;;  %v4760_v60 = vpop.f32.mrb[37].mxu0  ;;  %v10219_v47 = vadd.f32 %v5210_v4, %v13014_v58  ;;  %v5212_v38 = vpop.f32.mrb[37].mxu1 }
 0x397   :  { %v10188_v41 = vadd.f32 %v4760_v60, %v13016_v14  ;;  %v4762_v63 = vpop.f32.mrb[38].mxu0  ;;  %7287 = vmatprep.mubr.bf16.mxu0 %v5412_v53  ;;  %7739 = vmatprep.mubr.bf16.mxu1 %v5412_v53  ;;  %v10220_v51 = vadd.f32 %v5212_v38, %v13018_v11  ;;  %v5214_v42 = vpop.f32.mrb[38].mxu1 }
 0x398   :  { %v10189_v62 = vadd.f32 %v4762_v63, %v13012_v36  ;;  %v4764_v50 = vpop.f32.mrb[39].mxu0  ;;  %7288 = vmatmul.mubr.bf16.vlgmr.msra.gmra.mrb[64].mxu0 %v5411_v31  ;;  %7740 = vmatmul.mubr.bf16.vlgmr.msra.gmra.mrb[64].mxu1 %v5411_v31  ;;  %v10221_v26 = vadd.f32 %v5214_v42, %v13014_v58  ;;  %v5216_v43 = vpop.f32.mrb[39].mxu1  ;;  %v5299_v20 = vmax.f32 %v10187_v27, 0.0  ;;  %v5301_v18 = vmax.f32 %v10219_v47, 0.0  ;;  %v11278_v27 = vld [vmem:[#allocation6 + $0x668] ss:$16 sps:$4 sm:$0xff]  }
 0x399   :  { %v10190_v9 = vadd.f32 %v4764_v50, %v13016_v14  ;;  %7369 = vmatpush1.bf16.msra.mxu0 %v11257_v59  ;;  %7821 = vmatpush1.bf16.msra.mxu1 %v11260_v30  ;;  %v10222_v22 = vadd.f32 %v5216_v43, %v13018_v11  ;;  %v5300_v54 = vmax.f32 %v10188_v41, 0.0  ;;  %v5302_v13 = vmax.f32 %v10220_v51, 0.0  ;;  %v11275_v30 = vld [vmem:[#allocation6 + $0x660] ss:$16 sps:$4 sm:$0xff]   ;;  %v11286_v47 = vld [vmem:[#allocation6 + $0x68c] ss:$16 sps:$4 sm:$0xff]  }
 0x39a   :  { %v5307_v2 = vmax.f32 %v10189_v62, 0.0  ;;  %7370 = vmatprep.subr.bf16.mxu0 %v11265_v10  ;;  %7822 = vmatprep.subr.bf16.mxu1 %v11268_v57  ;;  %v5309_v44 = vmax.f32 %v10221_v26, 0.0  ;;  %v11283_v57 = vld [vmem:[#allocation6 + $0x684] ss:$16 sps:$4 sm:$0xff]  }
 0x39b   :  { %v5308_v0 = vmax.f32 %v10190_v9, 0.0  ;;  %v5310_v39 = vmax.f32 %v10222_v22, 0.0 }
 0x39c   :  { %v5419_v32 = vpack.c.bf16 %v5307_v2, %v5299_v20  ;;  %v13040_v24 = vpack.c.bf16 %v5309_v44, %v5301_v18  ;;  %v11292_v18 = vld [vmem:[#allocation6 + $0x6ac] ss:$16 sps:$4 sm:$0xff]  }
 0x39d   :  { %v5420_v46 = vpack.c.bf16 %v5308_v0, %v5300_v54  ;;  %v4768_v8 = vpop.f32.mrb[40].mxu0  ;;  %7371 = vmatpush1.bf16.msra.mxu0 %v11263_v34  ;;  %7823 = vmatpush1.bf16.msra.mxu1 %v11266_v28  ;;  %v13042_v61 = vpack.c.bf16 %v5310_v39, %v5302_v13  ;;  %v5220_v19 = vpop.f32.mrb[40].mxu1  ;;  %v11281_v34 = vld [vmem:[#allocation6 + $0x680] ss:$16 sps:$4 sm:$0xff]   ;;  %v11284_v28 = vld [vmem:[#allocation6 + $0x688] ss:$16 sps:$4 sm:$0xff]  }
 0x39e   :  { %v10191_v29 = vadd.f32 %v4768_v8, %v13012_v36  ;;  %v4770_v15 = vpop.f32.mrb[41].mxu0  ;;  %7372 = vmatprep.subr.bf16.mxu0 %v11271_v33  ;;  %7824 = vmatprep.subr.bf16.mxu1 %v11274_v56  ;;  %v10223_v45 = vadd.f32 %v5220_v19, %v13014_v58  ;;  %v5222_v25 = vpop.f32.mrb[41].mxu1  ;;  %v11289_v56 = vld [vmem:[#allocation6 + $0x6a4] ss:$16 sps:$4 sm:$0xff]   ;;  %v11287_v19 = vld [vmem:[#allocation6 + $0x6a0] ss:$16 sps:$4 sm:$0xff]  }
 0x39f   :  { %v10192_v21 = vadd.f32 %v4770_v15, %v13016_v14  ;;  %v4772_v48 = vpop.f32.mrb[42].mxu0  ;;  %7297 = vmatprep.mubr.bf16.mxu0 %v5420_v46  ;;  %7749 = vmatprep.mubr.bf16.mxu1 %v5420_v46  ;;  %v10224_v17 = vadd.f32 %v5222_v25, %v13018_v11  ;;  %v5224_v31 = vpop.f32.mrb[42].mxu1  ;;  %v11290_v15 = vld [vmem:[#allocation6 + $0x6a8] ss:$16 sps:$4 sm:$0xff]   ;;  %v11298_v25 = vld [vmem:[#allocation6 + $0x6cc] ss:$16 sps:$4 sm:$0xff]  }
 0x3a0   :  { %v10193_v55 = vadd.f32 %v4772_v48, %v13012_v36  ;;  %v4774_v6 = vpop.f32.mrb[43].mxu0  ;;  %7298 = vmatmul.mubr.bf16.gmra.mrb[68].mxu0 %v5419_v32  ;;  %7750 = vmatmul.mubr.bf16.gmra.mrb[68].mxu1 %v5419_v32  ;;  %v10225_v53 = vadd.f32 %v5224_v31, %v13014_v58  ;;  %v5226_v59 = vpop.f32.mrb[43].mxu1  ;;  %v5315_v4 = vmax.f32 %v10191_v29, 0.0  ;;  %v5317_v41 = vmax.f32 %v10223_v45, 0.0 }
 0x3a1   :  { %v10194_v52 = vadd.f32 %v4774_v6, %v13016_v14  ;;  %7373 = vmatpush1.bf16.msra.mxu0 %v11269_v16  ;;  %7825 = vmatpush1.bf16.msra.mxu1 %v11272_v35  ;;  %v10226_v10 = vadd.f32 %v5226_v59, %v13018_v11  ;;  %v5316_v38 = vmax.f32 %v10192_v21, 0.0  ;;  %v5318_v62 = vmax.f32 %v10224_v17, 0.0  ;;  %v11295_v21 = vld [vmem:[#allocation6 + $0x6c4] ss:$16 sps:$4 sm:$0xff]  }
 0x3a2   :  { %v5323_v60 = vmax.f32 %v10193_v55, 0.0  ;;  %7374 = vmatprep.subr.bf16.mxu0 %v11277_v1  ;;  %7826 = vmatprep.subr.bf16.mxu1 %v11280_v3  ;;  %v5325_v63 = vmax.f32 %v10225_v53, 0.0 }
 0x3a3   :  { %v5324_v51 = vmax.f32 %v10194_v52, 0.0  ;;  %v5326_v50 = vmax.f32 %v10226_v10, 0.0 }
 0x3a4   :  { %v5427_v42 = vpack.c.bf16 %v5323_v60, %v5315_v4  ;;  %v13052_v26 = vpack.c.bf16 %v5325_v63, %v5317_v41  ;;  %v11293_v4 = vld [vmem:[#allocation6 + $0x6c0] ss:$16 sps:$4 sm:$0xff]   ;;  %v11296_v60 = vld [vmem:[#allocation6 + $0x6c8] ss:$16 sps:$4 sm:$0xff]   ;;  %v11304_v63 = vld [vmem:[#allocation6 + $0x6ec] ss:$16 sps:$4 sm:$0xff]  }
 0x3a5   :  { %v5428_v9 = vpack.c.bf16 %v5324_v51, %v5316_v38  ;;  %v4778_v43 = vpop.f32.mrb[44].mxu0  ;;  %7375 = vmatpush1.bf16.msra.mxu0 %v11275_v30  ;;  %7827 = vmatpush1.bf16.msra.mxu1 %v11278_v27  ;;  %v13054_v20 = vpack.c.bf16 %v5326_v50, %v5318_v62  ;;  %v5230_v22 = vpop.f32.mrb[44].mxu1  ;;  %v11301_v38 = vld [vmem:[#allocation6 + $0x6e4] ss:$16 sps:$4 sm:$0xff]  }
 0x3a6   :  { %v10195_v2 = vadd.f32 %v4778_v43, %v13012_v36  ;;  %v4780_v33 = vpop.f32.mrb[45].mxu0  ;;  %7376 = vmatprep.subr.bf16.mxu0 %v11283_v57  ;;  %7828 = vmatprep.subr.bf16.mxu1 %v11286_v47  ;;  %v10227_v54 = vadd.f32 %v5230_v22, %v13014_v58  ;;  %v5232_v0 = vpop.f32.mrb[45].mxu1 }
 0x3a7   :  { %v10196_v44 = vadd.f32 %v4780_v33, %v13016_v14  ;;  %v4782_v13 = vpop.f32.mrb[46].mxu0  ;;  %7307 = vmatprep.mubr.bf16.mxu0 %v5428_v9  ;;  %7759 = vmatprep.mubr.bf16.mxu1 %v5428_v9  ;;  %v10228_v32 = vadd.f32 %v5232_v0, %v13018_v11  ;;  %v5234_v46 = vpop.f32.mrb[46].mxu1 }
 0x3a8   :  { %v10197_v39 = vadd.f32 %v4782_v13, %v13012_v36  ;;  %v4784_v8 = vpop.f32.mrb[47].mxu0  ;;  %7308 = vmatmul.mubr.bf16.gmra.mrb[72].mxu0 %v5427_v42  ;;  %7760 = vmatmul.mubr.bf16.gmra.mrb[72].mxu1 %v5427_v42  ;;  %v10229_v16 = vadd.f32 %v5234_v46, %v13014_v58  ;;  %v5236_v29 = vpop.f32.mrb[47].mxu1  ;;  %v5331_v1 = vmax.f32 %v10195_v2, 0.0  ;;  %v5333_v48 = vmax.f32 %v10227_v54, 0.0  ;;  %v11307_v13 = vld [vmem:[#allocation6 + $0x704] ss:$16 sps:$4 sm:$0xff]  }
 0x3a9   :  { %v10198_v35 = vadd.f32 %v4784_v8, %v13016_v14  ;;  %7377 = vmatpush1.bf16.msra.mxu0 %v11281_v34  ;;  %7829 = vmatpush1.bf16.msra.mxu1 %v11284_v28  ;;  %v10230_v45 = vadd.f32 %v5236_v29, %v13018_v11  ;;  %v5332_v17 = vmax.f32 %v10196_v44, 0.0  ;;  %v5334_v6 = vmax.f32 %v10228_v32, 0.0  ;;  %v11310_v32 = vld [vmem:[#allocation6 + $0x70c] ss:$16 sps:$4 sm:$0xff]  }
 0x3aa   :  { %v5339_v3 = vmax.f32 %v10197_v39, 0.0  ;;  %7378 = vmatprep.subr.bf16.mxu0 %v11289_v56  ;;  %7830 = vmatprep.subr.bf16.mxu1 %v11292_v18  ;;  %v5341_v55 = vmax.f32 %v10229_v16, 0.0  ;;  %v11299_v56 = vld [vmem:[#allocation6 + $0x6e0] ss:$16 sps:$4 sm:$0xff]   ;;  %v11302_v18 = vld [vmem:[#allocation6 + $0x6e8] ss:$16 sps:$4 sm:$0xff]  }
 0x3ab   :  { %v5340_v31 = vmax.f32 %v10198_v35, 0.0  ;;  %v5342_v52 = vmax.f32 %v10230_v45, 0.0  ;;  %v11305_v45 = vld [vmem:[#allocation6 + $0x700] ss:$16 sps:$4 sm:$0xff]  }
 0x3ac   :  { %v5435_v53 = vpack.c.bf16 %v5339_v3, %v5331_v1  ;;  %v13064_v59 = vpack.c.bf16 %v5341_v55, %v5333_v48 }
 0x3ad   :  { %v5436_v30 = vpack.c.bf16 %v5340_v31, %v5332_v17  ;;  %v4788_v27 = vpop.f32.mrb[48].mxu0  ;;  %7379 = vmatpush1.bf16.msra.mxu0 %v11287_v19  ;;  %7831 = vmatpush1.bf16.msra.mxu1 %v11290_v15  ;;  %v13066_v10 = vpack.c.bf16 %v5342_v52, %v5334_v6  ;;  %v5240_v47 = vpop.f32.mrb[48].mxu1  ;;  %v11313_v31 = vld [vmem:[#allocation6 + $0x724] ss:$16 sps:$4 sm:$0xff]   ;;  %v11316_v6 = vld [vmem:[#allocation6 + $0x72c] ss:$16 sps:$4 sm:$0xff]  }
 0x3ae   :  { %v10199_v57 = vadd.f32 %v4788_v27, %v13012_v36  ;;  %v4790_v41 = vpop.f32.mrb[49].mxu0  ;;  %7380 = vmatprep.subr.bf16.mxu0 %v11295_v21  ;;  %7832 = vmatprep.subr.bf16.mxu1 %v11298_v25  ;;  %v10231_v51 = vadd.f32 %v5240_v47, %v13014_v58  ;;  %v5242_v42 = vpop.f32.mrb[49].mxu1  ;;  %v11308_v21 = vld [vmem:[#allocation6 + $0x708] ss:$16 sps:$4 sm:$0xff]  }
 0x3af   :  { %v10200_v62 = vadd.f32 %v4790_v41, %v13016_v14  ;;  %v4792_v50 = vpop.f32.mrb[50].mxu0  ;;  %7317 = vmatprep.mubr.bf16.mxu0 %v5436_v30  ;;  %7769 = vmatprep.mubr.bf16.mxu1 %v5436_v30  ;;  %v10232_v9 = vadd.f32 %v5242_v42, %v13018_v11  ;;  %v5244_v34 = vpop.f32.mrb[50].mxu1 }
 0x3b0   :  { %v10201_v43 = vadd.f32 %v4792_v50, %v13012_v36  ;;  %v4794_v28 = vpop.f32.mrb[51].mxu0  ;;  %7318 = vmatmul.mubr.bf16.gmra.mrb[76].mxu0 %v5435_v53  ;;  %7770 = vmatmul.mubr.bf16.gmra.mrb[76].mxu1 %v5435_v53  ;;  %v10233_v2 = vadd.f32 %v5244_v34, %v13014_v58  ;;  %v5246_v33 = vpop.f32.mrb[51].mxu1  ;;  %v5347_v54 = vmax.f32 %v10199_v57, 0.0  ;;  %v5349_v39 = vmax.f32 %v10231_v51, 0.0  ;;  %v11311_v51 = vld [vmem:[#allocation6 + $0x720] ss:$16 sps:$4 sm:$0xff]  }
 0x3b1   :  { %v10202_v22 = vadd.f32 %v4794_v28, %v13016_v14  ;;  %7381 = vmatpush1.bf16.msra.mxu0 %v11293_v4  ;;  %7833 = vmatpush1.bf16.msra.mxu1 %v11296_v60  ;;  %v10234_v0 = vadd.f32 %v5246_v33, %v13018_v11  ;;  %v5348_v46 = vmax.f32 %v10200_v62, 0.0  ;;  %v5350_v35 = vmax.f32 %v10232_v9, 0.0  ;;  %v11314_v62 = vld [vmem:[#allocation6 + $0x728] ss:$16 sps:$4 sm:$0xff]   ;;  %v11322_v34 = vld [vmem:[#allocation6 + $0x74c] ss:$16 sps:$4 sm:$0xff]  }
 0x3b2   :  { %v5355_v44 = vmax.f32 %v10201_v43, 0.0  ;;  %7382 = vmatprep.subr.bf16.mxu0 %v11301_v38  ;;  %7834 = vmatprep.subr.bf16.mxu1 %v11304_v63  ;;  %v5357_v8 = vmax.f32 %v10233_v2, 0.0  ;;  %v11319_v43 = vld [vmem:[#allocation6 + $0x744] ss:$16 sps:$4 sm:$0xff]  }
 0x3b3   :  { %v5356_v16 = vmax.f32 %v10202_v22, 0.0  ;;  %v5358_v19 = vmax.f32 %v10234_v0, 0.0 }
 0x3b4   :  { %v5443_v29 = vpack.c.bf16 %v5355_v44, %v5347_v54  ;;  %v13076_v15 = vpack.c.bf16 %v5357_v8, %v5349_v39  ;;  %v11320_v39 = vld [vmem:[#allocation6 + $0x748] ss:$16 sps:$4 sm:$0xff]  }
 0x3b5   :  { %v5444_v1 = vpack.c.bf16 %v5356_v16, %v5348_v46  ;;  %v4798_v3 = vpop.f32.mrb[52].mxu0  ;;  %7383 = vmatpush1.bf16.msra.mxu0 %v11299_v56  ;;  %7835 = vmatpush1.bf16.msra.mxu1 %v11302_v18  ;;  %v13078_v25 = vpack.c.bf16 %v5358_v19, %v5350_v35  ;;  %v5250_v17 = vpop.f32.mrb[52].mxu1  ;;  %v11328_v19 = vld [vmem:[#allocation6 + $0x76c] ss:$16 sps:$4 sm:$0xff]  }
 0x3b6   :  { %v10203_v48 = vadd.f32 %v4798_v3, %v13012_v36  ;;  %v4800_v55 = vpop.f32.mrb[53].mxu0  ;;  %7384 = vmatprep.subr.bf16.mxu0 %v11307_v13  ;;  %7836 = vmatprep.subr.bf16.mxu1 %v11310_v32  ;;  %v10235_v53 = vadd.f32 %v5250_v17, %v13014_v58  ;;  %v5252_v30 = vpop.f32.mrb[53].mxu1  ;;  %v11317_v32 = vld [vmem:[#allocation6 + $0x740] ss:$16 sps:$4 sm:$0xff]  }
 0x3b7   :  { %v10204_v52 = vadd.f32 %v4800_v55, %v13016_v14  ;;  %v4802_v27 = vpop.f32.mrb[54].mxu0  ;;  %7327 = vmatprep.mubr.bf16.mxu0 %v5444_v1  ;;  %7779 = vmatprep.mubr.bf16.mxu1 %v5444_v1  ;;  %v10236_v4 = vadd.f32 %v5252_v30, %v13018_v11  ;;  %v5254_v57 = vpop.f32.mrb[54].mxu1  ;;  %v11323_v30 = vld [vmem:[#allocation6 + $0x760] ss:$16 sps:$4 sm:$0xff]  }
 0x3b8   :  { %v10205_v60 = vadd.f32 %v4802_v27, %v13012_v36  ;;  %v4804_v47 = vpop.f32.mrb[55].mxu0  ;;  %7328 = vmatmul.mubr.bf16.gmra.mrb[80].mxu0 %v5443_v29  ;;  %7780 = vmatmul.mubr.bf16.gmra.mrb[80].mxu1 %v5443_v29  ;;  %v10237_v41 = vadd.f32 %v5254_v57, %v13014_v58  ;;  %v5256_v63 = vpop.f32.mrb[55].mxu1  ;;  %v5363_v42 = vmax.f32 %v10203_v48, 0.0  ;;  %v5365_v28 = vmax.f32 %v10235_v53, 0.0  ;;  %v11325_v29 = vld [vmem:[#allocation6 + $0x764] ss:$16 sps:$4 sm:$0xff]  }
 0x3b9   :  { %v10206_v38 = vadd.f32 %v4804_v47, %v13016_v14  ;;  %7385 = vmatpush1.bf16.msra.mxu0 %v11305_v45  ;;  %7837 = vmatpush1.bf16.msra.mxu1 %v11308_v21  ;;  %v10238_v9 = vadd.f32 %v5256_v63, %v13018_v11  ;;  %v5364_v2 = vmax.f32 %v10204_v52, 0.0  ;;  %v5366_v56 = vmax.f32 %v10236_v4, 0.0  ;;  %v11326_v27 = vld [vmem:[#allocation6 + $0x768] ss:$16 sps:$4 sm:$0xff]   ;;  %v11331_v47 = vld [vmem:[#allocation6 + $0x784] ss:$16 sps:$4 sm:$0xff]  }
 0x3ba   :  { %v5371_v50 = vmax.f32 %v10205_v60, 0.0  ;;  %7386 = vmatprep.subr.bf16.mxu0 %v11313_v31  ;;  %7838 = vmatprep.subr.bf16.mxu1 %v11316_v6  ;;  %v5373_v22 = vmax.f32 %v10237_v41, 0.0  ;;  %v11334_v41 = vld [vmem:[#allocation6 + $0x78c] ss:$16 sps:$4 sm:$0xff]  }
 0x3bb   :  { %v5372_v33 = vmax.f32 %v10206_v38, 0.0  ;;  %v5374_v54 = vmax.f32 %v10238_v9, 0.0 }
 0x3bc   :  { %v5451_v18 = vpack.c.bf16 %v5371_v50, %v5363_v42  ;;  %v13088_v44 = vpack.c.bf16 %v5373_v22, %v5365_v28  ;;  %v11332_v22 = vld [vmem:[#allocation6 + $0x788] ss:$16 sps:$4 sm:$0xff]  }
 0x3bd   :  { %v5452_v0 = vpack.c.bf16 %v5372_v33, %v5364_v2  ;;  %v4808_v13 = vpop.f32.mrb[56].mxu0  ;;  %7387 = vmatpush1.bf16.msra.mxu0 %v11311_v51  ;;  %7839 = vmatpush1.bf16.msra.mxu1 %v11314_v62  ;;  %v13090_v46 = vpack.c.bf16 %v5374_v54, %v5366_v56  ;;  %v5260_v16 = vpop.f32.mrb[56].mxu1  ;;  %v11329_v2 = vld [vmem:[#allocation6 + $0x780] ss:$16 sps:$4 sm:$0xff]  }
 0x3be   :  { %v10207_v8 = vadd.f32 %v4808_v13, %v13012_v36  ;;  %v4810_v35 = vpop.f32.mrb[57].mxu0  ;;  %7388 = vmatprep.subr.bf16.mxu0 %v11319_v43  ;;  %7840 = vmatprep.subr.bf16.mxu1 %v11322_v34  ;;  %v10239_v1 = vadd.f32 %v5260_v16, %v13014_v58  ;;  %v5262_v45 = vpop.f32.mrb[57].mxu1  ;;  %v11340_v13 = vld [vmem:[#allocation6 + $0x7ac] ss:$16 sps:$4 sm:$0xff]  }
 0x3bf   :  { %v10208_v3 = vadd.f32 %v4810_v35, %v13016_v14  ;;  %v4812_v21 = vpop.f32.mrb[58].mxu0  ;;  %7337 = vmatprep.mubr.bf16.mxu0 %v5452_v0  ;;  %7789 = vmatprep.mubr.bf16.mxu1 %v5452_v0  ;;  %v10240_v48 = vadd.f32 %v5262_v45, %v13018_v11  ;;  %v5264_v55 = vpop.f32.mrb[58].mxu1  ;;  %v11337_v0 = vld [vmem:[#allocation6 + $0x7a4] ss:$16 sps:$4 sm:$0xff]  }
 0x3c0   :  { %v10209_v17 = vadd.f32 %v4812_v21, %v13012_v36  ;;  %v4814_v31 = vpop.f32.mrb[59].mxu0  ;;  %7338 = vmatmul.mubr.bf16.gmra.mrb[84].mxu0 %v5451_v18  ;;  %7790 = vmatmul.mubr.bf16.gmra.mrb[84].mxu1 %v5451_v18  ;;  %v10241_v6 = vadd.f32 %v5264_v55, %v13014_v58  ;;  %v5266_v52 = vpop.f32.mrb[59].mxu1  ;;  %v5379_v4 = vmax.f32 %v10207_v8, 0.0  ;;  %v5381_v38 = vmax.f32 %v10239_v1, 0.0 }
 0x3c1   :  { %v10210_v53 = vadd.f32 %v4814_v31, %v13016_v14  ;;  %7389 = vmatpush1.bf16.msra.mxu0 %v11317_v32  ;;  %7841 = vmatpush1.bf16.msra.mxu1 %v11320_v39  ;;  %v10242_v57 = vadd.f32 %v5266_v52, %v13018_v11  ;;  %v5380_v63 = vmax.f32 %v10208_v3, 0.0  ;;  %v5382_v42 = vmax.f32 %v10240_v48, 0.0  ;;  %v11335_v48 = vld [vmem:[#allocation6 + $0x7a0] ss:$16 sps:$4 sm:$0xff]  }
 0x3c2   :  { %v5387_v60 = vmax.f32 %v10209_v17, 0.0  ;;  %7390 = vmatprep.subr.bf16.mxu0 %v11325_v29  ;;  %7842 = vmatprep.subr.bf16.mxu1 %v11328_v19  ;;  %v5389_v51 = vmax.f32 %v10241_v6, 0.0  ;;  %v11338_v17 = vld [vmem:[#allocation6 + $0x7a8] ss:$16 sps:$4 sm:$0xff]  }
 0x3c3   :  { %v5388_v62 = vmax.f32 %v10210_v53, 0.0  ;;  %v5390_v9 = vmax.f32 %v10242_v57, 0.0  ;;  %v11346_v53 = vld [vmem:[#allocation6 + $0x7cc] ss:$16 sps:$4 sm:$0xff]  }
 0x3c4   :  { %v5459_v50 = vpack.c.bf16 %v5387_v60, %v5379_v4  ;;  %v13100_v43 = vpack.c.bf16 %v5389_v51, %v5381_v38  ;;  %v11352_v51 = vld [vmem:[#allocation6 + $0x7ec] ss:$16 sps:$4 sm:$0xff]  }
 0x3c5   :  { %v5460_v34 = vpack.c.bf16 %v5388_v62, %v5380_v63  ;;  %v4818_v28 = vpop.f32.mrb[60].mxu0  ;;  %7391 = vmatpush1.bf16.msra.mxu0 %v11323_v30  ;;  %7843 = vmatpush1.bf16.msra.mxu1 %v11326_v27  ;;  %v13102_v33 = vpack.c.bf16 %v5390_v9, %v5382_v42  ;;  %v5270_v18 = vpop.f32.mrb[60].mxu1  ;;  %v11349_v63 = vld [vmem:[#allocation6 + $0x7e4] ss:$16 sps:$4 sm:$0xff]   ;;  %v11347_v62 = vld [vmem:[#allocation6 + $0x7e0] ss:$16 sps:$4 sm:$0xff]  }
 0x3c6   :  { %v10211_v56 = vadd.f32 %v4818_v28, %v13012_v36  ;;  %v4820_v54 = vpop.f32.mrb[61].mxu0  ;;  %7392 = vmatprep.subr.bf16.mxu0 %v11331_v47  ;;  %7844 = vmatprep.subr.bf16.mxu1 %v11334_v41  ;;  %v10243_v32 = vadd.f32 %v5270_v18, %v13014_v58  ;;  %v5272_v8 = vpop.f32.mrb[61].mxu1  ;;  %v11341_v41 = vld [vmem:[#allocation6 + $0x7c0] ss:$16 sps:$4 sm:$0xff]   ;;  %v11350_v42 = vld [vmem:[#allocation6 + $0x7e8] ss:$16 sps:$4 sm:$0xff]  }
 0x3c7   :  { %v10212_v39 = vadd.f32 %v4820_v54, %v13016_v14  ;;  %v4822_v16 = vpop.f32.mrb[62].mxu0  ;;  %7347 = vmatprep.mubr.bf16.mxu0 %v5460_v34  ;;  %7799 = vmatprep.mubr.bf16.mxu1 %v5460_v34  ;;  %v10244_v35 = vadd.f32 %v5272_v8, %v13018_v11  ;;  %v5274_v19 = vpop.f32.mrb[62].mxu1  ;;  %v11353_v9 = vld [vmem:[#allocation9] ss:$8 sps:$4 sm:$0xff]   ;;  %v11358_v34 = vld [vmem:[#allocation9 + $0x14] ss:$8 sps:$4 sm:$0xff]  }
 0x3c8   :  { %v10213_v29 = vadd.f32 %v4822_v16, %v13012_v36  ;;  %v4824_v1 = vpop.f32.mrb[63].mxu0  ;;  %7348 = vmatmul.mubr.bf16.gmra.mrb[88].mxu0 %v5459_v50  ;;  %7800 = vmatmul.mubr.bf16.gmra.mrb[88].mxu1 %v5459_v50  ;;  %v10245_v3 = vadd.f32 %v5274_v19, %v13014_v58  ;;  %v5276_v21 = vpop.f32.mrb[63].mxu1  ;;  %v5395_v55 = vmax.f32 %v10211_v56, 0.0  ;;  %v11343_v36 = vld [vmem:[#allocation6 + $0x7c4] ss:$16 sps:$4 sm:$0xff]   ;;  %v5397_v52 = vmax.f32 %v10243_v32, 0.0 }
 0x3c9   :  { %v10214_v45 = vadd.f32 %v4824_v1, %v13016_v14  ;;  %7393 = vmatpush1.bf16.msra.mxu0 %v11329_v2  ;;  %7845 = vmatpush1.bf16.msra.mxu1 %v11332_v22  ;;  %v10246_v6 = vadd.f32 %v5276_v21, %v13018_v11  ;;  %v5396_v30 = vmax.f32 %v10212_v39, 0.0  ;;  %v5398_v58 = vmax.f32 %v10244_v35, 0.0  ;;  %v11344_v11 = vld [vmem:[#allocation6 + $0x7c8] ss:$16 sps:$4 sm:$0xff]   ;;  %v11356_v28 = vld [vmem:[#allocation9 + $0x10] ss:$8 sps:$4 sm:$0xff]  }
 0x3ca   :  { %v5403_v31 = vmax.f32 %v10213_v29, 0.0  ;;  %7394 = vmatprep.subr.bf16.mxu0 %v11337_v0  ;;  %7846 = vmatprep.subr.bf16.mxu1 %v11340_v13  ;;  %v5405_v27 = vmax.f32 %v10245_v3, 0.0  ;;  %v11355_v50 = vld [vmem:[#allocation9 + $0x4] ss:$8 sps:$4 sm:$0xff]   ;;  %v11359_v2 = vld [vmem:[#allocation9 + $0x20] ss:$8 sps:$4 sm:$0xff]  }
 0x3cb   :  { %v5404_v4 = vmax.f32 %v10214_v45, 0.0  ;;  %v5406_v14 = vmax.f32 %v10246_v6, 0.0  ;;  %v11364_v22 = vld [vmem:[#allocation9 + $0x34] ss:$8 sps:$4 sm:$0xff]   ;;  %v11365_v56 = vld [vmem:[#allocation9 + $0x40] ss:$8 sps:$4 sm:$0xff]  }
 0x3cc   :  { %v5467_v60 = vpack.c.bf16 %v5403_v31, %v5395_v55  ;;  %v13112_v57 = vpack.c.bf16 %v5405_v27, %v5397_v52  ;;  %v11370_v18 = vld [vmem:[#allocation9 + $0x54] ss:$8 sps:$4 sm:$0xff]   ;;  %v11371_v54 = vld [vmem:[#allocation9 + $0x60] ss:$8 sps:$4 sm:$0xff]   ;;  %v11398_v1 = vld [vmem:[#allocation9 + $0xf0] ss:$8 sps:$4 sm:$0xff]  }
 0x3cd   :  { %v5468_v47 = vpack.c.bf16 %v5404_v4, %v5396_v30  ;;  %7395 = vmatpush1.bf16.msra.mxu0 %v11335_v48  ;;  %7847 = vmatpush1.bf16.msra.mxu1 %v11338_v17  ;;  %v13114_v38 = vpack.c.bf16 %v5406_v14, %v5398_v58  ;;  %v11376_v0 = vld [vmem:[#allocation9 + $0x74] ss:$8 sps:$4 sm:$0xff]   ;;  %v11377_v13 = vld [vmem:[#allocation9 + $0x80] ss:$8 sps:$4 sm:$0xff]  }
 0x3ce   :  { %7396 = vmatprep.subr.bf16.mxu0 %v11343_v36  ;;  %7848 = vmatprep.subr.bf16.mxu1 %v11346_v53  ;;  %v11382_v32 = vld [vmem:[#allocation9 + $0x94] ss:$8 sps:$4 sm:$0xff]   ;;  %v11383_v39 = vld [vmem:[#allocation9 + $0xa0] ss:$8 sps:$4 sm:$0xff]  }
 0x3cf   :  { %7357 = vmatprep.mubr.bf16.mxu0 %v5468_v47  ;;  %7809 = vmatprep.mubr.bf16.mxu1 %v5468_v47  ;;  %v11388_v8 = vld [vmem:[#allocation9 + $0xb4] ss:$8 sps:$4 sm:$0xff]   ;;  %v11389_v16 = vld [vmem:[#allocation9 + $0xc0] ss:$8 sps:$4 sm:$0xff]  }
 0x3d0   :  { %7358 = vmatmul.mubr.bf16.gmra.mrb[92].mxu0 %v5467_v60  ;;  %7810 = vmatmul.mubr.bf16.gmra.mrb[92].mxu1 %v5467_v60  ;;  %v11394_v35 = vld [vmem:[#allocation9 + $0xd4] ss:$8 sps:$4 sm:$0xff]   ;;  %v11395_v29 = vld [vmem:[#allocation9 + $0xe0] ss:$8 sps:$4 sm:$0xff]  }
 0x3d1   :  { %7397 = vmatpush1.bf16.msra.mxu0 %v11341_v41  ;;  %7400 = vmatprep.mubr.bf16.mxu0 %v13030_v23  ;;  %v11400_v19 = vld [vmem:[#allocation9 + $0xf4] ss:$8 sps:$4 sm:$0xff]   ;;  %v11451_v14 = vld [vmem:[#allocation12 + $0x48] sm:$0xff]  }
 0x3d2   :  { %7849 = vmatpush1.bf16.msra.mxu1 %v11344_v11  ;;  %7852 = vmatprep.mubr.bf16.mxu1 %v13030_v23  ;;  %v11361_v23 = vld [vmem:[#allocation9 + $0x24] ss:$8 sps:$4 sm:$0xff]   ;;  %v5727_v3 = vld [vmem:[#allocation7] sm:$0xf] }
 0x3d3   :  { %7398 = vmatprep.subr.bf16.mxu0 %v11349_v63  ;;  %7850 = vmatprep.subr.bf16.mxu1 %v11352_v51  ;;  %v13149_v45 = vrot.slane %v5727_v3, %v12621_v7  ;;  %v13153_v21 = vrot.slane %v5727_v3, %v881_v5  ;;  %v13156_v48 = vrot.slane %v5727_v3, %v12625_v37 }
 0x3d4   :  { %v13160_v17 = vrot.slane %v5727_v3, %v885_v49  ;;  %v11450_v49 = vld [vmem:[#allocation12] sm:$0xff]  }
 0x3d5   :  { %7399 = vmatpush1.bf16.msra.mxu0 %v11347_v62 }
 0x3d6   :  { %7851 = vmatpush1.bf16.msra.mxu1 %v11350_v42  ;;  %8425 = vmatprep.subr.bf16.mxu0 %v11355_v50 }
 0x3d7   :  { %10007 = vmatprep.subr.bf16.mxu1 %v11449_v40 }
 0x3d8   :  { %7401 = vmatmul.mubr.bf16.vlgmr.msra.gmra.mrb[64].mxu0 %v13028_v12 }
 0x3d9   :  { %7853 = vmatmul.mubr.bf16.vlgmr.msra.gmra.mrb[64].mxu1 %v13028_v12  ;;  %7410 = vmatprep.mubr.bf16.mxu0 %v13042_v61  ;;  %v11362_v12 = vld [vmem:[#allocation9 + $0x30] ss:$8 sps:$4 sm:$0xff]  }
 0x3da   :  { %7862 = vmatprep.mubr.bf16.mxu1 %v13042_v61  ;;  %8426 = vmatpush1.bf16.msra.mxu0 %v11353_v9  ;;  %v11367_v61 = vld [vmem:[#allocation9 + $0x44] ss:$8 sps:$4 sm:$0xff]  }
 0x3db   :  { %8427 = vmatprep.subr.bf16.mxu0 %v11358_v34  ;;  %10008 = vmatpush3.bf16.msra.mxu1 %v11450_v49  ;;  %v11452_v9 = vld [vmem:[#allocation12 + $0x8] sm:$0xff]  }
 0x3dc   :  { %10009 = vmatprep.subr.bf16.mxu1 %v11451_v14 }
 0x3de   :  { %8428 = vmatpush1.bf16.msra.mxu0 %v11356_v28 }
 0x3df   :  { %8429 = vmatprep.subr.bf16.mxu0 %v11361_v23  ;;  %10010 = vmatpush3.bf16.msra.mxu1 %v11452_v9 }
 0x3e0   :  { %7411 = vmatmul.mubr.bf16.gmra.mrb[68].mxu0 %v13040_v24 }
 0x3e1   :  { %7863 = vmatmul.mubr.bf16.gmra.mrb[68].mxu1 %v13040_v24  ;;  %7420 = vmatprep.mubr.bf16.mxu0 %v13054_v20  ;;  %v11368_v24 = vld [vmem:[#allocation9 + $0x50] ss:$8 sps:$4 sm:$0xff]  }
 0x3e2   :  { %7872 = vmatprep.mubr.bf16.mxu1 %v13054_v20  ;;  %8430 = vmatpush1.bf16.msra.mxu0 %v11359_v2  ;;  %v11373_v20 = vld [vmem:[#allocation9 + $0x64] ss:$8 sps:$4 sm:$0xff]   ;;  %v11453_v2 = vld [vmem:[#allocation12 + $0x50] sm:$0xff]  }
 0x3e3   :  { %8431 = vmatprep.subr.bf16.mxu0 %v11364_v22  ;;  %10011 = vmatprep.subr.bf16.mxu1 %v11453_v2 }
 0x3e6   :  { %8432 = vmatpush1.bf16.msra.mxu0 %v11362_v12 }
 0x3e7   :  { %8433 = vmatprep.subr.bf16.mxu0 %v11367_v61 }
 0x3e8   :  { %7421 = vmatmul.mubr.bf16.gmra.mrb[72].mxu0 %v13052_v26 }
 0x3e9   :  { %7873 = vmatmul.mubr.bf16.gmra.mrb[72].mxu1 %v13052_v26  ;;  %7430 = vmatprep.mubr.bf16.mxu0 %v13066_v10  ;;  %v11374_v26 = vld [vmem:[#allocation9 + $0x70] ss:$8 sps:$4 sm:$0xff]  }
 0x3ea   :  { %7882 = vmatprep.mubr.bf16.mxu1 %v13066_v10  ;;  %8434 = vmatpush1.bf16.msra.mxu0 %v11365_v56  ;;  %v11379_v10 = vld [vmem:[#allocation9 + $0x84] ss:$8 sps:$4 sm:$0xff]   ;;  %v11401_v56 = vld [vmem:[#allocation9 + $0x100] ss:$8 sps:$4 sm:$0xff]  }
 0x3eb   :  { %8435 = vmatprep.subr.bf16.mxu0 %v11370_v18 }
 0x3ee   :  { %8436 = vmatpush1.bf16.msra.mxu0 %v11368_v24 }
 0x3ef   :  { %8437 = vmatprep.subr.bf16.mxu0 %v11373_v20 }
 0x3f0   :  { %7431 = vmatmul.mubr.bf16.gmra.mrb[76].mxu0 %v13064_v59 }
 0x3f1   :  { %7883 = vmatmul.mubr.bf16.gmra.mrb[76].mxu1 %v13064_v59  ;;  %7440 = vmatprep.mubr.bf16.mxu0 %v13078_v25  ;;  %v11380_v59 = vld [vmem:[#allocation9 + $0x90] ss:$8 sps:$4 sm:$0xff]  }
 0x3f2   :  { %7892 = vmatprep.mubr.bf16.mxu1 %v13078_v25  ;;  %8438 = vmatpush1.bf16.msra.mxu0 %v11371_v54  ;;  %v11385_v25 = vld [vmem:[#allocation9 + $0xa4] ss:$8 sps:$4 sm:$0xff]  }
 0x3f3   :  { %8439 = vmatprep.subr.bf16.mxu0 %v11376_v0  ;;  %v11406_v0 = vld [vmem:[#allocation9 + $0x114] ss:$8 sps:$4 sm:$0xff]  }
 0x3f6   :  { %8440 = vmatpush1.bf16.msra.mxu0 %v11374_v26 }
 0x3f7   :  { %8441 = vmatprep.subr.bf16.mxu0 %v11379_v10 }
 0x3f8   :  { %7441 = vmatmul.mubr.bf16.gmra.mrb[80].mxu0 %v13076_v15 }
 0x3f9   :  { %7893 = vmatmul.mubr.bf16.gmra.mrb[80].mxu1 %v13076_v15  ;;  %7450 = vmatprep.mubr.bf16.mxu0 %v13090_v46  ;;  %v11386_v15 = vld [vmem:[#allocation9 + $0xb0] ss:$8 sps:$4 sm:$0xff]  }
 0x3fa   :  { %7902 = vmatprep.mubr.bf16.mxu1 %v13090_v46  ;;  %8442 = vmatpush1.bf16.msra.mxu0 %v11377_v13  ;;  %v11391_v46 = vld [vmem:[#allocation9 + $0xc4] ss:$8 sps:$4 sm:$0xff]  }
 0x3fb   :  { %8443 = vmatprep.subr.bf16.mxu0 %v11382_v32 }
 0x3fe   :  { %8444 = vmatpush1.bf16.msra.mxu0 %v11380_v59  ;;  %v11454_v59 = vld [vmem:[#allocation12 + $0x10] sm:$0xff]  }
 0x3ff   :  { %8445 = vmatprep.subr.bf16.mxu0 %v11385_v25  ;;  %10012 = vmatpush3.bf16.msra.mxu1 %v11454_v59 }
 0x400   :  { %7451 = vmatmul.mubr.bf16.gmra.mrb[84].mxu0 %v13088_v44 }
 0x401   :  { %7903 = vmatmul.mubr.bf16.gmra.mrb[84].mxu1 %v13088_v44  ;;  %7460 = vmatprep.mubr.bf16.mxu0 %v13102_v33  ;;  %v11392_v44 = vld [vmem:[#allocation9 + $0xd0] ss:$8 sps:$4 sm:$0xff]  }
 0x402   :  { %7912 = vmatprep.mubr.bf16.mxu1 %v13102_v33  ;;  %8446 = vmatpush1.bf16.msra.mxu0 %v11383_v39  ;;  %v11397_v33 = vld [vmem:[#allocation9 + $0xe4] ss:$8 sps:$4 sm:$0xff]  }
 0x403   :  { %8447 = vmatprep.subr.bf16.mxu0 %v11388_v8 }
 0x406   :  { %8448 = vmatpush1.bf16.msra.mxu0 %v11386_v15 }
 0x407   :  { %8449 = vmatprep.subr.bf16.mxu0 %v11391_v46  ;;  %v11455_v46 = vld [vmem:[#allocation12 + $0x58] sm:$0xff]  }
 0x408   :  { %7461 = vmatmul.mubr.bf16.gmra.mrb[88].mxu0 %v13100_v43  ;;  %10013 = vmatprep.subr.bf16.mxu1 %v11455_v46 }
 0x409   :  { %7913 = vmatmul.mubr.bf16.gmra.mrb[88].mxu1 %v13100_v43  ;;  %7470 = vmatprep.mubr.bf16.mxu0 %v13114_v38  ;;  %v11403_v43 = vld [vmem:[#allocation9 + $0x104] ss:$8 sps:$4 sm:$0xff]  }
 0x40a   :  { %7922 = vmatprep.mubr.bf16.mxu1 %v13114_v38  ;;  %8450 = vmatpush1.bf16.msra.mxu0 %v11389_v16 }
 0x40b   :  { %8451 = vmatprep.subr.bf16.mxu0 %v11394_v35 }
 0x40e   :  { %8452 = vmatpush1.bf16.msra.mxu0 %v11392_v44 }
 0x40f   :  { %8453 = vmatprep.subr.bf16.mxu0 %v11397_v33  ;;  %v11404_v33 = vld [vmem:[#allocation9 + $0x110] ss:$8 sps:$4 sm:$0xff]  }
 0x410   :  { %7471 = vmatmul.mubr.bf16.gmra.mrb[92].mxu0 %v13112_v57 }
 0x411   :  { %7923 = vmatmul.mubr.bf16.gmra.mrb[92].mxu1 %v13112_v57 }
 0x412   :  { %8454 = vmatpush1.bf16.msra.mxu0 %v11395_v29 }
 0x413   :  { %8455 = vmatprep.subr.bf16.mxu0 %v11400_v19 }
 0x416   :  { %8456 = vmatpush1.bf16.msra.mxu0 %v11398_v1 }
 0x417   :  { %8538 = vmatprep.subr.bf16.mxu0 %v11403_v43  ;;  %v11409_v43 = vld [vmem:[#allocation9 + $0x124] ss:$8 sps:$4 sm:$0xff]  }
 0x4ab   :  { %v7402_v55 = vpop.f32.mrb[64].mxu0 }
 0x4ac   :  { %v10247_v31 = vadd.f32 %v7402_v55, %v13149_v45  ;;  %v7854_v6 = vpop.f32.mrb[64].mxu1  ;;  %v7404_v36 = vpop.f32.mrb[65].mxu0 }
 0x4ad   :  { %v10279_v53 = vadd.f32 %v7854_v6, %v13153_v21  ;;  %v10248_v52 = vadd.f32 %v7404_v36, %v13156_v48  ;;  %v7856_v30 = vpop.f32.mrb[65].mxu1  ;;  %v7406_v27 = vpop.f32.mrb[66].mxu0  ;;  %v11456_v36 = vld [vmem:[#allocation12 + $0x18] sm:$0xff]  }
 0x4ae   :  { %v10280_v5 = vadd.f32 %v7856_v30, %v13160_v17  ;;  %v10249_v4 = vadd.f32 %v7406_v27, %v13149_v45  ;;  %v7858_v58 = vpop.f32.mrb[66].mxu1  ;;  %v7408_v60 = vpop.f32.mrb[67].mxu0  ;;  %v7933_v38 = vmax.f32 %v10247_v31, 0.0  ;;  %v11457_v27 = vld [vmem:[#allocation12 + $0x60] sm:$0xff]   ;;  %10014 = vmatpush3.bf16.msra.mxu1 %v11456_v36 }
 0x4af   :  { %v10281_v57 = vadd.f32 %v7858_v58, %v13153_v21  ;;  %v10250_v47 = vadd.f32 %v7408_v60, %v13156_v48  ;;  %v7860_v41 = vpop.f32.mrb[67].mxu1  ;;  %v7935_v51 = vmax.f32 %v10279_v53, 0.0  ;;  %v7934_v62 = vmax.f32 %v10248_v52, 0.0  ;;  %v11407_v60 = vld [vmem:[#allocation9 + $0x120] ss:$8 sps:$4 sm:$0xff]   ;;  %10015 = vmatprep.subr.bf16.mxu1 %v11457_v27 }
 0x4b0   :  { %v7937_v11 = vmax.f32 %v10249_v4, 0.0  ;;  %v10282_v63 = vadd.f32 %v7860_v41, %v13160_v17  ;;  %v7936_v34 = vmax.f32 %v10280_v5, 0.0 }
 0x4b1   :  { %v7939_v42 = vmax.f32 %v10281_v57, 0.0  ;;  %v7938_v50 = vmax.f32 %v10250_v47, 0.0  ;;  %v11412_v47 = vld [vmem:[#allocation9 + $0x134] ss:$8 sps:$4 sm:$0xff]  }
 0x4b2   :  { %v7997_v28 = vpack.c.bf16 %v7937_v11, %v7933_v38  ;;  %v7940_v23 = vmax.f32 %v10282_v63, 0.0 }
 0x4b3   :  { %v13170_v22 = vpack.c.bf16 %v7939_v42, %v7935_v51  ;;  %v7998_v12 = vpack.c.bf16 %v7938_v50, %v7934_v62  ;;  %v7412_v61 = vpop.f32.mrb[68].mxu0  ;;  %v11458_v51 = vld [vmem:[#allocation12 + $0x20] sm:$0xff]  }
 0x4b4   :  { %v13172_v18 = vpack.c.bf16 %v7940_v23, %v7936_v34  ;;  %v10251_v24 = vadd.f32 %v7412_v61, %v13149_v45  ;;  %v7864_v20 = vpop.f32.mrb[68].mxu1  ;;  %v7414_v54 = vpop.f32.mrb[69].mxu0  ;;  %v11459_v34 = vld [vmem:[#allocation12 + $0x68] sm:$0xff]   ;;  %10016 = vmatpush3.bf16.msra.mxu1 %v11458_v51 }
 0x4b5   :  { %v10283_v26 = vadd.f32 %v7864_v20, %v13153_v21  ;;  %v10252_v10 = vadd.f32 %v7414_v54, %v13156_v48  ;;  %v7866_v13 = vpop.f32.mrb[69].mxu1  ;;  %v7416_v32 = vpop.f32.mrb[70].mxu0  ;;  %8457 = vmatprep.mubr.bf16.mxu0 %v7998_v12  ;;  %v11410_v12 = vld [vmem:[#allocation9 + $0x130] ss:$8 sps:$4 sm:$0xff]   ;;  %v11415_v20 = vld [vmem:[#allocation9 + $0x144] ss:$8 sps:$4 sm:$0xff]   ;;  %10017 = vmatprep.subr.bf16.mxu1 %v11459_v34 }
 0x4b6   :  { %v10284_v25 = vadd.f32 %v7866_v13, %v13160_v17  ;;  %v10253_v39 = vadd.f32 %v7416_v32, %v13149_v45  ;;  %v7868_v8 = vpop.f32.mrb[70].mxu1  ;;  %v7418_v15 = vpop.f32.mrb[71].mxu0  ;;  %8458 = vmatmul.mubr.bf16.vlgmr.msra.gmra.mrb[96].mxu0 %v7997_v28  ;;  %v7941_v29 = vmax.f32 %v10251_v24, 0.0  ;;  %v11460_v13 = vld [vmem:[#allocation12 + $0x28] sm:$0xff]  }
 0x4b7   :  { %v10285_v16 = vadd.f32 %v7868_v8, %v13153_v21  ;;  %v10254_v35 = vadd.f32 %v7418_v15, %v13156_v48  ;;  %v7870_v44 = vpop.f32.mrb[71].mxu1  ;;  %8539 = vmatpush1.bf16.msra.mxu0 %v11401_v56  ;;  %v7943_v3 = vmax.f32 %v10283_v26, 0.0  ;;  %v7942_v55 = vmax.f32 %v10252_v10, 0.0  ;;  %v11419_v34 = vld [vmem:[#allocation9 + $0x160] ss:$8 sps:$4 sm:$0xff]  }
 0x4b8   :  { %v7945_v19 = vmax.f32 %v10253_v39, 0.0  ;;  %v10286_v1 = vadd.f32 %v7870_v44, %v13160_v17  ;;  %8540 = vmatprep.subr.bf16.mxu0 %v11406_v0  ;;  %v7944_v53 = vmax.f32 %v10284_v25, 0.0  ;;  %v11461_v39 = vld [vmem:[#allocation12 + $0x70] sm:$0xff]   ;;  %10018 = vmatpush3.bf16.msra.mxu1 %v11460_v13 }
 0x4b9   :  { %v7947_v31 = vmax.f32 %v10285_v16, 0.0  ;;  %v7946_v6 = vmax.f32 %v10254_v35, 0.0  ;;  %v11413_v16 = vld [vmem:[#allocation9 + $0x140] ss:$8 sps:$4 sm:$0xff]   ;;  %10019 = vmatprep.subr.bf16.mxu1 %v11461_v39  ;;  %v11422_v39 = vld [vmem:[#allocation9 + $0x170] ss:$8 sps:$4 sm:$0xff]  }
 0x4ba   :  { %v8001_v52 = vpack.c.bf16 %v7945_v19, %v7941_v29  ;;  %v7948_v30 = vmax.f32 %v10286_v1, 0.0  ;;  %v11418_v19 = vld [vmem:[#allocation9 + $0x154] ss:$8 sps:$4 sm:$0xff]  }
 0x4bb   :  { %v13182_v5 = vpack.c.bf16 %v7947_v31, %v7943_v3  ;;  %v8002_v4 = vpack.c.bf16 %v7946_v6, %v7942_v55  ;;  %v7422_v58 = vpop.f32.mrb[72].mxu0  ;;  %8541 = vmatpush1.bf16.msra.mxu0 %v11404_v33  ;;  %v11462_v31 = vld [vmem:[#allocation12 + $0x30] sm:$0xff]  }
 0x4bc   :  { %v13184_v40 = vpack.c.bf16 %v7948_v30, %v7944_v53  ;;  %v10255_v49 = vadd.f32 %v7422_v58, %v13149_v45  ;;  %v7874_v14 = vpop.f32.mrb[72].mxu1  ;;  %v7424_v57 = vpop.f32.mrb[73].mxu0  ;;  %8542 = vmatprep.subr.bf16.mxu0 %v11409_v43  ;;  %v11416_v58 = vld [vmem:[#allocation9 + $0x150] ss:$8 sps:$4 sm:$0xff]   ;;  %10020 = vmatpush3.bf16.msra.mxu1 %v11462_v31 }
 0x4bd   :  { %v10287_v41 = vadd.f32 %v7874_v14, %v13153_v21  ;;  %v10256_v38 = vadd.f32 %v7424_v57, %v13156_v48  ;;  %v7876_v11 = vpop.f32.mrb[73].mxu1  ;;  %v7426_v63 = vpop.f32.mrb[74].mxu0  ;;  %8467 = vmatprep.mubr.bf16.mxu0 %v8002_v4  ;;  %v11421_v57 = vld [vmem:[#allocation9 + $0x164] ss:$8 sps:$4 sm:$0xff]  }
 0x4be   :  { %v10288_v62 = vadd.f32 %v7876_v11, %v13160_v17  ;;  %v10257_v42 = vadd.f32 %v7426_v63, %v13149_v45  ;;  %v7878_v50 = vpop.f32.mrb[74].mxu1  ;;  %v7428_v9 = vpop.f32.mrb[75].mxu0  ;;  %8468 = vmatmul.mubr.bf16.gmra.mrb[100].mxu0 %v8001_v52  ;;  %v7949_v61 = vmax.f32 %v10255_v49, 0.0 }
 0x4bf   :  { %v10289_v28 = vadd.f32 %v7878_v50, %v13153_v21  ;;  %v10258_v23 = vadd.f32 %v7428_v9, %v13156_v48  ;;  %v7880_v2 = vpop.f32.mrb[75].mxu1  ;;  %8543 = vmatpush1.bf16.msra.mxu0 %v11407_v60  ;;  %v7951_v54 = vmax.f32 %v10287_v41, 0.0  ;;  %v7950_v0 = vmax.f32 %v10256_v38, 0.0 }
 0x4c0   :  { %v7953_v56 = vmax.f32 %v10257_v42, 0.0  ;;  %v10290_v24 = vadd.f32 %v7880_v2, %v13160_v17  ;;  %8544 = vmatprep.subr.bf16.mxu0 %v11412_v47  ;;  %v7952_v32 = vmax.f32 %v10288_v62, 0.0 }
 0x4c1   :  { %v7955_v26 = vmax.f32 %v10289_v28, 0.0  ;;  %v7954_v10 = vmax.f32 %v10258_v23, 0.0 }
 0x4c2   :  { %v8005_v59 = vpack.c.bf16 %v7953_v56, %v7949_v61  ;;  %v7956_v25 = vmax.f32 %v10290_v24, 0.0  ;;  %v11424_v61 = vld [vmem:[#allocation9 + $0x174] ss:$8 sps:$4 sm:$0xff]  }
 0x4c3   :  { %v13194_v8 = vpack.c.bf16 %v7955_v26, %v7951_v54  ;;  %v8006_v15 = vpack.c.bf16 %v7954_v10, %v7950_v0  ;;  %v7432_v46 = vpop.f32.mrb[76].mxu0  ;;  %8545 = vmatpush1.bf16.msra.mxu0 %v11410_v12 }
 0x4c4   :  { %v13196_v35 = vpack.c.bf16 %v7956_v25, %v7952_v32  ;;  %v10259_v44 = vadd.f32 %v7432_v46, %v13149_v45  ;;  %v7884_v33 = vpop.f32.mrb[76].mxu1  ;;  %v7434_v29 = vpop.f32.mrb[77].mxu0  ;;  %8546 = vmatprep.subr.bf16.mxu0 %v11415_v20 }
 0x4c5   :  { %v10291_v1 = vadd.f32 %v7884_v33, %v13153_v21  ;;  %v10260_v43 = vadd.f32 %v7434_v29, %v13156_v48  ;;  %v7886_v3 = vpop.f32.mrb[77].mxu1  ;;  %v7436_v55 = vpop.f32.mrb[78].mxu0  ;;  %8477 = vmatprep.mubr.bf16.mxu0 %v8006_v15 }
 0x4c6   :  { %v10292_v6 = vadd.f32 %v7886_v3, %v13160_v17  ;;  %v10261_v36 = vadd.f32 %v7436_v55, %v13149_v45  ;;  %v7888_v53 = vpop.f32.mrb[78].mxu1  ;;  %v7438_v52 = vpop.f32.mrb[79].mxu0  ;;  %8478 = vmatmul.mubr.bf16.gmra.mrb[104].mxu0 %v8005_v59  ;;  %v7957_v60 = vmax.f32 %v10259_v44, 0.0  ;;  %v11427_v44 = vld [vmem:[#allocation9 + $0x184] ss:$8 sps:$4 sm:$0xff]  }
 0x4c7   :  { %v10293_v30 = vadd.f32 %v7888_v53, %v13153_v21  ;;  %v10262_v27 = vadd.f32 %v7438_v52, %v13156_v48  ;;  %v7890_v4 = vpop.f32.mrb[79].mxu1  ;;  %8547 = vmatpush1.bf16.msra.mxu0 %v11413_v16  ;;  %v7959_v47 = vmax.f32 %v10291_v1, 0.0  ;;  %v7958_v41 = vmax.f32 %v10260_v43, 0.0  ;;  %v11425_v53 = vld [vmem:[#allocation9 + $0x180] ss:$8 sps:$4 sm:$0xff]  }
 0x4c8   :  { %v7961_v49 = vmax.f32 %v10261_v36, 0.0  ;;  %v10294_v14 = vadd.f32 %v7890_v4, %v13160_v17  ;;  %8548 = vmatprep.subr.bf16.mxu0 %v11418_v19  ;;  %v7960_v63 = vmax.f32 %v10292_v6, 0.0 }
 0x4c9   :  { %v7963_v38 = vmax.f32 %v10293_v30, 0.0  ;;  %v7962_v11 = vmax.f32 %v10262_v27, 0.0 }
 0x4ca   :  { %v8009_v51 = vpack.c.bf16 %v7961_v49, %v7957_v60  ;;  %v7964_v62 = vmax.f32 %v10294_v14, 0.0 }
 0x4cb   :  { %v13206_v42 = vpack.c.bf16 %v7963_v38, %v7959_v47  ;;  %v8010_v50 = vpack.c.bf16 %v7962_v11, %v7958_v41  ;;  %v7442_v9 = vpop.f32.mrb[80].mxu0  ;;  %8549 = vmatpush1.bf16.msra.mxu0 %v11416_v58  ;;  %v11430_v58 = vld [vmem:[#allocation9 + $0x194] ss:$8 sps:$4 sm:$0xff]  }
 0x4cc   :  { %v13208_v28 = vpack.c.bf16 %v7964_v62, %v7960_v63  ;;  %v10263_v23 = vadd.f32 %v7442_v9, %v13149_v45  ;;  %v7894_v2 = vpop.f32.mrb[80].mxu1  ;;  %v7444_v12 = vpop.f32.mrb[81].mxu0  ;;  %8550 = vmatprep.subr.bf16.mxu0 %v11421_v57 }
 0x4cd   :  { %v10295_v56 = vadd.f32 %v7894_v2, %v13153_v21  ;;  %v10264_v24 = vadd.f32 %v7444_v12, %v13156_v48  ;;  %v7896_v20 = vpop.f32.mrb[81].mxu1  ;;  %v7446_v54 = vpop.f32.mrb[82].mxu0  ;;  %8487 = vmatprep.mubr.bf16.mxu0 %v8010_v50  ;;  %v11428_v50 = vld [vmem:[#allocation9 + $0x190] ss:$8 sps:$4 sm:$0xff]   ;;  %v11433_v2 = vld [vmem:[#allocation9 + $0x1a4] ss:$8 sps:$4 sm:$0xff]  }
 0x4ce   :  { %v10296_v0 = vadd.f32 %v7896_v20, %v13160_v17  ;;  %v10265_v26 = vadd.f32 %v7446_v54, %v13149_v45  ;;  %v7898_v10 = vpop.f32.mrb[82].mxu1  ;;  %v7448_v13 = vpop.f32.mrb[83].mxu0  ;;  %8488 = vmatmul.mubr.bf16.gmra.mrb[108].mxu0 %v8009_v51  ;;  %v7965_v15 = vmax.f32 %v10263_v23, 0.0 }
 0x4cf   :  { %v10297_v32 = vadd.f32 %v7898_v10, %v13153_v21  ;;  %v10266_v59 = vadd.f32 %v7448_v13, %v13156_v48  ;;  %v7900_v25 = vpop.f32.mrb[83].mxu1  ;;  %8551 = vmatpush1.bf16.msra.mxu0 %v11419_v34  ;;  %v7967_v33 = vmax.f32 %v10295_v56, 0.0  ;;  %v7966_v29 = vmax.f32 %v10264_v24, 0.0 }
 0x4d0   :  { %v7969_v46 = vmax.f32 %v10265_v26, 0.0  ;;  %v10298_v16 = vadd.f32 %v7900_v25, %v13160_v17  ;;  %8552 = vmatprep.subr.bf16.mxu0 %v11424_v61  ;;  %v7968_v43 = vmax.f32 %v10296_v0, 0.0 }
 0x4d1   :  { %v7971_v19 = vmax.f32 %v10297_v32, 0.0  ;;  %v7970_v1 = vmax.f32 %v10266_v59, 0.0  ;;  %v11431_v32 = vld [vmem:[#allocation9 + $0x1a0] ss:$8 sps:$4 sm:$0xff]  }
 0x4d2   :  { %v8013_v3 = vpack.c.bf16 %v7969_v46, %v7965_v15  ;;  %v7972_v55 = vmax.f32 %v10298_v16, 0.0  ;;  %v11436_v46 = vld [vmem:[#allocation9 + $0x1b4] ss:$8 sps:$4 sm:$0xff]  }
 0x4d3   :  { %v13218_v31 = vpack.c.bf16 %v7971_v19, %v7967_v33  ;;  %v8014_v6 = vpack.c.bf16 %v7970_v1, %v7966_v29  ;;  %v7452_v36 = vpop.f32.mrb[84].mxu0  ;;  %8553 = vmatpush1.bf16.msra.mxu0 %v11422_v39 }
 0x4d4   :  { %v13220_v52 = vpack.c.bf16 %v7972_v55, %v7968_v43  ;;  %v10267_v30 = vadd.f32 %v7452_v36, %v13149_v45  ;;  %v7904_v27 = vpop.f32.mrb[84].mxu1  ;;  %v7454_v4 = vpop.f32.mrb[85].mxu0  ;;  %8554 = vmatprep.subr.bf16.mxu0 %v11427_v44 }
 0x4d5   :  { %v10299_v60 = vadd.f32 %v7904_v27, %v13153_v21  ;;  %v10268_v49 = vadd.f32 %v7454_v4, %v13156_v48  ;;  %v7906_v14 = vpop.f32.mrb[85].mxu1  ;;  %v7456_v57 = vpop.f32.mrb[86].mxu0  ;;  %8497 = vmatprep.mubr.bf16.mxu0 %v8014_v6 }
 0x4d6   :  { %v10300_v47 = vadd.f32 %v7906_v14, %v13160_v17  ;;  %v10269_v41 = vadd.f32 %v7456_v57, %v13149_v45  ;;  %v7908_v38 = vpop.f32.mrb[86].mxu1  ;;  %v7458_v11 = vpop.f32.mrb[87].mxu0  ;;  %8498 = vmatmul.mubr.bf16.gmra.mrb[112].mxu0 %v8013_v3  ;;  %v7973_v9 = vmax.f32 %v10267_v30, 0.0 }
 0x4d7   :  { %v10301_v63 = vadd.f32 %v7908_v38, %v13153_v21  ;;  %v10270_v51 = vadd.f32 %v7458_v11, %v13156_v48  ;;  %v7910_v62 = vpop.f32.mrb[87].mxu1  ;;  %8555 = vmatpush1.bf16.msra.mxu0 %v11425_v53  ;;  %v7975_v12 = vmax.f32 %v10299_v60, 0.0  ;;  %v7974_v61 = vmax.f32 %v10268_v49, 0.0  ;;  %v11434_v53 = vld [vmem:[#allocation9 + $0x1b0] ss:$8 sps:$4 sm:$0xff]  }
 0x4d8   :  { %v7977_v34 = vmax.f32 %v10269_v41, 0.0  ;;  %v10302_v23 = vadd.f32 %v7910_v62, %v13160_v17  ;;  %8556 = vmatprep.subr.bf16.mxu0 %v11430_v58  ;;  %v7976_v20 = vmax.f32 %v10300_v47, 0.0  ;;  %v11439_v58 = vld [vmem:[#allocation9 + $0x1c4] ss:$8 sps:$4 sm:$0xff]   ;;  %v11437_v62 = vld [vmem:[#allocation9 + $0x1c0] ss:$8 sps:$4 sm:$0xff]  }
 0x4d9   :  { %v7979_v56 = vmax.f32 %v10301_v63, 0.0  ;;  %v7978_v24 = vmax.f32 %v10270_v51, 0.0 }
 0x4da   :  { %v8017_v54 = vpack.c.bf16 %v7977_v34, %v7973_v9  ;;  %v7980_v0 = vmax.f32 %v10302_v23, 0.0 }
 0x4db   :  { %v13230_v26 = vpack.c.bf16 %v7979_v56, %v7975_v12  ;;  %v8018_v10 = vpack.c.bf16 %v7978_v24, %v7974_v61  ;;  %v7462_v13 = vpop.f32.mrb[88].mxu0  ;;  %8557 = vmatpush1.bf16.msra.mxu0 %v11428_v50 }
 0x4dc   :  { %v13232_v59 = vpack.c.bf16 %v7980_v0, %v7976_v20  ;;  %v10271_v25 = vadd.f32 %v7462_v13, %v13149_v45  ;;  %v7914_v39 = vpop.f32.mrb[88].mxu1  ;;  %v7464_v15 = vpop.f32.mrb[89].mxu0  ;;  %8558 = vmatprep.subr.bf16.mxu0 %v11433_v2  ;;  %v11442_v2 = vld [vmem:[#allocation9 + $0x1d4] ss:$8 sps:$4 sm:$0xff]  }
 0x4dd   :  { %v10303_v16 = vadd.f32 %v7914_v39, %v13153_v21  ;;  %v10272_v44 = vadd.f32 %v7464_v15, %v13156_v48  ;;  %v7916_v33 = vpop.f32.mrb[89].mxu1  ;;  %v7466_v29 = vpop.f32.mrb[90].mxu0  ;;  %8507 = vmatprep.mubr.bf16.mxu0 %v8018_v10  ;;  %v11440_v39 = vld [vmem:[#allocation9 + $0x1d0] ss:$8 sps:$4 sm:$0xff]  }
 0x4de   :  { %v10304_v19 = vadd.f32 %v7916_v33, %v13160_v17  ;;  %v10273_v1 = vadd.f32 %v7466_v29, %v13149_v45  ;;  %v7918_v43 = vpop.f32.mrb[90].mxu1  ;;  %v7468_v3 = vpop.f32.mrb[91].mxu0  ;;  %8508 = vmatmul.mubr.bf16.gmra.mrb[116].mxu0 %v8017_v54  ;;  %v7981_v30 = vmax.f32 %v10271_v25, 0.0 }
 0x4df   :  { %v10305_v55 = vadd.f32 %v7918_v43, %v13153_v21  ;;  %v10274_v6 = vadd.f32 %v7468_v3, %v13156_v48  ;;  %v7920_v36 = vpop.f32.mrb[91].mxu1  ;;  %8559 = vmatpush1.bf16.msra.mxu0 %v11431_v32  ;;  %v7983_v60 = vmax.f32 %v10303_v16, 0.0  ;;  %v7982_v49 = vmax.f32 %v10272_v44, 0.0  ;;  %v11445_v44 = vld [vmem:[#allocation9 + $0x1e4] ss:$8 sps:$4 sm:$0xff]  }
 0x4e0   :  { %v7985_v27 = vmax.f32 %v10273_v1, 0.0  ;;  %v10306_v4 = vadd.f32 %v7920_v36, %v13160_v17  ;;  %8560 = vmatprep.subr.bf16.mxu0 %v11436_v46  ;;  %v7984_v47 = vmax.f32 %v10304_v19, 0.0  ;;  %v11448_v36 = vld [vmem:[#allocation9 + $0x1f4] ss:$8 sps:$4 sm:$0xff]  }
 0x4e1   :  { %v7987_v14 = vmax.f32 %v10305_v55, 0.0  ;;  %v7986_v57 = vmax.f32 %v10274_v6, 0.0 }
 0x4e2   :  { %v8021_v41 = vpack.c.bf16 %v7985_v27, %v7981_v30  ;;  %v7988_v38 = vmax.f32 %v10306_v4, 0.0 }
 0x4e3   :  { %v13242_v11 = vpack.c.bf16 %v7987_v14, %v7983_v60  ;;  %v8022_v63 = vpack.c.bf16 %v7986_v57, %v7982_v49  ;;  %v7472_v51 = vpop.f32.mrb[92].mxu0  ;;  %8561 = vmatpush1.bf16.msra.mxu0 %v11434_v53 }
 0x4e4   :  { %v8024_v50 = vpack.c.bf16 %v7988_v38, %v7984_v47  ;;  %v10275_v9 = vadd.f32 %v7472_v51, %v13149_v45  ;;  %v7924_v34 = vpop.f32.mrb[92].mxu1  ;;  %v7474_v23 = vpop.f32.mrb[93].mxu0  ;;  %8562 = vmatprep.subr.bf16.mxu0 %v11439_v58  ;;  %v11466_v47 = vld [vmem:[#allocation15 + $0x8] sm:$0xff]  }
 0x4e5   :  { %v10307_v12 = vadd.f32 %v7924_v34, %v13153_v21  ;;  %v10276_v61 = vadd.f32 %v7474_v23, %v13156_v48  ;;  %v7926_v56 = vpop.f32.mrb[93].mxu1  ;;  %v7476_v24 = vpop.f32.mrb[94].mxu0  ;;  %8517 = vmatprep.mubr.bf16.mxu0 %v8022_v63 }
 0x4e6   :  { %v10308_v20 = vadd.f32 %v7926_v56, %v13160_v17  ;;  %v10277_v54 = vadd.f32 %v7476_v24, %v13149_v45  ;;  %v7928_v0 = vpop.f32.mrb[94].mxu1  ;;  %v7478_v10 = vpop.f32.mrb[95].mxu0  ;;  %8518 = vmatmul.mubr.bf16.gmra.mrb[120].mxu0 %v8021_v41  ;;  %v7989_v15 = vmax.f32 %v10275_v9, 0.0  ;;  %v11467_v9 = vld [vmem:[#allocation15 + $0x10] sm:$0xff]  }
 0x4e7   :  { %v10309_v13 = vadd.f32 %v7928_v0, %v13153_v21  ;;  %v10278_v32 = vadd.f32 %v7478_v10, %v13156_v48  ;;  %v7930_v25 = vpop.f32.mrb[95].mxu1  ;;  %8563 = vmatpush1.bf16.msra.mxu0 %v11437_v62  ;;  %v7991_v33 = vmax.f32 %v10307_v12, 0.0  ;;  %v7990_v29 = vmax.f32 %v10276_v61, 0.0  ;;  %v11443_v48 = vld [vmem:[#allocation9 + $0x1e0] ss:$8 sps:$4 sm:$0xff]  }
 0x4e8   :  { %v7993_v46 = vmax.f32 %v10277_v54, 0.0  ;;  %v10310_v16 = vadd.f32 %v7930_v25, %v13160_v17  ;;  %8564 = vmatprep.subr.bf16.mxu0 %v11442_v2  ;;  %v7992_v1 = vmax.f32 %v10308_v20, 0.0  ;;  %v11446_v17 = vld [vmem:[#allocation9 + $0x1f0] ss:$8 sps:$4 sm:$0xff]  }
 0x4e9   :  { %v7995_v19 = vmax.f32 %v10309_v13, 0.0  ;;  %v7994_v45 = vmax.f32 %v10278_v32, 0.0 }
 0x4ea   :  { %v8025_v43 = vpack.c.bf16 %v7993_v46, %v7989_v15  ;;  %v7996_v3 = vmax.f32 %v10310_v16, 0.0 }
 0x4eb   :  { %v8027_v55 = vpack.c.bf16 %v7995_v19, %v7991_v33  ;;  %v8026_v21 = vpack.c.bf16 %v7994_v45, %v7990_v29  ;;  %8565 = vmatpush1.bf16.msra.mxu0 %v11440_v39 }
 0x4ec   :  { %v8028_v6 = vpack.c.bf16 %v7996_v3, %v7992_v1  ;;  %8566 = vmatprep.subr.bf16.mxu0 %v11445_v44 }
 0x4ed   :  { %8527 = vmatprep.mubr.bf16.mxu0 %v8026_v21 }
 0x4ee   :  { %8528 = vmatmul.mubr.bf16.gmra.mrb[124].mxu0 %v8025_v43 }
 0x4ef   :  { %8567 = vmatpush1.bf16.msra.mxu0 %v11443_v48  ;;  %8570 = vmatprep.mubr.bf16.mxu0 %v13172_v18  ;;  %v11464_v18 = vld [vmem:[#allocation12 + $0x38] sm:$0xff]  }
 0x4f0   :  { %8568 = vmatprep.subr.bf16.mxu0 %v11448_v36 }
 0x4f3   :  { %8569 = vmatpush1.bf16.msra.mxu0 %v11446_v17 }
 0x4f6   :  { %8571 = vmatmul.mubr.bf16.vlgmr.msra.gmra.mrb[96].mxu0 %v13170_v22  ;;  %v11463_v22 = vld [vmem:[#allocation12 + $0x78] sm:$0xff]  }
 0x4f7   :  { %8580 = vmatprep.mubr.bf16.mxu0 %v13184_v40  ;;  %10021 = vmatprep.subr.bf16.mxu1 %v11463_v22  ;;  %v8093_v40 = vld [vmem:[#allocation10] sm:$0x3] }
 0x4f8   :  { %10022 = vmatpush3.bf16.msra.mxu1 %v11464_v18 }
 0x4fe   :  { %8581 = vmatmul.mubr.bf16.gmra.mrb[100].mxu0 %v13182_v5  ;;  %v11465_v5 = vld [vmem:[#allocation15] sm:$0xff]  }
 0x4ff   :  { %8590 = vmatprep.mubr.bf16.mxu0 %v13196_v35  ;;  %10087 = vmatprep.subr.bf16.mxu1 %v11465_v5  ;;  %v13269_v35 = vrot.slane %v8093_v40, %v12625_v37 }
 0x506   :  { %8591 = vmatmul.mubr.bf16.gmra.mrb[104].mxu0 %v13194_v8  ;;  %v13266_v8 = vrot.slane %v8093_v40, %v12621_v7 }
 0x507   :  { %8600 = vmatprep.mubr.bf16.mxu0 %v13208_v28 }
 0x50e   :  { %8601 = vmatmul.mubr.bf16.gmra.mrb[108].mxu0 %v13206_v42 }
 0x50f   :  { %8610 = vmatprep.mubr.bf16.mxu0 %v13220_v52 }
 0x516   :  { %8611 = vmatmul.mubr.bf16.gmra.mrb[112].mxu0 %v13218_v31 }
 0x517   :  { %8620 = vmatprep.mubr.bf16.mxu0 %v13232_v59 }
 0x51e   :  { %8621 = vmatmul.mubr.bf16.gmra.mrb[116].mxu0 %v13230_v26 }
 0x51f   :  { %8630 = vmatprep.mubr.bf16.mxu0 %v8024_v50 }
 0x526   :  { %8631 = vmatmul.mubr.bf16.gmra.mrb[120].mxu0 %v13242_v11 }
 0x527   :  { %8640 = vmatprep.mubr.bf16.mxu0 %v8028_v6 }
 0x52e   :  { %8641 = vmatmul.mubr.bf16.gmra.mrb[124].mxu0 %v8027_v55 }
 0x5c9   :  { %v8572_v42 = vpop.f32.mrb[96].mxu0 }
 0x5ca   :  { %v10311_v28 = vadd.f32 %v8572_v42, %v13266_v8  ;;  %v8574_v31 = vpop.f32.mrb[97].mxu0 }
 0x5cb   :  { %v10312_v52 = vadd.f32 %v8574_v31, %v13269_v35  ;;  %v8576_v26 = vpop.f32.mrb[98].mxu0 }
 0x5cc   :  { %v10313_v59 = vadd.f32 %v8576_v26, %v13266_v8  ;;  %v8578_v53 = vpop.f32.mrb[99].mxu0  ;;  %v8651_v27 = vmax.f32 %v10311_v28, 0.0 }
 0x5cd   :  { %v10314_v30 = vadd.f32 %v8578_v53, %v13269_v35  ;;  %v8652_v58 = vmax.f32 %v10312_v52, 0.0 }
 0x5ce   :  { %v8653_v4 = vmax.f32 %v10313_v59, 0.0 }
 0x5cf   :  { %v8654_v7 = vmax.f32 %v10314_v30, 0.0 }
 0x5d0   :  { %v8683_v60 = vpack.c.bf16 %v8653_v4, %v8651_v27 }
 0x5d1   :  { %v8684_v49 = vpack.c.bf16 %v8654_v7, %v8652_v58  ;;  %v8582_v37 = vpop.f32.mrb[100].mxu0 }
 0x5d2   :  { %v10315_v14 = vadd.f32 %v8582_v37, %v13266_v8  ;;  %v8584_v57 = vpop.f32.mrb[101].mxu0 }
 0x5d3   :  { %v10316_v41 = vadd.f32 %v8584_v57, %v13269_v35  ;;  %v8586_v38 = vpop.f32.mrb[102].mxu0  ;;  %8866 = vmatprep.mubr.bf16.mxu1 %v8684_v49 }
 0x5d4   :  { %v10317_v11 = vadd.f32 %v8586_v38, %v13266_v8  ;;  %v8588_v63 = vpop.f32.mrb[103].mxu0  ;;  %8867 = vmatmul.mubr.bf16.vlgmr.msra.gmra.mrb[96].mxu1 %v8683_v60  ;;  %v8655_v62 = vmax.f32 %v10315_v14, 0.0 }
 0x5d5   :  { %v10318_v51 = vadd.f32 %v8588_v63, %v13269_v35  ;;  %10088 = vmatpush3.bf16.msra.mxu1 %v11465_v5  ;;  %v8656_v34 = vmax.f32 %v10316_v41, 0.0 }
 0x5d6   :  { %v8657_v50 = vmax.f32 %v10317_v11, 0.0  ;;  %10089 = vmatprep.subr.bf16.mxu1 %v11466_v47 }
 0x5d7   :  { %v8658_v23 = vmax.f32 %v10318_v51, 0.0 }
 0x5d8   :  { %v8685_v2 = vpack.c.bf16 %v8657_v50, %v8655_v62 }
 0x5d9   :  { %v8686_v12 = vpack.c.bf16 %v8658_v23, %v8656_v34  ;;  %v8592_v61 = vpop.f32.mrb[104].mxu0  ;;  %10090 = vmatpush3.bf16.msra.mxu1 %v11466_v47 }
 0x5da   :  { %v10319_v56 = vadd.f32 %v8592_v61, %v13266_v8  ;;  %v8594_v24 = vpop.f32.mrb[105].mxu0  ;;  %10091 = vmatprep.subr.bf16.mxu1 %v11467_v9 }
 0x5db   :  { %v10320_v20 = vadd.f32 %v8594_v24, %v13269_v35  ;;  %v8596_v54 = vpop.f32.mrb[106].mxu0  ;;  %8874 = vmatprep.mubr.bf16.mxu1 %v8686_v12 }
 0x5dc   :  { %v10321_v0 = vadd.f32 %v8596_v54, %v13266_v8  ;;  %v8598_v10 = vpop.f32.mrb[107].mxu0  ;;  %8875 = vmatmul.mubr.bf16.gmra.mrb[100].mxu1 %v8685_v2  ;;  %v8659_v32 = vmax.f32 %v10319_v56, 0.0 }
 0x5dd   :  { %v10322_v13 = vadd.f32 %v8598_v10, %v13269_v35  ;;  %10092 = vmatpush3.bf16.msra.mxu1 %v11467_v9  ;;  %v8660_v39 = vmax.f32 %v10320_v20, 0.0 }
 0x5de   :  { %v8661_v25 = vmax.f32 %v10321_v0, 0.0 }
 0x5df   :  { %v8662_v15 = vmax.f32 %v10322_v13, 0.0 }
 0x5e0   :  { %v8687_v46 = vpack.c.bf16 %v8661_v25, %v8659_v32 }
 0x5e1   :  { %v8688_v16 = vpack.c.bf16 %v8662_v15, %v8660_v39  ;;  %v8602_v44 = vpop.f32.mrb[108].mxu0 }
 0x5e2   :  { %v10323_v33 = vadd.f32 %v8602_v44, %v13266_v8  ;;  %v8604_v29 = vpop.f32.mrb[109].mxu0 }
 0x5e3   :  { %v10324_v19 = vadd.f32 %v8604_v29, %v13269_v35  ;;  %v8606_v45 = vpop.f32.mrb[110].mxu0  ;;  %8882 = vmatprep.mubr.bf16.mxu1 %v8688_v16 }
 0x5e4   :  { %v10325_v1 = vadd.f32 %v8606_v45, %v13266_v8  ;;  %v8608_v43 = vpop.f32.mrb[111].mxu0  ;;  %8883 = vmatmul.mubr.bf16.gmra.mrb[104].mxu1 %v8687_v46  ;;  %v8663_v55 = vmax.f32 %v10323_v33, 0.0 }
 0x5e5   :  { %v10326_v3 = vadd.f32 %v8608_v43, %v13269_v35  ;;  %v8664_v48 = vmax.f32 %v10324_v19, 0.0 }
 0x5e6   :  { %v8665_v21 = vmax.f32 %v10325_v1, 0.0 }
 0x5e7   :  { %v8666_v6 = vmax.f32 %v10326_v3, 0.0 }
 0x5e8   :  { %v8689_v36 = vpack.c.bf16 %v8665_v21, %v8663_v55  ;;  %v11468_v55 = vld [vmem:[#allocation15 + $0x18] sm:$0xff]   ;;  %v11469_v21 = vld [vmem:[#allocation15 + $0x20] sm:$0xff]  }
 0x5e9   :  { %v8690_v17 = vpack.c.bf16 %v8666_v6, %v8664_v48  ;;  %v8612_v22 = vpop.f32.mrb[112].mxu0  ;;  %10093 = vmatprep.subr.bf16.mxu1 %v11468_v55  ;;  %v11470_v48 = vld [vmem:[#allocation15 + $0x28] sm:$0xff]  }
 0x5ea   :  { %v10327_v18 = vadd.f32 %v8612_v22, %v13266_v8  ;;  %v8614_v5 = vpop.f32.mrb[113].mxu0  ;;  %10094 = vmatpush3.bf16.msra.mxu1 %v11468_v55 }
 0x5eb   :  { %v10328_v40 = vadd.f32 %v8614_v5, %v13269_v35  ;;  %v8616_v42 = vpop.f32.mrb[114].mxu0  ;;  %8890 = vmatprep.mubr.bf16.mxu1 %v8690_v17  ;;  %10095 = vmatprep.subr.bf16.mxu1 %v11469_v21 }
 0x5ec   :  { %v10329_v28 = vadd.f32 %v8616_v42, %v13266_v8  ;;  %v8618_v31 = vpop.f32.mrb[115].mxu0  ;;  %8891 = vmatmul.mubr.bf16.gmra.mrb[108].mxu1 %v8689_v36  ;;  %v8667_v26 = vmax.f32 %v10327_v18, 0.0  ;;  %v13303_v36 = vld [vmem:[#allocation13] ss:$0 sm:$0xff] }
 0x5ed   :  { %v10330_v52 = vadd.f32 %v8618_v31, %v13269_v35  ;;  %v8668_v53 = vmax.f32 %v10328_v40, 0.0 }
 0x5ee   :  { %v8669_v59 = vmax.f32 %v10329_v28, 0.0  ;;  %10096 = vmatpush3.bf16.msra.mxu1 %v11469_v21 }
 0x5ef   :  { %v8670_v30 = vmax.f32 %v10330_v52, 0.0  ;;  %10097 = vmatprep.subr.bf16.mxu1 %v11470_v48 }
 0x5f0   :  { %v8691_v27 = vpack.c.bf16 %v8669_v59, %v8667_v26 }
 0x5f1   :  { %v8692_v4 = vpack.c.bf16 %v8670_v30, %v8668_v53  ;;  %v8622_v58 = vpop.f32.mrb[116].mxu0 }
 0x5f2   :  { %v10331_v7 = vadd.f32 %v8622_v58, %v13266_v8  ;;  %v8624_v60 = vpop.f32.mrb[117].mxu0  ;;  %10098 = vmatpush3.bf16.msra.mxu1 %v11470_v48 }
 0x5f3   :  { %v10332_v49 = vadd.f32 %v8624_v60, %v13269_v35  ;;  %v8626_v37 = vpop.f32.mrb[118].mxu0  ;;  %8898 = vmatprep.mubr.bf16.mxu1 %v8692_v4 }
 0x5f4   :  { %v10333_v14 = vadd.f32 %v8626_v37, %v13266_v8  ;;  %v8628_v57 = vpop.f32.mrb[119].mxu0  ;;  %8899 = vmatmul.mubr.bf16.gmra.mrb[112].mxu1 %v8691_v27  ;;  %v8671_v41 = vmax.f32 %v10331_v7, 0.0 }
 0x5f5   :  { %v10334_v47 = vadd.f32 %v8628_v57, %v13269_v35  ;;  %v8672_v11 = vmax.f32 %v10332_v49, 0.0 }
 0x5f6   :  { %v8673_v38 = vmax.f32 %v10333_v14, 0.0 }
 0x5f7   :  { %v8674_v63 = vmax.f32 %v10334_v47, 0.0 }
 0x5f8   :  { %v8693_v51 = vpack.c.bf16 %v8673_v38, %v8671_v41 }
 0x5f9   :  { %v8694_v62 = vpack.c.bf16 %v8674_v63, %v8672_v11  ;;  %v8632_v50 = vpop.f32.mrb[120].mxu0 }
 0x5fa   :  { %v10335_v9 = vadd.f32 %v8632_v50, %v13266_v8  ;;  %v8634_v34 = vpop.f32.mrb[121].mxu0 }
 0x5fb   :  { %v10336_v23 = vadd.f32 %v8634_v34, %v13269_v35  ;;  %v8636_v2 = vpop.f32.mrb[122].mxu0  ;;  %8906 = vmatprep.mubr.bf16.mxu1 %v8694_v62 }
 0x5fc   :  { %v10337_v12 = vadd.f32 %v8636_v2, %v13266_v8  ;;  %v8638_v61 = vpop.f32.mrb[123].mxu0  ;;  %8907 = vmatmul.mubr.bf16.gmra.mrb[116].mxu1 %v8693_v51  ;;  %v8675_v24 = vmax.f32 %v10335_v9, 0.0 }
 0x5fd   :  { %v10338_v56 = vadd.f32 %v8638_v61, %v13269_v35  ;;  %v8676_v54 = vmax.f32 %v10336_v23, 0.0 }
 0x5fe   :  { %v8677_v20 = vmax.f32 %v10337_v12, 0.0 }
 0x5ff   :  { %v8678_v0 = vmax.f32 %v10338_v56, 0.0 }
 0x600   :  { %v8695_v10 = vpack.c.bf16 %v8677_v20, %v8675_v24 }
 0x601   :  { %v8696_v13 = vpack.c.bf16 %v8678_v0, %v8676_v54  ;;  %v8642_v32 = vpop.f32.mrb[124].mxu0 }
 0x602   :  { %v10339_v25 = vadd.f32 %v8642_v32, %v13266_v8  ;;  %v8644_v39 = vpop.f32.mrb[125].mxu0 }
 0x603   :  { %v10340_v15 = vadd.f32 %v8644_v39, %v13269_v35  ;;  %v8646_v46 = vpop.f32.mrb[126].mxu0  ;;  %8914 = vmatprep.mubr.bf16.mxu1 %v8696_v13 }
 0x604   :  { %v10341_v16 = vadd.f32 %v8646_v46, %v13266_v8  ;;  %v8648_v44 = vpop.f32.mrb[127].mxu0  ;;  %8915 = vmatmul.mubr.bf16.gmra.mrb[120].mxu1 %v8695_v10  ;;  %v8679_v29 = vmax.f32 %v10339_v25, 0.0  ;;  %v11471_v8 = vld [vmem:[#allocation15 + $0x30] sm:$0xff]  }
 0x605   :  { %v10342_v33 = vadd.f32 %v8648_v44, %v13269_v35  ;;  %v8680_v45 = vmax.f32 %v10340_v15, 0.0  ;;  %10099 = vmatprep.subr.bf16.mxu1 %v11471_v8  ;;  %v11472_v35 = vld [vmem:[#allocation15 + $0x38] sm:$0xff]  }
 0x606   :  { %v8681_v19 = vmax.f32 %v10341_v16, 0.0  ;;  %10100 = vmatpush3.bf16.msra.mxu1 %v11471_v8 }
 0x607   :  { %v8682_v1 = vmax.f32 %v10342_v33, 0.0  ;;  %10101 = vmatprep.subr.bf16.mxu1 %v11472_v35 }
 0x608   :  { %v8697_v43 = vpack.c.bf16 %v8681_v19, %v8679_v29 }
 0x609   :  { %v8698_v3 = vpack.c.bf16 %v8682_v1, %v8680_v45 }
 0x60a   :  { %10102 = vmatpush3.bf16.msra.mxu1 %v11472_v35 }
 0x60b   :  { %8922 = vmatprep.mubr.bf16.mxu1 %v8698_v3 }
 0x60c   :  { %8923 = vmatmul.mubr.bf16.gmra.mrb[124].mxu1 %v8697_v43 }
 0x6a7   :  { %v10023_v6 = vpop.f32.mrb[96].mxu1 }
 0x6a8   :  { %v10024_v17 = vpop.f32.mrb[97].mxu1 }
 0x6a9   :  { %v10025_v22 = vadd.f32 %v10024_v17, %v10023_v6  ;;  %v10026_v18 = vpop.f32.mrb[98].mxu1 }
 0x6aa   :  { %v10027_v5 = vpop.f32.mrb[99].mxu1 }
 0x6ab   :  { %v8869_v40 = vadd.f32 %v10025_v22, %v13303_v36  ;;  %v10028_v42 = vadd.f32 %v10027_v5, %v10026_v18 }
 0x6ad   :  { %v8872_v28 = vadd.f32 %v10028_v42, %v13303_v36  ;;  %v8931_v31 = vmax.f32 %v8869_v40, 0.0 }
 0x6af   :  { %v8932_v52 = vmax.f32 %v8872_v28, 0.0  ;;  %v10029_v26 = vpop.f32.mrb[100].mxu1 }
 0x6b0   :  { %v10030_v59 = vpop.f32.mrb[101].mxu1 }
 0x6b1   :  { %v10031_v53 = vadd.f32 %v10030_v59, %v10029_v26  ;;  %v10032_v30 = vpop.f32.mrb[102].mxu1  ;;  %v8947_v27 = vpack.c.bf16 %v8932_v52, %v8931_v31 }
 0x6b2   :  { %v10033_v4 = vpop.f32.mrb[103].mxu1 }
 0x6b3   :  { %v8877_v58 = vadd.f32 %v10031_v53, %v13303_v36  ;;  %v10034_v7 = vadd.f32 %v10033_v4, %v10032_v30  ;;  %10103 = vmatprep.mubr.bf16.mxu1 %v8947_v27 }
 0x6b5   :  { %v8880_v60 = vadd.f32 %v10034_v7, %v13303_v36  ;;  %v8933_v49 = vmax.f32 %v8877_v58, 0.0 }
 0x6b7   :  { %v8934_v37 = vmax.f32 %v8880_v60, 0.0  ;;  %v10035_v14 = vpop.f32.mrb[104].mxu1 }
 0x6b8   :  { %v10036_v57 = vpop.f32.mrb[105].mxu1 }
 0x6b9   :  { %v8948_v47 = vpack.c.bf16 %v8934_v37, %v8933_v49  ;;  %v10037_v41 = vadd.f32 %v10036_v57, %v10035_v14  ;;  %v10038_v38 = vpop.f32.mrb[106].mxu1 }
 0x6ba   :  { %v10039_v11 = vpop.f32.mrb[107].mxu1 }
 0x6bb   :  { %v8885_v63 = vadd.f32 %v10037_v41, %v13303_v36  ;;  %v10040_v51 = vadd.f32 %v10039_v11, %v10038_v38  ;;  %10104 = vmatmul.mubr.bf16.vlgmr.msra.gmra.mrb[128].mxu1 %v8948_v47  ;;  %v9998_v38 = vld [vmem:[#allocation16] ss:$0 sm:$0xff] }
 0x6bd   :  { %v8888_v62 = vadd.f32 %v10040_v51, %v13303_v36  ;;  %v8935_v50 = vmax.f32 %v8885_v63, 0.0 }
 0x6bf   :  { %v8936_v9 = vmax.f32 %v8888_v62, 0.0  ;;  %v10041_v34 = vpop.f32.mrb[108].mxu1 }
 0x6c0   :  { %v10042_v23 = vpop.f32.mrb[109].mxu1 }
 0x6c1   :  { %v10043_v2 = vadd.f32 %v10042_v23, %v10041_v34  ;;  %v10044_v12 = vpop.f32.mrb[110].mxu1  ;;  %v8949_v61 = vpack.c.bf16 %v8936_v9, %v8935_v50 }
 0x6c2   :  { %v10045_v56 = vpop.f32.mrb[111].mxu1 }
 0x6c3   :  { %v8893_v24 = vadd.f32 %v10043_v2, %v13303_v36  ;;  %v10046_v20 = vadd.f32 %v10045_v56, %v10044_v12  ;;  %10107 = vmatprep.mubr.bf16.mxu1 %v8949_v61 }
 0x6c5   :  { %v8896_v54 = vadd.f32 %v10046_v20, %v13303_v36  ;;  %v8937_v0 = vmax.f32 %v8893_v24, 0.0 }
 0x6c7   :  { %v8938_v10 = vmax.f32 %v8896_v54, 0.0  ;;  %v10047_v13 = vpop.f32.mrb[112].mxu1 }
 0x6c8   :  { %v10048_v32 = vpop.f32.mrb[113].mxu1 }
 0x6c9   :  { %v10049_v25 = vadd.f32 %v10048_v32, %v10047_v13  ;;  %v10050_v39 = vpop.f32.mrb[114].mxu1  ;;  %v8950_v15 = vpack.c.bf16 %v8938_v10, %v8937_v0 }
 0x6ca   :  { %v10051_v46 = vpop.f32.mrb[115].mxu1 }
 0x6cb   :  { %v8901_v16 = vadd.f32 %v10049_v25, %v13303_v36  ;;  %v10052_v44 = vadd.f32 %v10051_v46, %v10050_v39  ;;  %10108 = vmatmul.mubr.bf16.gmra.mrb[132].mxu1 %v8950_v15 }
 0x6cd   :  { %v8904_v33 = vadd.f32 %v10052_v44, %v13303_v36  ;;  %v8939_v29 = vmax.f32 %v8901_v16, 0.0 }
 0x6cf   :  { %v8940_v19 = vmax.f32 %v8904_v33, 0.0  ;;  %v10053_v45 = vpop.f32.mrb[116].mxu1 }
 0x6d0   :  { %v10054_v1 = vpop.f32.mrb[117].mxu1 }
 0x6d1   :  { %v10055_v43 = vadd.f32 %v10054_v1, %v10053_v45  ;;  %v10056_v3 = vpop.f32.mrb[118].mxu1  ;;  %v8951_v55 = vpack.c.bf16 %v8940_v19, %v8939_v29 }
 0x6d2   :  { %v10057_v21 = vpop.f32.mrb[119].mxu1 }
 0x6d3   :  { %v8909_v48 = vadd.f32 %v10055_v43, %v13303_v36  ;;  %v10058_v8 = vadd.f32 %v10057_v21, %v10056_v3  ;;  %10111 = vmatprep.mubr.bf16.mxu1 %v8951_v55 }
 0x6d5   :  { %v8912_v35 = vadd.f32 %v10058_v8, %v13303_v36  ;;  %v8941_v6 = vmax.f32 %v8909_v48, 0.0 }
 0x6d7   :  { %v8942_v17 = vmax.f32 %v8912_v35, 0.0  ;;  %v10059_v22 = vpop.f32.mrb[120].mxu1 }
 0x6d8   :  { %v10060_v18 = vpop.f32.mrb[121].mxu1 }
 0x6d9   :  { %v10061_v5 = vadd.f32 %v10060_v18, %v10059_v22  ;;  %v10062_v40 = vpop.f32.mrb[122].mxu1  ;;  %v8952_v42 = vpack.c.bf16 %v8942_v17, %v8941_v6 }
 0x6da   :  { %v10063_v28 = vpop.f32.mrb[123].mxu1 }
 0x6db   :  { %v8917_v31 = vadd.f32 %v10061_v5, %v13303_v36  ;;  %v10064_v52 = vadd.f32 %v10063_v28, %v10062_v40  ;;  %10112 = vmatmul.mubr.bf16.gmra.mrb[136].mxu1 %v8952_v42 }
 0x6dd   :  { %v8920_v26 = vadd.f32 %v10064_v52, %v13303_v36  ;;  %v8943_v59 = vmax.f32 %v8917_v31, 0.0 }
 0x6df   :  { %v8944_v53 = vmax.f32 %v8920_v26, 0.0  ;;  %v10065_v30 = vpop.f32.mrb[124].mxu1 }
 0x6e0   :  { %v10066_v27 = vpop.f32.mrb[125].mxu1 }
 0x6e1   :  { %v10067_v4 = vadd.f32 %v10066_v27, %v10065_v30  ;;  %v10068_v58 = vpop.f32.mrb[126].mxu1  ;;  %v8953_v7 = vpack.c.bf16 %v8944_v53, %v8943_v59 }
 0x6e2   :  { %v10069_v60 = vpop.f32.mrb[127].mxu1 }
 0x6e3   :  { %v8925_v49 = vadd.f32 %v10067_v4, %v13303_v36  ;;  %v10070_v37 = vadd.f32 %v10069_v60, %v10068_v58  ;;  %10115 = vmatprep.mubr.bf16.mxu1 %v8953_v7 }
 0x6e5   :  { %v8928_v14 = vadd.f32 %v10070_v37, %v13303_v36  ;;  %v8945_v57 = vmax.f32 %v8925_v49, 0.0 }
 0x6e7   :  { %v8946_v47 = vmax.f32 %v8928_v14, 0.0 }
 0x6e9   :  { %v8954_v41 = vpack.c.bf16 %v8946_v47, %v8945_v57 }
 0x6eb   :  { %10116 = vmatmul.mubr.bf16.gmra.mrb[140].mxu1 %v8954_v41 }
 0x78e   :  { %v10105_v11 = vpop.f32.mrb[128].mxu1 }
 0x78f   :  { %v9069_v63 = vadd.f32 %v10105_v11, %v9998_v38  ;;  %v9060_v51 = vpop.f32.mrb[129].mxu1 }
 0x790   :  { %v9061_v62 = vadd.f32 %v9998_v38, %v9060_v51  ;;  %v10106_v50 = vpop.f32.mrb[130].mxu1 }
 0x791   :  { %9125 = vst [vmem:[%s13380_s11 + $0x10] sm:$0xff] %v9069_v63  ;;  %v9072_v9 = vadd.f32 %v10106_v50, %v9998_v38  ;;  %v9063_v34 = vpop.f32.mrb[131].mxu1 }
 0x792   :  { %9123 = vst [vmem:[%s13380_s11] sm:$0xff] %v9061_v62  ;;  %v9064_v36 = vadd.f32 %v9998_v38, %v9063_v34 }
 0x793   :  { %9126 = vst [vmem:[%s13380_s11 + $0x18] sm:$0xff] %v9072_v9 }
 0x794   :  { %9124 = vst [vmem:[%s13380_s11 + $0x8] sm:$0xff] %v9064_v36 }
 0x79e   :  { %v10109_v23 = vpop.f32.mrb[132].mxu1 }
 0x79f   :  { %v9085_v2 = vadd.f32 %v10109_v23, %v9998_v38  ;;  %v9076_v12 = vpop.f32.mrb[133].mxu1 }
 0x7a0   :  { %v9077_v61 = vadd.f32 %v9998_v38, %v9076_v12  ;;  %v10110_v56 = vpop.f32.mrb[134].mxu1 }
 0x7a1   :  { %9129 = vst [vmem:[%s13380_s11 + $0x30] sm:$0xff] %v9085_v2  ;;  %v9088_v24 = vadd.f32 %v10110_v56, %v9998_v38  ;;  %v9079_v20 = vpop.f32.mrb[135].mxu1 }
 0x7a2   :  { %9127 = vst [vmem:[%s13380_s11 + $0x20] sm:$0xff] %v9077_v61  ;;  %v9080_v54 = vadd.f32 %v9998_v38, %v9079_v20 }
 0x7a3   :  { %9130 = vst [vmem:[%s13380_s11 + $0x38] sm:$0xff] %v9088_v24 }
 0x7a4   :  { %9128 = vst [vmem:[%s13380_s11 + $0x28] sm:$0xff] %v9080_v54 }
 0x7ae   :  { %v10113_v0 = vpop.f32.mrb[136].mxu1 }
 0x7af   :  { %v9101_v10 = vadd.f32 %v10113_v0, %v9998_v38  ;;  %v9092_v13 = vpop.f32.mrb[137].mxu1 }
 0x7b0   :  { %v9093_v32 = vadd.f32 %v9998_v38, %v9092_v13  ;;  %v10114_v25 = vpop.f32.mrb[138].mxu1 }
 0x7b1   :  { %9133 = vst [vmem:[%s13380_s11 + $0x50] sm:$0xff] %v9101_v10  ;;  %v9104_v39 = vadd.f32 %v10114_v25, %v9998_v38  ;;  %v9095_v15 = vpop.f32.mrb[139].mxu1 }
 0x7b2   :  { %9131 = vst [vmem:[%s13380_s11 + $0x40] sm:$0xff] %v9093_v32  ;;  %v9096_v46 = vadd.f32 %v9998_v38, %v9095_v15 }
 0x7b3   :  { %9134 = vst [vmem:[%s13380_s11 + $0x58] sm:$0xff] %v9104_v39 }
 0x7b4   :  { %9132 = vst [vmem:[%s13380_s11 + $0x48] sm:$0xff] %v9096_v46 }
 0x7be   :  { %v10117_v16 = vpop.f32.mrb[140].mxu1 }
 0x7bf   :  { %v9117_v44 = vadd.f32 %v10117_v16, %v9998_v38  ;;  %v9108_v33 = vpop.f32.mrb[141].mxu1 }
 0x7c0   :  { %v9109_v29 = vadd.f32 %v9998_v38, %v9108_v33  ;;  %v10118_v19 = vpop.f32.mrb[142].mxu1 }
 0x7c1   :  { %9137 = vst [vmem:[%s13380_s11 + $0x70] sm:$0xff] %v9117_v44  ;;  %v9120_v45 = vadd.f32 %v10118_v19, %v9998_v38  ;;  %v9111_v1 = vpop.f32.mrb[143].mxu1 }
 0x7c2   :  { %9135 = vst [vmem:[%s13380_s11 + $0x60] sm:$0xff] %v9109_v29  ;;  %v9112_v43 = vadd.f32 %v9998_v38, %v9111_v1 }
 0x7c3   :  { %9138 = vst [vmem:[%s13380_s11 + $0x78] sm:$0xff] %v9120_v45 }
 0x7c4   :  { %9136 = vst [vmem:[%s13380_s11 + $0x68] sm:$0xff] %v9112_v43 }
 0x7c5   :  { %9143 = vsyncpa [#allocation3], 1 }
 0x7c6   :  { %9144 = vsyncpa [#allocation5], 1 }
 0x7c7   :  { %9145 = vsyncpa [#allocation8], 1 }
 0x7c8   :  { %9146 = vsyncpa [#allocation11], 1 }
 0x7c9   :  { %9147 = vsyncpa [#allocation14], 1 }
 0x7ca   :  { %9148 = vsyncpa [#allocation17], 1 }

</bundles_post_ra>
